<compile_context>
chip_gen: v5e
topology: v5e:2x2
jax: 0.10.0
libtpu: 0.0.40
codegen_flags: <defaults>
</compile_context>

<pallas_src>
import functools

import jax
import jax.numpy as jnp
from jax.experimental import pallas as pl
from jax.experimental.pallas import tpu as pltpu

CPAD = 128            # lane-dense channel padding for all GEMM outputs
BN_EPS = 1e-5
LRELU_SLOPE = 0.2


def _spec(shape):
    return pl.BlockSpec(shape, lambda: (0,) * len(shape))


def _lrelu(y, slope):
    return jnp.where(y >= 0.0, y, slope * y)


# ----------------------------- Pallas kernels ------------------------------

def _conv_bn_lrelu_kernel(p_ref, w_ref, g_ref, b_ref, o_ref, *, eps, slope, inv_m):
    """patches @ W  ->  BatchNorm (batch stats, one-pass)  ->  LeakyReLU."""
    acc = jnp.dot(p_ref[...], w_ref[...], preferred_element_type=jnp.float32)   # (M,128)
    s = jnp.sum(acc, axis=0, keepdims=True) * inv_m                             # E[x]
    q = jnp.sum(acc * acc, axis=0, keepdims=True) * inv_m                       # E[x^2]
    scale = g_ref[...] * jax.lax.rsqrt(q - s * s + eps)
    shift = b_ref[...] - s * scale
    o_ref[...] = _lrelu(acc * scale + shift, slope).astype(o_ref.dtype)


def conv_bn_lrelu(patches, w, g, b, *, out_dtype=jnp.bfloat16):
    m, k = patches.shape
    n = w.shape[1]
    kern = functools.partial(_conv_bn_lrelu_kernel, eps=BN_EPS, slope=LRELU_SLOPE,
                             inv_m=1.0 / m)
    return pl.pallas_call(
        kern,
        out_shape=jax.ShapeDtypeStruct((m, n), out_dtype),
        in_specs=[_spec((m, k)), _spec((k, n)), _spec((1, n)), _spec((1, n))],
        out_specs=_spec((m, n)),
    )(patches, w, g, b)


def _phase_deconv_bn_lrelu_kernel(p_ref, w_ref, g_ref, b_ref, o_ref, *, eps, slope,
                                  inv_n, group):
    """Merged 4-phase stride-2 ConvTranspose GEMM + BN + LeakyReLU.

    Output columns are (phase, channel), `group` channels per phase.  BN statistics are
    per channel over rows AND phases, so per-column row sums are folded across the four
    phase groups with lane rotations (XLU, essentially free next to the MXU work).
    """
    acc = jnp.dot(p_ref[...], w_ref[...], preferred_element_type=jnp.float32)   # (M,128)
    s = jnp.sum(acc, axis=0, keepdims=True)
    q = jnp.sum(acc * acc, axis=0, keepdims=True)
    sf, qf = s, q
    for k in range(1, CPAD // group):
        sf = sf + pltpu.roll(s, k * group, 1)
        qf = qf + pltpu.roll(q, k * group, 1)
    m = sf * inv_n
    scale = g_ref[...] * jax.lax.rsqrt(qf * inv_n - m * m + eps)  # gamma/beta pre-tiled
    shift = b_ref[...] - m * scale
    o_ref[...] = _lrelu(acc * scale + shift, slope).astype(o_ref.dtype)


def phase_deconv_bn_lrelu(patches, w, g, b, *, inv_n, group=32, out_dtype=jnp.bfloat16):
    m, k = patches.shape
    n = w.shape[1]
    kern = functools.partial(_phase_deconv_bn_lrelu_kernel, eps=BN_EPS,
                             slope=LRELU_SLOPE, inv_n=inv_n, group=group)
    return pl.pallas_call(
        kern,
        out_shape=jax.ShapeDtypeStruct((m, n), out_dtype),
        in_specs=[_spec((m, k)), _spec((k, n)), _spec((1, n)), _spec((1, n))],
        out_specs=_spec((m, n)),
    )(patches, w, g, b)


def _conv_bias_kernel(p_ref, w_ref, b_ref, o_ref):
    """Final layer: patches @ W + bias (no BN, no activation), f32 out."""
    o_ref[...] = (jnp.dot(p_ref[...], w_ref[...], preferred_element_type=jnp.float32)
                  + b_ref[...]).astype(o_ref.dtype)


def conv_bias(patches, w, b):
    m, k = patches.shape
    n = w.shape[1]
    return pl.pallas_call(
        _conv_bias_kernel,
        out_shape=jax.ShapeDtypeStruct((m, n), jnp.float32),
        in_specs=[_spec((m, k)), _spec((k, n)), _spec((1, n))],
        out_specs=_spec((m, n)),
    )(patches, w, b)


def _tail_kernel(xf_ref, we3_ref, ge3_ref, be3_ref,
                 wh_ref, bh_ref, eps_ref,
                 wd1_ref, gd1_ref, bd1_ref,
                 wd2_ref, gd2_ref, bd2_ref,
                 mu_ref, lv_ref, d2y_ref,
                 d1_scr, p2_scr, d2acc,
                 *, b, eps, slope):
    """Fused e3 -> heads/reparametrise -> d1 -> d2, all activations VMEM-resident."""
    # ---- e3: full-window 5x5 conv on a 5x5 map == FC (B, 25*128) @ (25*128, 128) ----
    acc = jnp.dot(xf_ref[...], we3_ref[...], preferred_element_type=jnp.float32)  # (B,128)
    inv_b = 1.0 / b
    s = jnp.sum(acc, axis=0, keepdims=True) * inv_b
    q = jnp.sum(acc * acc, axis=0, keepdims=True) * inv_b
    scale = ge3_ref[...] * jax.lax.rsqrt(q - s * s + eps)
    shift = be3_ref[...] - s * scale
    h = _lrelu(acc * scale + shift, slope)

    # ---- heads: [mu | log_var-pre] in one lane-dense GEMM, Softplus, z = mu+eps*sigma ---
    ha = (jnp.dot(h.astype(jnp.bfloat16), wh_ref[...],
                  preferred_element_type=jnp.float32) + bh_ref[...])               # (B,256)
    mu = ha[:, :CPAD]
    pre = ha[:, CPAD:]
    log_var = jnp.where(pre > 20.0, pre,
                        jnp.log1p(jnp.exp(jnp.minimum(pre, 20.0))))   # torch Softplus
    z = mu + eps_ref[...] * jnp.exp(0.5 * log_var)
    mu_ref[...] = mu
    lv_ref[...] = log_var

    # ---- d1: ConvT(z->128, k3) on a 1x1 map == FC (B,128) @ (128, 9*128); BN per ch -----
    a1 = jnp.dot(z.astype(jnp.bfloat16), wd1_ref[...],
                 preferred_element_type=jnp.float32)                               # (B,1152)
    s1 = jnp.sum(a1, axis=0, keepdims=True)
    q1 = jnp.sum(a1 * a1, axis=0, keepdims=True)
    sc, qc = s1[:, :CPAD], q1[:, :CPAD]
    for j in range(1, 9):                      # fold 9 spatial blocks (128-aligned slices)
        sc = sc + s1[:, j * CPAD:(j + 1) * CPAD]
        qc = qc + q1[:, j * CPAD:(j + 1) * CPAD]
    inv_n1 = 1.0 / (9 * b)
    m1 = sc * inv_n1
    sc1 = gd1_ref[...] * jax.lax.rsqrt(qc * inv_n1 - m1 * m1 + eps)
    sh1 = bd1_ref[...] - m1 * sc1
    for j in range(9):                         # stack normalised blocks as (9B, 128)
        y = _lrelu(a1[:, j * CPAD:(j + 1) * CPAD] * sc1 + sh1, slope)
        d1_scr[pl.ds(j * b, b), :] = y

    # ---- d2: ConvT(128->64, k5, s1) as one GEMM against all 25 taps + static gather ----
    # p2[j*B+n, t*128+co] = sum_ci d1y[n, ci @ spatial j] * w_d2[ci, co, dh, dw], t=dh*5+dw
    p2_scr[...] = jnp.dot(d1_scr[...].astype(jnp.bfloat16), wd2_ref[...],
                          preferred_element_type=jnp.float32)                      # (9B,3200)
    for oh in range(7):
        for ow in range(7):
            tot = jnp.zeros((b, CPAD), jnp.float32)
            for ih in range(max(0, oh - 4), min(2, oh) + 1):
                for iw in range(max(0, ow - 4), min(2, ow) + 1):
                    j = ih * 3 + iw
                    t = (oh - ih) * 5 + (ow - iw)
                    tot = tot + p2_scr[pl.ds(j * b, b), pl.ds(t * CPAD, CPAD)]
            d2acc[pl.ds((oh * 7 + ow) * b, b), :] = tot

    a2 = d2acc[...]                                                                # (49B,128)
    inv_n2 = 1.0 / (49 * b)
    s2 = jnp.sum(a2, axis=0, keepdims=True) * inv_n2
    q2 = jnp.sum(a2 * a2, axis=0, keepdims=True) * inv_n2
    sc2 = gd2_ref[...] * jax.lax.rsqrt(q2 - s2 * s2 + eps)
    sh2 = bd2_ref[...] - s2 * sc2
    d2y_ref[...] = _lrelu(a2 * sc2 + sh2, slope).astype(d2y_ref.dtype)


def vae_tail(xflat, p, eps_pad):
    b = xflat.shape[0]
    kern = functools.partial(_tail_kernel, b=b, eps=BN_EPS, slope=LRELU_SLOPE)
    args = (xflat, p["e3_w"], p["e3_g"], p["e3_b"],
            p["head_w"], p["head_b"], eps_pad,
            p["d1_w"], p["d1_g"], p["d1_b"],
            p["d2_w"], p["d2_g"], p["d2_b"])
    return pl.pallas_call(
        kern,
        out_shape=(jax.ShapeDtypeStruct((b, CPAD), jnp.float32),          # mu
                   jax.ShapeDtypeStruct((b, CPAD), jnp.float32),          # log_var
                   jax.ShapeDtypeStruct((49 * b, CPAD), jnp.bfloat16)),   # d2 activation
        in_specs=[_spec(a.shape) for a in args],
        out_specs=(_spec((b, CPAD)), _spec((b, CPAD)), _spec((49 * b, CPAD))),
        scratch_shapes=[pltpu.VMEM((9 * b, CPAD), jnp.float32),           # d1 activation
                        pltpu.VMEM((9 * b, 25 * CPAD), jnp.float32),      # d2 tap-block GEMM
                        pltpu.VMEM((49 * b, CPAD), jnp.float32)],         # d2 pre-BN acc
    )(*args)


# ------------------------------- JAX glue -----------------------------------

def _patches(x_nhwc, k, stride, pad):
    """im2col in one XLA op. Feature order is (Cin, kh, kw) (channel-major)."""
    bsz = x_nhwc.shape[0]
    pt = jax.lax.conv_general_dilated_patches(
        x_nhwc, filter_shape=(k, k), window_strides=(stride, stride),
        padding=[(pad, pad), (pad, pad)],
        dimension_numbers=("NHWC", "HWIO", "NHWC"))
    _, oh, ow, kk = pt.shape
    return pt.reshape(bsz * oh * ow, kk), oh, ow


# ----------------------------- parameter init / pack -------------------------

def init_raw_params(key, z_dim=20):
    """Random parameters in the PyTorch layouts.  Conv biases of BN-followed layers
    (e1-e3, d1-d3) are omitted: a per-channel bias is exactly cancelled by the batch-mean
    subtraction of training-mode BatchNorm."""
    ks = iter(jax.random.split(key, 24))

    def w(shape, scale=0.1):
        return (scale * jax.random.normal(next(ks), shape)).astype(jnp.float32)

    zeros = lambda s: jnp.zeros(s, jnp.float32)
    ones = lambda s: jnp.ones(s, jnp.float32)

    r = {}
    # encoder convs: (Cout, Cin, KH, KW); gamma / beta
    r["e1_w"], r["e1_g"], r["e1_be"] = w((32, 1, 4, 4)), ones((32,)), zeros((32,))
    r["e2_w"], r["e2_g"], r["e2_be"] = w((64, 32, 4, 4)), ones((64,)), zeros((64,))
    r["e3_w"], r["e3_g"], r["e3_be"] = w((128, 64, 5, 5)), ones((128,)), zeros((128,))
    # heads, stored (in, out)
    r["fm_w"], r["fm_b"] = w((128, z_dim)), zeros((z_dim,))
    r["fl_w"], r["fl_b"] = w((128, z_dim)), zeros((z_dim,))
    # decoder conv-transposes: torch layout (Cin, Cout, KH, KW)
    r["d1_w"], r["d1_g"], r["d1_be"] = w((z_dim, 128, 3, 3)), ones((128,)), zeros((128,))
    r["d2_w"], r["d2_g"], r["d2_be"] = w((128, 64, 5, 5)), ones((64,)), zeros((64,))
    r["d3_w"], r["d3_g"], r["d3_be"] = w((64, 32, 4, 4)), ones((32,)), zeros((32,))
    r["d4_w"], r["d4_b"] = w((32, 1, 4, 4)), zeros((1,))
    return r


# For ConvTranspose2d(k=4, s=2, p=1): output parity e with window position w (over input
# positions i-1, i, i+1) uses ConvT kernel index _PHASE_TAP[e][w] (-1 == structurally 0).
_PHASE_TAP = ((3, 1, -1), (-1, 2, 0))


def _phase_weight(wt):
    """(Cin, Cout, 4, 4) ConvT weight -> merged 4-phase 3x3 conv weight (Cin*9, 4*Cout).
    Rows ordered (ci, wh, ww); columns ordered (phase = eh*2+ew, cout)."""
    cin, cout = wt.shape[0], wt.shape[1]
    cols = []
    for eh in range(2):
        for ew in range(2):
            k = jnp.zeros((cin, cout, 3, 3), wt.dtype)
            for wh in range(3):
                kh = _PHASE_TAP[eh][wh]
                if kh < 0:
                    continue
                for ww in range(3):
                    kw = _PHASE_TAP[ew][ww]
                    if kw < 0:
                        continue
                    k = k.at[:, :, wh, ww].set(wt[:, :, kh, kw])
            cols.append(k.transpose(0, 2, 3, 1).reshape(cin * 9, cout))
    return jnp.concatenate(cols, axis=1)


def pack_params(r, z_dim=20):
    """Pack into kernel layouts: bf16 GEMM weights, outputs zero-padded to 128 lanes."""
    f32, bf16 = jnp.float32, jnp.bfloat16

    def pad_cols(m, n=CPAD):
        return jnp.pad(m, ((0, 0), (0, n - m.shape[1])))

    def conv_w(w):                                   # (Cout,Cin,KH,KW) -> (Cin*KH*KW, 128)
        return pad_cols(w.reshape(w.shape[0], -1).T).astype(bf16)

    def bn(g, b):
        c = g.shape[0]
        gp = jnp.pad(g, (0, CPAD - c), constant_values=1.0).reshape(1, CPAD)
        bp = jnp.pad(b, (0, CPAD - c)).reshape(1, CPAD)
        return gp.astype(f32), bp.astype(f32)

    p = {}
    # encoder convs (im2col GEMM weights, feature order (ci, kh, kw))
    p["e1_w"] = conv_w(r["e1_w"]); p["e1_g"], p["e1_b"] = bn(r["e1_g"], r["e1_be"])
    p["e2_w"] = conv_w(r["e2_w"]); p["e2_g"], p["e2_b"] = bn(r["e2_g"], r["e2_be"])

    # e3 as a pure FC over the flattened (spatial-major, channel-padded) e2 activation
    w3 = jnp.pad(r["e3_w"], ((0, 0), (0, CPAD - 64), (0, 0), (0, 0)))   # (co,ci,kh,kw)
    p["e3_w"] = w3.transpose(2, 3, 1, 0).reshape(25 * CPAD, CPAD).astype(bf16)
    p["e3_g"], p["e3_b"] = bn(r["e3_g"], r["e3_be"])

    # fused heads: (128, 256) with mu cols [0:z), logvar cols [128:128+z)
    wc = jnp.zeros((CPAD, 2 * CPAD), f32)
    wc = wc.at[:, :z_dim].set(r["fm_w"]).at[:, CPAD:CPAD + z_dim].set(r["fl_w"])
    bc = jnp.zeros((1, 2 * CPAD), f32)
    bc = bc.at[0, :z_dim].set(r["fm_b"]).at[0, CPAD:CPAD + z_dim].set(r["fl_b"])
    p["head_w"] = wc.astype(bf16)
    p["head_b"] = bc

    # d1: ConvT(z->128, k3) on a 1x1 map == FC z -> 9 spatial-major blocks of 128 channels
    w1 = jnp.pad(r["d1_w"], ((0, CPAD - z_dim), (0, 0), (0, 0), (0, 0)))  # (ci,co,kh,kw)
    p["d1_w"] = w1.transpose(0, 2, 3, 1).reshape(CPAD, 9 * CPAD).astype(bf16)
    p["d1_g"], p["d1_b"] = bn(r["d1_g"], r["d1_be"])

    # d2: ConvT(128->64, k5) gather weight: rows ci, cols = 25 tap blocks x padded co
    w2 = jnp.pad(r["d2_w"], ((0, 0), (0, CPAD - 64), (0, 0), (0, 0)))     # (ci,co,dh,dw)
    p["d2_w"] = w2.transpose(0, 2, 3, 1).reshape(CPAD, 25 * CPAD).astype(bf16)
    p["d2_g"], p["d2_b"] = bn(r["d2_g"], r["d2_be"])

    # d3 / d4: stride-2 ConvT via merged 4-phase 3x3 weights
    p["d3_w"] = _phase_weight(r["d3_w"]).astype(bf16)                     # (576, 4*32)
    p["d3_g"] = jnp.tile(r["d3_g"], 4).reshape(1, CPAD).astype(f32)       # per-phase tiled
    p["d3_b"] = jnp.tile(r["d3_be"], 4).reshape(1, CPAD).astype(f32)
    p["d4_w"] = pad_cols(_phase_weight(r["d4_w"])).astype(bf16)           # (288, 4) -> 128
    p["d4_b"] = jnp.pad(jnp.tile(r["d4_b"], 4), (0, CPAD - 4)).reshape(1, CPAD).astype(f32)
    return p


# ------------------------------ VAE forward ---------------------------------

def vae_forward(p, x, eps_noise, z_dim=20):
    """x: (B,1,28,28) f32 NCHW. Returns (logits (B,1,28,28) f32, mu, log_var)."""
    bsz = x.shape[0]
    xh = jnp.transpose(x, (0, 2, 3, 1)).astype(jnp.bfloat16)              # NHWC bf16

    # ---- encoder: Conv2d + BatchNorm2d(batch stats) + LeakyReLU(0.2) ----
    pt, oh, ow = _patches(xh, 4, 2, 0)                                    # 28 -> 13
    e1 = conv_bn_lrelu(pt, p["e1_w"], p["e1_g"], p["e1_b"])
    e1 = e1.reshape(bsz, oh, ow, CPAD)[..., :32]
    pt, _, _ = _patches(e1, 4, 2, 0)                                      # 13 -> 5
    e2 = conv_bn_lrelu(pt, p["e2_w"], p["e2_g"], p["e2_b"])               # (B*25, 128)
    xflat = e2.reshape(bsz, 25 * CPAD)                                    # (B, 3200)

    # ---- fused tail: e3 -> mu/log_var/reparametrize -> d1 -> d2 (one pallas_call) ----
    eps_pad = jnp.pad(eps_noise.astype(jnp.float32), ((0, 0), (0, CPAD - z_dim)))
    mu_p, lv_p, d2y = vae_tail(xflat, p, eps_pad)
    mu, log_var = mu_p[:, :z_dim], lv_p[:, :z_dim]
    d2n = d2y.reshape(7, 7, bsz, CPAD).transpose(2, 0, 1, 3)[..., :64]    # (B,7,7,64)

    # ---- d3: ConvT(64->32, k4, s2, p1) via merged 4-phase 3x3 GEMM + BN + LReLU ----
    pt, _, _ = _patches(d2n, 3, 1, 1)                                     # (B*49, 576)
    d3 = phase_deconv_bn_lrelu(pt, p["d3_w"], p["d3_g"], p["d3_b"],
                               inv_n=1.0 / (bsz * 14 * 14))               # (B*49, 128)
    d3n = (d3.reshape(bsz, 7, 7, 2, 2, 32)
             .transpose(0, 1, 3, 2, 4, 5)
             .reshape(bsz, 14, 14, 32))                                   # 7 -> 14

    # ---- d4: ConvT(32->1, k4, s2, p1) via merged 4-phase 3x3 GEMM + bias ----
    pt, _, _ = _patches(d3n, 3, 1, 1)                                     # (B*196, 288)
    d4 = conv_bias(pt, p["d4_w"], p["d4_b"])                              # (B*196, 128) f32
    logits = (d4[:, :4].reshape(bsz, 14, 14, 2, 2)
                .transpose(0, 1, 3, 2, 4)
                .reshape(bsz, 1, 28, 28))                                 # 14 -> 28
    return logits, mu, log_var


# --------------------------------- main --------------------------------------

if __name__ == "__main__":
    key = jax.random.PRNGKey(0)
    k_x, k_eps, k_p = jax.random.split(key, 3)

    B, Z = 2, 20
    x = jax.random.normal(k_x, (B, 1, 28, 28), dtype=jnp.float32)     # NCHW, image_size=784
    eps_noise = jax.random.normal(k_eps, (B, Z), dtype=jnp.float32)   # reparametrization noise
    params = pack_params(init_raw_params(k_p, z_dim=Z), z_dim=Z)

    fwd = jax.jit(functools.partial(vae_forward, z_dim=Z))
    logits, mu, log_var = fwd(params, x, eps_noise)
    jax.block_until_ready((logits, mu, log_var))

    assert logits.shape == (B, 1, 28, 28) and logits.dtype == jnp.float32
    assert mu.shape == (B, Z) and log_var.shape == (B, Z)
    assert bool(jnp.all(jnp.isfinite(logits)))
    assert bool(jnp.all(jnp.isfinite(mu))) and bool(jnp.all(jnp.isfinite(log_var)))
    assert bool(jnp.all(log_var >= 0.0))   # Softplus output is non-negative
    print("KERNEL_OK")
</pallas_src>

<mosaic_0001>
module attributes {stable_mosaic.version = 11 : i64} {
  func.func @_conv_bn_lrelu_kernel(%arg0: memref<338x16xbf16, #tpu.memory_space<vmem>>, %arg1: memref<16x128xbf16, #tpu.memory_space<vmem>>, %arg2: memref<1x128xf32, #tpu.memory_space<vmem>>, %arg3: memref<1x128xf32, #tpu.memory_space<vmem>>, %arg4: memref<338x128xbf16, #tpu.memory_space<vmem>>) attributes {dimension_semantics = [], scalar_prefetch = 0 : i64, scratch_operands = 0 : i64, tpu.core_type = #tpu.core_type<tc>} {
    %c0 = arith.constant 0 : index
    %c0_0 = arith.constant 0 : index
    %0 = vector.load %arg0[%c0, %c0_0] : memref<338x16xbf16, #tpu.memory_space<vmem>>, vector<338x16xbf16>
    %c0_1 = arith.constant 0 : index
    %c0_2 = arith.constant 0 : index
    %1 = vector.load %arg1[%c0_1, %c0_2] : memref<16x128xbf16, #tpu.memory_space<vmem>>, vector<16x128xbf16>
    %cst = arith.constant dense<0.000000e+00> : vector<338x128xf32>
    %2 = tpu.matmul %0, %1, %cst {dimension_numbers = #tpu.dot_dimension_numbers<[1], [0], [0], [1], [0, 0, 1, 1], [], []>} : vector<338x16xbf16>, vector<16x128xbf16>, vector<338x128xf32> -> vector<338x128xf32>
    %cst_3 = arith.constant dense<0.000000e+00> : vector<128xf32>
    %3 = vector.multi_reduction <add>, %2, %cst_3 [0] : vector<338x128xf32> to vector<128xf32>
    %4 = vector.shape_cast %3 : vector<128xf32> to vector<1x128xf32>
    %cst_4 = arith.constant 2.958580e-03 : f32
    %5 = vector.broadcast %cst_4 : f32 to vector<1x128xf32>
    %6 = arith.mulf %4, %5 : vector<1x128xf32>
    %7 = arith.mulf %2, %2 : vector<338x128xf32>
    %cst_5 = arith.constant dense<0.000000e+00> : vector<128xf32>
    %8 = vector.multi_reduction <add>, %7, %cst_5 [0] : vector<338x128xf32> to vector<128xf32>
    %9 = vector.shape_cast %8 : vector<128xf32> to vector<1x128xf32>
    %cst_6 = arith.constant 2.958580e-03 : f32
    %10 = vector.broadcast %cst_6 : f32 to vector<1x128xf32>
    %11 = arith.mulf %9, %10 : vector<1x128xf32>
    %c0_7 = arith.constant 0 : index
    %c0_8 = arith.constant 0 : index
    %12 = vector.load %arg2[%c0_7, %c0_8] : memref<1x128xf32, #tpu.memory_space<vmem>>, vector<1x128xf32>
    %13 = arith.mulf %6, %6 : vector<1x128xf32>
    %14 = arith.subf %11, %13 : vector<1x128xf32>
    %cst_9 = arith.constant 9.99999974E-6 : f32
    %15 = vector.broadcast %cst_9 : f32 to vector<1x128xf32>
    %16 = arith.addf %14, %15 : vector<1x128xf32>
    %17 = math.rsqrt %16 : vector<1x128xf32>
    %18 = arith.mulf %12, %17 : vector<1x128xf32>
    %c0_10 = arith.constant 0 : index
    %c0_11 = arith.constant 0 : index
    %19 = vector.load %arg3[%c0_10, %c0_11] : memref<1x128xf32, #tpu.memory_space<vmem>>, vector<1x128xf32>
    %20 = arith.mulf %6, %18 : vector<1x128xf32>
    %21 = arith.subf %19, %20 : vector<1x128xf32>
    %22 = vector.broadcast %18 : vector<1x128xf32> to vector<338x128xf32>
    %23 = arith.mulf %2, %22 : vector<338x128xf32>
    %24 = vector.broadcast %21 : vector<1x128xf32> to vector<338x128xf32>
    %25 = arith.addf %23, %24 : vector<338x128xf32>
    %cst_12 = arith.constant 0.000000e+00 : f32
    %26 = vector.broadcast %cst_12 : f32 to vector<338x128xf32>
    %27 = arith.cmpf oge, %25, %26 : vector<338x128xf32>
    %cst_13 = arith.constant 2.000000e-01 : f32
    %28 = vector.broadcast %cst_13 : f32 to vector<338x128xf32>
    %29 = arith.mulf %28, %25 : vector<338x128xf32>
    %30 = arith.select %27, %25, %29 : vector<338x128xi1>, vector<338x128xf32>
    %31 = arith.truncf %30 : vector<338x128xf32> to vector<338x128xbf16>
    %c0_14 = arith.constant 0 : index
    %c0_15 = arith.constant 0 : index
    %32 = vector.load %arg4[%c0_14, %c0_15] : memref<338x128xbf16, #tpu.memory_space<vmem>>, vector<338x128xbf16>
    tpu.vector_store %arg4[%c0_14, %c0_15], %31 {strides = array<i32>} : memref<338x128xbf16, #tpu.memory_space<vmem>>, vector<338x128xbf16>,
    return
  }
}

module attributes {stable_mosaic.version = 11 : i64} {
  func.func @_conv_bn_lrelu_kernel(%arg0: memref<50x512xbf16, #tpu.memory_space<vmem>>, %arg1: memref<512x128xbf16, #tpu.memory_space<vmem>>, %arg2: memref<1x128xf32, #tpu.memory_space<vmem>>, %arg3: memref<1x128xf32, #tpu.memory_space<vmem>>, %arg4: memref<50x128xbf16, #tpu.memory_space<vmem>>) attributes {dimension_semantics = [], scalar_prefetch = 0 : i64, scratch_operands = 0 : i64, tpu.core_type = #tpu.core_type<tc>} {
    %c0 = arith.constant 0 : index
    %c0_0 = arith.constant 0 : index
    %0 = vector.load %arg0[%c0, %c0_0] : memref<50x512xbf16, #tpu.memory_space<vmem>>, vector<50x512xbf16>
    %c0_1 = arith.constant 0 : index
    %c0_2 = arith.constant 0 : index
    %1 = vector.load %arg1[%c0_1, %c0_2] : memref<512x128xbf16, #tpu.memory_space<vmem>>, vector<512x128xbf16>
    %cst = arith.constant dense<0.000000e+00> : vector<50x128xf32>
    %2 = tpu.matmul %0, %1, %cst {dimension_numbers = #tpu.dot_dimension_numbers<[1], [0], [0], [1], [0, 0, 1, 1], [], []>} : vector<50x512xbf16>, vector<512x128xbf16>, vector<50x128xf32> -> vector<50x128xf32>
    %cst_3 = arith.constant dense<0.000000e+00> : vector<128xf32>
    %3 = vector.multi_reduction <add>, %2, %cst_3 [0] : vector<50x128xf32> to vector<128xf32>
    %4 = vector.shape_cast %3 : vector<128xf32> to vector<1x128xf32>
    %cst_4 = arith.constant 2.000000e-02 : f32
    %5 = vector.broadcast %cst_4 : f32 to vector<1x128xf32>
    %6 = arith.mulf %4, %5 : vector<1x128xf32>
    %7 = arith.mulf %2, %2 : vector<50x128xf32>
    %cst_5 = arith.constant dense<0.000000e+00> : vector<128xf32>
    %8 = vector.multi_reduction <add>, %7, %cst_5 [0] : vector<50x128xf32> to vector<128xf32>
    %9 = vector.shape_cast %8 : vector<128xf32> to vector<1x128xf32>
    %cst_6 = arith.constant 2.000000e-02 : f32
    %10 = vector.broadcast %cst_6 : f32 to vector<1x128xf32>
    %11 = arith.mulf %9, %10 : vector<1x128xf32>
    %c0_7 = arith.constant 0 : index
    %c0_8 = arith.constant 0 : index
    %12 = vector.load %arg2[%c0_7, %c0_8] : memref<1x128xf32, #tpu.memory_space<vmem>>, vector<1x128xf32>
    %13 = arith.mulf %6, %6 : vector<1x128xf32>
    %14 = arith.subf %11, %13 : vector<1x128xf32>
    %cst_9 = arith.constant 9.99999974E-6 : f32
    %15 = vector.broadcast %cst_9 : f32 to vector<1x128xf32>
    %16 = arith.addf %14, %15 : vector<1x128xf32>
    %17 = math.rsqrt %16 : vector<1x128xf32>
    %18 = arith.mulf %12, %17 : vector<1x128xf32>
    %c0_10 = arith.constant 0 : index
    %c0_11 = arith.constant 0 : index
    %19 = vector.load %arg3[%c0_10, %c0_11] : memref<1x128xf32, #tpu.memory_space<vmem>>, vector<1x128xf32>
    %20 = arith.mulf %6, %18 : vector<1x128xf32>
    %21 = arith.subf %19, %20 : vector<1x128xf32>
    %22 = vector.broadcast %18 : vector<1x128xf32> to vector<50x128xf32>
    %23 = arith.mulf %2, %22 : vector<50x128xf32>
    %24 = vector.broadcast %21 : vector<1x128xf32> to vector<50x128xf32>
    %25 = arith.addf %23, %24 : vector<50x128xf32>
    %cst_12 = arith.constant 0.000000e+00 : f32
    %26 = vector.broadcast %cst_12 : f32 to vector<50x128xf32>
    %27 = arith.cmpf oge, %25, %26 : vector<50x128xf32>
    %cst_13 = arith.constant 2.000000e-01 : f32
    %28 = vector.broadcast %cst_13 : f32 to vector<50x128xf32>
    %29 = arith.mulf %28, %25 : vector<50x128xf32>
    %30 = arith.select %27, %25, %29 : vector<50x128xi1>, vector<50x128xf32>
    %31 = arith.truncf %30 : vector<50x128xf32> to vector<50x128xbf16>
    %c0_14 = arith.constant 0 : index
    %c0_15 = arith.constant 0 : index
    %32 = vector.load %arg4[%c0_14, %c0_15] : memref<50x128xbf16, #tpu.memory_space<vmem>>, vector<50x128xbf16>
    tpu.vector_store %arg4[%c0_14, %c0_15], %31 {strides = array<i32>} : memref<50x128xbf16, #tpu.memory_space<vmem>>, vector<50x128xbf16>,
    return
  }
}

module attributes {stable_mosaic.version = 11 : i64} {
  func.func @_tail_kernel(%arg0: memref<2x3200xbf16, #tpu.memory_space<vmem>>, %arg1: memref<3200x128xbf16, #tpu.memory_space<vmem>>, %arg2: memref<1x128xf32, #tpu.memory_space<vmem>>, %arg3: memref<1x128xf32, #tpu.memory_space<vmem>>, %arg4: memref<128x256xbf16, #tpu.memory_space<vmem>>, %arg5: memref<1x256xf32, #tpu.memory_space<vmem>>, %arg6: memref<2x128xf32, #tpu.memory_space<vmem>>, %arg7: memref<128x1152xbf16, #tpu.memory_space<vmem>>, %arg8: memref<1x128xf32, #tpu.memory_space<vmem>>, %arg9: memref<1x128xf32, #tpu.memory_space<vmem>>, %arg10: memref<128x3200xbf16, #tpu.memory_space<vmem>>, %arg11: memref<1x128xf32, #tpu.memory_space<vmem>>, %arg12: memref<1x128xf32, #tpu.memory_space<vmem>>, %arg13: memref<2x128xf32, #tpu.memory_space<vmem>>, %arg14: memref<2x128xf32, #tpu.memory_space<vmem>>, %arg15: memref<98x128xbf16, #tpu.memory_space<vmem>>, %arg16: memref<18x128xf32, #tpu.memory_space<vmem>>, %arg17: memref<18x3200xf32, #tpu.memory_space<vmem>>, %arg18: memref<98x128xf32, #tpu.memory_space<vmem>>) attributes {dimension_semantics = [], scalar_prefetch = 0 : i64, scratch_operands = 3 : i64, tpu.core_type = #tpu.core_type<tc>} {
    %c0 = arith.constant 0 : index
    %c0_0 = arith.constant 0 : index
    %0 = vector.load %arg0[%c0, %c0_0] : memref<2x3200xbf16, #tpu.memory_space<vmem>>, vector<2x3200xbf16>
    %c0_1 = arith.constant 0 : index
    %c0_2 = arith.constant 0 : index
    %1 = vector.load %arg1[%c0_1, %c0_2] : memref<3200x128xbf16, #tpu.memory_space<vmem>>, vector<3200x128xbf16>
    %cst = arith.constant dense<0.000000e+00> : vector<2x128xf32>
    %2 = tpu.matmul %0, %1, %cst {dimension_numbers = #tpu.dot_dimension_numbers<[1], [0], [0], [1], [0, 0, 1, 1], [], []>} : vector<2x3200xbf16>, vector<3200x128xbf16>, vector<2x128xf32> -> vector<2x128xf32>
    %cst_3 = arith.constant dense<0.000000e+00> : vector<128xf32>
    %3 = vector.multi_reduction <add>, %2, %cst_3 [0] : vector<2x128xf32> to vector<128xf32>
    %4 = vector.shape_cast %3 : vector<128xf32> to vector<1x128xf32>
    %cst_4 = arith.constant 5.000000e-01 : f32
    %5 = vector.broadcast %cst_4 : f32 to vector<1x128xf32>
    %6 = arith.mulf %4, %5 : vector<1x128xf32>
    %7 = arith.mulf %2, %2 : vector<2x128xf32>
    %cst_5 = arith.constant dense<0.000000e+00> : vector<128xf32>
    %8 = vector.multi_reduction <add>, %7, %cst_5 [0] : vector<2x128xf32> to vector<128xf32>
    %9 = vector.shape_cast %8 : vector<128xf32> to vector<1x128xf32>
    %cst_6 = arith.constant 5.000000e-01 : f32
    %10 = vector.broadcast %cst_6 : f32 to vector<1x128xf32>
    %11 = arith.mulf %9, %10 : vector<1x128xf32>
    %c0_7 = arith.constant 0 : index
    %c0_8 = arith.constant 0 : index
    %12 = vector.load %arg2[%c0_7, %c0_8] : memref<1x128xf32, #tpu.memory_space<vmem>>, vector<1x128xf32>
    %13 = arith.mulf %6, %6 : vector<1x128xf32>
    %14 = arith.subf %11, %13 : vector<1x128xf32>
    %cst_9 = arith.constant 9.99999974E-6 : f32
    %15 = vector.broadcast %cst_9 : f32 to vector<1x128xf32>
    %16 = arith.addf %14, %15 : vector<1x128xf32>
    %17 = math.rsqrt %16 : vector<1x128xf32>
    %18 = arith.mulf %12, %17 : vector<1x128xf32>
    %c0_10 = arith.constant 0 : index
    %c0_11 = arith.constant 0 : index
    %19 = vector.load %arg3[%c0_10, %c0_11] : memref<1x128xf32, #tpu.memory_space<vmem>>, vector<1x128xf32>
    %20 = arith.mulf %6, %18 : vector<1x128xf32>
    %21 = arith.subf %19, %20 : vector<1x128xf32>
    %22 = vector.broadcast %18 : vector<1x128xf32> to vector<2x128xf32>
    %23 = arith.mulf %2, %22 : vector<2x128xf32>
    %24 = vector.broadcast %21 : vector<1x128xf32> to vector<2x128xf32>
    %25 = arith.addf %23, %24 : vector<2x128xf32>
    %cst_12 = arith.constant 0.000000e+00 : f32
    %26 = vector.broadcast %cst_12 : f32 to vector<2x128xf32>
    %27 = arith.cmpf oge, %25, %26 : vector<2x128xf32>
    %cst_13 = arith.constant 2.000000e-01 : f32
    %28 = vector.broadcast %cst_13 : f32 to vector<2x128xf32>
    %29 = arith.mulf %28, %25 : vector<2x128xf32>
    %30 = arith.select %27, %25, %29 : vector<2x128xi1>, vector<2x128xf32>
    %31 = arith.truncf %30 : vector<2x128xf32> to vector<2x128xbf16>
    %c0_14 = arith.constant 0 : index
    %c0_15 = arith.constant 0 : index
    %32 = vector.load %arg4[%c0_14, %c0_15] : memref<128x256xbf16, #tpu.memory_space<vmem>>, vector<128x256xbf16>
    %cst_16 = arith.constant dense<0.000000e+00> : vector<2x256xf32>
    %33 = tpu.matmul %31, %32, %cst_16 {dimension_numbers = #tpu.dot_dimension_numbers<[1], [0], [0], [1], [0, 0, 1, 1], [], []>} : vector<2x128xbf16>, vector<128x256xbf16>, vector<2x256xf32> -> vector<2x256xf32>
    %c0_17 = arith.constant 0 : index
    %c0_18 = arith.constant 0 : index
    %34 = vector.load %arg5[%c0_17, %c0_18] : memref<1x256xf32, #tpu.memory_space<vmem>>, vector<1x256xf32>
    %35 = vector.broadcast %34 : vector<1x256xf32> to vector<2x256xf32>
    %36 = arith.addf %33, %35 : vector<2x256xf32>
    %37 = vector.extract_strided_slice %36 {offsets = [0, 0], sizes = [2, 128], strides = [1, 1]} : vector<2x256xf32> to vector<2x128xf32>
    %38 = vector.extract_strided_slice %36 {offsets = [0, 128], sizes = [2, 128], strides = [1, 1]} : vector<2x256xf32> to vector<2x128xf32>
    %cst_19 = arith.constant 2.000000e+01 : f32
    %39 = vector.broadcast %cst_19 : f32 to vector<2x128xf32>
    %40 = arith.cmpf ogt, %38, %39 : vector<2x128xf32>
    %cst_20 = arith.constant 2.000000e+01 : f32
    %41 = vector.broadcast %cst_20 : f32 to vector<2x128xf32>
    %42 = arith.minimumf %38, %41 : vector<2x128xf32>
    %43 = math.exp %42 : vector<2x128xf32>
    %44 = math.log1p %43 : vector<2x128xf32>
    %45 = arith.select %40, %38, %44 : vector<2x128xi1>, vector<2x128xf32>
    %c0_21 = arith.constant 0 : index
    %c0_22 = arith.constant 0 : index
    %46 = vector.load %arg6[%c0_21, %c0_22] : memref<2x128xf32, #tpu.memory_space<vmem>>, vector<2x128xf32>
    %cst_23 = arith.constant 5.000000e-01 : f32
    %47 = vector.broadcast %cst_23 : f32 to vector<2x128xf32>
    %48 = arith.mulf %47, %45 : vector<2x128xf32>
    %49 = math.exp %48 : vector<2x128xf32>
    %50 = arith.mulf %46, %49 : vector<2x128xf32>
    %51 = arith.addf %37, %50 : vector<2x128xf32>
    %c0_24 = arith.constant 0 : index
    %c0_25 = arith.constant 0 : index
    %52 = vector.load %arg13[%c0_24, %c0_25] : memref<2x128xf32, #tpu.memory_space<vmem>>, vector<2x128xf32>
    tpu.vector_store %arg13[%c0_24, %c0_25], %37 {strides = array<i32>} : memref<2x128xf32, #tpu.memory_space<vmem>>, vector<2x128xf32>,
    %c0_26 = arith.constant 0 : index
    %c0_27 = arith.constant 0 : index
    %53 = vector.load %arg14[%c0_26, %c0_27] : memref<2x128xf32, #tpu.memory_space<vmem>>, vector<2x128xf32>
    tpu.vector_store %arg14[%c0_26, %c0_27], %45 {strides = array<i32>} : memref<2x128xf32, #tpu.memory_space<vmem>>, vector<2x128xf32>,
    %54 = arith.truncf %51 : vector<2x128xf32> to vector<2x128xbf16>
    %c0_28 = arith.constant 0 : index
    %c0_29 = arith.constant 0 : index
    %55 = vector.load %arg7[%c0_28, %c0_29] : memref<128x1152xbf16, #tpu.memory_space<vmem>>, vector<128x1152xbf16>
    %cst_30 = arith.constant dense<0.000000e+00> : vector<2x1152xf32>
    %56 = tpu.matmul %54, %55, %cst_30 {dimension_numbers = #tpu.dot_dimension_numbers<[1], [0], [0], [1], [0, 0, 1, 1], [], []>} : vector<2x128xbf16>, vector<128x1152xbf16>, vector<2x1152xf32> -> vector<2x1152xf32>
    %cst_31 = arith.constant dense<0.000000e+00> : vector<1152xf32>
    %57 = vector.multi_reduction <add>, %56, %cst_31 [0] : vector<2x1152xf32> to vector<1152xf32>
    %58 = vector.shape_cast %57 : vector<1152xf32> to vector<1x1152xf32>
    %59 = arith.mulf %56, %56 : vector<2x1152xf32>
    %cst_32 = arith.constant dense<0.000000e+00> : vector<1152xf32>
    %60 = vector.multi_reduction <add>, %59, %cst_32 [0] : vector<2x1152xf32> to vector<1152xf32>
    %61 = vector.shape_cast %60 : vector<1152xf32> to vector<1x1152xf32>
    %62 = vector.extract_strided_slice %58 {offsets = [0, 0], sizes = [1, 128], strides = [1, 1]} : vector<1x1152xf32> to vector<1x128xf32>
    %63 = vector.extract_strided_slice %61 {offsets = [0, 0], sizes = [1, 128], strides = [1, 1]} : vector<1x1152xf32> to vector<1x128xf32>
    %64 = vector.extract_strided_slice %58 {offsets = [0, 128], sizes = [1, 128], strides = [1, 1]} : vector<1x1152xf32> to vector<1x128xf32>
    %65 = arith.addf %62, %64 : vector<1x128xf32>
    %66 = vector.extract_strided_slice %61 {offsets = [0, 128], sizes = [1, 128], strides = [1, 1]} : vector<1x1152xf32> to vector<1x128xf32>
    %67 = arith.addf %63, %66 : vector<1x128xf32>
    %68 = vector.extract_strided_slice %58 {offsets = [0, 256], sizes = [1, 128], strides = [1, 1]} : vector<1x1152xf32> to vector<1x128xf32>
    %69 = arith.addf %65, %68 : vector<1x128xf32>
    %70 = vector.extract_strided_slice %61 {offsets = [0, 256], sizes = [1, 128], strides = [1, 1]} : vector<1x1152xf32> to vector<1x128xf32>
    %71 = arith.addf %67, %70 : vector<1x128xf32>
    %72 = vector.extract_strided_slice %58 {offsets = [0, 384], sizes = [1, 128], strides = [1, 1]} : vector<1x1152xf32> to vector<1x128xf32>
    %73 = arith.addf %69, %72 : vector<1x128xf32>
    %74 = vector.extract_strided_slice %61 {offsets = [0, 384], sizes = [1, 128], strides = [1, 1]} : vector<1x1152xf32> to vector<1x128xf32>
    %75 = arith.addf %71, %74 : vector<1x128xf32>
    %76 = vector.extract_strided_slice %58 {offsets = [0, 512], sizes = [1, 128], strides = [1, 1]} : vector<1x1152xf32> to vector<1x128xf32>
    %77 = arith.addf %73, %76 : vector<1x128xf32>
    %78 = vector.extract_strided_slice %61 {offsets = [0, 512], sizes = [1, 128], strides = [1, 1]} : vector<1x1152xf32> to vector<1x128xf32>
    %79 = arith.addf %75, %78 : vector<1x128xf32>
    %80 = vector.extract_strided_slice %58 {offsets = [0, 640], sizes = [1, 128], strides = [1, 1]} : vector<1x1152xf32> to vector<1x128xf32>
    %81 = arith.addf %77, %80 : vector<1x128xf32>
    %82 = vector.extract_strided_slice %61 {offsets = [0, 640], sizes = [1, 128], strides = [1, 1]} : vector<1x1152xf32> to vector<1x128xf32>
    %83 = arith.addf %79, %82 : vector<1x128xf32>
    %84 = vector.extract_strided_slice %58 {offsets = [0, 768], sizes = [1, 128], strides = [1, 1]} : vector<1x1152xf32> to vector<1x128xf32>
    %85 = arith.addf %81, %84 : vector<1x128xf32>
    %86 = vector.extract_strided_slice %61 {offsets = [0, 768], sizes = [1, 128], strides = [1, 1]} : vector<1x1152xf32> to vector<1x128xf32>
    %87 = arith.addf %83, %86 : vector<1x128xf32>
    %88 = vector.extract_strided_slice %58 {offsets = [0, 896], sizes = [1, 128], strides = [1, 1]} : vector<1x1152xf32> to vector<1x128xf32>
    %89 = arith.addf %85, %88 : vector<1x128xf32>
    %90 = vector.extract_strided_slice %61 {offsets = [0, 896], sizes = [1, 128], strides = [1, 1]} : vector<1x1152xf32> to vector<1x128xf32>
    %91 = arith.addf %87, %90 : vector<1x128xf32>
    %92 = vector.extract_strided_slice %58 {offsets = [0, 1024], sizes = [1, 128], strides = [1, 1]} : vector<1x1152xf32> to vector<1x128xf32>
    %93 = arith.addf %89, %92 : vector<1x128xf32>
    %94 = vector.extract_strided_slice %61 {offsets = [0, 1024], sizes = [1, 128], strides = [1, 1]} : vector<1x1152xf32> to vector<1x128xf32>
    %95 = arith.addf %91, %94 : vector<1x128xf32>
    %cst_33 = arith.constant 0.055555556 : f32
    %96 = vector.broadcast %cst_33 : f32 to vector<1x128xf32>
    %97 = arith.mulf %93, %96 : vector<1x128xf32>
    %c0_34 = arith.constant 0 : index
    %c0_35 = arith.constant 0 : index
    %98 = vector.load %arg8[%c0_34, %c0_35] : memref<1x128xf32, #tpu.memory_space<vmem>>, vector<1x128xf32>
    %cst_36 = arith.constant 0.055555556 : f32
    %99 = vector.broadcast %cst_36 : f32 to vector<1x128xf32>
    %100 = arith.mulf %95, %99 : vector<1x128xf32>
    %101 = arith.mulf %97, %97 : vector<1x128xf32>
    %102 = arith.subf %100, %101 : vector<1x128xf32>
    %cst_37 = arith.constant 9.99999974E-6 : f32
    %103 = vector.broadcast %cst_37 : f32 to vector<1x128xf32>
    %104 = arith.addf %102, %103 : vector<1x128xf32>
    %105 = math.rsqrt %104 : vector<1x128xf32>
    %106 = arith.mulf %98, %105 : vector<1x128xf32>
    %c0_38 = arith.constant 0 : index
    %c0_39 = arith.constant 0 : index
    %107 = vector.load %arg9[%c0_38, %c0_39] : memref<1x128xf32, #tpu.memory_space<vmem>>, vector<1x128xf32>
    %108 = arith.mulf %97, %106 : vector<1x128xf32>
    %109 = arith.subf %107, %108 : vector<1x128xf32>
    %110 = vector.extract_strided_slice %56 {offsets = [0, 0], sizes = [2, 128], strides = [1, 1]} : vector<2x1152xf32> to vector<2x128xf32>
    %111 = vector.broadcast %106 : vector<1x128xf32> to vector<2x128xf32>
    %112 = arith.mulf %110, %111 : vector<2x128xf32>
    %113 = vector.broadcast %109 : vector<1x128xf32> to vector<2x128xf32>
    %114 = arith.addf %112, %113 : vector<2x128xf32>
    %cst_40 = arith.constant 0.000000e+00 : f32
    %115 = vector.broadcast %cst_40 : f32 to vector<2x128xf32>
    %116 = arith.cmpf oge, %114, %115 : vector<2x128xf32>
    %cst_41 = arith.constant 2.000000e-01 : f32
    %117 = vector.broadcast %cst_41 : f32 to vector<2x128xf32>
    %118 = arith.mulf %117, %114 : vector<2x128xf32>
    %119 = arith.select %116, %114, %118 : vector<2x128xi1>, vector<2x128xf32>
    %c0_42 = arith.constant 0 : index
    %c0_43 = arith.constant 0 : index
    %120 = vector.load %arg16[%c0_42, %c0_43] : memref<18x128xf32, #tpu.memory_space<vmem>>, vector<2x128xf32>
    tpu.vector_store %arg16[%c0_42, %c0_43], %119 {strides = array<i32>} : memref<18x128xf32, #tpu.memory_space<vmem>>, vector<2x128xf32>,
    %121 = vector.extract_strided_slice %56 {offsets = [0, 128], sizes = [2, 128], strides = [1, 1]} : vector<2x1152xf32> to vector<2x128xf32>
    %122 = vector.broadcast %106 : vector<1x128xf32> to vector<2x128xf32>
    %123 = arith.mulf %121, %122 : vector<2x128xf32>
    %124 = vector.broadcast %109 : vector<1x128xf32> to vector<2x128xf32>
    %125 = arith.addf %123, %124 : vector<2x128xf32>
    %cst_44 = arith.constant 0.000000e+00 : f32
    %126 = vector.broadcast %cst_44 : f32 to vector<2x128xf32>
    %127 = arith.cmpf oge, %125, %126 : vector<2x128xf32>
    %cst_45 = arith.constant 2.000000e-01 : f32
    %128 = vector.broadcast %cst_45 : f32 to vector<2x128xf32>
    %129 = arith.mulf %128, %125 : vector<2x128xf32>
    %130 = arith.select %127, %125, %129 : vector<2x128xi1>, vector<2x128xf32>
    %c2 = arith.constant 2 : index
    %c0_46 = arith.constant 0 : index
    %131 = vector.load %arg16[%c2, %c0_46] : memref<18x128xf32, #tpu.memory_space<vmem>>, vector<2x128xf32>
    tpu.vector_store %arg16[%c2, %c0_46], %130 {strides = array<i32>} : memref<18x128xf32, #tpu.memory_space<vmem>>, vector<2x128xf32>,
    %132 = vector.extract_strided_slice %56 {offsets = [0, 256], sizes = [2, 128], strides = [1, 1]} : vector<2x1152xf32> to vector<2x128xf32>
    %133 = vector.broadcast %106 : vector<1x128xf32> to vector<2x128xf32>
    %134 = arith.mulf %132, %133 : vector<2x128xf32>
    %135 = vector.broadcast %109 : vector<1x128xf32> to vector<2x128xf32>
    %136 = arith.addf %134, %135 : vector<2x128xf32>
    %cst_47 = arith.constant 0.000000e+00 : f32
    %137 = vector.broadcast %cst_47 : f32 to vector<2x128xf32>
    %138 = arith.cmpf oge, %136, %137 : vector<2x128xf32>
    %cst_48 = arith.constant 2.000000e-01 : f32
    %139 = vector.broadcast %cst_48 : f32 to vector<2x128xf32>
    %140 = arith.mulf %139, %136 : vector<2x128xf32>
    %141 = arith.select %138, %136, %140 : vector<2x128xi1>, vector<2x128xf32>
    %c4 = arith.constant 4 : index
    %c0_49 = arith.constant 0 : index
    %142 = vector.load %arg16[%c4, %c0_49] : memref<18x128xf32, #tpu.memory_space<vmem>>, vector<2x128xf32>
    tpu.vector_store %arg16[%c4, %c0_49], %141 {strides = array<i32>} : memref<18x128xf32, #tpu.memory_space<vmem>>, vector<2x128xf32>,
    %143 = vector.extract_strided_slice %56 {offsets = [0, 384], sizes = [2, 128], strides = [1, 1]} : vector<2x1152xf32> to vector<2x128xf32>
    %144 = vector.broadcast %106 : vector<1x128xf32> to vector<2x128xf32>
    %145 = arith.mulf %143, %144 : vector<2x128xf32>
    %146 = vector.broadcast %109 : vector<1x128xf32> to vector<2x128xf32>
    %147 = arith.addf %145, %146 : vector<2x128xf32>
    %cst_50 = arith.constant 0.000000e+00 : f32
    %148 = vector.broadcast %cst_50 : f32 to vector<2x128xf32>
    %149 = arith.cmpf oge, %147, %148 : vector<2x128xf32>
    %cst_51 = arith.constant 2.000000e-01 : f32
    %150 = vector.broadcast %cst_51 : f32 to vector<2x128xf32>
    %151 = arith.mulf %150, %147 : vector<2x128xf32>
    %152 = arith.select %149, %147, %151 : vector<2x128xi1>, vector<2x128xf32>
    %c6 = arith.constant 6 : index
    %c0_52 = arith.constant 0 : index
    %153 = vector.load %arg16[%c6, %c0_52] : memref<18x128xf32, #tpu.memory_space<vmem>>, vector<2x128xf32>
    tpu.vector_store %arg16[%c6, %c0_52], %152 {strides = array<i32>} : memref<18x128xf32, #tpu.memory_space<vmem>>, vector<2x128xf32>,
    %154 = vector.extract_strided_slice %56 {offsets = [0, 512], sizes = [2, 128], strides = [1, 1]} : vector<2x1152xf32> to vector<2x128xf32>
    %155 = vector.broadcast %106 : vector<1x128xf32> to vector<2x128xf32>
    %156 = arith.mulf %154, %155 : vector<2x128xf32>
    %157 = vector.broadcast %109 : vector<1x128xf32> to vector<2x128xf32>
    %158 = arith.addf %156, %157 : vector<2x128xf32>
    %cst_53 = arith.constant 0.000000e+00 : f32
    %159 = vector.broadcast %cst_53 : f32 to vector<2x128xf32>
    %160 = arith.cmpf oge, %158, %159 : vector<2x128xf32>
    %cst_54 = arith.constant 2.000000e-01 : f32
    %161 = vector.broadcast %cst_54 : f32 to vector<2x128xf32>
    %162 = arith.mulf %161, %158 : vector<2x128xf32>
    %163 = arith.select %160, %158, %162 : vector<2x128xi1>, vector<2x128xf32>
    %c8 = arith.constant 8 : index
    %c0_55 = arith.constant 0 : index
    %164 = vector.load %arg16[%c8, %c0_55] : memref<18x128xf32, #tpu.memory_space<vmem>>, vector<2x128xf32>
    tpu.vector_store %arg16[%c8, %c0_55], %163 {strides = array<i32>} : memref<18x128xf32, #tpu.memory_space<vmem>>, vector<2x128xf32>,
    %165 = vector.extract_strided_slice %56 {offsets = [0, 640], sizes = [2, 128], strides = [1, 1]} : vector<2x1152xf32> to vector<2x128xf32>
    %166 = vector.broadcast %106 : vector<1x128xf32> to vector<2x128xf32>
    %167 = arith.mulf %165, %166 : vector<2x128xf32>
    %168 = vector.broadcast %109 : vector<1x128xf32> to vector<2x128xf32>
    %169 = arith.addf %167, %168 : vector<2x128xf32>
    %cst_56 = arith.constant 0.000000e+00 : f32
    %170 = vector.broadcast %cst_56 : f32 to vector<2x128xf32>
    %171 = arith.cmpf oge, %169, %170 : vector<2x128xf32>
    %cst_57 = arith.constant 2.000000e-01 : f32
    %172 = vector.broadcast %cst_57 : f32 to vector<2x128xf32>
    %173 = arith.mulf %172, %169 : vector<2x128xf32>
    %174 = arith.select %171, %169, %173 : vector<2x128xi1>, vector<2x128xf32>
    %c10 = arith.constant 10 : index
    %c0_58 = arith.constant 0 : index
    %175 = vector.load %arg16[%c10, %c0_58] : memref<18x128xf32, #tpu.memory_space<vmem>>, vector<2x128xf32>
    tpu.vector_store %arg16[%c10, %c0_58], %174 {strides = array<i32>} : memref<18x128xf32, #tpu.memory_space<vmem>>, vector<2x128xf32>,
    %176 = vector.extract_strided_slice %56 {offsets = [0, 768], sizes = [2, 128], strides = [1, 1]} : vector<2x1152xf32> to vector<2x128xf32>
    %177 = vector.broadcast %106 : vector<1x128xf32> to vector<2x128xf32>
    %178 = arith.mulf %176, %177 : vector<2x128xf32>
    %179 = vector.broadcast %109 : vector<1x128xf32> to vector<2x128xf32>
    %180 = arith.addf %178, %179 : vector<2x128xf32>
    %cst_59 = arith.constant 0.000000e+00 : f32
    %181 = vector.broadcast %cst_59 : f32 to vector<2x128xf32>
    %182 = arith.cmpf oge, %180, %181 : vector<2x128xf32>
    %cst_60 = arith.constant 2.000000e-01 : f32
    %183 = vector.broadcast %cst_60 : f32 to vector<2x128xf32>
    %184 = arith.mulf %183, %180 : vector<2x128xf32>
    %185 = arith.select %182, %180, %184 : vector<2x128xi1>, vector<2x128xf32>
    %c12 = arith.constant 12 : index
    %c0_61 = arith.constant 0 : index
    %186 = vector.load %arg16[%c12, %c0_61] : memref<18x128xf32, #tpu.memory_space<vmem>>, vector<2x128xf32>
    tpu.vector_store %arg16[%c12, %c0_61], %185 {strides = array<i32>} : memref<18x128xf32, #tpu.memory_space<vmem>>, vector<2x128xf32>,
    %187 = vector.extract_strided_slice %56 {offsets = [0, 896], sizes = [2, 128], strides = [1, 1]} : vector<2x1152xf32> to vector<2x128xf32>
    %188 = vector.broadcast %106 : vector<1x128xf32> to vector<2x128xf32>
    %189 = arith.mulf %187, %188 : vector<2x128xf32>
    %190 = vector.broadcast %109 : vector<1x128xf32> to vector<2x128xf32>
    %191 = arith.addf %189, %190 : vector<2x128xf32>
    %cst_62 = arith.constant 0.000000e+00 : f32
    %192 = vector.broadcast %cst_62 : f32 to vector<2x128xf32>
    %193 = arith.cmpf oge, %191, %192 : vector<2x128xf32>
    %cst_63 = arith.constant 2.000000e-01 : f32
    %194 = vector.broadcast %cst_63 : f32 to vector<2x128xf32>
    %195 = arith.mulf %194, %191 : vector<2x128xf32>
    %196 = arith.select %193, %191, %195 : vector<2x128xi1>, vector<2x128xf32>
    %c14 = arith.constant 14 : index
    %c0_64 = arith.constant 0 : index
    %197 = vector.load %arg16[%c14, %c0_64] : memref<18x128xf32, #tpu.memory_space<vmem>>, vector<2x128xf32>
    tpu.vector_store %arg16[%c14, %c0_64], %196 {strides = array<i32>} : memref<18x128xf32, #tpu.memory_space<vmem>>, vector<2x128xf32>,
    %198 = vector.extract_strided_slice %56 {offsets = [0, 1024], sizes = [2, 128], strides = [1, 1]} : vector<2x1152xf32> to vector<2x128xf32>
    %199 = vector.broadcast %106 : vector<1x128xf32> to vector<2x128xf32>
    %200 = arith.mulf %198, %199 : vector<2x128xf32>
    %201 = vector.broadcast %109 : vector<1x128xf32> to vector<2x128xf32>
    %202 = arith.addf %200, %201 : vector<2x128xf32>
    %cst_65 = arith.constant 0.000000e+00 : f32
    %203 = vector.broadcast %cst_65 : f32 to vector<2x128xf32>
    %204 = arith.cmpf oge, %202, %203 : vector<2x128xf32>
    %cst_66 = arith.constant 2.000000e-01 : f32
    %205 = vector.broadcast %cst_66 : f32 to vector<2x128xf32>
    %206 = arith.mulf %205, %202 : vector<2x128xf32>
    %207 = arith.select %204, %202, %206 : vector<2x128xi1>, vector<2x128xf32>
    %c16 = arith.constant 16 : index
    %c0_67 = arith.constant 0 : index
    %208 = vector.load %arg16[%c16, %c0_67] : memref<18x128xf32, #tpu.memory_space<vmem>>, vector<2x128xf32>
    tpu.vector_store %arg16[%c16, %c0_67], %207 {strides = array<i32>} : memref<18x128xf32, #tpu.memory_space<vmem>>, vector<2x128xf32>,
    %c0_68 = arith.constant 0 : index
    %c0_69 = arith.constant 0 : index
    %209 = vector.load %arg16[%c0_68, %c0_69] : memref<18x128xf32, #tpu.memory_space<vmem>>, vector<18x128xf32>
    %210 = arith.truncf %209 : vector<18x128xf32> to vector<18x128xbf16>
    %c0_70 = arith.constant 0 : index
    %c0_71 = arith.constant 0 : index
    %211 = vector.load %arg10[%c0_70, %c0_71] : memref<128x3200xbf16, #tpu.memory_space<vmem>>, vector<128x3200xbf16>
    %cst_72 = arith.constant dense<0.000000e+00> : vector<18x3200xf32>
    %212 = tpu.matmul %210, %211, %cst_72 {dimension_numbers = #tpu.dot_dimension_numbers<[1], [0], [0], [1], [0, 0, 1, 1], [], []>} : vector<18x128xbf16>, vector<128x3200xbf16>, vector<18x3200xf32> -> vector<18x3200xf32>
    %c0_73 = arith.constant 0 : index
    %c0_74 = arith.constant 0 : index
    %213 = vector.load %arg17[%c0_73, %c0_74] : memref<18x3200xf32, #tpu.memory_space<vmem>>, vector<18x3200xf32>
    tpu.vector_store %arg17[%c0_73, %c0_74], %212 {strides = array<i32>} : memref<18x3200xf32, #tpu.memory_space<vmem>>, vector<18x3200xf32>,
    %cst_75 = arith.constant 0.000000e+00 : f32
    %214 = vector.broadcast %cst_75 : f32 to vector<2x128xf32>
    %c0_76 = arith.constant 0 : index
    %c0_77 = arith.constant 0 : index
    %215 = vector.load %arg17[%c0_76, %c0_77] : memref<18x3200xf32, #tpu.memory_space<vmem>>, vector<2x128xf32>
    %216 = arith.addf %214, %215 : vector<2x128xf32>
    %c0_78 = arith.constant 0 : index
    %c0_79 = arith.constant 0 : index
    %217 = vector.load %arg18[%c0_78, %c0_79] : memref<98x128xf32, #tpu.memory_space<vmem>>, vector<2x128xf32>
    tpu.vector_store %arg18[%c0_78, %c0_79], %216 {strides = array<i32>} : memref<98x128xf32, #tpu.memory_space<vmem>>, vector<2x128xf32>,
    %cst_80 = arith.constant 0.000000e+00 : f32
    %218 = vector.broadcast %cst_80 : f32 to vector<2x128xf32>
    %c0_81 = arith.constant 0 : index
    %c128 = arith.constant 128 : index
    %219 = vector.load %arg17[%c0_81, %c128] : memref<18x3200xf32, #tpu.memory_space<vmem>>, vector<2x128xf32>
    %220 = arith.addf %218, %219 : vector<2x128xf32>
    %c2_82 = arith.constant 2 : index
    %c0_83 = arith.constant 0 : index
    %221 = vector.load %arg17[%c2_82, %c0_83] : memref<18x3200xf32, #tpu.memory_space<vmem>>, vector<2x128xf32>
    %222 = arith.addf %220, %221 : vector<2x128xf32>
    %c2_84 = arith.constant 2 : index
    %c0_85 = arith.constant 0 : index
    %223 = vector.load %arg18[%c2_84, %c0_85] : memref<98x128xf32, #tpu.memory_space<vmem>>, vector<2x128xf32>
    tpu.vector_store %arg18[%c2_84, %c0_85], %222 {strides = array<i32>} : memref<98x128xf32, #tpu.memory_space<vmem>>, vector<2x128xf32>,
    %cst_86 = arith.constant 0.000000e+00 : f32
    %224 = vector.broadcast %cst_86 : f32 to vector<2x128xf32>
    %c0_87 = arith.constant 0 : index
    %c256 = arith.constant 256 : index
    %225 = vector.load %arg17[%c0_87, %c256] : memref<18x3200xf32, #tpu.memory_space<vmem>>, vector<2x128xf32>
    %226 = arith.addf %224, %225 : vector<2x128xf32>
    %c2_88 = arith.constant 2 : index
    %c128_89 = arith.constant 128 : index
    %227 = vector.load %arg17[%c2_88, %c128_89] : memref<18x3200xf32, #tpu.memory_space<vmem>>, vector<2x128xf32>
    %228 = arith.addf %226, %227 : vector<2x128xf32>
    %c4_90 = arith.constant 4 : index
    %c0_91 = arith.constant 0 : index
    %229 = vector.load %arg17[%c4_90, %c0_91] : memref<18x3200xf32, #tpu.memory_space<vmem>>, vector<2x128xf32>
    %230 = arith.addf %228, %229 : vector<2x128xf32>
    %c4_92 = arith.constant 4 : index
    %c0_93 = arith.constant 0 : index
    %231 = vector.load %arg18[%c4_92, %c0_93] : memref<98x128xf32, #tpu.memory_space<vmem>>, vector<2x128xf32>
    tpu.vector_store %arg18[%c4_92, %c0_93], %230 {strides = array<i32>} : memref<98x128xf32, #tpu.memory_space<vmem>>, vector<2x128xf32>,
    %cst_94 = arith.constant 0.000000e+00 : f32
    %232 = vector.broadcast %cst_94 : f32 to vector<2x128xf32>
    %c0_95 = arith.constant 0 : index
    %c384 = arith.constant 384 : index
    %233 = vector.load %arg17[%c0_95, %c384] : memref<18x3200xf32, #tpu.memory_space<vmem>>, vector<2x128xf32>
    %234 = arith.addf %232, %233 : vector<2x128xf32>
    %c2_96 = arith.constant 2 : index
    %c256_97 = arith.constant 256 : index
    %235 = vector.load %arg17[%c2_96, %c256_97] : memref<18x3200xf32, #tpu.memory_space<vmem>>, vector<2x128xf32>
    %236 = arith.addf %234, %235 : vector<2x128xf32>
    %c4_98 = arith.constant 4 : index
    %c128_99 = arith.constant 128 : index
    %237 = vector.load %arg17[%c4_98, %c128_99] : memref<18x3200xf32, #tpu.memory_space<vmem>>, vector<2x128xf32>
    %238 = arith.addf %236, %237 : vector<2x128xf32>
    %c6_100 = arith.constant 6 : index
    %c0_101 = arith.constant 0 : index
    %239 = vector.load %arg18[%c6_100, %c0_101] : memref<98x128xf32, #tpu.memory_space<vmem>>, vector<2x128xf32>
    tpu.vector_store %arg18[%c6_100, %c0_101], %238 {strides = array<i32>} : memref<98x128xf32, #tpu.memory_space<vmem>>, vector<2x128xf32>,
    %cst_102 = arith.constant 0.000000e+00 : f32
    %240 = vector.broadcast %cst_102 : f32 to vector<2x128xf32>
    %c0_103 = arith.constant 0 : index
    %c512 = arith.constant 512 : index
    %241 = vector.load %arg17[%c0_103, %c512] : memref<18x3200xf32, #tpu.memory_space<vmem>>, vector<2x128xf32>
    %242 = arith.addf %240, %241 : vector<2x128xf32>
    %c2_104 = arith.constant 2 : index
    %c384_105 = arith.constant 384 : index
    %243 = vector.load %arg17[%c2_104, %c384_105] : memref<18x3200xf32, #tpu.memory_space<vmem>>, vector<2x128xf32>
    %244 = arith.addf %242, %243 : vector<2x128xf32>
    %c4_106 = arith.constant 4 : index
    %c256_107 = arith.constant 256 : index
    %245 = vector.load %arg17[%c4_106, %c256_107] : memref<18x3200xf32, #tpu.memory_space<vmem>>, vector<2x128xf32>
    %246 = arith.addf %244, %245 : vector<2x128xf32>
    %c8_108 = arith.constant 8 : index
    %c0_109 = arith.constant 0 : index
    %247 = vector.load %arg18[%c8_108, %c0_109] : memref<98x128xf32, #tpu.memory_space<vmem>>, vector<2x128xf32>
    tpu.vector_store %arg18[%c8_108, %c0_109], %246 {strides = array<i32>} : memref<98x128xf32, #tpu.memory_space<vmem>>, vector<2x128xf32>,
    %cst_110 = arith.constant 0.000000e+00 : f32
    %248 = vector.broadcast %cst_110 : f32 to vector<2x128xf32>
    %c2_111 = arith.constant 2 : index
    %c512_112 = arith.constant 512 : index
    %249 = vector.load %arg17[%c2_111, %c512_112] : memref<18x3200xf32, #tpu.memory_space<vmem>>, vector<2x128xf32>
    %250 = arith.addf %248, %249 : vector<2x128xf32>
    %c4_113 = arith.constant 4 : index
    %c384_114 = arith.constant 384 : index
    %251 = vector.load %arg17[%c4_113, %c384_114] : memref<18x3200xf32, #tpu.memory_space<vmem>>, vector<2x128xf32>
    %252 = arith.addf %250, %251 : vector<2x128xf32>
    %c10_115 = arith.constant 10 : index
    %c0_116 = arith.constant 0 : index
    %253 = vector.load %arg18[%c10_115, %c0_116] : memref<98x128xf32, #tpu.memory_space<vmem>>, vector<2x128xf32>
    tpu.vector_store %arg18[%c10_115, %c0_116], %252 {strides = array<i32>} : memref<98x128xf32, #tpu.memory_space<vmem>>, vector<2x128xf32>,
    %cst_117 = arith.constant 0.000000e+00 : f32
    %254 = vector.broadcast %cst_117 : f32 to vector<2x128xf32>
    %c4_118 = arith.constant 4 : index
    %c512_119 = arith.constant 512 : index
    %255 = vector.load %arg17[%c4_118, %c512_119] : memref<18x3200xf32, #tpu.memory_space<vmem>>, vector<2x128xf32>
    %256 = arith.addf %254, %255 : vector<2x128xf32>
    %c12_120 = arith.constant 12 : index
    %c0_121 = arith.constant 0 : index
    %257 = vector.load %arg18[%c12_120, %c0_121] : memref<98x128xf32, #tpu.memory_space<vmem>>, vector<2x128xf32>
    tpu.vector_store %arg18[%c12_120, %c0_121], %256 {strides = array<i32>} : memref<98x128xf32, #tpu.memory_space<vmem>>, vector<2x128xf32>,
    %cst_122 = arith.constant 0.000000e+00 : f32
    %258 = vector.broadcast %cst_122 : f32 to vector<2x128xf32>
    %c0_123 = arith.constant 0 : index
    %c640 = arith.constant 640 : index
    %259 = vector.load %arg17[%c0_123, %c640] : memref<18x3200xf32, #tpu.memory_space<vmem>>, vector<2x128xf32>
    %260 = arith.addf %258, %259 : vector<2x128xf32>
    %c6_124 = arith.constant 6 : index
    %c0_125 = arith.constant 0 : index
    %261 = vector.load %arg17[%c6_124, %c0_125] : memref<18x3200xf32, #tpu.memory_space<vmem>>, vector<2x128xf32>
    %262 = arith.addf %260, %261 : vector<2x128xf32>
    %c14_126 = arith.constant 14 : index
    %c0_127 = arith.constant 0 : index
    %263 = vector.load %arg18[%c14_126, %c0_127] : memref<98x128xf32, #tpu.memory_space<vmem>>, vector<2x128xf32>
    tpu.vector_store %arg18[%c14_126, %c0_127], %262 {strides = array<i32>} : memref<98x128xf32, #tpu.memory_space<vmem>>, vector<2x128xf32>,
    %cst_128 = arith.constant 0.000000e+00 : f32
    %264 = vector.broadcast %cst_128 : f32 to vector<2x128xf32>
    %c0_129 = arith.constant 0 : index
    %c768 = arith.constant 768 : index
    %265 = vector.load %arg17[%c0_129, %c768] : memref<18x3200xf32, #tpu.memory_space<vmem>>, vector<2x128xf32>
    %266 = arith.addf %264, %265 : vector<2x128xf32>
    %c2_130 = arith.constant 2 : index
    %c640_131 = arith.constant 640 : index
    %267 = vector.load %arg17[%c2_130, %c640_131] : memref<18x3200xf32, #tpu.memory_space<vmem>>, vector<2x128xf32>
    %268 = arith.addf %266, %267 : vector<2x128xf32>
    %c6_132 = arith.constant 6 : index
    %c128_133 = arith.constant 128 : index
    %269 = vector.load %arg17[%c6_132, %c128_133] : memref<18x3200xf32, #tpu.memory_space<vmem>>, vector<2x128xf32>
    %270 = arith.addf %268, %269 : vector<2x128xf32>
    %c8_134 = arith.constant 8 : index
    %c0_135 = arith.constant 0 : index
    %271 = vector.load %arg17[%c8_134, %c0_135] : memref<18x3200xf32, #tpu.memory_space<vmem>>, vector<2x128xf32>
    %272 = arith.addf %270, %271 : vector<2x128xf32>
    %c16_136 = arith.constant 16 : index
    %c0_137 = arith.constant 0 : index
    %273 = vector.load %arg18[%c16_136, %c0_137] : memref<98x128xf32, #tpu.memory_space<vmem>>, vector<2x128xf32>
    tpu.vector_store %arg18[%c16_136, %c0_137], %272 {strides = array<i32>} : memref<98x128xf32, #tpu.memory_space<vmem>>, vector<2x128xf32>,
    %cst_138 = arith.constant 0.000000e+00 : f32
    %274 = vector.broadcast %cst_138 : f32 to vector<2x128xf32>
    %c0_139 = arith.constant 0 : index
    %c896 = arith.constant 896 : index
    %275 = vector.load %arg17[%c0_139, %c896] : memref<18x3200xf32, #tpu.memory_space<vmem>>, vector<2x128xf32>
    %276 = arith.addf %274, %275 : vector<2x128xf32>
    %c2_140 = arith.constant 2 : index
    %c768_141 = arith.constant 768 : index
    %277 = vector.load %arg17[%c2_140, %c768_141] : memref<18x3200xf32, #tpu.memory_space<vmem>>, vector<2x128xf32>
    %278 = arith.addf %276, %277 : vector<2x128xf32>
    %c4_142 = arith.constant 4 : index
    %c640_143 = arith.constant 640 : index
    %279 = vector.load %arg17[%c4_142, %c640_143] : memref<18x3200xf32, #tpu.memory_space<vmem>>, vector<2x128xf32>
    %280 = arith.addf %278, %279 : vector<2x128xf32>
    %c6_144 = arith.constant 6 : index
    %c256_145 = arith.constant 256 : index
    %281 = vector.load %arg17[%c6_144, %c256_145] : memref<18x3200xf32, #tpu.memory_space<vmem>>, vector<2x128xf32>
    %282 = arith.addf %280, %281 : vector<2x128xf32>
    %c8_146 = arith.constant 8 : index
    %c128_147 = arith.constant 128 : index
    %283 = vector.load %arg17[%c8_146, %c128_147] : memref<18x3200xf32, #tpu.memory_space<vmem>>, vector<2x128xf32>
    %284 = arith.addf %282, %283 : vector<2x128xf32>
    %c10_148 = arith.constant 10 : index
    %c0_149 = arith.constant 0 : index
    %285 = vector.load %arg17[%c10_148, %c0_149] : memref<18x3200xf32, #tpu.memory_space<vmem>>, vector<2x128xf32>
    %286 = arith.addf %284, %285 : vector<2x128xf32>
    %c18 = arith.constant 18 : index
    %c0_150 = arith.constant 0 : index
    %287 = vector.load %arg18[%c18, %c0_150] : memref<98x128xf32, #tpu.memory_space<vmem>>, vector<2x128xf32>
    tpu.vector_store %arg18[%c18, %c0_150], %286 {strides = array<i32>} : memref<98x128xf32, #tpu.memory_space<vmem>>, vector<2x128xf32>,
    %cst_151 = arith.constant 0.000000e+00 : f32
    %288 = vector.broadcast %cst_151 : f32 to vector<2x128xf32>
    %c0_152 = arith.constant 0 : index
    %c1024 = arith.constant 1024 : index
    %289 = vector.load %arg17[%c0_152, %c1024] : memref<18x3200xf32, #tpu.memory_space<vmem>>, vector<2x128xf32>
    %290 = arith.addf %288, %289 : vector<2x128xf32>
    %c2_153 = arith.constant 2 : index
    %c896_154 = arith.constant 896 : index
    %291 = vector.load %arg17[%c2_153, %c896_154] : memref<18x3200xf32, #tpu.memory_space<vmem>>, vector<2x128xf32>
    %292 = arith.addf %290, %291 : vector<2x128xf32>
    %c4_155 = arith.constant 4 : index
    %c768_156 = arith.constant 768 : index
    %293 = vector.load %arg17[%c4_155, %c768_156] : memref<18x3200xf32, #tpu.memory_space<vmem>>, vector<2x128xf32>
    %294 = arith.addf %292, %293 : vector<2x128xf32>
    %c6_157 = arith.constant 6 : index
    %c384_158 = arith.constant 384 : index
    %295 = vector.load %arg17[%c6_157, %c384_158] : memref<18x3200xf32, #tpu.memory_space<vmem>>, vector<2x128xf32>
    %296 = arith.addf %294, %295 : vector<2x128xf32>
    %c8_159 = arith.constant 8 : index
    %c256_160 = arith.constant 256 : index
    %297 = vector.load %arg17[%c8_159, %c256_160] : memref<18x3200xf32, #tpu.memory_space<vmem>>, vector<2x128xf32>
    %298 = arith.addf %296, %297 : vector<2x128xf32>
    %c10_161 = arith.constant 10 : index
    %c128_162 = arith.constant 128 : index
    %299 = vector.load %arg17[%c10_161, %c128_162] : memref<18x3200xf32, #tpu.memory_space<vmem>>, vector<2x128xf32>
    %300 = arith.addf %298, %299 : vector<2x128xf32>
    %c20 = arith.constant 20 : index
    %c0_163 = arith.constant 0 : index
    %301 = vector.load %arg18[%c20, %c0_163] : memref<98x128xf32, #tpu.memory_space<vmem>>, vector<2x128xf32>
    tpu.vector_store %arg18[%c20, %c0_163], %300 {strides = array<i32>} : memref<98x128xf32, #tpu.memory_space<vmem>>, vector<2x128xf32>,
    %cst_164 = arith.constant 0.000000e+00 : f32
    %302 = vector.broadcast %cst_164 : f32 to vector<2x128xf32>
    %c0_165 = arith.constant 0 : index
    %c1152 = arith.constant 1152 : index
    %303 = vector.load %arg17[%c0_165, %c1152] : memref<18x3200xf32, #tpu.memory_space<vmem>>, vector<2x128xf32>
    %304 = arith.addf %302, %303 : vector<2x128xf32>
    %c2_166 = arith.constant 2 : index
    %c1024_167 = arith.constant 1024 : index
    %305 = vector.load %arg17[%c2_166, %c1024_167] : memref<18x3200xf32, #tpu.memory_space<vmem>>, vector<2x128xf32>
    %306 = arith.addf %304, %305 : vector<2x128xf32>
    %c4_168 = arith.constant 4 : index
    %c896_169 = arith.constant 896 : index
    %307 = vector.load %arg17[%c4_168, %c896_169] : memref<18x3200xf32, #tpu.memory_space<vmem>>, vector<2x128xf32>
    %308 = arith.addf %306, %307 : vector<2x128xf32>
    %c6_170 = arith.constant 6 : index
    %c512_171 = arith.constant 512 : index
    %309 = vector.load %arg17[%c6_170, %c512_171] : memref<18x3200xf32, #tpu.memory_space<vmem>>, vector<2x128xf32>
    %310 = arith.addf %308, %309 : vector<2x128xf32>
    %c8_172 = arith.constant 8 : index
    %c384_173 = arith.constant 384 : index
    %311 = vector.load %arg17[%c8_172, %c384_173] : memref<18x3200xf32, #tpu.memory_space<vmem>>, vector<2x128xf32>
    %312 = arith.addf %310, %311 : vector<2x128xf32>
    %c10_174 = arith.constant 10 : index
    %c256_175 = arith.constant 256 : index
    %313 = vector.load %arg17[%c10_174, %c256_175] : memref<18x3200xf32, #tpu.memory_space<vmem>>, vector<2x128xf32>
    %314 = arith.addf %312, %313 : vector<2x128xf32>
    %c22 = arith.constant 22 : index
    %c0_176 = arith.constant 0 : index
    %315 = vector.load %arg18[%c22, %c0_176] : memref<98x128xf32, #tpu.memory_space<vmem>>, vector<2x128xf32>
    tpu.vector_store %arg18[%c22, %c0_176], %314 {strides = array<i32>} : memref<98x128xf32, #tpu.memory_space<vmem>>, vector<2x128xf32>,
    %cst_177 = arith.constant 0.000000e+00 : f32
    %316 = vector.broadcast %cst_177 : f32 to vector<2x128xf32>
    %c2_178 = arith.constant 2 : index
    %c1152_179 = arith.constant 1152 : index
    %317 = vector.load %arg17[%c2_178, %c1152_179] : memref<18x3200xf32, #tpu.memory_space<vmem>>, vector<2x128xf32>
    %318 = arith.addf %316, %317 : vector<2x128xf32>
    %c4_180 = arith.constant 4 : index
    %c1024_181 = arith.constant 1024 : index
    %319 = vector.load %arg17[%c4_180, %c1024_181] : memref<18x3200xf32, #tpu.memory_space<vmem>>, vector<2x128xf32>
    %320 = arith.addf %318, %319 : vector<2x128xf32>
    %c8_182 = arith.constant 8 : index
    %c512_183 = arith.constant 512 : index
    %321 = vector.load %arg17[%c8_182, %c512_183] : memref<18x3200xf32, #tpu.memory_space<vmem>>, vector<2x128xf32>
    %322 = arith.addf %320, %321 : vector<2x128xf32>
    %c10_184 = arith.constant 10 : index
    %c384_185 = arith.constant 384 : index
    %323 = vector.load %arg17[%c10_184, %c384_185] : memref<18x3200xf32, #tpu.memory_space<vmem>>, vector<2x128xf32>
    %324 = arith.addf %322, %323 : vector<2x128xf32>
    %c24 = arith.constant 24 : index
    %c0_186 = arith.constant 0 : index
    %325 = vector.load %arg18[%c24, %c0_186] : memref<98x128xf32, #tpu.memory_space<vmem>>, vector<2x128xf32>
    tpu.vector_store %arg18[%c24, %c0_186], %324 {strides = array<i32>} : memref<98x128xf32, #tpu.memory_space<vmem>>, vector<2x128xf32>,
    %cst_187 = arith.constant 0.000000e+00 : f32
    %326 = vector.broadcast %cst_187 : f32 to vector<2x128xf32>
    %c4_188 = arith.constant 4 : index
    %c1152_189 = arith.constant 1152 : index
    %327 = vector.load %arg17[%c4_188, %c1152_189] : memref<18x3200xf32, #tpu.memory_space<vmem>>, vector<2x128xf32>
    %328 = arith.addf %326, %327 : vector<2x128xf32>
    %c10_190 = arith.constant 10 : index
    %c512_191 = arith.constant 512 : index
    %329 = vector.load %arg17[%c10_190, %c512_191] : memref<18x3200xf32, #tpu.memory_space<vmem>>, vector<2x128xf32>
    %330 = arith.addf %328, %329 : vector<2x128xf32>
    %c26 = arith.constant 26 : index
    %c0_192 = arith.constant 0 : index
    %331 = vector.load %arg18[%c26, %c0_192] : memref<98x128xf32, #tpu.memory_space<vmem>>, vector<2x128xf32>
    tpu.vector_store %arg18[%c26, %c0_192], %330 {strides = array<i32>} : memref<98x128xf32, #tpu.memory_space<vmem>>, vector<2x128xf32>,
    %cst_193 = arith.constant 0.000000e+00 : f32
    %332 = vector.broadcast %cst_193 : f32 to vector<2x128xf32>
    %c0_194 = arith.constant 0 : index
    %c1280 = arith.constant 1280 : index
    %333 = vector.load %arg17[%c0_194, %c1280] : memref<18x3200xf32, #tpu.memory_space<vmem>>, vector<2x128xf32>
    %334 = arith.addf %332, %333 : vector<2x128xf32>
    %c6_195 = arith.constant 6 : index
    %c640_196 = arith.constant 640 : index
    %335 = vector.load %arg17[%c6_195, %c640_196] : memref<18x3200xf32, #tpu.memory_space<vmem>>, vector<2x128xf32>
    %336 = arith.addf %334, %335 : vector<2x128xf32>
    %c12_197 = arith.constant 12 : index
    %c0_198 = arith.constant 0 : index
    %337 = vector.load %arg17[%c12_197, %c0_198] : memref<18x3200xf32, #tpu.memory_space<vmem>>, vector<2x128xf32>
    %338 = arith.addf %336, %337 : vector<2x128xf32>
    %c28 = arith.constant 28 : index
    %c0_199 = arith.constant 0 : index
    %339 = vector.load %arg18[%c28, %c0_199] : memref<98x128xf32, #tpu.memory_space<vmem>>, vector<2x128xf32>
    tpu.vector_store %arg18[%c28, %c0_199], %338 {strides = array<i32>} : memref<98x128xf32, #tpu.memory_space<vmem>>, vector<2x128xf32>,
    %cst_200 = arith.constant 0.000000e+00 : f32
    %340 = vector.broadcast %cst_200 : f32 to vector<2x128xf32>
    %c0_201 = arith.constant 0 : index
    %c1408 = arith.constant 1408 : index
    %341 = vector.load %arg17[%c0_201, %c1408] : memref<18x3200xf32, #tpu.memory_space<vmem>>, vector<2x128xf32>
    %342 = arith.addf %340, %341 : vector<2x128xf32>
    %c2_202 = arith.constant 2 : index
    %c1280_203 = arith.constant 1280 : index
    %343 = vector.load %arg17[%c2_202, %c1280_203] : memref<18x3200xf32, #tpu.memory_space<vmem>>, vector<2x128xf32>
    %344 = arith.addf %342, %343 : vector<2x128xf32>
    %c6_204 = arith.constant 6 : index
    %c768_205 = arith.constant 768 : index
    %345 = vector.load %arg17[%c6_204, %c768_205] : memref<18x3200xf32, #tpu.memory_space<vmem>>, vector<2x128xf32>
    %346 = arith.addf %344, %345 : vector<2x128xf32>
    %c8_206 = arith.constant 8 : index
    %c640_207 = arith.constant 640 : index
    %347 = vector.load %arg17[%c8_206, %c640_207] : memref<18x3200xf32, #tpu.memory_space<vmem>>, vector<2x128xf32>
    %348 = arith.addf %346, %347 : vector<2x128xf32>
    %c12_208 = arith.constant 12 : index
    %c128_209 = arith.constant 128 : index
    %349 = vector.load %arg17[%c12_208, %c128_209] : memref<18x3200xf32, #tpu.memory_space<vmem>>, vector<2x128xf32>
    %350 = arith.addf %348, %349 : vector<2x128xf32>
    %c14_210 = arith.constant 14 : index
    %c0_211 = arith.constant 0 : index
    %351 = vector.load %arg17[%c14_210, %c0_211] : memref<18x3200xf32, #tpu.memory_space<vmem>>, vector<2x128xf32>
    %352 = arith.addf %350, %351 : vector<2x128xf32>
    %c30 = arith.constant 30 : index
    %c0_212 = arith.constant 0 : index
    %353 = vector.load %arg18[%c30, %c0_212] : memref<98x128xf32, #tpu.memory_space<vmem>>, vector<2x128xf32>
    tpu.vector_store %arg18[%c30, %c0_212], %352 {strides = array<i32>} : memref<98x128xf32, #tpu.memory_space<vmem>>, vector<2x128xf32>,
    %cst_213 = arith.constant 0.000000e+00 : f32
    %354 = vector.broadcast %cst_213 : f32 to vector<2x128xf32>
    %c0_214 = arith.constant 0 : index
    %c1536 = arith.constant 1536 : index
    %355 = vector.load %arg17[%c0_214, %c1536] : memref<18x3200xf32, #tpu.memory_space<vmem>>, vector<2x128xf32>
    %356 = arith.addf %354, %355 : vector<2x128xf32>
    %c2_215 = arith.constant 2 : index
    %c1408_216 = arith.constant 1408 : index
    %357 = vector.load %arg17[%c2_215, %c1408_216] : memref<18x3200xf32, #tpu.memory_space<vmem>>, vector<2x128xf32>
    %358 = arith.addf %356, %357 : vector<2x128xf32>
    %c4_217 = arith.constant 4 : index
    %c1280_218 = arith.constant 1280 : index
    %359 = vector.load %arg17[%c4_217, %c1280_218] : memref<18x3200xf32, #tpu.memory_space<vmem>>, vector<2x128xf32>
    %360 = arith.addf %358, %359 : vector<2x128xf32>
    %c6_219 = arith.constant 6 : index
    %c896_220 = arith.constant 896 : index
    %361 = vector.load %arg17[%c6_219, %c896_220] : memref<18x3200xf32, #tpu.memory_space<vmem>>, vector<2x128xf32>
    %362 = arith.addf %360, %361 : vector<2x128xf32>
    %c8_221 = arith.constant 8 : index
    %c768_222 = arith.constant 768 : index
    %363 = vector.load %arg17[%c8_221, %c768_222] : memref<18x3200xf32, #tpu.memory_space<vmem>>, vector<2x128xf32>
    %364 = arith.addf %362, %363 : vector<2x128xf32>
    %c10_223 = arith.constant 10 : index
    %c640_224 = arith.constant 640 : index
    %365 = vector.load %arg17[%c10_223, %c640_224] : memref<18x3200xf32, #tpu.memory_space<vmem>>, vector<2x128xf32>
    %366 = arith.addf %364, %365 : vector<2x128xf32>
    %c12_225 = arith.constant 12 : index
    %c256_226 = arith.constant 256 : index
    %367 = vector.load %arg17[%c12_225, %c256_226] : memref<18x3200xf32, #tpu.memory_space<vmem>>, vector<2x128xf32>
    %368 = arith.addf %366, %367 : vector<2x128xf32>
    %c14_227 = arith.constant 14 : index
    %c128_228 = arith.constant 128 : index
    %369 = vector.load %arg17[%c14_227, %c128_228] : memref<18x3200xf32, #tpu.memory_space<vmem>>, vector<2x128xf32>
    %370 = arith.addf %368, %369 : vector<2x128xf32>
    %c16_229 = arith.constant 16 : index
    %c0_230 = arith.constant 0 : index
    %371 = vector.load %arg17[%c16_229, %c0_230] : memref<18x3200xf32, #tpu.memory_space<vmem>>, vector<2x128xf32>
    %372 = arith.addf %370, %371 : vector<2x128xf32>
    %c32 = arith.constant 32 : index
    %c0_231 = arith.constant 0 : index
    %373 = vector.load %arg18[%c32, %c0_231] : memref<98x128xf32, #tpu.memory_space<vmem>>, vector<2x128xf32>
    tpu.vector_store %arg18[%c32, %c0_231], %372 {strides = array<i32>} : memref<98x128xf32, #tpu.memory_space<vmem>>, vector<2x128xf32>,
    %cst_232 = arith.constant 0.000000e+00 : f32
    %374 = vector.broadcast %cst_232 : f32 to vector<2x128xf32>
    %c0_233 = arith.constant 0 : index
    %c1664 = arith.constant 1664 : index
    %375 = vector.load %arg17[%c0_233, %c1664] : memref<18x3200xf32, #tpu.memory_space<vmem>>, vector<2x128xf32>
    %376 = arith.addf %374, %375 : vector<2x128xf32>
    %c2_234 = arith.constant 2 : index
    %c1536_235 = arith.constant 1536 : index
    %377 = vector.load %arg17[%c2_234, %c1536_235] : memref<18x3200xf32, #tpu.memory_space<vmem>>, vector<2x128xf32>
    %378 = arith.addf %376, %377 : vector<2x128xf32>
    %c4_236 = arith.constant 4 : index
    %c1408_237 = arith.constant 1408 : index
    %379 = vector.load %arg17[%c4_236, %c1408_237] : memref<18x3200xf32, #tpu.memory_space<vmem>>, vector<2x128xf32>
    %380 = arith.addf %378, %379 : vector<2x128xf32>
    %c6_238 = arith.constant 6 : index
    %c1024_239 = arith.constant 1024 : index
    %381 = vector.load %arg17[%c6_238, %c1024_239] : memref<18x3200xf32, #tpu.memory_space<vmem>>, vector<2x128xf32>
    %382 = arith.addf %380, %381 : vector<2x128xf32>
    %c8_240 = arith.constant 8 : index
    %c896_241 = arith.constant 896 : index
    %383 = vector.load %arg17[%c8_240, %c896_241] : memref<18x3200xf32, #tpu.memory_space<vmem>>, vector<2x128xf32>
    %384 = arith.addf %382, %383 : vector<2x128xf32>
    %c10_242 = arith.constant 10 : index
    %c768_243 = arith.constant 768 : index
    %385 = vector.load %arg17[%c10_242, %c768_243] : memref<18x3200xf32, #tpu.memory_space<vmem>>, vector<2x128xf32>
    %386 = arith.addf %384, %385 : vector<2x128xf32>
    %c12_244 = arith.constant 12 : index
    %c384_245 = arith.constant 384 : index
    %387 = vector.load %arg17[%c12_244, %c384_245] : memref<18x3200xf32, #tpu.memory_space<vmem>>, vector<2x128xf32>
    %388 = arith.addf %386, %387 : vector<2x128xf32>
    %c14_246 = arith.constant 14 : index
    %c256_247 = arith.constant 256 : index
    %389 = vector.load %arg17[%c14_246, %c256_247] : memref<18x3200xf32, #tpu.memory_space<vmem>>, vector<2x128xf32>
    %390 = arith.addf %388, %389 : vector<2x128xf32>
    %c16_248 = arith.constant 16 : index
    %c128_249 = arith.constant 128 : index
    %391 = vector.load %arg17[%c16_248, %c128_249] : memref<18x3200xf32, #tpu.memory_space<vmem>>, vector<2x128xf32>
    %392 = arith.addf %390, %391 : vector<2x128xf32>
    %c34 = arith.constant 34 : index
    %c0_250 = arith.constant 0 : index
    %393 = vector.load %arg18[%c34, %c0_250] : memref<98x128xf32, #tpu.memory_space<vmem>>, vector<2x128xf32>
    tpu.vector_store %arg18[%c34, %c0_250], %392 {strides = array<i32>} : memref<98x128xf32, #tpu.memory_space<vmem>>, vector<2x128xf32>,
    %cst_251 = arith.constant 0.000000e+00 : f32
    %394 = vector.broadcast %cst_251 : f32 to vector<2x128xf32>
    %c0_252 = arith.constant 0 : index
    %c1792 = arith.constant 1792 : index
    %395 = vector.load %arg17[%c0_252, %c1792] : memref<18x3200xf32, #tpu.memory_space<vmem>>, vector<2x128xf32>
    %396 = arith.addf %394, %395 : vector<2x128xf32>
    %c2_253 = arith.constant 2 : index
    %c1664_254 = arith.constant 1664 : index
    %397 = vector.load %arg17[%c2_253, %c1664_254] : memref<18x3200xf32, #tpu.memory_space<vmem>>, vector<2x128xf32>
    %398 = arith.addf %396, %397 : vector<2x128xf32>
    %c4_255 = arith.constant 4 : index
    %c1536_256 = arith.constant 1536 : index
    %399 = vector.load %arg17[%c4_255, %c1536_256] : memref<18x3200xf32, #tpu.memory_space<vmem>>, vector<2x128xf32>
    %400 = arith.addf %398, %399 : vector<2x128xf32>
    %c6_257 = arith.constant 6 : index
    %c1152_258 = arith.constant 1152 : index
    %401 = vector.load %arg17[%c6_257, %c1152_258] : memref<18x3200xf32, #tpu.memory_space<vmem>>, vector<2x128xf32>
    %402 = arith.addf %400, %401 : vector<2x128xf32>
    %c8_259 = arith.constant 8 : index
    %c1024_260 = arith.constant 1024 : index
    %403 = vector.load %arg17[%c8_259, %c1024_260] : memref<18x3200xf32, #tpu.memory_space<vmem>>, vector<2x128xf32>
    %404 = arith.addf %402, %403 : vector<2x128xf32>
    %c10_261 = arith.constant 10 : index
    %c896_262 = arith.constant 896 : index
    %405 = vector.load %arg17[%c10_261, %c896_262] : memref<18x3200xf32, #tpu.memory_space<vmem>>, vector<2x128xf32>
    %406 = arith.addf %404, %405 : vector<2x128xf32>
    %c12_263 = arith.constant 12 : index
    %c512_264 = arith.constant 512 : index
    %407 = vector.load %arg17[%c12_263, %c512_264] : memref<18x3200xf32, #tpu.memory_space<vmem>>, vector<2x128xf32>
    %408 = arith.addf %406, %407 : vector<2x128xf32>
    %c14_265 = arith.constant 14 : index
    %c384_266 = arith.constant 384 : index
    %409 = vector.load %arg17[%c14_265, %c384_266] : memref<18x3200xf32, #tpu.memory_space<vmem>>, vector<2x128xf32>
    %410 = arith.addf %408, %409 : vector<2x128xf32>
    %c16_267 = arith.constant 16 : index
    %c256_268 = arith.constant 256 : index
    %411 = vector.load %arg17[%c16_267, %c256_268] : memref<18x3200xf32, #tpu.memory_space<vmem>>, vector<2x128xf32>
    %412 = arith.addf %410, %411 : vector<2x128xf32>
    %c36 = arith.constant 36 : index
    %c0_269 = arith.constant 0 : index
    %413 = vector.load %arg18[%c36, %c0_269] : memref<98x128xf32, #tpu.memory_space<vmem>>, vector<2x128xf32>
    tpu.vector_store %arg18[%c36, %c0_269], %412 {strides = array<i32>} : memref<98x128xf32, #tpu.memory_space<vmem>>, vector<2x128xf32>,
    %cst_270 = arith.constant 0.000000e+00 : f32
    %414 = vector.broadcast %cst_270 : f32 to vector<2x128xf32>
    %c2_271 = arith.constant 2 : index
    %c1792_272 = arith.constant 1792 : index
    %415 = vector.load %arg17[%c2_271, %c1792_272] : memref<18x3200xf32, #tpu.memory_space<vmem>>, vector<2x128xf32>
    %416 = arith.addf %414, %415 : vector<2x128xf32>
    %c4_273 = arith.constant 4 : index
    %c1664_274 = arith.constant 1664 : index
    %417 = vector.load %arg17[%c4_273, %c1664_274] : memref<18x3200xf32, #tpu.memory_space<vmem>>, vector<2x128xf32>
    %418 = arith.addf %416, %417 : vector<2x128xf32>
    %c8_275 = arith.constant 8 : index
    %c1152_276 = arith.constant 1152 : index
    %419 = vector.load %arg17[%c8_275, %c1152_276] : memref<18x3200xf32, #tpu.memory_space<vmem>>, vector<2x128xf32>
    %420 = arith.addf %418, %419 : vector<2x128xf32>
    %c10_277 = arith.constant 10 : index
    %c1024_278 = arith.constant 1024 : index
    %421 = vector.load %arg17[%c10_277, %c1024_278] : memref<18x3200xf32, #tpu.memory_space<vmem>>, vector<2x128xf32>
    %422 = arith.addf %420, %421 : vector<2x128xf32>
    %c14_279 = arith.constant 14 : index
    %c512_280 = arith.constant 512 : index
    %423 = vector.load %arg17[%c14_279, %c512_280] : memref<18x3200xf32, #tpu.memory_space<vmem>>, vector<2x128xf32>
    %424 = arith.addf %422, %423 : vector<2x128xf32>
    %c16_281 = arith.constant 16 : index
    %c384_282 = arith.constant 384 : index
    %425 = vector.load %arg17[%c16_281, %c384_282] : memref<18x3200xf32, #tpu.memory_space<vmem>>, vector<2x128xf32>
    %426 = arith.addf %424, %425 : vector<2x128xf32>
    %c38 = arith.constant 38 : index
    %c0_283 = arith.constant 0 : index
    %427 = vector.load %arg18[%c38, %c0_283] : memref<98x128xf32, #tpu.memory_space<vmem>>, vector<2x128xf32>
    tpu.vector_store %arg18[%c38, %c0_283], %426 {strides = array<i32>} : memref<98x128xf32, #tpu.memory_space<vmem>>, vector<2x128xf32>,
    %cst_284 = arith.constant 0.000000e+00 : f32
    %428 = vector.broadcast %cst_284 : f32 to vector<2x128xf32>
    %c4_285 = arith.constant 4 : index
    %c1792_286 = arith.constant 1792 : index
    %429 = vector.load %arg17[%c4_285, %c1792_286] : memref<18x3200xf32, #tpu.memory_space<vmem>>, vector<2x128xf32>
    %430 = arith.addf %428, %429 : vector<2x128xf32>
    %c10_287 = arith.constant 10 : index
    %c1152_288 = arith.constant 1152 : index
    %431 = vector.load %arg17[%c10_287, %c1152_288] : memref<18x3200xf32, #tpu.memory_space<vmem>>, vector<2x128xf32>
    %432 = arith.addf %430, %431 : vector<2x128xf32>
    %c16_289 = arith.constant 16 : index
    %c512_290 = arith.constant 512 : index
    %433 = vector.load %arg17[%c16_289, %c512_290] : memref<18x3200xf32, #tpu.memory_space<vmem>>, vector<2x128xf32>
    %434 = arith.addf %432, %433 : vector<2x128xf32>
    %c40 = arith.constant 40 : index
    %c0_291 = arith.constant 0 : index
    %435 = vector.load %arg18[%c40, %c0_291] : memref<98x128xf32, #tpu.memory_space<vmem>>, vector<2x128xf32>
    tpu.vector_store %arg18[%c40, %c0_291], %434 {strides = array<i32>} : memref<98x128xf32, #tpu.memory_space<vmem>>, vector<2x128xf32>,
    %cst_292 = arith.constant 0.000000e+00 : f32
    %436 = vector.broadcast %cst_292 : f32 to vector<2x128xf32>
    %c0_293 = arith.constant 0 : index
    %c1920 = arith.constant 1920 : index
    %437 = vector.load %arg17[%c0_293, %c1920] : memref<18x3200xf32, #tpu.memory_space<vmem>>, vector<2x128xf32>
    %438 = arith.addf %436, %437 : vector<2x128xf32>
    %c6_294 = arith.constant 6 : index
    %c1280_295 = arith.constant 1280 : index
    %439 = vector.load %arg17[%c6_294, %c1280_295] : memref<18x3200xf32, #tpu.memory_space<vmem>>, vector<2x128xf32>
    %440 = arith.addf %438, %439 : vector<2x128xf32>
    %c12_296 = arith.constant 12 : index
    %c640_297 = arith.constant 640 : index
    %441 = vector.load %arg17[%c12_296, %c640_297] : memref<18x3200xf32, #tpu.memory_space<vmem>>, vector<2x128xf32>
    %442 = arith.addf %440, %441 : vector<2x128xf32>
    %c42 = arith.constant 42 : index
    %c0_298 = arith.constant 0 : index
    %443 = vector.load %arg18[%c42, %c0_298] : memref<98x128xf32, #tpu.memory_space<vmem>>, vector<2x128xf32>
    tpu.vector_store %arg18[%c42, %c0_298], %442 {strides = array<i32>} : memref<98x128xf32, #tpu.memory_space<vmem>>, vector<2x128xf32>,
    %cst_299 = arith.constant 0.000000e+00 : f32
    %444 = vector.broadcast %cst_299 : f32 to vector<2x128xf32>
    %c0_300 = arith.constant 0 : index
    %c2048 = arith.constant 2048 : index
    %445 = vector.load %arg17[%c0_300, %c2048] : memref<18x3200xf32, #tpu.memory_space<vmem>>, vector<2x128xf32>
    %446 = arith.addf %444, %445 : vector<2x128xf32>
    %c2_301 = arith.constant 2 : index
    %c1920_302 = arith.constant 1920 : index
    %447 = vector.load %arg17[%c2_301, %c1920_302] : memref<18x3200xf32, #tpu.memory_space<vmem>>, vector<2x128xf32>
    %448 = arith.addf %446, %447 : vector<2x128xf32>
    %c6_303 = arith.constant 6 : index
    %c1408_304 = arith.constant 1408 : index
    %449 = vector.load %arg17[%c6_303, %c1408_304] : memref<18x3200xf32, #tpu.memory_space<vmem>>, vector<2x128xf32>
    %450 = arith.addf %448, %449 : vector<2x128xf32>
    %c8_305 = arith.constant 8 : index
    %c1280_306 = arith.constant 1280 : index
    %451 = vector.load %arg17[%c8_305, %c1280_306] : memref<18x3200xf32, #tpu.memory_space<vmem>>, vector<2x128xf32>
    %452 = arith.addf %450, %451 : vector<2x128xf32>
    %c12_307 = arith.constant 12 : index
    %c768_308 = arith.constant 768 : index
    %453 = vector.load %arg17[%c12_307, %c768_308] : memref<18x3200xf32, #tpu.memory_space<vmem>>, vector<2x128xf32>
    %454 = arith.addf %452, %453 : vector<2x128xf32>
    %c14_309 = arith.constant 14 : index
    %c640_310 = arith.constant 640 : index
    %455 = vector.load %arg17[%c14_309, %c640_310] : memref<18x3200xf32, #tpu.memory_space<vmem>>, vector<2x128xf32>
    %456 = arith.addf %454, %455 : vector<2x128xf32>
    %c44 = arith.constant 44 : index
    %c0_311 = arith.constant 0 : index
    %457 = vector.load %arg18[%c44, %c0_311] : memref<98x128xf32, #tpu.memory_space<vmem>>, vector<2x128xf32>
    tpu.vector_store %arg18[%c44, %c0_311], %456 {strides = array<i32>} : memref<98x128xf32, #tpu.memory_space<vmem>>, vector<2x128xf32>,
    %cst_312 = arith.constant 0.000000e+00 : f32
    %458 = vector.broadcast %cst_312 : f32 to vector<2x128xf32>
    %c0_313 = arith.constant 0 : index
    %c2176 = arith.constant 2176 : index
    %459 = vector.load %arg17[%c0_313, %c2176] : memref<18x3200xf32, #tpu.memory_space<vmem>>, vector<2x128xf32>
    %460 = arith.addf %458, %459 : vector<2x128xf32>
    %c2_314 = arith.constant 2 : index
    %c2048_315 = arith.constant 2048 : index
    %461 = vector.load %arg17[%c2_314, %c2048_315] : memref<18x3200xf32, #tpu.memory_space<vmem>>, vector<2x128xf32>
    %462 = arith.addf %460, %461 : vector<2x128xf32>
    %c4_316 = arith.constant 4 : index
    %c1920_317 = arith.constant 1920 : index
    %463 = vector.load %arg17[%c4_316, %c1920_317] : memref<18x3200xf32, #tpu.memory_space<vmem>>, vector<2x128xf32>
    %464 = arith.addf %462, %463 : vector<2x128xf32>
    %c6_318 = arith.constant 6 : index
    %c1536_319 = arith.constant 1536 : index
    %465 = vector.load %arg17[%c6_318, %c1536_319] : memref<18x3200xf32, #tpu.memory_space<vmem>>, vector<2x128xf32>
    %466 = arith.addf %464, %465 : vector<2x128xf32>
    %c8_320 = arith.constant 8 : index
    %c1408_321 = arith.constant 1408 : index
    %467 = vector.load %arg17[%c8_320, %c1408_321] : memref<18x3200xf32, #tpu.memory_space<vmem>>, vector<2x128xf32>
    %468 = arith.addf %466, %467 : vector<2x128xf32>
    %c10_322 = arith.constant 10 : index
    %c1280_323 = arith.constant 1280 : index
    %469 = vector.load %arg17[%c10_322, %c1280_323] : memref<18x3200xf32, #tpu.memory_space<vmem>>, vector<2x128xf32>
    %470 = arith.addf %468, %469 : vector<2x128xf32>
    %c12_324 = arith.constant 12 : index
    %c896_325 = arith.constant 896 : index
    %471 = vector.load %arg17[%c12_324, %c896_325] : memref<18x3200xf32, #tpu.memory_space<vmem>>, vector<2x128xf32>
    %472 = arith.addf %470, %471 : vector<2x128xf32>
    %c14_326 = arith.constant 14 : index
    %c768_327 = arith.constant 768 : index
    %473 = vector.load %arg17[%c14_326, %c768_327] : memref<18x3200xf32, #tpu.memory_space<vmem>>, vector<2x128xf32>
    %474 = arith.addf %472, %473 : vector<2x128xf32>
    %c16_328 = arith.constant 16 : index
    %c640_329 = arith.constant 640 : index
    %475 = vector.load %arg17[%c16_328, %c640_329] : memref<18x3200xf32, #tpu.memory_space<vmem>>, vector<2x128xf32>
    %476 = arith.addf %474, %475 : vector<2x128xf32>
    %c46 = arith.constant 46 : index
    %c0_330 = arith.constant 0 : index
    %477 = vector.load %arg18[%c46, %c0_330] : memref<98x128xf32, #tpu.memory_space<vmem>>, vector<2x128xf32>
    tpu.vector_store %arg18[%c46, %c0_330], %476 {strides = array<i32>} : memref<98x128xf32, #tpu.memory_space<vmem>>, vector<2x128xf32>,
    %cst_331 = arith.constant 0.000000e+00 : f32
    %478 = vector.broadcast %cst_331 : f32 to vector<2x128xf32>
    %c0_332 = arith.constant 0 : index
    %c2304 = arith.constant 2304 : index
    %479 = vector.load %arg17[%c0_332, %c2304] : memref<18x3200xf32, #tpu.memory_space<vmem>>, vector<2x128xf32>
    %480 = arith.addf %478, %479 : vector<2x128xf32>
    %c2_333 = arith.constant 2 : index
    %c2176_334 = arith.constant 2176 : index
    %481 = vector.load %arg17[%c2_333, %c2176_334] : memref<18x3200xf32, #tpu.memory_space<vmem>>, vector<2x128xf32>
    %482 = arith.addf %480, %481 : vector<2x128xf32>
    %c4_335 = arith.constant 4 : index
    %c2048_336 = arith.constant 2048 : index
    %483 = vector.load %arg17[%c4_335, %c2048_336] : memref<18x3200xf32, #tpu.memory_space<vmem>>, vector<2x128xf32>
    %484 = arith.addf %482, %483 : vector<2x128xf32>
    %c6_337 = arith.constant 6 : index
    %c1664_338 = arith.constant 1664 : index
    %485 = vector.load %arg17[%c6_337, %c1664_338] : memref<18x3200xf32, #tpu.memory_space<vmem>>, vector<2x128xf32>
    %486 = arith.addf %484, %485 : vector<2x128xf32>
    %c8_339 = arith.constant 8 : index
    %c1536_340 = arith.constant 1536 : index
    %487 = vector.load %arg17[%c8_339, %c1536_340] : memref<18x3200xf32, #tpu.memory_space<vmem>>, vector<2x128xf32>
    %488 = arith.addf %486, %487 : vector<2x128xf32>
    %c10_341 = arith.constant 10 : index
    %c1408_342 = arith.constant 1408 : index
    %489 = vector.load %arg17[%c10_341, %c1408_342] : memref<18x3200xf32, #tpu.memory_space<vmem>>, vector<2x128xf32>
    %490 = arith.addf %488, %489 : vector<2x128xf32>
    %c12_343 = arith.constant 12 : index
    %c1024_344 = arith.constant 1024 : index
    %491 = vector.load %arg17[%c12_343, %c1024_344] : memref<18x3200xf32, #tpu.memory_space<vmem>>, vector<2x128xf32>
    %492 = arith.addf %490, %491 : vector<2x128xf32>
    %c14_345 = arith.constant 14 : index
    %c896_346 = arith.constant 896 : index
    %493 = vector.load %arg17[%c14_345, %c896_346] : memref<18x3200xf32, #tpu.memory_space<vmem>>, vector<2x128xf32>
    %494 = arith.addf %492, %493 : vector<2x128xf32>
    %c16_347 = arith.constant 16 : index
    %c768_348 = arith.constant 768 : index
    %495 = vector.load %arg17[%c16_347, %c768_348] : memref<18x3200xf32, #tpu.memory_space<vmem>>, vector<2x128xf32>
    %496 = arith.addf %494, %495 : vector<2x128xf32>
    %c48 = arith.constant 48 : index
    %c0_349 = arith.constant 0 : index
    %497 = vector.load %arg18[%c48, %c0_349] : memref<98x128xf32, #tpu.memory_space<vmem>>, vector<2x128xf32>
    tpu.vector_store %arg18[%c48, %c0_349], %496 {strides = array<i32>} : memref<98x128xf32, #tpu.memory_space<vmem>>, vector<2x128xf32>,
    %cst_350 = arith.constant 0.000000e+00 : f32
    %498 = vector.broadcast %cst_350 : f32 to vector<2x128xf32>
    %c0_351 = arith.constant 0 : index
    %c2432 = arith.constant 2432 : index
    %499 = vector.load %arg17[%c0_351, %c2432] : memref<18x3200xf32, #tpu.memory_space<vmem>>, vector<2x128xf32>
    %500 = arith.addf %498, %499 : vector<2x128xf32>
    %c2_352 = arith.constant 2 : index
    %c2304_353 = arith.constant 2304 : index
    %501 = vector.load %arg17[%c2_352, %c2304_353] : memref<18x3200xf32, #tpu.memory_space<vmem>>, vector<2x128xf32>
    %502 = arith.addf %500, %501 : vector<2x128xf32>
    %c4_354 = arith.constant 4 : index
    %c2176_355 = arith.constant 2176 : index
    %503 = vector.load %arg17[%c4_354, %c2176_355] : memref<18x3200xf32, #tpu.memory_space<vmem>>, vector<2x128xf32>
    %504 = arith.addf %502, %503 : vector<2x128xf32>
    %c6_356 = arith.constant 6 : index
    %c1792_357 = arith.constant 1792 : index
    %505 = vector.load %arg17[%c6_356, %c1792_357] : memref<18x3200xf32, #tpu.memory_space<vmem>>, vector<2x128xf32>
    %506 = arith.addf %504, %505 : vector<2x128xf32>
    %c8_358 = arith.constant 8 : index
    %c1664_359 = arith.constant 1664 : index
    %507 = vector.load %arg17[%c8_358, %c1664_359] : memref<18x3200xf32, #tpu.memory_space<vmem>>, vector<2x128xf32>
    %508 = arith.addf %506, %507 : vector<2x128xf32>
    %c10_360 = arith.constant 10 : index
    %c1536_361 = arith.constant 1536 : index
    %509 = vector.load %arg17[%c10_360, %c1536_361] : memref<18x3200xf32, #tpu.memory_space<vmem>>, vector<2x128xf32>
    %510 = arith.addf %508, %509 : vector<2x128xf32>
    %c12_362 = arith.constant 12 : index
    %c1152_363 = arith.constant 1152 : index
    %511 = vector.load %arg17[%c12_362, %c1152_363] : memref<18x3200xf32, #tpu.memory_space<vmem>>, vector<2x128xf32>
    %512 = arith.addf %510, %511 : vector<2x128xf32>
    %c14_364 = arith.constant 14 : index
    %c1024_365 = arith.constant 1024 : index
    %513 = vector.load %arg17[%c14_364, %c1024_365] : memref<18x3200xf32, #tpu.memory_space<vmem>>, vector<2x128xf32>
    %514 = arith.addf %512, %513 : vector<2x128xf32>
    %c16_366 = arith.constant 16 : index
    %c896_367 = arith.constant 896 : index
    %515 = vector.load %arg17[%c16_366, %c896_367] : memref<18x3200xf32, #tpu.memory_space<vmem>>, vector<2x128xf32>
    %516 = arith.addf %514, %515 : vector<2x128xf32>
    %c50 = arith.constant 50 : index
    %c0_368 = arith.constant 0 : index
    %517 = vector.load %arg18[%c50, %c0_368] : memref<98x128xf32, #tpu.memory_space<vmem>>, vector<2x128xf32>
    tpu.vector_store %arg18[%c50, %c0_368], %516 {strides = array<i32>} : memref<98x128xf32, #tpu.memory_space<vmem>>, vector<2x128xf32>,
    %cst_369 = arith.constant 0.000000e+00 : f32
    %518 = vector.broadcast %cst_369 : f32 to vector<2x128xf32>
    %c2_370 = arith.constant 2 : index
    %c2432_371 = arith.constant 2432 : index
    %519 = vector.load %arg17[%c2_370, %c2432_371] : memref<18x3200xf32, #tpu.memory_space<vmem>>, vector<2x128xf32>
    %520 = arith.addf %518, %519 : vector<2x128xf32>
    %c4_372 = arith.constant 4 : index
    %c2304_373 = arith.constant 2304 : index
    %521 = vector.load %arg17[%c4_372, %c2304_373] : memref<18x3200xf32, #tpu.memory_space<vmem>>, vector<2x128xf32>
    %522 = arith.addf %520, %521 : vector<2x128xf32>
    %c8_374 = arith.constant 8 : index
    %c1792_375 = arith.constant 1792 : index
    %523 = vector.load %arg17[%c8_374, %c1792_375] : memref<18x3200xf32, #tpu.memory_space<vmem>>, vector<2x128xf32>
    %524 = arith.addf %522, %523 : vector<2x128xf32>
    %c10_376 = arith.constant 10 : index
    %c1664_377 = arith.constant 1664 : index
    %525 = vector.load %arg17[%c10_376, %c1664_377] : memref<18x3200xf32, #tpu.memory_space<vmem>>, vector<2x128xf32>
    %526 = arith.addf %524, %525 : vector<2x128xf32>
    %c14_378 = arith.constant 14 : index
    %c1152_379 = arith.constant 1152 : index
    %527 = vector.load %arg17[%c14_378, %c1152_379] : memref<18x3200xf32, #tpu.memory_space<vmem>>, vector<2x128xf32>
    %528 = arith.addf %526, %527 : vector<2x128xf32>
    %c16_380 = arith.constant 16 : index
    %c1024_381 = arith.constant 1024 : index
    %529 = vector.load %arg17[%c16_380, %c1024_381] : memref<18x3200xf32, #tpu.memory_space<vmem>>, vector<2x128xf32>
    %530 = arith.addf %528, %529 : vector<2x128xf32>
    %c52 = arith.constant 52 : index
    %c0_382 = arith.constant 0 : index
    %531 = vector.load %arg18[%c52, %c0_382] : memref<98x128xf32, #tpu.memory_space<vmem>>, vector<2x128xf32>
    tpu.vector_store %arg18[%c52, %c0_382], %530 {strides = array<i32>} : memref<98x128xf32, #tpu.memory_space<vmem>>, vector<2x128xf32>,
    %cst_383 = arith.constant 0.000000e+00 : f32
    %532 = vector.broadcast %cst_383 : f32 to vector<2x128xf32>
    %c4_384 = arith.constant 4 : index
    %c2432_385 = arith.constant 2432 : index
    %533 = vector.load %arg17[%c4_384, %c2432_385] : memref<18x3200xf32, #tpu.memory_space<vmem>>, vector<2x128xf32>
    %534 = arith.addf %532, %533 : vector<2x128xf32>
    %c10_386 = arith.constant 10 : index
    %c1792_387 = arith.constant 1792 : index
    %535 = vector.load %arg17[%c10_386, %c1792_387] : memref<18x3200xf32, #tpu.memory_space<vmem>>, vector<2x128xf32>
    %536 = arith.addf %534, %535 : vector<2x128xf32>
    %c16_388 = arith.constant 16 : index
    %c1152_389 = arith.constant 1152 : index
    %537 = vector.load %arg17[%c16_388, %c1152_389] : memref<18x3200xf32, #tpu.memory_space<vmem>>, vector<2x128xf32>
    %538 = arith.addf %536, %537 : vector<2x128xf32>
    %c54 = arith.constant 54 : index
    %c0_390 = arith.constant 0 : index
    %539 = vector.load %arg18[%c54, %c0_390] : memref<98x128xf32, #tpu.memory_space<vmem>>, vector<2x128xf32>
    tpu.vector_store %arg18[%c54, %c0_390], %538 {strides = array<i32>} : memref<98x128xf32, #tpu.memory_space<vmem>>, vector<2x128xf32>,
    %cst_391 = arith.constant 0.000000e+00 : f32
    %540 = vector.broadcast %cst_391 : f32 to vector<2x128xf32>
    %c0_392 = arith.constant 0 : index
    %c2560 = arith.constant 2560 : index
    %541 = vector.load %arg17[%c0_392, %c2560] : memref<18x3200xf32, #tpu.memory_space<vmem>>, vector<2x128xf32>
    %542 = arith.addf %540, %541 : vector<2x128xf32>
    %c6_393 = arith.constant 6 : index
    %c1920_394 = arith.constant 1920 : index
    %543 = vector.load %arg17[%c6_393, %c1920_394] : memref<18x3200xf32, #tpu.memory_space<vmem>>, vector<2x128xf32>
    %544 = arith.addf %542, %543 : vector<2x128xf32>
    %c12_395 = arith.constant 12 : index
    %c1280_396 = arith.constant 1280 : index
    %545 = vector.load %arg17[%c12_395, %c1280_396] : memref<18x3200xf32, #tpu.memory_space<vmem>>, vector<2x128xf32>
    %546 = arith.addf %544, %545 : vector<2x128xf32>
    %c56 = arith.constant 56 : index
    %c0_397 = arith.constant 0 : index
    %547 = vector.load %arg18[%c56, %c0_397] : memref<98x128xf32, #tpu.memory_space<vmem>>, vector<2x128xf32>
    tpu.vector_store %arg18[%c56, %c0_397], %546 {strides = array<i32>} : memref<98x128xf32, #tpu.memory_space<vmem>>, vector<2x128xf32>,
    %cst_398 = arith.constant 0.000000e+00 : f32
    %548 = vector.broadcast %cst_398 : f32 to vector<2x128xf32>
    %c0_399 = arith.constant 0 : index
    %c2688 = arith.constant 2688 : index
    %549 = vector.load %arg17[%c0_399, %c2688] : memref<18x3200xf32, #tpu.memory_space<vmem>>, vector<2x128xf32>
    %550 = arith.addf %548, %549 : vector<2x128xf32>
    %c2_400 = arith.constant 2 : index
    %c2560_401 = arith.constant 2560 : index
    %551 = vector.load %arg17[%c2_400, %c2560_401] : memref<18x3200xf32, #tpu.memory_space<vmem>>, vector<2x128xf32>
    %552 = arith.addf %550, %551 : vector<2x128xf32>
    %c6_402 = arith.constant 6 : index
    %c2048_403 = arith.constant 2048 : index
    %553 = vector.load %arg17[%c6_402, %c2048_403] : memref<18x3200xf32, #tpu.memory_space<vmem>>, vector<2x128xf32>
    %554 = arith.addf %552, %553 : vector<2x128xf32>
    %c8_404 = arith.constant 8 : index
    %c1920_405 = arith.constant 1920 : index
    %555 = vector.load %arg17[%c8_404, %c1920_405] : memref<18x3200xf32, #tpu.memory_space<vmem>>, vector<2x128xf32>
    %556 = arith.addf %554, %555 : vector<2x128xf32>
    %c12_406 = arith.constant 12 : index
    %c1408_407 = arith.constant 1408 : index
    %557 = vector.load %arg17[%c12_406, %c1408_407] : memref<18x3200xf32, #tpu.memory_space<vmem>>, vector<2x128xf32>
    %558 = arith.addf %556, %557 : vector<2x128xf32>
    %c14_408 = arith.constant 14 : index
    %c1280_409 = arith.constant 1280 : index
    %559 = vector.load %arg17[%c14_408, %c1280_409] : memref<18x3200xf32, #tpu.memory_space<vmem>>, vector<2x128xf32>
    %560 = arith.addf %558, %559 : vector<2x128xf32>
    %c58 = arith.constant 58 : index
    %c0_410 = arith.constant 0 : index
    %561 = vector.load %arg18[%c58, %c0_410] : memref<98x128xf32, #tpu.memory_space<vmem>>, vector<2x128xf32>
    tpu.vector_store %arg18[%c58, %c0_410], %560 {strides = array<i32>} : memref<98x128xf32, #tpu.memory_space<vmem>>, vector<2x128xf32>,
    %cst_411 = arith.constant 0.000000e+00 : f32
    %562 = vector.broadcast %cst_411 : f32 to vector<2x128xf32>
    %c0_412 = arith.constant 0 : index
    %c2816 = arith.constant 2816 : index
    %563 = vector.load %arg17[%c0_412, %c2816] : memref<18x3200xf32, #tpu.memory_space<vmem>>, vector<2x128xf32>
    %564 = arith.addf %562, %563 : vector<2x128xf32>
    %c2_413 = arith.constant 2 : index
    %c2688_414 = arith.constant 2688 : index
    %565 = vector.load %arg17[%c2_413, %c2688_414] : memref<18x3200xf32, #tpu.memory_space<vmem>>, vector<2x128xf32>
    %566 = arith.addf %564, %565 : vector<2x128xf32>
    %c4_415 = arith.constant 4 : index
    %c2560_416 = arith.constant 2560 : index
    %567 = vector.load %arg17[%c4_415, %c2560_416] : memref<18x3200xf32, #tpu.memory_space<vmem>>, vector<2x128xf32>
    %568 = arith.addf %566, %567 : vector<2x128xf32>
    %c6_417 = arith.constant 6 : index
    %c2176_418 = arith.constant 2176 : index
    %569 = vector.load %arg17[%c6_417, %c2176_418] : memref<18x3200xf32, #tpu.memory_space<vmem>>, vector<2x128xf32>
    %570 = arith.addf %568, %569 : vector<2x128xf32>
    %c8_419 = arith.constant 8 : index
    %c2048_420 = arith.constant 2048 : index
    %571 = vector.load %arg17[%c8_419, %c2048_420] : memref<18x3200xf32, #tpu.memory_space<vmem>>, vector<2x128xf32>
    %572 = arith.addf %570, %571 : vector<2x128xf32>
    %c10_421 = arith.constant 10 : index
    %c1920_422 = arith.constant 1920 : index
    %573 = vector.load %arg17[%c10_421, %c1920_422] : memref<18x3200xf32, #tpu.memory_space<vmem>>, vector<2x128xf32>
    %574 = arith.addf %572, %573 : vector<2x128xf32>
    %c12_423 = arith.constant 12 : index
    %c1536_424 = arith.constant 1536 : index
    %575 = vector.load %arg17[%c12_423, %c1536_424] : memref<18x3200xf32, #tpu.memory_space<vmem>>, vector<2x128xf32>
    %576 = arith.addf %574, %575 : vector<2x128xf32>
    %c14_425 = arith.constant 14 : index
    %c1408_426 = arith.constant 1408 : index
    %577 = vector.load %arg17[%c14_425, %c1408_426] : memref<18x3200xf32, #tpu.memory_space<vmem>>, vector<2x128xf32>
    %578 = arith.addf %576, %577 : vector<2x128xf32>
    %c16_427 = arith.constant 16 : index
    %c1280_428 = arith.constant 1280 : index
    %579 = vector.load %arg17[%c16_427, %c1280_428] : memref<18x3200xf32, #tpu.memory_space<vmem>>, vector<2x128xf32>
    %580 = arith.addf %578, %579 : vector<2x128xf32>
    %c60 = arith.constant 60 : index
    %c0_429 = arith.constant 0 : index
    %581 = vector.load %arg18[%c60, %c0_429] : memref<98x128xf32, #tpu.memory_space<vmem>>, vector<2x128xf32>
    tpu.vector_store %arg18[%c60, %c0_429], %580 {strides = array<i32>} : memref<98x128xf32, #tpu.memory_space<vmem>>, vector<2x128xf32>,
    %cst_430 = arith.constant 0.000000e+00 : f32
    %582 = vector.broadcast %cst_430 : f32 to vector<2x128xf32>
    %c0_431 = arith.constant 0 : index
    %c2944 = arith.constant 2944 : index
    %583 = vector.load %arg17[%c0_431, %c2944] : memref<18x3200xf32, #tpu.memory_space<vmem>>, vector<2x128xf32>
    %584 = arith.addf %582, %583 : vector<2x128xf32>
    %c2_432 = arith.constant 2 : index
    %c2816_433 = arith.constant 2816 : index
    %585 = vector.load %arg17[%c2_432, %c2816_433] : memref<18x3200xf32, #tpu.memory_space<vmem>>, vector<2x128xf32>
    %586 = arith.addf %584, %585 : vector<2x128xf32>
    %c4_434 = arith.constant 4 : index
    %c2688_435 = arith.constant 2688 : index
    %587 = vector.load %arg17[%c4_434, %c2688_435] : memref<18x3200xf32, #tpu.memory_space<vmem>>, vector<2x128xf32>
    %588 = arith.addf %586, %587 : vector<2x128xf32>
    %c6_436 = arith.constant 6 : index
    %c2304_437 = arith.constant 2304 : index
    %589 = vector.load %arg17[%c6_436, %c2304_437] : memref<18x3200xf32, #tpu.memory_space<vmem>>, vector<2x128xf32>
    %590 = arith.addf %588, %589 : vector<2x128xf32>
    %c8_438 = arith.constant 8 : index
    %c2176_439 = arith.constant 2176 : index
    %591 = vector.load %arg17[%c8_438, %c2176_439] : memref<18x3200xf32, #tpu.memory_space<vmem>>, vector<2x128xf32>
    %592 = arith.addf %590, %591 : vector<2x128xf32>
    %c10_440 = arith.constant 10 : index
    %c2048_441 = arith.constant 2048 : index
    %593 = vector.load %arg17[%c10_440, %c2048_441] : memref<18x3200xf32, #tpu.memory_space<vmem>>, vector<2x128xf32>
    %594 = arith.addf %592, %593 : vector<2x128xf32>
    %c12_442 = arith.constant 12 : index
    %c1664_443 = arith.constant 1664 : index
    %595 = vector.load %arg17[%c12_442, %c1664_443] : memref<18x3200xf32, #tpu.memory_space<vmem>>, vector<2x128xf32>
    %596 = arith.addf %594, %595 : vector<2x128xf32>
    %c14_444 = arith.constant 14 : index
    %c1536_445 = arith.constant 1536 : index
    %597 = vector.load %arg17[%c14_444, %c1536_445] : memref<18x3200xf32, #tpu.memory_space<vmem>>, vector<2x128xf32>
    %598 = arith.addf %596, %597 : vector<2x128xf32>
    %c16_446 = arith.constant 16 : index
    %c1408_447 = arith.constant 1408 : index
    %599 = vector.load %arg17[%c16_446, %c1408_447] : memref<18x3200xf32, #tpu.memory_space<vmem>>, vector<2x128xf32>
    %600 = arith.addf %598, %599 : vector<2x128xf32>
    %c62 = arith.constant 62 : index
    %c0_448 = arith.constant 0 : index
    %601 = vector.load %arg18[%c62, %c0_448] : memref<98x128xf32, #tpu.memory_space<vmem>>, vector<2x128xf32>
    tpu.vector_store %arg18[%c62, %c0_448], %600 {strides = array<i32>} : memref<98x128xf32, #tpu.memory_space<vmem>>, vector<2x128xf32>,
    %cst_449 = arith.constant 0.000000e+00 : f32
    %602 = vector.broadcast %cst_449 : f32 to vector<2x128xf32>
    %c0_450 = arith.constant 0 : index
    %c3072 = arith.constant 3072 : index
    %603 = vector.load %arg17[%c0_450, %c3072] : memref<18x3200xf32, #tpu.memory_space<vmem>>, vector<2x128xf32>
    %604 = arith.addf %602, %603 : vector<2x128xf32>
    %c2_451 = arith.constant 2 : index
    %c2944_452 = arith.constant 2944 : index
    %605 = vector.load %arg17[%c2_451, %c2944_452] : memref<18x3200xf32, #tpu.memory_space<vmem>>, vector<2x128xf32>
    %606 = arith.addf %604, %605 : vector<2x128xf32>
    %c4_453 = arith.constant 4 : index
    %c2816_454 = arith.constant 2816 : index
    %607 = vector.load %arg17[%c4_453, %c2816_454] : memref<18x3200xf32, #tpu.memory_space<vmem>>, vector<2x128xf32>
    %608 = arith.addf %606, %607 : vector<2x128xf32>
    %c6_455 = arith.constant 6 : index
    %c2432_456 = arith.constant 2432 : index
    %609 = vector.load %arg17[%c6_455, %c2432_456] : memref<18x3200xf32, #tpu.memory_space<vmem>>, vector<2x128xf32>
    %610 = arith.addf %608, %609 : vector<2x128xf32>
    %c8_457 = arith.constant 8 : index
    %c2304_458 = arith.constant 2304 : index
    %611 = vector.load %arg17[%c8_457, %c2304_458] : memref<18x3200xf32, #tpu.memory_space<vmem>>, vector<2x128xf32>
    %612 = arith.addf %610, %611 : vector<2x128xf32>
    %c10_459 = arith.constant 10 : index
    %c2176_460 = arith.constant 2176 : index
    %613 = vector.load %arg17[%c10_459, %c2176_460] : memref<18x3200xf32, #tpu.memory_space<vmem>>, vector<2x128xf32>
    %614 = arith.addf %612, %613 : vector<2x128xf32>
    %c12_461 = arith.constant 12 : index
    %c1792_462 = arith.constant 1792 : index
    %615 = vector.load %arg17[%c12_461, %c1792_462] : memref<18x3200xf32, #tpu.memory_space<vmem>>, vector<2x128xf32>
    %616 = arith.addf %614, %615 : vector<2x128xf32>
    %c14_463 = arith.constant 14 : index
    %c1664_464 = arith.constant 1664 : index
    %617 = vector.load %arg17[%c14_463, %c1664_464] : memref<18x3200xf32, #tpu.memory_space<vmem>>, vector<2x128xf32>
    %618 = arith.addf %616, %617 : vector<2x128xf32>
    %c16_465 = arith.constant 16 : index
    %c1536_466 = arith.constant 1536 : index
    %619 = vector.load %arg17[%c16_465, %c1536_466] : memref<18x3200xf32, #tpu.memory_space<vmem>>, vector<2x128xf32>
    %620 = arith.addf %618, %619 : vector<2x128xf32>
    %c64 = arith.constant 64 : index
    %c0_467 = arith.constant 0 : index
    %621 = vector.load %arg18[%c64, %c0_467] : memref<98x128xf32, #tpu.memory_space<vmem>>, vector<2x128xf32>
    tpu.vector_store %arg18[%c64, %c0_467], %620 {strides = array<i32>} : memref<98x128xf32, #tpu.memory_space<vmem>>, vector<2x128xf32>,
    %cst_468 = arith.constant 0.000000e+00 : f32
    %622 = vector.broadcast %cst_468 : f32 to vector<2x128xf32>
    %c2_469 = arith.constant 2 : index
    %c3072_470 = arith.constant 3072 : index
    %623 = vector.load %arg17[%c2_469, %c3072_470] : memref<18x3200xf32, #tpu.memory_space<vmem>>, vector<2x128xf32>
    %624 = arith.addf %622, %623 : vector<2x128xf32>
    %c4_471 = arith.constant 4 : index
    %c2944_472 = arith.constant 2944 : index
    %625 = vector.load %arg17[%c4_471, %c2944_472] : memref<18x3200xf32, #tpu.memory_space<vmem>>, vector<2x128xf32>
    %626 = arith.addf %624, %625 : vector<2x128xf32>
    %c8_473 = arith.constant 8 : index
    %c2432_474 = arith.constant 2432 : index
    %627 = vector.load %arg17[%c8_473, %c2432_474] : memref<18x3200xf32, #tpu.memory_space<vmem>>, vector<2x128xf32>
    %628 = arith.addf %626, %627 : vector<2x128xf32>
    %c10_475 = arith.constant 10 : index
    %c2304_476 = arith.constant 2304 : index
    %629 = vector.load %arg17[%c10_475, %c2304_476] : memref<18x3200xf32, #tpu.memory_space<vmem>>, vector<2x128xf32>
    %630 = arith.addf %628, %629 : vector<2x128xf32>
    %c14_477 = arith.constant 14 : index
    %c1792_478 = arith.constant 1792 : index
    %631 = vector.load %arg17[%c14_477, %c1792_478] : memref<18x3200xf32, #tpu.memory_space<vmem>>, vector<2x128xf32>
    %632 = arith.addf %630, %631 : vector<2x128xf32>
    %c16_479 = arith.constant 16 : index
    %c1664_480 = arith.constant 1664 : index
    %633 = vector.load %arg17[%c16_479, %c1664_480] : memref<18x3200xf32, #tpu.memory_space<vmem>>, vector<2x128xf32>
    %634 = arith.addf %632, %633 : vector<2x128xf32>
    %c66 = arith.constant 66 : index
    %c0_481 = arith.constant 0 : index
    %635 = vector.load %arg18[%c66, %c0_481] : memref<98x128xf32, #tpu.memory_space<vmem>>, vector<2x128xf32>
    tpu.vector_store %arg18[%c66, %c0_481], %634 {strides = array<i32>} : memref<98x128xf32, #tpu.memory_space<vmem>>, vector<2x128xf32>,
    %cst_482 = arith.constant 0.000000e+00 : f32
    %636 = vector.broadcast %cst_482 : f32 to vector<2x128xf32>
    %c4_483 = arith.constant 4 : index
    %c3072_484 = arith.constant 3072 : index
    %637 = vector.load %arg17[%c4_483, %c3072_484] : memref<18x3200xf32, #tpu.memory_space<vmem>>, vector<2x128xf32>
    %638 = arith.addf %636, %637 : vector<2x128xf32>
    %c10_485 = arith.constant 10 : index
    %c2432_486 = arith.constant 2432 : index
    %639 = vector.load %arg17[%c10_485, %c2432_486] : memref<18x3200xf32, #tpu.memory_space<vmem>>, vector<2x128xf32>
    %640 = arith.addf %638, %639 : vector<2x128xf32>
    %c16_487 = arith.constant 16 : index
    %c1792_488 = arith.constant 1792 : index
    %641 = vector.load %arg17[%c16_487, %c1792_488] : memref<18x3200xf32, #tpu.memory_space<vmem>>, vector<2x128xf32>
    %642 = arith.addf %640, %641 : vector<2x128xf32>
    %c68 = arith.constant 68 : index
    %c0_489 = arith.constant 0 : index
    %643 = vector.load %arg18[%c68, %c0_489] : memref<98x128xf32, #tpu.memory_space<vmem>>, vector<2x128xf32>
    tpu.vector_store %arg18[%c68, %c0_489], %642 {strides = array<i32>} : memref<98x128xf32, #tpu.memory_space<vmem>>, vector<2x128xf32>,
    %cst_490 = arith.constant 0.000000e+00 : f32
    %644 = vector.broadcast %cst_490 : f32 to vector<2x128xf32>
    %c6_491 = arith.constant 6 : index
    %c2560_492 = arith.constant 2560 : index
    %645 = vector.load %arg17[%c6_491, %c2560_492] : memref<18x3200xf32, #tpu.memory_space<vmem>>, vector<2x128xf32>
    %646 = arith.addf %644, %645 : vector<2x128xf32>
    %c12_493 = arith.constant 12 : index
    %c1920_494 = arith.constant 1920 : index
    %647 = vector.load %arg17[%c12_493, %c1920_494] : memref<18x3200xf32, #tpu.memory_space<vmem>>, vector<2x128xf32>
    %648 = arith.addf %646, %647 : vector<2x128xf32>
    %c70 = arith.constant 70 : index
    %c0_495 = arith.constant 0 : index
    %649 = vector.load %arg18[%c70, %c0_495] : memref<98x128xf32, #tpu.memory_space<vmem>>, vector<2x128xf32>
    tpu.vector_store %arg18[%c70, %c0_495], %648 {strides = array<i32>} : memref<98x128xf32, #tpu.memory_space<vmem>>, vector<2x128xf32>,
    %cst_496 = arith.constant 0.000000e+00 : f32
    %650 = vector.broadcast %cst_496 : f32 to vector<2x128xf32>
    %c6_497 = arith.constant 6 : index
    %c2688_498 = arith.constant 2688 : index
    %651 = vector.load %arg17[%c6_497, %c2688_498] : memref<18x3200xf32, #tpu.memory_space<vmem>>, vector<2x128xf32>
    %652 = arith.addf %650, %651 : vector<2x128xf32>
    %c8_499 = arith.constant 8 : index
    %c2560_500 = arith.constant 2560 : index
    %653 = vector.load %arg17[%c8_499, %c2560_500] : memref<18x3200xf32, #tpu.memory_space<vmem>>, vector<2x128xf32>
    %654 = arith.addf %652, %653 : vector<2x128xf32>
    %c12_501 = arith.constant 12 : index
    %c2048_502 = arith.constant 2048 : index
    %655 = vector.load %arg17[%c12_501, %c2048_502] : memref<18x3200xf32, #tpu.memory_space<vmem>>, vector<2x128xf32>
    %656 = arith.addf %654, %655 : vector<2x128xf32>
    %c14_503 = arith.constant 14 : index
    %c1920_504 = arith.constant 1920 : index
    %657 = vector.load %arg17[%c14_503, %c1920_504] : memref<18x3200xf32, #tpu.memory_space<vmem>>, vector<2x128xf32>
    %658 = arith.addf %656, %657 : vector<2x128xf32>
    %c72 = arith.constant 72 : index
    %c0_505 = arith.constant 0 : index
    %659 = vector.load %arg18[%c72, %c0_505] : memref<98x128xf32, #tpu.memory_space<vmem>>, vector<2x128xf32>
    tpu.vector_store %arg18[%c72, %c0_505], %658 {strides = array<i32>} : memref<98x128xf32, #tpu.memory_space<vmem>>, vector<2x128xf32>,
    %cst_506 = arith.constant 0.000000e+00 : f32
    %660 = vector.broadcast %cst_506 : f32 to vector<2x128xf32>
    %c6_507 = arith.constant 6 : index
    %c2816_508 = arith.constant 2816 : index
    %661 = vector.load %arg17[%c6_507, %c2816_508] : memref<18x3200xf32, #tpu.memory_space<vmem>>, vector<2x128xf32>
    %662 = arith.addf %660, %661 : vector<2x128xf32>
    %c8_509 = arith.constant 8 : index
    %c2688_510 = arith.constant 2688 : index
    %663 = vector.load %arg17[%c8_509, %c2688_510] : memref<18x3200xf32, #tpu.memory_space<vmem>>, vector<2x128xf32>
    %664 = arith.addf %662, %663 : vector<2x128xf32>
    %c10_511 = arith.constant 10 : index
    %c2560_512 = arith.constant 2560 : index
    %665 = vector.load %arg17[%c10_511, %c2560_512] : memref<18x3200xf32, #tpu.memory_space<vmem>>, vector<2x128xf32>
    %666 = arith.addf %664, %665 : vector<2x128xf32>
    %c12_513 = arith.constant 12 : index
    %c2176_514 = arith.constant 2176 : index
    %667 = vector.load %arg17[%c12_513, %c2176_514] : memref<18x3200xf32, #tpu.memory_space<vmem>>, vector<2x128xf32>
    %668 = arith.addf %666, %667 : vector<2x128xf32>
    %c14_515 = arith.constant 14 : index
    %c2048_516 = arith.constant 2048 : index
    %669 = vector.load %arg17[%c14_515, %c2048_516] : memref<18x3200xf32, #tpu.memory_space<vmem>>, vector<2x128xf32>
    %670 = arith.addf %668, %669 : vector<2x128xf32>
    %c16_517 = arith.constant 16 : index
    %c1920_518 = arith.constant 1920 : index
    %671 = vector.load %arg17[%c16_517, %c1920_518] : memref<18x3200xf32, #tpu.memory_space<vmem>>, vector<2x128xf32>
    %672 = arith.addf %670, %671 : vector<2x128xf32>
    %c74 = arith.constant 74 : index
    %c0_519 = arith.constant 0 : index
    %673 = vector.load %arg18[%c74, %c0_519] : memref<98x128xf32, #tpu.memory_space<vmem>>, vector<2x128xf32>
    tpu.vector_store %arg18[%c74, %c0_519], %672 {strides = array<i32>} : memref<98x128xf32, #tpu.memory_space<vmem>>, vector<2x128xf32>,
    %cst_520 = arith.constant 0.000000e+00 : f32
    %674 = vector.broadcast %cst_520 : f32 to vector<2x128xf32>
    %c6_521 = arith.constant 6 : index
    %c2944_522 = arith.constant 2944 : index
    %675 = vector.load %arg17[%c6_521, %c2944_522] : memref<18x3200xf32, #tpu.memory_space<vmem>>, vector<2x128xf32>
    %676 = arith.addf %674, %675 : vector<2x128xf32>
    %c8_523 = arith.constant 8 : index
    %c2816_524 = arith.constant 2816 : index
    %677 = vector.load %arg17[%c8_523, %c2816_524] : memref<18x3200xf32, #tpu.memory_space<vmem>>, vector<2x128xf32>
    %678 = arith.addf %676, %677 : vector<2x128xf32>
    %c10_525 = arith.constant 10 : index
    %c2688_526 = arith.constant 2688 : index
    %679 = vector.load %arg17[%c10_525, %c2688_526] : memref<18x3200xf32, #tpu.memory_space<vmem>>, vector<2x128xf32>
    %680 = arith.addf %678, %679 : vector<2x128xf32>
    %c12_527 = arith.constant 12 : index
    %c2304_528 = arith.constant 2304 : index
    %681 = vector.load %arg17[%c12_527, %c2304_528] : memref<18x3200xf32, #tpu.memory_space<vmem>>, vector<2x128xf32>
    %682 = arith.addf %680, %681 : vector<2x128xf32>
    %c14_529 = arith.constant 14 : index
    %c2176_530 = arith.constant 2176 : index
    %683 = vector.load %arg17[%c14_529, %c2176_530] : memref<18x3200xf32, #tpu.memory_space<vmem>>, vector<2x128xf32>
    %684 = arith.addf %682, %683 : vector<2x128xf32>
    %c16_531 = arith.constant 16 : index
    %c2048_532 = arith.constant 2048 : index
    %685 = vector.load %arg17[%c16_531, %c2048_532] : memref<18x3200xf32, #tpu.memory_space<vmem>>, vector<2x128xf32>
    %686 = arith.addf %684, %685 : vector<2x128xf32>
    %c76 = arith.constant 76 : index
    %c0_533 = arith.constant 0 : index
    %687 = vector.load %arg18[%c76, %c0_533] : memref<98x128xf32, #tpu.memory_space<vmem>>, vector<2x128xf32>
    tpu.vector_store %arg18[%c76, %c0_533], %686 {strides = array<i32>} : memref<98x128xf32, #tpu.memory_space<vmem>>, vector<2x128xf32>,
    %cst_534 = arith.constant 0.000000e+00 : f32
    %688 = vector.broadcast %cst_534 : f32 to vector<2x128xf32>
    %c6_535 = arith.constant 6 : index
    %c3072_536 = arith.constant 3072 : index
    %689 = vector.load %arg17[%c6_535, %c3072_536] : memref<18x3200xf32, #tpu.memory_space<vmem>>, vector<2x128xf32>
    %690 = arith.addf %688, %689 : vector<2x128xf32>
    %c8_537 = arith.constant 8 : index
    %c2944_538 = arith.constant 2944 : index
    %691 = vector.load %arg17[%c8_537, %c2944_538] : memref<18x3200xf32, #tpu.memory_space<vmem>>, vector<2x128xf32>
    %692 = arith.addf %690, %691 : vector<2x128xf32>
    %c10_539 = arith.constant 10 : index
    %c2816_540 = arith.constant 2816 : index
    %693 = vector.load %arg17[%c10_539, %c2816_540] : memref<18x3200xf32, #tpu.memory_space<vmem>>, vector<2x128xf32>
    %694 = arith.addf %692, %693 : vector<2x128xf32>
    %c12_541 = arith.constant 12 : index
    %c2432_542 = arith.constant 2432 : index
    %695 = vector.load %arg17[%c12_541, %c2432_542] : memref<18x3200xf32, #tpu.memory_space<vmem>>, vector<2x128xf32>
    %696 = arith.addf %694, %695 : vector<2x128xf32>
    %c14_543 = arith.constant 14 : index
    %c2304_544 = arith.constant 2304 : index
    %697 = vector.load %arg17[%c14_543, %c2304_544] : memref<18x3200xf32, #tpu.memory_space<vmem>>, vector<2x128xf32>
    %698 = arith.addf %696, %697 : vector<2x128xf32>
    %c16_545 = arith.constant 16 : index
    %c2176_546 = arith.constant 2176 : index
    %699 = vector.load %arg17[%c16_545, %c2176_546] : memref<18x3200xf32, #tpu.memory_space<vmem>>, vector<2x128xf32>
    %700 = arith.addf %698, %699 : vector<2x128xf32>
    %c78 = arith.constant 78 : index
    %c0_547 = arith.constant 0 : index
    %701 = vector.load %arg18[%c78, %c0_547] : memref<98x128xf32, #tpu.memory_space<vmem>>, vector<2x128xf32>
    tpu.vector_store %arg18[%c78, %c0_547], %700 {strides = array<i32>} : memref<98x128xf32, #tpu.memory_space<vmem>>, vector<2x128xf32>,
    %cst_548 = arith.constant 0.000000e+00 : f32
    %702 = vector.broadcast %cst_548 : f32 to vector<2x128xf32>
    %c8_549 = arith.constant 8 : index
    %c3072_550 = arith.constant 3072 : index
    %703 = vector.load %arg17[%c8_549, %c3072_550] : memref<18x3200xf32, #tpu.memory_space<vmem>>, vector<2x128xf32>
    %704 = arith.addf %702, %703 : vector<2x128xf32>
    %c10_551 = arith.constant 10 : index
    %c2944_552 = arith.constant 2944 : index
    %705 = vector.load %arg17[%c10_551, %c2944_552] : memref<18x3200xf32, #tpu.memory_space<vmem>>, vector<2x128xf32>
    %706 = arith.addf %704, %705 : vector<2x128xf32>
    %c14_553 = arith.constant 14 : index
    %c2432_554 = arith.constant 2432 : index
    %707 = vector.load %arg17[%c14_553, %c2432_554] : memref<18x3200xf32, #tpu.memory_space<vmem>>, vector<2x128xf32>
    %708 = arith.addf %706, %707 : vector<2x128xf32>
    %c16_555 = arith.constant 16 : index
    %c2304_556 = arith.constant 2304 : index
    %709 = vector.load %arg17[%c16_555, %c2304_556] : memref<18x3200xf32, #tpu.memory_space<vmem>>, vector<2x128xf32>
    %710 = arith.addf %708, %709 : vector<2x128xf32>
    %c80 = arith.constant 80 : index
    %c0_557 = arith.constant 0 : index
    %711 = vector.load %arg18[%c80, %c0_557] : memref<98x128xf32, #tpu.memory_space<vmem>>, vector<2x128xf32>
    tpu.vector_store %arg18[%c80, %c0_557], %710 {strides = array<i32>} : memref<98x128xf32, #tpu.memory_space<vmem>>, vector<2x128xf32>,
    %cst_558 = arith.constant 0.000000e+00 : f32
    %712 = vector.broadcast %cst_558 : f32 to vector<2x128xf32>
    %c10_559 = arith.constant 10 : index
    %c3072_560 = arith.constant 3072 : index
    %713 = vector.load %arg17[%c10_559, %c3072_560] : memref<18x3200xf32, #tpu.memory_space<vmem>>, vector<2x128xf32>
    %714 = arith.addf %712, %713 : vector<2x128xf32>
    %c16_561 = arith.constant 16 : index
    %c2432_562 = arith.constant 2432 : index
    %715 = vector.load %arg17[%c16_561, %c2432_562] : memref<18x3200xf32, #tpu.memory_space<vmem>>, vector<2x128xf32>
    %716 = arith.addf %714, %715 : vector<2x128xf32>
    %c82 = arith.constant 82 : index
    %c0_563 = arith.constant 0 : index
    %717 = vector.load %arg18[%c82, %c0_563] : memref<98x128xf32, #tpu.memory_space<vmem>>, vector<2x128xf32>
    tpu.vector_store %arg18[%c82, %c0_563], %716 {strides = array<i32>} : memref<98x128xf32, #tpu.memory_space<vmem>>, vector<2x128xf32>,
    %cst_564 = arith.constant 0.000000e+00 : f32
    %718 = vector.broadcast %cst_564 : f32 to vector<2x128xf32>
    %c12_565 = arith.constant 12 : index
    %c2560_566 = arith.constant 2560 : index
    %719 = vector.load %arg17[%c12_565, %c2560_566] : memref<18x3200xf32, #tpu.memory_space<vmem>>, vector<2x128xf32>
    %720 = arith.addf %718, %719 : vector<2x128xf32>
    %c84 = arith.constant 84 : index
    %c0_567 = arith.constant 0 : index
    %721 = vector.load %arg18[%c84, %c0_567] : memref<98x128xf32, #tpu.memory_space<vmem>>, vector<2x128xf32>
    tpu.vector_store %arg18[%c84, %c0_567], %720 {strides = array<i32>} : memref<98x128xf32, #tpu.memory_space<vmem>>, vector<2x128xf32>,
    %cst_568 = arith.constant 0.000000e+00 : f32
    %722 = vector.broadcast %cst_568 : f32 to vector<2x128xf32>
    %c12_569 = arith.constant 12 : index
    %c2688_570 = arith.constant 2688 : index
    %723 = vector.load %arg17[%c12_569, %c2688_570] : memref<18x3200xf32, #tpu.memory_space<vmem>>, vector<2x128xf32>
    %724 = arith.addf %722, %723 : vector<2x128xf32>
    %c14_571 = arith.constant 14 : index
    %c2560_572 = arith.constant 2560 : index
    %725 = vector.load %arg17[%c14_571, %c2560_572] : memref<18x3200xf32, #tpu.memory_space<vmem>>, vector<2x128xf32>
    %726 = arith.addf %724, %725 : vector<2x128xf32>
    %c86 = arith.constant 86 : index
    %c0_573 = arith.constant 0 : index
    %727 = vector.load %arg18[%c86, %c0_573] : memref<98x128xf32, #tpu.memory_space<vmem>>, vector<2x128xf32>
    tpu.vector_store %arg18[%c86, %c0_573], %726 {strides = array<i32>} : memref<98x128xf32, #tpu.memory_space<vmem>>, vector<2x128xf32>,
    %cst_574 = arith.constant 0.000000e+00 : f32
    %728 = vector.broadcast %cst_574 : f32 to vector<2x128xf32>
    %c12_575 = arith.constant 12 : index
    %c2816_576 = arith.constant 2816 : index
    %729 = vector.load %arg17[%c12_575, %c2816_576] : memref<18x3200xf32, #tpu.memory_space<vmem>>, vector<2x128xf32>
    %730 = arith.addf %728, %729 : vector<2x128xf32>
    %c14_577 = arith.constant 14 : index
    %c2688_578 = arith.constant 2688 : index
    %731 = vector.load %arg17[%c14_577, %c2688_578] : memref<18x3200xf32, #tpu.memory_space<vmem>>, vector<2x128xf32>
    %732 = arith.addf %730, %731 : vector<2x128xf32>
    %c16_579 = arith.constant 16 : index
    %c2560_580 = arith.constant 2560 : index
    %733 = vector.load %arg17[%c16_579, %c2560_580] : memref<18x3200xf32, #tpu.memory_space<vmem>>, vector<2x128xf32>
    %734 = arith.addf %732, %733 : vector<2x128xf32>
    %c88 = arith.constant 88 : index
    %c0_581 = arith.constant 0 : index
    %735 = vector.load %arg18[%c88, %c0_581] : memref<98x128xf32, #tpu.memory_space<vmem>>, vector<2x128xf32>
    tpu.vector_store %arg18[%c88, %c0_581], %734 {strides = array<i32>} : memref<98x128xf32, #tpu.memory_space<vmem>>, vector<2x128xf32>,
    %cst_582 = arith.constant 0.000000e+00 : f32
    %736 = vector.broadcast %cst_582 : f32 to vector<2x128xf32>
    %c12_583 = arith.constant 12 : index
    %c2944_584 = arith.constant 2944 : index
    %737 = vector.load %arg17[%c12_583, %c2944_584] : memref<18x3200xf32, #tpu.memory_space<vmem>>, vector<2x128xf32>
    %738 = arith.addf %736, %737 : vector<2x128xf32>
    %c14_585 = arith.constant 14 : index
    %c2816_586 = arith.constant 2816 : index
    %739 = vector.load %arg17[%c14_585, %c2816_586] : memref<18x3200xf32, #tpu.memory_space<vmem>>, vector<2x128xf32>
    %740 = arith.addf %738, %739 : vector<2x128xf32>
    %c16_587 = arith.constant 16 : index
    %c2688_588 = arith.constant 2688 : index
    %741 = vector.load %arg17[%c16_587, %c2688_588] : memref<18x3200xf32, #tpu.memory_space<vmem>>, vector<2x128xf32>
    %742 = arith.addf %740, %741 : vector<2x128xf32>
    %c90 = arith.constant 90 : index
    %c0_589 = arith.constant 0 : index
    %743 = vector.load %arg18[%c90, %c0_589] : memref<98x128xf32, #tpu.memory_space<vmem>>, vector<2x128xf32>
    tpu.vector_store %arg18[%c90, %c0_589], %742 {strides = array<i32>} : memref<98x128xf32, #tpu.memory_space<vmem>>, vector<2x128xf32>,
    %cst_590 = arith.constant 0.000000e+00 : f32
    %744 = vector.broadcast %cst_590 : f32 to vector<2x128xf32>
    %c12_591 = arith.constant 12 : index
    %c3072_592 = arith.constant 3072 : index
    %745 = vector.load %arg17[%c12_591, %c3072_592] : memref<18x3200xf32, #tpu.memory_space<vmem>>, vector<2x128xf32>
    %746 = arith.addf %744, %745 : vector<2x128xf32>
    %c14_593 = arith.constant 14 : index
    %c2944_594 = arith.constant 2944 : index
    %747 = vector.load %arg17[%c14_593, %c2944_594] : memref<18x3200xf32, #tpu.memory_space<vmem>>, vector<2x128xf32>
    %748 = arith.addf %746, %747 : vector<2x128xf32>
    %c16_595 = arith.constant 16 : index
    %c2816_596 = arith.constant 2816 : index
    %749 = vector.load %arg17[%c16_595, %c2816_596] : memref<18x3200xf32, #tpu.memory_space<vmem>>, vector<2x128xf32>
    %750 = arith.addf %748, %749 : vector<2x128xf32>
    %c92 = arith.constant 92 : index
    %c0_597 = arith.constant 0 : index
    %751 = vector.load %arg18[%c92, %c0_597] : memref<98x128xf32, #tpu.memory_space<vmem>>, vector<2x128xf32>
    tpu.vector_store %arg18[%c92, %c0_597], %750 {strides = array<i32>} : memref<98x128xf32, #tpu.memory_space<vmem>>, vector<2x128xf32>,
    %cst_598 = arith.constant 0.000000e+00 : f32
    %752 = vector.broadcast %cst_598 : f32 to vector<2x128xf32>
    %c14_599 = arith.constant 14 : index
    %c3072_600 = arith.constant 3072 : index
    %753 = vector.load %arg17[%c14_599, %c3072_600] : memref<18x3200xf32, #tpu.memory_space<vmem>>, vector<2x128xf32>
    %754 = arith.addf %752, %753 : vector<2x128xf32>
    %c16_601 = arith.constant 16 : index
    %c2944_602 = arith.constant 2944 : index
    %755 = vector.load %arg17[%c16_601, %c2944_602] : memref<18x3200xf32, #tpu.memory_space<vmem>>, vector<2x128xf32>
    %756 = arith.addf %754, %755 : vector<2x128xf32>
    %c94 = arith.constant 94 : index
    %c0_603 = arith.constant 0 : index
    %757 = vector.load %arg18[%c94, %c0_603] : memref<98x128xf32, #tpu.memory_space<vmem>>, vector<2x128xf32>
    tpu.vector_store %arg18[%c94, %c0_603], %756 {strides = array<i32>} : memref<98x128xf32, #tpu.memory_space<vmem>>, vector<2x128xf32>,
    %cst_604 = arith.constant 0.000000e+00 : f32
    %758 = vector.broadcast %cst_604 : f32 to vector<2x128xf32>
    %c16_605 = arith.constant 16 : index
    %c3072_606 = arith.constant 3072 : index
    %759 = vector.load %arg17[%c16_605, %c3072_606] : memref<18x3200xf32, #tpu.memory_space<vmem>>, vector<2x128xf32>
    %760 = arith.addf %758, %759 : vector<2x128xf32>
    %c96 = arith.constant 96 : index
    %c0_607 = arith.constant 0 : index
    %761 = vector.load %arg18[%c96, %c0_607] : memref<98x128xf32, #tpu.memory_space<vmem>>, vector<2x128xf32>
    tpu.vector_store %arg18[%c96, %c0_607], %760 {strides = array<i32>} : memref<98x128xf32, #tpu.memory_space<vmem>>, vector<2x128xf32>,
    %c0_608 = arith.constant 0 : index
    %c0_609 = arith.constant 0 : index
    %762 = vector.load %arg18[%c0_608, %c0_609] : memref<98x128xf32, #tpu.memory_space<vmem>>, vector<98x128xf32>
    %cst_610 = arith.constant dense<0.000000e+00> : vector<128xf32>
    %763 = vector.multi_reduction <add>, %762, %cst_610 [0] : vector<98x128xf32> to vector<128xf32>
    %764 = vector.shape_cast %763 : vector<128xf32> to vector<1x128xf32>
    %cst_611 = arith.constant 0.0102040814 : f32
    %765 = vector.broadcast %cst_611 : f32 to vector<1x128xf32>
    %766 = arith.mulf %764, %765 : vector<1x128xf32>
    %767 = arith.mulf %762, %762 : vector<98x128xf32>
    %cst_612 = arith.constant dense<0.000000e+00> : vector<128xf32>
    %768 = vector.multi_reduction <add>, %767, %cst_612 [0] : vector<98x128xf32> to vector<128xf32>
    %769 = vector.shape_cast %768 : vector<128xf32> to vector<1x128xf32>
    %cst_613 = arith.constant 0.0102040814 : f32
    %770 = vector.broadcast %cst_613 : f32 to vector<1x128xf32>
    %771 = arith.mulf %769, %770 : vector<1x128xf32>
    %c0_614 = arith.constant 0 : index
    %c0_615 = arith.constant 0 : index
    %772 = vector.load %arg11[%c0_614, %c0_615] : memref<1x128xf32, #tpu.memory_space<vmem>>, vector<1x128xf32>
    %773 = arith.mulf %766, %766 : vector<1x128xf32>
    %774 = arith.subf %771, %773 : vector<1x128xf32>
    %cst_616 = arith.constant 9.99999974E-6 : f32
    %775 = vector.broadcast %cst_616 : f32 to vector<1x128xf32>
    %776 = arith.addf %774, %775 : vector<1x128xf32>
    %777 = math.rsqrt %776 : vector<1x128xf32>
    %778 = arith.mulf %772, %777 : vector<1x128xf32>
    %c0_617 = arith.constant 0 : index
    %c0_618 = arith.constant 0 : index
    %779 = vector.load %arg12[%c0_617, %c0_618] : memref<1x128xf32, #tpu.memory_space<vmem>>, vector<1x128xf32>
    %780 = arith.mulf %766, %778 : vector<1x128xf32>
    %781 = arith.subf %779, %780 : vector<1x128xf32>
    %782 = vector.broadcast %778 : vector<1x128xf32> to vector<98x128xf32>
    %783 = arith.mulf %762, %782 : vector<98x128xf32>
    %784 = vector.broadcast %781 : vector<1x128xf32> to vector<98x128xf32>
    %785 = arith.addf %783, %784 : vector<98x128xf32>
    %cst_619 = arith.constant 0.000000e+00 : f32
    %786 = vector.broadcast %cst_619 : f32 to vector<98x128xf32>
    %787 = arith.cmpf oge, %785, %786 : vector<98x128xf32>
    %cst_620 = arith.constant 2.000000e-01 : f32
    %788 = vector.broadcast %cst_620 : f32 to vector<98x128xf32>
    %789 = arith.mulf %788, %785 : vector<98x128xf32>
    %790 = arith.select %787, %785, %789 : vector<98x128xi1>, vector<98x128xf32>
    %791 = arith.truncf %790 : vector<98x128xf32> to vector<98x128xbf16>
    %c0_621 = arith.constant 0 : index
    %c0_622 = arith.constant 0 : index
    %792 = vector.load %arg15[%c0_621, %c0_622] : memref<98x128xbf16, #tpu.memory_space<vmem>>, vector<98x128xbf16>
    tpu.vector_store %arg15[%c0_621, %c0_622], %791 {strides = array<i32>} : memref<98x128xbf16, #tpu.memory_space<vmem>>, vector<98x128xbf16>,
    return
  }
}

module attributes {stable_mosaic.version = 11 : i64} {
  func.func @_phase_deconv_bn_lrelu_kernel(%arg0: memref<98x576xbf16, #tpu.memory_space<vmem>>, %arg1: memref<576x128xbf16, #tpu.memory_space<vmem>>, %arg2: memref<1x128xf32, #tpu.memory_space<vmem>>, %arg3: memref<1x128xf32, #tpu.memory_space<vmem>>, %arg4: memref<98x128xbf16, #tpu.memory_space<vmem>>) attributes {dimension_semantics = [], scalar_prefetch = 0 : i64, scratch_operands = 0 : i64, tpu.core_type = #tpu.core_type<tc>} {
    %c0 = arith.constant 0 : index
    %c0_0 = arith.constant 0 : index
    %0 = vector.load %arg0[%c0, %c0_0] : memref<98x576xbf16, #tpu.memory_space<vmem>>, vector<98x576xbf16>
    %c0_1 = arith.constant 0 : index
    %c0_2 = arith.constant 0 : index
    %1 = vector.load %arg1[%c0_1, %c0_2] : memref<576x128xbf16, #tpu.memory_space<vmem>>, vector<576x128xbf16>
    %cst = arith.constant dense<0.000000e+00> : vector<98x128xf32>
    %2 = tpu.matmul %0, %1, %cst {dimension_numbers = #tpu.dot_dimension_numbers<[1], [0], [0], [1], [0, 0, 1, 1], [], []>} : vector<98x576xbf16>, vector<576x128xbf16>, vector<98x128xf32> -> vector<98x128xf32>
    %cst_3 = arith.constant dense<0.000000e+00> : vector<128xf32>
    %3 = vector.multi_reduction <add>, %2, %cst_3 [0] : vector<98x128xf32> to vector<128xf32>
    %4 = vector.shape_cast %3 : vector<128xf32> to vector<1x128xf32>
    %5 = arith.mulf %2, %2 : vector<98x128xf32>
    %cst_4 = arith.constant dense<0.000000e+00> : vector<128xf32>
    %6 = vector.multi_reduction <add>, %5, %cst_4 [0] : vector<98x128xf32> to vector<128xf32>
    %7 = vector.shape_cast %6 : vector<128xf32> to vector<1x128xf32>
    %c32_i32 = arith.constant 32 : i32
    %8 = tpu.dynamic_rotate %4 by %c32_i32 dim 1 : vector<1x128xf32>, i32 -> vector<1x128xf32>
    %9 = arith.addf %4, %8 : vector<1x128xf32>
    %c32_i32_5 = arith.constant 32 : i32
    %10 = tpu.dynamic_rotate %7 by %c32_i32_5 dim 1 : vector<1x128xf32>, i32 -> vector<1x128xf32>
    %11 = arith.addf %7, %10 : vector<1x128xf32>
    %c64_i32 = arith.constant 64 : i32
    %12 = tpu.dynamic_rotate %4 by %c64_i32 dim 1 : vector<1x128xf32>, i32 -> vector<1x128xf32>
    %13 = arith.addf %9, %12 : vector<1x128xf32>
    %c64_i32_6 = arith.constant 64 : i32
    %14 = tpu.dynamic_rotate %7 by %c64_i32_6 dim 1 : vector<1x128xf32>, i32 -> vector<1x128xf32>
    %15 = arith.addf %11, %14 : vector<1x128xf32>
    %c96_i32 = arith.constant 96 : i32
    %16 = tpu.dynamic_rotate %4 by %c96_i32 dim 1 : vector<1x128xf32>, i32 -> vector<1x128xf32>
    %17 = arith.addf %13, %16 : vector<1x128xf32>
    %c96_i32_7 = arith.constant 96 : i32
    %18 = tpu.dynamic_rotate %7 by %c96_i32_7 dim 1 : vector<1x128xf32>, i32 -> vector<1x128xf32>
    %19 = arith.addf %15, %18 : vector<1x128xf32>
    %cst_8 = arith.constant 0.00255102036 : f32
    %20 = vector.broadcast %cst_8 : f32 to vector<1x128xf32>
    %21 = arith.mulf %17, %20 : vector<1x128xf32>
    %c0_9 = arith.constant 0 : index
    %c0_10 = arith.constant 0 : index
    %22 = vector.load %arg2[%c0_9, %c0_10] : memref<1x128xf32, #tpu.memory_space<vmem>>, vector<1x128xf32>
    %cst_11 = arith.constant 0.00255102036 : f32
    %23 = vector.broadcast %cst_11 : f32 to vector<1x128xf32>
    %24 = arith.mulf %19, %23 : vector<1x128xf32>
    %25 = arith.mulf %21, %21 : vector<1x128xf32>
    %26 = arith.subf %24, %25 : vector<1x128xf32>
    %cst_12 = arith.constant 9.99999974E-6 : f32
    %27 = vector.broadcast %cst_12 : f32 to vector<1x128xf32>
    %28 = arith.addf %26, %27 : vector<1x128xf32>
    %29 = math.rsqrt %28 : vector<1x128xf32>
    %30 = arith.mulf %22, %29 : vector<1x128xf32>
    %c0_13 = arith.constant 0 : index
    %c0_14 = arith.constant 0 : index
    %31 = vector.load %arg3[%c0_13, %c0_14] : memref<1x128xf32, #tpu.memory_space<vmem>>, vector<1x128xf32>
    %32 = arith.mulf %21, %30 : vector<1x128xf32>
    %33 = arith.subf %31, %32 : vector<1x128xf32>
    %34 = vector.broadcast %30 : vector<1x128xf32> to vector<98x128xf32>
    %35 = arith.mulf %2, %34 : vector<98x128xf32>
    %36 = vector.broadcast %33 : vector<1x128xf32> to vector<98x128xf32>
    %37 = arith.addf %35, %36 : vector<98x128xf32>
    %cst_15 = arith.constant 0.000000e+00 : f32
    %38 = vector.broadcast %cst_15 : f32 to vector<98x128xf32>
    %39 = arith.cmpf oge, %37, %38 : vector<98x128xf32>
    %cst_16 = arith.constant 2.000000e-01 : f32
    %40 = vector.broadcast %cst_16 : f32 to vector<98x128xf32>
    %41 = arith.mulf %40, %37 : vector<98x128xf32>
    %42 = arith.select %39, %37, %41 : vector<98x128xi1>, vector<98x128xf32>
    %43 = arith.truncf %42 : vector<98x128xf32> to vector<98x128xbf16>
    %c0_17 = arith.constant 0 : index
    %c0_18 = arith.constant 0 : index
    %44 = vector.load %arg4[%c0_17, %c0_18] : memref<98x128xbf16, #tpu.memory_space<vmem>>, vector<98x128xbf16>
    tpu.vector_store %arg4[%c0_17, %c0_18], %43 {strides = array<i32>} : memref<98x128xbf16, #tpu.memory_space<vmem>>, vector<98x128xbf16>,
    return
  }
}

module attributes {stable_mosaic.version = 11 : i64} {
  func.func @_conv_bias_kernel(%arg0: memref<392x288xbf16, #tpu.memory_space<vmem>>, %arg1: memref<288x128xbf16, #tpu.memory_space<vmem>>, %arg2: memref<1x128xf32, #tpu.memory_space<vmem>>, %arg3: memref<392x128xf32, #tpu.memory_space<vmem>>) attributes {dimension_semantics = [], scalar_prefetch = 0 : i64, scratch_operands = 0 : i64, tpu.core_type = #tpu.core_type<tc>} {
    %c0 = arith.constant 0 : index
    %c0_0 = arith.constant 0 : index
    %0 = vector.load %arg0[%c0, %c0_0] : memref<392x288xbf16, #tpu.memory_space<vmem>>, vector<392x288xbf16>
    %c0_1 = arith.constant 0 : index
    %c0_2 = arith.constant 0 : index
    %1 = vector.load %arg1[%c0_1, %c0_2] : memref<288x128xbf16, #tpu.memory_space<vmem>>, vector<288x128xbf16>
    %cst = arith.constant dense<0.000000e+00> : vector<392x128xf32>
    %2 = tpu.matmul %0, %1, %cst {dimension_numbers = #tpu.dot_dimension_numbers<[1], [0], [0], [1], [0, 0, 1, 1], [], []>} : vector<392x288xbf16>, vector<288x128xbf16>, vector<392x128xf32> -> vector<392x128xf32>
    %c0_3 = arith.constant 0 : index
    %c0_4 = arith.constant 0 : index
    %3 = vector.load %arg2[%c0_3, %c0_4] : memref<1x128xf32, #tpu.memory_space<vmem>>, vector<1x128xf32>
    %4 = vector.broadcast %3 : vector<1x128xf32> to vector<392x128xf32>
    %5 = arith.addf %2, %4 : vector<392x128xf32>
    %c0_5 = arith.constant 0 : index
    %c0_6 = arith.constant 0 : index
    %6 = vector.load %arg3[%c0_5, %c0_6] : memref<392x128xf32, #tpu.memory_space<vmem>>, vector<392x128xf32>
    tpu.vector_store %arg3[%c0_5, %c0_6], %5 {strides = array<i32>} : memref<392x128xf32, #tpu.memory_space<vmem>>, vector<392x128xf32>,
    return
  }
}

</mosaic_0001>

<bundles_post_ra>
// kernel: vae_forward.5
= control target key start
LH: loop header
LB: loop body
LE: loop exit
PB: predicated region body
PF: predicated region fallthrough
CT: control target
= control target key end

     0   :  { %vm177_vm0 = vcmask 130048   ;;  %vm403_vm1 = vcmask 1041408   ;;  %s1905_s1 = inlined_call_operand.vmem [shape: bf16[16,128], index: 1, kind: input, shape index: {}]   ;;  %s1906_s0 = inlined_call_operand.vmem [shape: bf16[338,16], index: 0, kind: input, shape index: {}]   ;;  %s1907_s2 = inlined_call_operand.vmem [shape: f32[1,128], index: 2, kind: input, shape index: {}]   ;;  %s1908_s3 = inlined_call_operand.vmem [shape: f32[1,128], index: 3, kind: input, shape index: {}]   ;;  %s1909_s4 = inlined_call_operand.vmem [shape: bf16[338,128], index: 4, kind: output, shape index: {}]  }
   0x1   :  { %v966_v0 = vld [vmem:[%s1905_s1] sm:$0xff]  ;;  %v951_v2 = vld [vmem:[%s1906_s0 + $0x30] sm:$0xff]  ;;  %v946_v4 = vld [vmem:[%s1906_s0 + $0x8] sm:$0xff] }
   0x2   :  { %v945_v1 = vld [vmem:[%s1906_s0] sm:$0xff]  ;;  %251 = vmatpush.bf16.msra.mxu0 %v966_v0  ;;  %1092 = vmatpush.bf16.msra.mxu1 %v966_v0  ;;  %v952_v5 = vld [vmem:[%s1906_s0 + $0x38] sm:$0xff]  ;;  %v958_v6 = vld [vmem:[%s1906_s0 + $0x68] sm:$0xff] }
   0x3   :  { %1093 = vmatpush.bf16.msra.mxu2 %v966_v0  ;;  %1094 = vmatpush.bf16.msra.mxu3 %v966_v0  ;;  %v957_v3 = vld [vmem:[%s1906_s0 + $0x60] sm:$0xff]  ;;  %v947_v7 = vld [vmem:[%s1906_s0 + $0x10] sm:$0xff]  ;;  %v948_v10 = vld [vmem:[%s1906_s0 + $0x18] sm:$0xff] }
   0x4   :  { %v953_v8 = vld [vmem:[%s1906_s0 + $0x40] sm:$0xff]  ;;  %v959_v9 = vld [vmem:[%s1906_s0 + $0x70] sm:$0xff]  ;;  %v954_v11 = vld [vmem:[%s1906_s0 + $0x48] sm:$0xff] }
   0x5   :  { %923 = vmatmul.msk.bf16.vlgmr.msra.gmra.mxu0 %vm177_vm0, %v945_v1  ;;  %929 = vmatmul.msk.bf16.vlgmr.msra.gmra.mxu1 %vm177_vm0, %v951_v2  ;;  %v960_v12 = vld [vmem:[%s1906_s0 + $0x78] sm:$0xff]  ;;  %v963_v13 = vld [vmem:[%s1906_s0 + $0x90] sm:$0xff]  ;;  %v949_v14 = vld [vmem:[%s1906_s0 + $0x20] sm:$0xff] }
   0x6   :  { %935 = vmatmul.msk.bf16.vlgmr.msra.gmra.mxu2 %vm177_vm0, %v957_v3  ;;  %941 = vmatmul.msk.bf16.vlgmr.msra.gmra.mxu3 %vm177_vm0, %v963_v13  ;;  %v955_v15 = vld [vmem:[%s1906_s0 + $0x50] sm:$0xff]  ;;  %v961_v16 = vld [vmem:[%s1906_s0 + $0x80] sm:$0xff]  ;;  %v964_v17 = vld [vmem:[%s1906_s0 + $0x98] sm:$0xff] }
   0x7   :  { %v950_v18 = vld [vmem:[%s1906_s0 + $0x28] sm:$0xff]  ;;  %v956_v19 = vld [vmem:[%s1906_s0 + $0x58] sm:$0xff]  ;;  %v965_v21 = vld [vmem:[%s1906_s0 + $0xa0] sm:$0xff] }
   0x8   :  { %v962_v20 = vld [vmem:[%s1906_s0 + $0x88] sm:$0xff] }
   0x9   :  { %v60_v22 = vld [vmem:[%s1906_s0 + $0xa8] sm:$0x1] }
   0xa   :  { %v148_v23 = vunpack.c.l.b16 %v60_v22 }
   0xc   :  { %v170_v24 = vpack.c.b16 %v148_v23, %v148_v23 }
  0x15   :  { %924 = vmatmul.msk.bf16.gmra.mxu0 %vm177_vm0, %v946_v4  ;;  %930 = vmatmul.msk.bf16.gmra.mxu1 %vm177_vm0, %v952_v5 }
  0x16   :  { %936 = vmatmul.msk.bf16.gmra.mxu2 %vm177_vm0, %v958_v6  ;;  %942 = vmatmul.msk.bf16.gmra.mxu3 %vm177_vm0, %v964_v17 }
  0x25   :  { %925 = vmatmul.msk.bf16.gmra.mxu0 %vm177_vm0, %v947_v7  ;;  %931 = vmatmul.msk.bf16.gmra.mxu1 %vm177_vm0, %v953_v8 }
  0x26   :  { %937 = vmatmul.msk.bf16.gmra.mxu2 %vm177_vm0, %v959_v9  ;;  %943 = vmatmul.msk.bf16.gmra.mxu3 %vm177_vm0, %v965_v21 }
  0x35   :  { %926 = vmatmul.msk.bf16.gmra.mxu0 %vm177_vm0, %v948_v10  ;;  %932 = vmatmul.msk.bf16.gmra.mxu1 %vm177_vm0, %v954_v11 }
  0x36   :  { %938 = vmatmul.msk.bf16.gmra.mxu2 %vm177_vm0, %v960_v12  ;;  %944 = vmatmul.msk.bf16.gmra.mxu3 %vm177_vm0, %v170_v24 }
  0x45   :  { %927 = vmatmul.msk.bf16.gmra.mxu0 %vm177_vm0, %v949_v14  ;;  %933 = vmatmul.msk.bf16.gmra.mxu1 %vm177_vm0, %v955_v15 }
  0x46   :  { %939 = vmatmul.msk.bf16.gmra.mxu2 %vm177_vm0, %v961_v16 }
  0x55   :  { %928 = vmatmul.msk.bf16.gmra.mxu0 %vm177_vm0, %v950_v18  ;;  %934 = vmatmul.msk.bf16.gmra.mxu1 %vm177_vm0, %v956_v19 }
  0x56   :  { %940 = vmatmul.msk.bf16.gmra.mxu2 %vm177_vm0, %v962_v20 }
  0x82   :  { %v1213_v25 = vpop.f32.mrf.mxu0  ;;  %v1215_v26 = vpop.f32.mrf.mxu1 }
  0x83   :  { %v413_v48 = vmul.f32 %v1213_v25, %v1213_v25 }
  0x89   :  { %v1227_v32 = vpop.f32.mrf.mxu2  ;;  %v1251_v44 = vpop.f32.mrf.mxu3 }
  0x8a   :  { %v1217_v27 = vpop.f32.mrf.mxu0  ;;  %v1219_v28 = vpop.f32.mrf.mxu1 }
  0x8b   :  { %v414_v47 = vmul.f32 %v1217_v27, %v1217_v27  ;;  %v362_v49 = vadd.f32 %v1217_v27, %v1213_v25 }
  0x8d   :  { %v456_v53 = vadd.f32 %v414_v47, %v413_v48 }
  0x91   :  { %v1233_v35 = vpop.f32.mrf.mxu2  ;;  %v1265_v51 = vpop.f32.mrf.mxu3 }
  0x92   :  { %v1221_v29 = vpop.f32.mrf.mxu0  ;;  %v1223_v30 = vpop.f32.mrf.mxu1 }
  0x93   :  { %v415_v50 = vmul.f32 %v1221_v29, %v1221_v29  ;;  %v363_v54 = vadd.f32 %v362_v49, %v1221_v29  ;;  %v425_v49 = vmul.f32 %v1215_v26, %v1215_v26 }
  0x95   :  { %v457_v57 = vadd.f32 %v456_v53, %v415_v50 }
  0x99   :  { %v1239_v38 = vpop.f32.mrf.mxu2  ;;  %v1285_v3 = vpop.f32.mrf.mxu3 }
  0x9a   :  { %v1225_v31 = vpop.f32.mrf.mxu0  ;;  %v1229_v33 = vpop.f32.mrf.mxu1  ;;  %1926 = vst [vmem:[#allocation2_spill] sm:$0xff] %v1285_v3 }
  0x9b   :  { %v416_v55 = vmul.f32 %v1225_v31, %v1225_v31  ;;  %v364_v58 = vadd.f32 %v363_v54, %v1225_v31  ;;  %v426_v54 = vmul.f32 %v1219_v28, %v1219_v28 }
  0x9d   :  { %v458_v61 = vadd.f32 %v457_v57, %v416_v55 }
  0xa1   :  { %v1245_v41 = vpop.f32.mrf.mxu2  ;;  %v1305_v19 = vpop.f32.mrf.mxu3 }
  0xa2   :  { %v1231_v34 = vpop.f32.mrf.mxu0  ;;  %v1237_v37 = vpop.f32.mrf.mxu1  ;;  %1927 = vst [vmem:[#allocation3_spill] sm:$0xff] %v1305_v19 }
  0xa3   :  { %v417_v59 = vmul.f32 %v1231_v34, %v1231_v34  ;;  %v365_v62 = vadd.f32 %v364_v58, %v1231_v34 }
  0xa5   :  { %v459_v0 = vadd.f32 %v458_v61, %v417_v59  ;;  %v427_v61 = vmul.f32 %v1223_v30, %v1223_v30 }
  0xa9   :  { %v1255_v46 = vpop.f32.mrf.mxu2  ;;  %v1321_v58 = vpop.f32.mrf.mxu3 }
  0xaa   :  { %v1235_v36 = vpop.f32.mrf.mxu0  ;;  %v1243_v40 = vpop.f32.mrf.mxu1  ;;  %1928 = vst [vmem:[#allocation4_spill] sm:$0xff] %v1321_v58 }
  0xab   :  { %v418_v63 = vmul.f32 %v1235_v36, %v1235_v36  ;;  %v366_v1 = vadd.f32 %v365_v62, %v1235_v36 }
  0xad   :  { %v460_v4 = vadd.f32 %v459_v0, %v418_v63  ;;  %v428_v0 = vmul.f32 %v1229_v33, %v1229_v33 }
  0xb1   :  { %v1277_v60 = vpop.f32.mrf.mxu2 }
  0xb2   :  { %v1241_v39 = vpop.f32.mrf.mxu0  ;;  %v1249_v43 = vpop.f32.mrf.mxu1 }
  0xb3   :  { %v419_v2 = vmul.f32 %v1241_v39, %v1241_v39  ;;  %v367_v5 = vadd.f32 %v366_v1, %v1241_v39 }
  0xb5   :  { %v461_v9 = vadd.f32 %v460_v4, %v419_v2  ;;  %v429_v4 = vmul.f32 %v1237_v37, %v1237_v37 }
  0xb9   :  { %v1300_v15 = vpop.f32.mrf.mxu2 }
  0xba   :  { %v1247_v42 = vpop.f32.mrf.mxu0  ;;  %v1267_v52 = vpop.f32.mrf.mxu1 }
  0xbb   :  { %v420_v6 = vmul.f32 %v1247_v42, %v1247_v42  ;;  %v368_v10 = vadd.f32 %v367_v5, %v1247_v42 }
  0xbd   :  { %v462_v12 = vadd.f32 %v461_v9, %v420_v6 }
  0xc1   :  { %v1323_v59 = vpop.f32.mrf.mxu2 }
  0xc2   :  { %v1253_v45 = vpop.f32.mrf.mxu0  ;;  %v1292_v8 = vpop.f32.mrf.mxu1 }
  0xc3   :  { %v421_v11 = vmul.f32 %v1253_v45, %v1253_v45  ;;  %v369_v13 = vadd.f32 %v368_v10, %v1253_v45  ;;  %v430_v10 = vmul.f32 %v1243_v40, %v1243_v40 }
  0xc5   :  { %v463_v16 = vadd.f32 %v462_v12, %v421_v11 }
  0xca   :  { %v1272_v56 = vpop.f32.mrf.mxu0  ;;  %v1313_v48 = vpop.f32.mrf.mxu1 }
  0xcb   :  { %v422_v14 = vmul.f32 %v1272_v56, %v1272_v56  ;;  %v370_v17 = vadd.f32 %v369_v13, %v1272_v56  ;;  %v1339_v13 = vpop.f32.mrf.mxu3 }
  0xcc   :  { %1929 = vst [vmem:[#allocation5_spill] sm:$0xff] %v1339_v13 }
  0xcd   :  { %v464_v20 = vadd.f32 %v463_v16, %v422_v14  ;;  %v431_v14 = vmul.f32 %v1249_v43, %v1249_v43 }
  0xd2   :  { %v1290_v7 = vpop.f32.mrf.mxu0  ;;  %v1334_v9 = vpop.f32.mrf.mxu1 }
  0xd3   :  { %v423_v18 = vmul.f32 %v1290_v7, %v1290_v7  ;;  %v371_v21 = vadd.f32 %v370_v17, %v1290_v7 }
  0xd5   :  { %v465_v23 = vadd.f32 %v464_v20, %v423_v18  ;;  %v1344_v18 = vpop.f32.mrf.mxu2  ;;  %v432_v20 = vmul.f32 %v1267_v52, %v1267_v52 }
  0xda   :  { %v1308_v22 = vpop.f32.mrf.mxu0 }
  0xdb   :  { %v372_v24 = vadd.f32 %v371_v21, %v1308_v22  ;;  %v424_v47 = vmul.f32 %v1308_v22, %v1308_v22 }
  0xdd   :  { %v373_v50 = vadd.f32 %v372_v24, %v1215_v26  ;;  %v466_v53 = vadd.f32 %v465_v23, %v424_v47  ;;  %v433_v24 = vmul.f32 %v1292_v8, %v1292_v8 }
  0xdf   :  { %v374_v55 = vadd.f32 %v373_v50, %v1219_v28  ;;  %v467_v57 = vadd.f32 %v466_v53, %v425_v49  ;;  %v434_v53 = vmul.f32 %v1313_v48, %v1313_v48 }
  0xe1   :  { %v375_v62 = vadd.f32 %v374_v55, %v1223_v30  ;;  %v468_v63 = vadd.f32 %v467_v57, %v426_v54  ;;  %v1355_v55 = vpop.f32.mrf.mxu3  ;;  %v1357_v57 = vpop.f32.mrf.mxu1 }
  0xe2   :  { %1930 = vst [vmem:[#allocation6_spill] sm:$0xff] %v1355_v55 }
  0xe3   :  { %v376_v1 = vadd.f32 %v375_v62, %v1229_v33  ;;  %v469_v2 = vadd.f32 %v468_v63, %v427_v61  ;;  %v435_v63 = vmul.f32 %v1334_v9, %v1334_v9 }
  0xe5   :  { %v377_v5 = vadd.f32 %v376_v1, %v1237_v37  ;;  %v470_v6 = vadd.f32 %v469_v2, %v428_v0  ;;  %v436_v2 = vmul.f32 %v1357_v57, %v1357_v57 }
  0xe7   :  { %v471_v11 = vadd.f32 %v470_v6, %v429_v4  ;;  %v378_v12 = vadd.f32 %v377_v5, %v1243_v40  ;;  %v1365_v4 = vpop.f32.mrf.mxu2  ;;  %v437_v5 = vmul.f32 %v1227_v32, %v1227_v32 }
  0xe9   :  { %v379_v16 = vadd.f32 %v378_v12, %v1249_v43  ;;  %v472_v17 = vadd.f32 %v471_v11, %v430_v10  ;;  %v438_v11 = vmul.f32 %v1233_v35, %v1233_v35 }
  0xeb   :  { %v380_v21 = vadd.f32 %v379_v16, %v1267_v52  ;;  %v473_v23 = vadd.f32 %v472_v17, %v431_v14  ;;  %v360_v16 = vpop.f32.mrf.mxu3  ;;  %v439_v17 = vmul.f32 %v1239_v38, %v1239_v38 }
  0xed   :  { %v381_v47 = vadd.f32 %v380_v21, %v1292_v8  ;;  %v474_v49 = vadd.f32 %v473_v23, %v432_v20  ;;  %v440_v23 = vmul.f32 %v1245_v41, %v1245_v41 }
  0xef   :  { %v382_v50 = vadd.f32 %v381_v47, %v1313_v48  ;;  %v475_v54 = vadd.f32 %v474_v49, %v433_v24  ;;  %v441_v49 = vmul.f32 %v1255_v46, %v1255_v46 }
  0xf1   :  { %v476_v61 = vadd.f32 %v475_v54, %v434_v53  ;;  %v383_v62 = vadd.f32 %v382_v50, %v1334_v9  ;;  %v1382_v54 = vpop.f32.mrf.mxu2 }
  0xf3   :  { %v477_v0 = vadd.f32 %v476_v61, %v435_v63  ;;  %v384_v1 = vadd.f32 %v383_v62, %v1357_v57  ;;  %v442_v61 = vmul.f32 %v1277_v60, %v1277_v60 }
  0xf5   :  { %v385_v6 = vadd.f32 %v384_v1, %v1227_v32  ;;  %v478_v10 = vadd.f32 %v477_v0, %v436_v2  ;;  %v443_v0 = vmul.f32 %v1300_v15, %v1300_v15 }
  0xf7   :  { %v386_v12 = vadd.f32 %v385_v6, %v1233_v35  ;;  %v479_v14 = vadd.f32 %v478_v10, %v437_v5  ;;  %v444_v5 = vmul.f32 %v1323_v59, %v1323_v59 }
  0xf9   :  { %v387_v20 = vadd.f32 %v386_v12, %v1239_v38  ;;  %v480_v21 = vadd.f32 %v479_v14, %v438_v11  ;;  %v445_v12 = vmul.f32 %v1344_v18, %v1344_v18 }
  0xfb   :  { %v388_v24 = vadd.f32 %v387_v20, %v1245_v41  ;;  %v481_v47 = vadd.f32 %v480_v21, %v439_v17  ;;  %v446_v20 = vmul.f32 %v1365_v4, %v1365_v4  ;;  %v1399_v21 = vpop.f32.mrf.mxu2 }
  0xfd   :  { %v482_v50 = vadd.f32 %v481_v47, %v440_v23  ;;  %v389_v53 = vadd.f32 %v388_v24, %v1255_v46  ;;  %v447_v47 = vmul.f32 %v1382_v54, %v1382_v54 }
  0xff   :  { %v390_v62 = vadd.f32 %v389_v53, %v1277_v60  ;;  %v483_v63 = vadd.f32 %v482_v50, %v441_v49  ;;  %v448_v53 = vmul.f32 %v1399_v21, %v1399_v21 }
 0x101   :  { %v391_v1 = vadd.f32 %v390_v62, %v1300_v15  ;;  %v484_v2 = vadd.f32 %v483_v63, %v442_v61  ;;  %v449_v61 = vmul.f32 %v1251_v44, %v1251_v44 }
 0x103   :  { %v392_v6 = vadd.f32 %v391_v1, %v1323_v59  ;;  %v485_v10 = vadd.f32 %v484_v2, %v443_v0  ;;  %v450_v0 = vmul.f32 %v1265_v51, %v1265_v51 }
 0x105   :  { %v393_v11 = vadd.f32 %v392_v6, %v1344_v18  ;;  %v486_v14 = vadd.f32 %v485_v10, %v444_v5  ;;  %v451_v5 = vmul.f32 %v1285_v3, %v1285_v3 }
 0x107   :  { %v487_v16 = vadd.f32 %v486_v14, %v445_v12  ;;  %v394_v17 = vadd.f32 %v393_v11, %v1365_v4  ;;  %v452_v11 = vmul.f32 %v1305_v19, %v1305_v19 }
 0x109   :  { %v488_v23 = vadd.f32 %v487_v16, %v446_v20  ;;  %v395_v24 = vadd.f32 %v394_v17, %v1382_v54  ;;  %v455_v16 = vmul.f32 %v1355_v55, %v1355_v55  ;;  %v453_v17 = vmul.f32 %v1321_v58, %v1321_v58 }
 0x10b   :  { %v489_v49 = vadd.f32 %v488_v23, %v447_v47  ;;  %v396_v50 = vadd.f32 %v395_v24, %v1399_v21  ;;  %v404_v24 = vsel %vm403_vm1, %v1355_v55, 0.0 }
 0x10d   :  { %v397_v62 = vadd.f32 %v396_v50, %v1251_v44  ;;  %v490_v63 = vadd.f32 %v489_v49, %v448_v53  ;;  %v454_v49 = vmul.f32 %v1339_v13, %v1339_v13  ;;  %v497_v53 = vsel %vm403_vm1, %v455_v16, 0.0 }
 0x10f   :  { %v398_v1 = vadd.f32 %v397_v62, %v1265_v51  ;;  %v491_v2 = vadd.f32 %v490_v63, %v449_v61 }
 0x111   :  { %v399_v6 = vadd.f32 %v398_v1, %v1285_v3  ;;  %v492_v10 = vadd.f32 %v491_v2, %v450_v0 }
 0x113   :  { %v493_v12 = vadd.f32 %v492_v10, %v451_v5  ;;  %v400_v14 = vadd.f32 %v399_v6, %v1305_v19 }
 0x115   :  { %v401_v20 = vadd.f32 %v400_v14, %v1321_v58  ;;  %v494_v23 = vadd.f32 %v493_v12, %v452_v11 }
 0x117   :  { %v402_v47 = vadd.f32 %v401_v20, %v1339_v13  ;;  %v495_v50 = vadd.f32 %v494_v23, %v453_v17 }
 0x119   :  { %v496_v61 = vadd.f32 %v495_v50, %v454_v49  ;;  %v405_v62 = vadd.f32 %v404_v24, %v402_v47 }
 0x11b   :  { %v406_v63 = vrot.slane %v405_v62, 4  ;;  %v498_v0 = vadd.f32 %v497_v53, %v496_v61  ;;  %v506_v61 = vld [vmem:[%s1907_s2] sm:$0x1] }
 0x11d   :  { %v407_v1 = vadd.f32 %v406_v63, %v405_v62  ;;  %v499_v2 = vrot.slane %v498_v0, 4 }
 0x11f   :  { %v408_v5 = vrot.slane %v407_v1, 2  ;;  %v500_v6 = vadd.f32 %v499_v2, %v498_v0 }
 0x121   :  { %v409_v10 = vadd.f32 %v408_v5, %v407_v1  ;;  %v501_v14 = vrot.slane %v500_v6, 2 }
 0x123   :  { %v410_v11 = vrot.slane %v409_v10, 1  ;;  %v502_v12 = vadd.f32 %v501_v14, %v500_v6 }
 0x125   :  { %v411_v55 = vadd.f32 %v410_v11, %v409_v10  ;;  %v503_v58 = vrot.slane %v502_v12, 1 }
 0x127   :  { %v412_v20 = vmul.f32 0.00295858, %v411_v55  ;;  %v504_v19 = vadd.f32 %v503_v58, %v502_v12 }
 0x129   :  { %v505_v3 = vmul.f32 0.00295858, %v504_v19  ;;  %v507_v13 = vmul.f32 %v412_v20, %v412_v20 }
 0x12b   :  { %v508_v17 = vsub.f32 %v505_v3, %v507_v13  ;;  %v521_v3 = vld [vmem:[%s1908_s3] sm:$0x1] }
 0x12d   :  { %v509_v16 = vadd.f32 1e-05, %v508_v17  ;;  %v1931_v17 = vld [vmem:[#allocation2_spill] sm:$0xff] }
 0x12f   :  { %1095 = vrsqrt.f32 %v509_v16  ;;  %vm516_vm3 = vweird.f32 %v509_v16 }
 0x135   :  { %v1096_v23 = vpop.eup %1095 }
 0x136   :  { %v511_v24 = vmul.f32 %v1096_v23, %v509_v16  ;;  %vm517_vm2 = vweird.f32 %v1096_v23  ;;  %v1932_v16 = vld [vmem:[#allocation3_spill] sm:$0xff] }
 0x137   :  { %vm518_vm4 = vmor %vm516_vm3, %vm517_vm2 }
 0x138   :  { %v512_v47 = vmul.f32 %v1096_v23, %v511_v24  ;;  %v1934_v24 = vld [vmem:[#allocation5_spill] sm:$0xff] }
 0x13a   :  { %v513_v49 = vmul.f32 0.5, %v512_v47  ;;  %v1935_v47 = vld [vmem:[#allocation6_spill] sm:$0xff] }
 0x13c   :  { %v514_v50 = vsub.f32 1.5, %v513_v49 }
 0x13e   :  { %v515_v53 = vmul.f32 %v1096_v23, %v514_v50 }
 0x140   :  { %v519_v55 = vsel %vm518_vm4, %v1096_v23, %v515_v53  ;;  %v1933_v23 = vld [vmem:[#allocation4_spill] sm:$0xff] }
 0x141   :  { %v520_v58 = vmul.f32 %v519_v55, %v506_v61 }
 0x143   :  { %v522_v19 = vmul.f32 %v520_v58, %v412_v20  ;;  %v525_v62 = vperm.slane %v520_v58, 0 }
 0x145   :  { %v523_v13 = vsub.f32 %v521_v3, %v522_v19  ;;  %v527_v63 = vmul.f32 %v525_v62, %v1213_v25  ;;  %v528_v0 = vmul.f32 %v525_v62, %v1217_v27  ;;  %v529_v1 = vmul.f32 %v525_v62, %v1221_v29 }
 0x146   :  { %v530_v2 = vmul.f32 %v525_v62, %v1225_v31  ;;  %v531_v5 = vmul.f32 %v525_v62, %v1231_v34  ;;  %v532_v6 = vmul.f32 %v525_v62, %v1235_v36  ;;  %v533_v10 = vmul.f32 %v525_v62, %v1241_v39 }
 0x147   :  { %v534_v14 = vmul.f32 %v525_v62, %v1247_v42  ;;  %v535_v11 = vmul.f32 %v525_v62, %v1253_v45  ;;  %v536_v12 = vmul.f32 %v525_v62, %v1272_v56  ;;  %v537_v25 = vmul.f32 %v525_v62, %v1290_v7 }
 0x148   :  { %v538_v27 = vmul.f32 %v525_v62, %v1308_v22  ;;  %v539_v29 = vmul.f32 %v525_v62, %v1215_v26  ;;  %v540_v31 = vmul.f32 %v525_v62, %v1219_v28  ;;  %v541_v34 = vmul.f32 %v525_v62, %v1223_v30 }
 0x149   :  { %v542_v36 = vmul.f32 %v525_v62, %v1229_v33  ;;  %v543_v39 = vmul.f32 %v525_v62, %v1237_v37  ;;  %v544_v42 = vmul.f32 %v525_v62, %v1243_v40  ;;  %v545_v45 = vmul.f32 %v525_v62, %v1249_v43 }
 0x14a   :  { %v546_v56 = vmul.f32 %v525_v62, %v1267_v52  ;;  %v547_v7 = vmul.f32 %v525_v62, %v1292_v8  ;;  %v548_v22 = vmul.f32 %v525_v62, %v1313_v48  ;;  %v549_v26 = vmul.f32 %v525_v62, %v1334_v9 }
 0x14b   :  { %v550_v28 = vmul.f32 %v525_v62, %v1357_v57  ;;  %v551_v30 = vmul.f32 %v525_v62, %v1227_v32  ;;  %v552_v33 = vmul.f32 %v525_v62, %v1233_v35  ;;  %v553_v37 = vmul.f32 %v525_v62, %v1239_v38 }
 0x14c   :  { %v554_v40 = vmul.f32 %v525_v62, %v1245_v41  ;;  %v1462_v20 = vperm.slane %v523_v13, 0  ;;  %v555_v43 = vmul.f32 %v525_v62, %v1255_v46  ;;  %v556_v52 = vmul.f32 %v525_v62, %v1277_v60 }
 0x14d   :  { %v557_v8 = vmul.f32 %v525_v62, %v1300_v15  ;;  %v558_v48 = vmul.f32 %v525_v62, %v1323_v59  ;;  %v559_v9 = vmul.f32 %v525_v62, %v1344_v18  ;;  %v560_v32 = vmul.f32 %v525_v62, %v1365_v4 }
 0x14e   :  { %v561_v35 = vmul.f32 %v525_v62, %v1382_v54  ;;  %v562_v38 = vmul.f32 %v525_v62, %v1399_v21  ;;  %v563_v41 = vmul.f32 %v525_v62, %v1251_v44  ;;  %v564_v57 = vmul.f32 %v525_v62, %v1265_v51 }
 0x14f   :  { %v565_v46 = vmul.f32 %v525_v62, %v1931_v17  ;;  %v566_v60 = vmul.f32 %v525_v62, %v1932_v16  ;;  %v567_v15 = vmul.f32 %v525_v62, %v1933_v23  ;;  %v568_v59 = vmul.f32 %v525_v62, %v1934_v24 }
 0x150   :  { %v569_v18 = vmul.f32 %v525_v62, %v1935_v47  ;;  %v1480_v4 = vadd.f32 %v1462_v20, %v527_v63  ;;  %v1483_v54 = vadd.f32 %v1462_v20, %v528_v0  ;;  %v1486_v44 = vadd.f32 %v1462_v20, %v529_v1 }
 0x151   :  { %v1489_v51 = vadd.f32 %v1462_v20, %v530_v2  ;;  %v1492_v21 = vadd.f32 %v1462_v20, %v531_v5  ;;  %v1495_v49 = vadd.f32 %v1462_v20, %v532_v6  ;;  %v1498_v50 = vadd.f32 %v1462_v20, %v533_v10 }
 0x152   :  { %v1501_v53 = vadd.f32 %v1462_v20, %v534_v14  ;;  %v1504_v61 = vadd.f32 %v1462_v20, %v535_v11  ;;  %v1507_v55 = vadd.f32 %v1462_v20, %v536_v12  ;;  %v1510_v58 = vadd.f32 %v1462_v20, %v537_v25 }
 0x153   :  { %v1513_v19 = vadd.f32 %v1462_v20, %v538_v27  ;;  %v1516_v62 = vadd.f32 %v1462_v20, %v539_v29  ;;  %v1519_v3 = vadd.f32 %v1462_v20, %v540_v31  ;;  %v1522_v13 = vadd.f32 %v1462_v20, %v541_v34 }
 0x154   :  { %v1525_v63 = vadd.f32 %v1462_v20, %v542_v36  ;;  %v1528_v0 = vadd.f32 %v1462_v20, %v543_v39  ;;  %v1531_v1 = vadd.f32 %v1462_v20, %v544_v42  ;;  %v1534_v2 = vadd.f32 %v1462_v20, %v545_v45 }
 0x155   :  { %v1537_v5 = vadd.f32 %v1462_v20, %v546_v56  ;;  %v1540_v6 = vadd.f32 %v1462_v20, %v547_v7  ;;  %v1543_v10 = vadd.f32 %v1462_v20, %v548_v22  ;;  %v1546_v14 = vadd.f32 %v1462_v20, %v549_v26 }
 0x156   :  { %v1549_v11 = vadd.f32 %v1462_v20, %v550_v28  ;;  %v1552_v12 = vadd.f32 %v1462_v20, %v551_v30  ;;  %v1555_v25 = vadd.f32 %v1462_v20, %v552_v33  ;;  %v1558_v27 = vadd.f32 %v1462_v20, %v553_v37 }
 0x157   :  { %1936 = vst [vmem:[#allocation2_spill] sm:$0xff] %v1540_v6  ;;  %v1561_v29 = vadd.f32 %v1462_v20, %v554_v40  ;;  %v1564_v31 = vadd.f32 %v1462_v20, %v555_v43  ;;  %v1567_v34 = vadd.f32 %v1462_v20, %v556_v52  ;;  %v1570_v36 = vadd.f32 %v1462_v20, %v557_v8 }
 0x158   :  { %1937 = vst [vmem:[#allocation3_spill] sm:$0xff] %v1546_v14  ;;  %v1573_v39 = vadd.f32 %v1462_v20, %v558_v48  ;;  %v1576_v42 = vadd.f32 %v1462_v20, %v559_v9  ;;  %v1579_v45 = vadd.f32 %v1462_v20, %v560_v32  ;;  %v1582_v56 = vadd.f32 %v1462_v20, %v561_v35 }
 0x159   :  { %1938 = vst [vmem:[#allocation4_spill] sm:$0xff] %v1552_v12  ;;  %v1585_v7 = vadd.f32 %v1462_v20, %v562_v38  ;;  %v1588_v22 = vadd.f32 %v1462_v20, %v563_v41  ;;  %v1591_v26 = vadd.f32 %v1462_v20, %v564_v57  ;;  %v1594_v28 = vadd.f32 %v1462_v20, %v565_v46 }
 0x15a   :  { %1939 = vst [vmem:[#allocation5_spill] sm:$0xff] %v1558_v27  ;;  %v1597_v30 = vadd.f32 %v1462_v20, %v566_v60  ;;  %v1600_v33 = vadd.f32 %v1462_v20, %v567_v15  ;;  %v1603_v37 = vadd.f32 %v1462_v20, %v568_v59  ;;  %vm616_vm5 = vcmp.ge.f32.partialorder %v1480_v4, 0.0 }
 0x15b   :  { %1940 = vst [vmem:[#allocation6_spill] sm:$0xff] %v1567_v34  ;;  %vm617_vm6 = vcmp.ge.f32.partialorder %v1483_v54, 0.0  ;;  %vm618_vm7 = vcmp.ge.f32.partialorder %v1486_v44, 0.0  ;;  %vm619_vm8 = vcmp.ge.f32.partialorder %v1489_v51, 0.0  ;;  %vm620_vm9 = vcmp.ge.f32.partialorder %v1492_v21, 0.0 }
 0x15c   :  { %vm621_vm10 = vcmp.ge.f32.partialorder %v1495_v49, 0.0  ;;  %v659_v40 = vmul.f32 0.2, %v1480_v4  ;;  %vm622_vm11 = vcmp.ge.f32.partialorder %v1498_v50, 0.0  ;;  %vm623_vm12 = vcmp.ge.f32.partialorder %v1501_v53, 0.0 }
 0x15d   :  { %vm624_vm13 = vcmp.ge.f32.partialorder %v1504_v61, 0.0  ;;  %v660_v43 = vmul.f32 0.2, %v1483_v54  ;;  %vm625_vm14 = vcmp.ge.f32.partialorder %v1507_v55, 0.0  ;;  %vm626_vm15 = vcmp.ge.f32.partialorder %v1510_v58, 0.0 }
 0x15e   :  { %vm627_vm0 = vcmp.ge.f32.partialorder %v1513_v19, 0.0  ;;  %v661_v52 = vmul.f32 0.2, %v1486_v44  ;;  %v1621_v8 = vadd.f32 %v1462_v20, %v569_v18  ;;  %v662_v48 = vmul.f32 0.2, %v1489_v51 }
 0x15f   :  { %v663_v9 = vmul.f32 0.2, %v1492_v21  ;;  %v664_v32 = vmul.f32 0.2, %v1495_v49  ;;  %v665_v35 = vmul.f32 0.2, %v1498_v50  ;;  %v1636_v41 = vsel %vm616_vm5, %v1480_v4, %v659_v40 }
 0x160   :  { %1941 = vst [vmem:[#allocation7_spill] sm:$0xff] %v1621_v8  ;;  %v666_v38 = vmul.f32 0.2, %v1501_v53  ;;  %v667_v20 = vmul.f32 0.2, %v1504_v61  ;;  %vm632_vm2 = vcmp.ge.f32.partialorder %v1528_v0, 0.0  ;;  %v703_v16 = vsel %vm617_vm6, %v1483_v54, %v660_v43 }
 0x161   :  { %v668_v57 = vmul.f32 0.2, %v1507_v55  ;;  %v669_v17 = vmul.f32 0.2, %v1510_v58  ;;  %v670_v46 = vmul.f32 0.2, %v1513_v19  ;;  %v1654_v24 = vsel %vm618_vm7, %v1486_v44, %v661_v52 }
 0x162   :  { %vm634_vm4 = vcmp.ge.f32.partialorder %v1534_v2, 0.0  ;;  %v671_v60 = vmul.f32 0.2, %v1516_v62  ;;  %v672_v23 = vmul.f32 0.2, %v1519_v3  ;;  %vm636_vm5 = vcmp.ge.f32.partialorder %v1540_v6, 0.0 }
 0x163   :  { %v673_v15 = vmul.f32 0.2, %v1522_v13  ;;  %v674_v59 = vmul.f32 0.2, %v1525_v63  ;;  %v675_v47 = vmul.f32 0.2, %v1528_v0  ;;  %v705_v4 = vsel %vm619_vm8, %v1489_v51, %v662_v48 }
 0x164   :  { %v676_v18 = vmul.f32 0.2, %v1531_v1  ;;  %vm638_vm6 = vcmp.ge.f32.partialorder %v1546_v14, 0.0  ;;  %v677_v54 = vmul.f32 0.2, %v1534_v2  ;;  %v706_v43 = vsel %vm620_vm9, %v1492_v21, %v663_v9 }
 0x165   :  { %v678_v44 = vmul.f32 0.2, %v1537_v5  ;;  %v679_v40 = vmul.f32 0.2, %v1540_v6  ;;  %vm640_vm7 = vcmp.ge.f32.partialorder %v1552_v12, 0.0  ;;  %v707_v8 = vsel %vm621_vm10, %v1495_v49, %v664_v32 }
 0x166   :  { %v680_v51 = vmul.f32 0.2, %v1543_v10  ;;  %v681_v52 = vmul.f32 0.2, %v1546_v14  ;;  %v682_v48 = vmul.f32 0.2, %v1549_v11  ;;  %v708_v14 = vsel %vm622_vm11, %v1498_v50, %v665_v35 }
 0x167   :  { %vm642_vm8 = vcmp.ge.f32.partialorder %v1558_v27, 0.0  ;;  %vm643_vm3 = vcmp.ge.f32.partialorder %v1561_v29, 0.0  ;;  %v683_v21 = vmul.f32 0.2, %v1552_v12  ;;  %v684_v9 = vmul.f32 0.2, %v1555_v25 }
 0x168   :  { %v1685_v6 = vmul.f32 0.2, %v1558_v27  ;;  %vm644_vm9 = vcmp.ge.f32.partialorder %v1564_v31, 0.0  ;;  %vm645_vm1 = vcmp.ge.f32.partialorder %v1567_v34, 0.0  ;;  %v686_v49 = vmul.f32 0.2, %v1561_v29 }
 0x169   :  { %v1694_v32 = vmul.f32 0.2, %v1564_v31  ;;  %v1697_v12 = vmul.f32 0.2, %v1567_v34  ;;  %v709_v27 = vsel %vm623_vm12, %v1501_v53, %v666_v38  ;;  %vm647_vm11 = vcmp.ge.f32.partialorder %v1573_v39, 0.0 }
 0x16a   :  { %v1705_v50 = vmul.f32 0.2, %v1570_v36  ;;  %v710_v35 = vsel %vm624_vm13, %v1504_v61, %v667_v20  ;;  %v711_v34 = vsel %vm625_vm14, %v1507_v55, %v668_v57  ;;  %v713_v53 = vsel %vm627_vm0, %v1513_v19, %v670_v46  ;;  %v1949_v46 = vld [vmem:[#allocation2_spill] sm:$0xff] }
 0x16b   :  { %1942 = vst [vmem:[#allocation8_spill] sm:$0xff] %v1697_v12  ;;  %v712_v12 = vsel %vm626_vm15, %v1510_v58, %v669_v17  ;;  %v970_v38 = vpack.c.bf16 %v703_v16, %v1636_v41  ;;  %v975_v61 = vpack.c.bf16 %v705_v4, %v1654_v24  ;;  %v980_v20 = vpack.c.bf16 %v707_v8, %v706_v43 }
 0x16c   :  { %v690_v55 = vmul.f32 0.2, %v1573_v39  ;;  %vm1943_vm15 = vcmp.ge.f32.partialorder %v1516_v62, 0.0  ;;  %vm1944_vm10 = vcmp.ge.f32.partialorder %v1519_v3, 0.0  ;;  %v985_v19 = vpack.c.bf16 %v709_v27, %v708_v14 }
 0x16d   :  { %v714_v58 = vsel %vm1943_vm15, %v1516_v62, %v671_v60  ;;  %v715_v57 = vsel %vm1944_vm10, %v1519_v3, %v672_v23  ;;  %vm652_vm0 = vcmp.ge.f32.partialorder %v1588_v22, 0.0  ;;  %vm653_vm12 = vcmp.ge.f32.partialorder %v1591_v26, 0.0  ;;  %971 = vst [vmem:[%s1909_s4] sm:$0xff] %v970_v38   ;;  %v1951_v23 = vld [vmem:[#allocation3_spill] sm:$0xff] }
 0x16e   :  { %v691_v8 = vmul.f32 0.2, %v1576_v42  ;;  %vm1945_vm14 = vcmp.ge.f32.partialorder %v1522_v13, 0.0  ;;  %vm1946_vm13 = vcmp.ge.f32.partialorder %v1525_v63, 0.0  ;;  %v990_v62 = vpack.c.bf16 %v711_v34, %v710_v35  ;;  %1072 = vst [vmem:[%s1909_s4 + $0x8] sm:$0xff] %v975_v61  }
 0x16f   :  { %v716_v41 = vsel %vm1945_vm14, %v1522_v13, %v673_v15  ;;  %v717_v17 = vsel %vm1946_vm13, %v1525_v63, %v674_v59  ;;  %vm655_vm15 = vcmp.ge.f32.partialorder %v1597_v30, 0.0  ;;  %v692_v3 = vmul.f32 0.2, %v1579_v45  ;;  %1073 = vst [vmem:[%s1909_s4 + $0x10] sm:$0xff] %v980_v20  }
 0x170   :  { %v718_v14 = vsel %vm632_vm2, %v1528_v0, %v675_v47  ;;  %vm1947_vm14 = vcmp.ge.f32.partialorder %v1531_v1, 0.0  ;;  %v995_v63 = vpack.c.bf16 %v713_v53, %v712_v12  ;;  %vm656_vm13 = vcmp.ge.f32.partialorder %v1600_v33, 0.0  ;;  %1074 = vst [vmem:[%s1909_s4 + $0x18] sm:$0xff] %v985_v19   ;;  %v1953_v47 = vld [vmem:[#allocation4_spill] sm:$0xff] }
 0x171   :  { %v719_v13 = vsel %vm1947_vm14, %v1531_v1, %v676_v18  ;;  %vm657_vm10 = vcmp.ge.f32.partialorder %v1603_v37, 0.0  ;;  %v693_v27 = vmul.f32 0.2, %v1582_v56  ;;  %v720_v34 = vsel %vm634_vm4, %v1534_v2, %v677_v54  ;;  %1075 = vst [vmem:[%s1909_s4 + $0x20] sm:$0xff] %v990_v62  }
 0x172   :  { %vm1948_vm2 = vcmp.ge.f32.partialorder %v1537_v5, 0.0  ;;  %v1000_v1 = vpack.c.bf16 %v715_v57, %v714_v58  ;;  %v694_v12 = vmul.f32 0.2, %v1585_v7  ;;  %v722_v16 = vsel %vm636_vm5, %v1949_v46, %v679_v40  ;;  %1076 = vst [vmem:[%s1909_s4 + $0x28] sm:$0xff] %v995_v63  }
 0x173   :  { %v721_v0 = vsel %vm1948_vm2, %v1537_v5, %v678_v44  ;;  %vm1950_vm14 = vcmp.ge.f32.partialorder %v1543_v10, 0.0  ;;  %v1005_v2 = vpack.c.bf16 %v717_v17, %v716_v41  ;;  %v695_v5 = vmul.f32 0.2, %v1588_v22  ;;  %v1955_v44 = vld [vmem:[#allocation5_spill] sm:$0xff] }
 0x174   :  { %v723_v60 = vsel %vm1950_vm14, %v1543_v10, %v680_v51  ;;  %v724_v15 = vsel %vm638_vm6, %v1951_v23, %v681_v52  ;;  %vm1952_vm4 = vcmp.ge.f32.partialorder %v1549_v11, 0.0  ;;  %v1010_v10 = vpack.c.bf16 %v719_v13, %v718_v14  ;;  %1077 = vst [vmem:[%s1909_s4 + $0x30] sm:$0xff] %v1000_v1  }
 0x175   :  { %v725_v24 = vsel %vm1952_vm4, %v1549_v11, %v682_v48  ;;  %v696_v59 = vmul.f32 0.2, %v1591_v26  ;;  %v726_v18 = vsel %vm640_vm7, %v1953_v47, %v683_v21  ;;  %vm1954_vm5 = vcmp.ge.f32.partialorder %v1555_v25, 0.0  ;;  %v1956_v48 = vld [vmem:[#allocation8_spill] sm:$0xff]  ;;  %v1957_v21 = vld [vmem:[#allocation6_spill] sm:$0xff]  ;;  %1078 = vst [vmem:[%s1909_s4 + $0x38] sm:$0xff] %v1005_v2  }
 0x176   :  { %v727_v4 = vsel %vm1954_vm5, %v1555_v25, %v684_v9  ;;  %v1015_v11 = vpack.c.bf16 %v721_v0, %v720_v34  ;;  %v697_v54 = vmul.f32 0.2, %v1594_v28  ;;  %v728_v40 = vsel %vm642_vm8, %v1955_v44, %v1685_v6  ;;  %1079 = vst [vmem:[%s1909_s4 + $0x40] sm:$0xff] %v1010_v10  }
 0x177   :  { %v729_v43 = vsel %vm643_vm3, %v1561_v29, %v686_v49  ;;  %v1020_v25 = vpack.c.bf16 %v723_v60, %v722_v16  ;;  %v698_v51 = vmul.f32 0.2, %v1597_v30  ;;  %v730_v52 = vsel %vm644_vm9, %v1564_v31, %v1694_v32 }
 0x178   :  { %v731_v6 = vsel %vm645_vm1, %v1957_v21, %v1956_v48  ;;  %v1025_v29 = vpack.c.bf16 %v725_v24, %v724_v15  ;;  %v699_v9 = vmul.f32 0.2, %v1600_v33  ;;  %vm1958_vm3 = vcmp.ge.f32.partialorder %v1570_v36, 0.0  ;;  %1080 = vst [vmem:[%s1909_s4 + $0x48] sm:$0xff] %v1015_v11  }
 0x179   :  { %v732_v49 = vsel %vm1958_vm3, %v1570_v36, %v1705_v50  ;;  %v733_v31 = vsel %vm647_vm11, %v1573_v39, %v690_v55  ;;  %v1030_v32 = vpack.c.bf16 %v727_v4, %v726_v18  ;;  %v700_v35 = vmul.f32 0.2, %v1603_v37  ;;  %v1961_v39 = vld [vmem:[#allocation7_spill] sm:$0xff]  ;;  %1081 = vst [vmem:[%s1909_s4 + $0x50] sm:$0xff] %v1020_v25  }
 0x17a   :  { %vm1959_vm1 = vcmp.ge.f32.partialorder %v1576_v42, 0.0  ;;  %vm1960_vm6 = vcmp.ge.f32.partialorder %v1579_v45, 0.0  ;;  %v1035_v36 = vpack.c.bf16 %v729_v43, %v728_v40  ;;  %v701_v50 = vmul.f32 0.2, %v1961_v39  ;;  %1082 = vst [vmem:[%s1909_s4 + $0x58] sm:$0xff] %v1025_v29  }
 0x17b   :  { %v734_v53 = vsel %vm1959_vm1, %v1576_v42, %v691_v8  ;;  %v735_v38 = vsel %vm1960_vm6, %v1579_v45, %v692_v3  ;;  %vm1962_vm7 = vcmp.ge.f32.partialorder %v1582_v56, 0.0  ;;  %vm1963_vm8 = vcmp.ge.f32.partialorder %v1585_v7, 0.0  ;;  %1083 = vst [vmem:[%s1909_s4 + $0x60] sm:$0xff] %v1030_v32  }
 0x17c   :  { %v736_v61 = vsel %vm1962_vm7, %v1582_v56, %v693_v27  ;;  %v737_v20 = vsel %vm1963_vm8, %v1585_v7, %v694_v12  ;;  %v1040_v42 = vpack.c.bf16 %v731_v6, %v730_v52  ;;  %vm658_vm9 = vcmp.ge.f32.partialorder %v1961_v39, 0.0  ;;  %1084 = vst [vmem:[%s1909_s4 + $0x68] sm:$0xff] %v1035_v36  }
 0x17d   :  { %v738_v45 = vsel %vm652_vm0, %v1588_v22, %v695_v5  ;;  %v739_v55 = vsel %vm653_vm12, %v1591_v26, %v696_v59  ;;  %v1045_v56 = vpack.c.bf16 %v733_v31, %v732_v49  ;;  %vm1964_vm11 = vcmp.ge.f32.partialorder %v1594_v28, 0.0 }
 0x17e   :  { %v740_v7 = vsel %vm1964_vm11, %v1594_v28, %v697_v54  ;;  %v741_v58 = vsel %vm655_vm15, %v1597_v30, %v698_v51  ;;  %v1050_v22 = vpack.c.bf16 %v735_v38, %v734_v53  ;;  %v742_v26 = vsel %vm656_vm13, %v1600_v33, %v699_v9  ;;  %1085 = vst [vmem:[%s1909_s4 + $0x70] sm:$0xff] %v1040_v42  }
 0x17f   :  { %v743_v57 = vsel %vm657_vm10, %v1603_v37, %v700_v35  ;;  %v1055_v28 = vpack.c.bf16 %v737_v20, %v736_v61  ;;  %v744_v30 = vsel %vm658_vm9, %v1961_v39, %v701_v50  ;;  %v1060_v19 = vpack.c.bf16 %v739_v55, %v738_v45  ;;  %1086 = vst [vmem:[%s1909_s4 + $0x78] sm:$0xff] %v1045_v56  }
 0x180   :  { %v1065_v33 = vpack.c.bf16 %v741_v58, %v740_v7  ;;  %1087 = vst [vmem:[%s1909_s4 + $0x80] sm:$0xff] %v1050_v22   ;;  %v1070_v37 = vpack.c.bf16 %v743_v57, %v742_v26  ;;  %v787_v8 = vpack.c.bf16 %v744_v30, %v744_v30 }
 0x181   :  { %1088 = vst [vmem:[%s1909_s4 + $0x88] sm:$0xff] %v1055_v28  }
 0x182   :  { %1089 = vst [vmem:[%s1909_s4 + $0x90] sm:$0xff] %v1060_v19  }
 0x183   :  { %1090 = vst [vmem:[%s1909_s4 + $0x98] sm:$0xff] %v1065_v33  }
 0x184   :  { %1091 = vst [vmem:[%s1909_s4 + $0xa0] sm:$0xff] %v1070_v37  }
 0x185   :  { %830 = vst [vmem:[%s1909_s4 + $0xa8] sm:$0x1] %v787_v8 }

// kernel: vae_forward.6
= control target key start
LH: loop header
LB: loop body
LE: loop exit
PB: predicated region body
PF: predicated region fallthrough
CT: control target
= control target key end

     0   :  { %vm478_vm0 = vcmask 1041408   ;;  %s1078_s1 = inlined_call_operand.vmem [shape: bf16[512,128], index: 1, kind: input, shape index: {}]   ;;  %s1079_s0 = inlined_call_operand.vmem [shape: bf16[50,512], index: 0, kind: input, shape index: {}]   ;;  %s1080_s2 = inlined_call_operand.vmem [shape: f32[1,128], index: 2, kind: input, shape index: {}]   ;;  %s1081_s3 = inlined_call_operand.vmem [shape: f32[1,128], index: 3, kind: input, shape index: {}]   ;;  %s1082_s4 = inlined_call_operand.vmem [shape: bf16[50,128], index: 4, kind: output, shape index: {}]  }
   0x1   :  { %v781_v0 = vld [vmem:[%s1078_s1 + $0x38] sm:$0xff]  ;;  %v780_v4 = vld [vmem:[%s1078_s1 + $0x30] sm:$0xff]  ;;  %v779_v8 = vld [vmem:[%s1078_s1 + $0x28] sm:$0xff] }
   0x2   :  { %v789_v1 = vld [vmem:[%s1078_s1 + $0x78] sm:$0xff]  ;;  %361 = vmatpush.bf16.msra.mxu0 %v781_v0  ;;  %v788_v5 = vld [vmem:[%s1078_s1 + $0x70] sm:$0xff]  ;;  %v787_v9 = vld [vmem:[%s1078_s1 + $0x68] sm:$0xff] }
   0x3   :  { %v797_v2 = vld [vmem:[%s1078_s1 + $0xb8] sm:$0xff]  ;;  %389 = vmatpush.bf16.msra.mxu1 %v789_v1  ;;  %v796_v6 = vld [vmem:[%s1078_s1 + $0xb0] sm:$0xff]  ;;  %v795_v10 = vld [vmem:[%s1078_s1 + $0xa8] sm:$0xff] }
   0x4   :  { %v805_v3 = vld [vmem:[%s1078_s1 + $0xf8] sm:$0xff]  ;;  %417 = vmatpush.bf16.msra.mxu2 %v797_v2  ;;  %v804_v7 = vld [vmem:[%s1078_s1 + $0xf0] sm:$0xff]  ;;  %v803_v11 = vld [vmem:[%s1078_s1 + $0xe8] sm:$0xff] }
   0x5   :  { %445 = vmatpush.bf16.msra.mxu3 %v805_v3  ;;  %v778_v12 = vld [vmem:[%s1078_s1 + $0x20] sm:$0xff]  ;;  %v777_v16 = vld [vmem:[%s1078_s1 + $0x18] sm:$0xff]  ;;  %v776_v20 = vld [vmem:[%s1078_s1 + $0x10] sm:$0xff] }
   0x6   :  { %362 = vmatpush.bf16.msra.mxu0 %v780_v4  ;;  %v786_v13 = vld [vmem:[%s1078_s1 + $0x60] sm:$0xff]  ;;  %v785_v17 = vld [vmem:[%s1078_s1 + $0x58] sm:$0xff]  ;;  %v784_v21 = vld [vmem:[%s1078_s1 + $0x50] sm:$0xff] }
   0x7   :  { %390 = vmatpush.bf16.msra.mxu1 %v788_v5  ;;  %v794_v14 = vld [vmem:[%s1078_s1 + $0xa0] sm:$0xff]  ;;  %v793_v18 = vld [vmem:[%s1078_s1 + $0x98] sm:$0xff]  ;;  %v792_v22 = vld [vmem:[%s1078_s1 + $0x90] sm:$0xff] }
   0x8   :  { %418 = vmatpush.bf16.msra.mxu2 %v796_v6  ;;  %v802_v15 = vld [vmem:[%s1078_s1 + $0xe0] sm:$0xff]  ;;  %v801_v19 = vld [vmem:[%s1078_s1 + $0xd8] sm:$0xff]  ;;  %v800_v23 = vld [vmem:[%s1078_s1 + $0xd0] sm:$0xff] }
   0x9   :  { %446 = vmatpush.bf16.msra.mxu3 %v804_v7  ;;  %v775_v24 = vld [vmem:[%s1078_s1 + $0x8] sm:$0xff]  ;;  %v774_v28 = vld [vmem:[%s1078_s1] sm:$0xff]  ;;  %v764_v33 = vld [vmem:[%s1079_s0 + $0xc] sm:$0xf0] }
   0xa   :  { %363 = vmatpush.bf16.msra.mxu0 %v779_v8  ;;  %v783_v25 = vld [vmem:[%s1078_s1 + $0x48] sm:$0xff]  ;;  %v782_v29 = vld [vmem:[%s1078_s1 + $0x40] sm:$0xff]  ;;  %v590_v35 = vld [vmem:[%s1079_s0 + $0x10] sm:$0xf0] }
   0xb   :  { %391 = vmatpush.bf16.msra.mxu1 %v787_v9  ;;  %v791_v26 = vld [vmem:[%s1078_s1 + $0x88] sm:$0xff]  ;;  %v790_v30 = vld [vmem:[%s1078_s1 + $0x80] sm:$0xff]  ;;  %v765_v37 = vld [vmem:[%s1079_s0 + $0x14] sm:$0xf0] }
   0xc   :  { %419 = vmatpush.bf16.msra.mxu2 %v795_v10  ;;  %v799_v27 = vld [vmem:[%s1078_s1 + $0xc8] sm:$0xff]  ;;  %v798_v31 = vld [vmem:[%s1078_s1 + $0xc0] sm:$0xff]  ;;  %v598_v39 = vld [vmem:[%s1079_s0 + $0x18] sm:$0xf0] }
   0xd   :  { %447 = vmatpush.bf16.msra.mxu3 %v803_v11  ;;  %v588_v32 = vld [vmem:[%s1079_s0] sm:$0xf]  ;;  %v762_v34 = vld [vmem:[%s1079_s0 + $0x4] sm:$0xf]  ;;  %v596_v36 = vld [vmem:[%s1079_s0 + $0x8] sm:$0xf] }
   0xe   :  { %364 = vmatpush.bf16.msra.mxu0 %v778_v12  ;;  %v763_v38 = vld [vmem:[%s1079_s0 + $0xc] sm:$0xf]  ;;  %v589_v40 = vor.u32 %v764_v33, %v588_v32  ;;  %v593_v41 = vor.u32 %v762_v34, %v590_v35  ;;  %v597_v42 = vor.u32 %v765_v37, %v596_v36  ;;  %v604_v44 = vld [vmem:[%s1079_s0 + $0x20] sm:$0xf]  ;;  %v768_v45 = vld [vmem:[%s1079_s0 + $0x2c] sm:$0xf0] }
   0xf   :  { %392 = vmatpush.bf16.msra.mxu1 %v786_v13  ;;  %v601_v43 = vor.u32 %v763_v38, %v598_v39  ;;  %v766_v46 = vld [vmem:[%s1079_s0 + $0x24] sm:$0xf]  ;;  %v606_v47 = vld [vmem:[%s1079_s0 + $0x30] sm:$0xf0]  ;;  %v612_v48 = vld [vmem:[%s1079_s0 + $0x28] sm:$0xf]  ;;  %v605_v52 = vor.u32 %v768_v45, %v604_v44 }
  0x10   :  { %420 = vmatpush.bf16.msra.mxu2 %v794_v14  ;;  %v769_v49 = vld [vmem:[%s1079_s0 + $0x34] sm:$0xf0]  ;;  %v767_v50 = vld [vmem:[%s1079_s0 + $0x2c] sm:$0xf]  ;;  %v614_v51 = vld [vmem:[%s1079_s0 + $0x38] sm:$0xf0]  ;;  %v609_v53 = vor.u32 %v766_v46, %v606_v47 }
  0x11   :  { %448 = vmatpush.bf16.msra.mxu3 %v802_v15  ;;  %v613_v54 = vor.u32 %v769_v49, %v612_v48  ;;  %v617_v55 = vor.u32 %v767_v50, %v614_v51  ;;  %v620_v56 = vld [vmem:[%s1079_s0 + $0x40] sm:$0xf]  ;;  %v772_v57 = vld [vmem:[%s1079_s0 + $0x4c] sm:$0xf0]  ;;  %v770_v58 = vld [vmem:[%s1079_s0 + $0x44] sm:$0xf] }
  0x12   :  { %365 = vmatpush.bf16.msra.mxu0 %v777_v16  ;;  %v622_v59 = vld [vmem:[%s1079_s0 + $0x50] sm:$0xf0]  ;;  %v628_v60 = vld [vmem:[%s1079_s0 + $0x48] sm:$0xf]  ;;  %v773_v61 = vld [vmem:[%s1079_s0 + $0x54] sm:$0xf0]  ;;  %v621_v0 = vor.u32 %v772_v57, %v620_v56 }
  0x13   :  { %393 = vmatpush.bf16.msra.mxu1 %v785_v17  ;;  %v771_v62 = vld [vmem:[%s1079_s0 + $0x4c] sm:$0xf]  ;;  %v630_v63 = vld [vmem:[%s1079_s0 + $0x58] sm:$0xf0]  ;;  %v625_v1 = vor.u32 %v770_v58, %v622_v59  ;;  %v629_v2 = vor.u32 %v773_v61, %v628_v60  ;;  %v29_v4 = vld [vmem:[%s1079_s0 + $0x60] sm:$0x11] }
  0x14   :  { %421 = vmatpush.bf16.msra.mxu2 %v793_v18  ;;  %v633_v3 = vor.u32 %v771_v62, %v630_v63  ;;  %v30_v5 = vld [vmem:[%s1079_s0 + $0x68] sm:$0x11]  ;;  %v133_v6 = vunpack.c.l.b16 %v29_v4  ;;  %v134_v7 = vunpack.c.h.b16 %v29_v4 }
  0x15   :  { %449 = vmatpush.bf16.msra.mxu3 %v801_v19  ;;  %v135_v8 = vunpack.c.l.b16 %v30_v5  ;;  %v136_v9 = vunpack.c.h.b16 %v30_v5 }
  0x16   :  { %366 = vmatpush.bf16.msra.mxu0 %v776_v20  ;;  %v149_v10 = vpack.c.b16 %v133_v6, %v133_v6  ;;  %v150_v11 = vpack.c.b16 %v134_v7, %v134_v7 }
  0x17   :  { %394 = vmatpush.bf16.msra.mxu1 %v784_v21  ;;  %v151_v12 = vpack.c.b16 %v135_v8, %v135_v8  ;;  %v152_v13 = vpack.c.b16 %v136_v9, %v136_v9 }
  0x18   :  { %422 = vmatpush.bf16.msra.mxu2 %v792_v22 }
  0x19   :  { %450 = vmatpush.bf16.msra.mxu3 %v800_v23 }
  0x1a   :  { %367 = vmatpush.bf16.msra.mxu0 %v775_v24 }
  0x1b   :  { %395 = vmatpush.bf16.msra.mxu1 %v783_v25 }
  0x1c   :  { %423 = vmatpush.bf16.msra.mxu2 %v791_v26 }
  0x1d   :  { %451 = vmatpush.bf16.msra.mxu3 %v799_v27 }
  0x1e   :  { %368 = vmatpush.bf16.msra.mxu0 %v774_v28 }
  0x1f   :  { %396 = vmatpush.bf16.msra.mxu1 %v782_v29 }
  0x20   :  { %424 = vmatpush.bf16.msra.mxu2 %v790_v30 }
  0x21   :  { %452 = vmatpush.bf16.msra.mxu3 %v798_v31  ;;  %369 = vmatmul.bf16.vlgmr.msra.gmra.mxu0 %v589_v40 }
  0x22   :  { %397 = vmatmul.bf16.vlgmr.msra.gmra.mxu1 %v593_v41 }
  0x23   :  { %425 = vmatmul.bf16.vlgmr.msra.gmra.mxu2 %v597_v42 }
  0x24   :  { %453 = vmatmul.bf16.vlgmr.msra.gmra.mxu3 %v601_v43 }
  0x31   :  { %374 = vmatmul.bf16.gmra.mxu0 %v605_v52 }
  0x32   :  { %402 = vmatmul.bf16.gmra.mxu1 %v609_v53 }
  0x33   :  { %430 = vmatmul.bf16.gmra.mxu2 %v613_v54 }
  0x34   :  { %458 = vmatmul.bf16.gmra.mxu3 %v617_v55 }
  0x41   :  { %379 = vmatmul.bf16.gmra.mxu0 %v621_v0 }
  0x42   :  { %407 = vmatmul.bf16.gmra.mxu1 %v625_v1 }
  0x43   :  { %435 = vmatmul.bf16.gmra.mxu2 %v629_v2 }
  0x44   :  { %463 = vmatmul.bf16.gmra.mxu3 %v633_v3 }
  0x51   :  { %384 = vmatmul.bf16.gmra.mxu0 %v149_v10 }
  0x52   :  { %412 = vmatmul.bf16.gmra.mxu1 %v150_v11 }
  0x53   :  { %440 = vmatmul.bf16.gmra.mxu2 %v151_v12 }
  0x54   :  { %468 = vmatmul.bf16.gmra.mxu3 %v152_v13 }
  0x9e   :  { %v370_v14 = vpop.f32.mrf.mxu0 }
  0x9f   :  { %v398_v15 = vpop.f32.mrf.mxu1 }
  0xa0   :  { %v399_v32 = vadd.f32 %v398_v15, %v370_v14 }
  0xa6   :  { %v426_v16 = vpop.f32.mrf.mxu2  ;;  %v372_v18 = vpop.f32.mrf.mxu0 }
  0xa7   :  { %v454_v17 = vpop.f32.mrf.mxu3  ;;  %v400_v19 = vpop.f32.mrf.mxu1  ;;  %v427_v40 = vadd.f32 %v426_v16, %v399_v32 }
  0xa8   :  { %v401_v33 = vadd.f32 %v400_v19, %v372_v18 }
  0xa9   :  { %v1026_v46 = vadd.f32 %v454_v17, %v427_v40 }
  0xab   :  { %v488_v57 = vmul.f32 %v1026_v46, %v1026_v46 }
  0xae   :  { %v428_v20 = vpop.f32.mrf.mxu2  ;;  %v375_v22 = vpop.f32.mrf.mxu0 }
  0xaf   :  { %v456_v21 = vpop.f32.mrf.mxu3  ;;  %v403_v23 = vpop.f32.mrf.mxu1  ;;  %v429_v39 = vadd.f32 %v428_v20, %v401_v33 }
  0xb0   :  { %v404_v34 = vadd.f32 %v403_v23, %v375_v22 }
  0xb1   :  { %v1024_v44 = vadd.f32 %v456_v21, %v429_v39 }
  0xb3   :  { %v489_v54 = vmul.f32 %v1024_v44, %v1024_v44  ;;  %v473_v58 = vadd.f32 %v1024_v44, %v1026_v46 }
  0xb5   :  { %v495_v62 = vadd.f32 %v489_v54, %v488_v57 }
  0xb6   :  { %v431_v24 = vpop.f32.mrf.mxu2  ;;  %v377_v26 = vpop.f32.mrf.mxu0 }
  0xb7   :  { %v459_v25 = vpop.f32.mrf.mxu3  ;;  %v405_v27 = vpop.f32.mrf.mxu1  ;;  %v432_v41 = vadd.f32 %v431_v24, %v404_v34 }
  0xb8   :  { %v406_v42 = vadd.f32 %v405_v27, %v377_v26 }
  0xb9   :  { %v1028_v47 = vadd.f32 %v459_v25, %v432_v41 }
  0xbb   :  { %v490_v59 = vmul.f32 %v1028_v47, %v1028_v47  ;;  %v474_v63 = vadd.f32 %v473_v58, %v1028_v47 }
  0xbd   :  { %v496_v2 = vadd.f32 %v495_v62, %v490_v59 }
  0xbe   :  { %v433_v28 = vpop.f32.mrf.mxu2  ;;  %v380_v30 = vpop.f32.mrf.mxu0 }
  0xbf   :  { %v461_v29 = vpop.f32.mrf.mxu3  ;;  %v408_v31 = vpop.f32.mrf.mxu1  ;;  %v434_v45 = vadd.f32 %v433_v28, %v406_v42 }
  0xc0   :  { %v409_v43 = vadd.f32 %v408_v31, %v380_v30 }
  0xc1   :  { %v1032_v55 = vadd.f32 %v461_v29, %v434_v45 }
  0xc3   :  { %v491_v0 = vmul.f32 %v1032_v55, %v1032_v55  ;;  %v475_v3 = vadd.f32 %v474_v63, %v1032_v55 }
  0xc5   :  { %v497_v10 = vadd.f32 %v496_v2, %v491_v0 }
  0xc6   :  { %v436_v35 = vpop.f32.mrf.mxu2  ;;  %v382_v37 = vpop.f32.mrf.mxu0 }
  0xc7   :  { %v464_v36 = vpop.f32.mrf.mxu3  ;;  %v410_v38 = vpop.f32.mrf.mxu1  ;;  %v437_v48 = vadd.f32 %v436_v35, %v409_v43 }
  0xc8   :  { %v411_v49 = vadd.f32 %v410_v38, %v382_v37 }
  0xc9   :  { %v1040_v60 = vadd.f32 %v464_v36, %v437_v48 }
  0xcb   :  { %v492_v4 = vmul.f32 %v1040_v60, %v1040_v60  ;;  %v476_v11 = vadd.f32 %v475_v3, %v1040_v60 }
  0xcd   :  { %v498_v14 = vadd.f32 %v497_v10, %v492_v4 }
  0xce   :  { %v438_v50 = vpop.f32.mrf.mxu2  ;;  %v385_v52 = vpop.f32.mrf.mxu0 }
  0xcf   :  { %v466_v51 = vpop.f32.mrf.mxu3  ;;  %v413_v53 = vpop.f32.mrf.mxu1  ;;  %v439_v56 = vadd.f32 %v438_v50, %v411_v49  ;;  %v509_v49 = vld [vmem:[%s1080_s2] sm:$0x1] }
  0xd0   :  { %v414_v61 = vadd.f32 %v413_v53, %v385_v52  ;;  %v524_v53 = vld [vmem:[%s1081_s3] sm:$0x1] }
  0xd1   :  { %v1045_v1 = vadd.f32 %v466_v51, %v439_v56 }
  0xd3   :  { %v493_v12 = vmul.f32 %v1045_v1, %v1045_v1  ;;  %v477_v15 = vadd.f32 %v476_v11, %v1045_v1 }
  0xd5   :  { %v499_v18 = vadd.f32 %v498_v14, %v493_v12 }
  0xd6   :  { %v441_v5 = vpop.f32.mrf.mxu2  ;;  %v387_v8 = vpop.f32.mrf.mxu0 }
  0xd7   :  { %v469_v6 = vpop.f32.mrf.mxu3  ;;  %v442_v7 = vadd.f32 %v441_v5, %v414_v61  ;;  %v415_v9 = vpop.f32.mrf.mxu1 }
  0xd9   :  { %v470_v13 = vadd.f32 %v469_v6, %v442_v7 }
  0xdb   :  { %v479_v16 = vsel %vm478_vm0, %v470_v13, 0.0  ;;  %v494_v17 = vmul.f32 %v470_v13, %v470_v13 }
  0xdc   :  { %v480_v19 = vadd.f32 %v479_v16, %v477_v15 }
  0xdd   :  { %v500_v20 = vsel %vm478_vm0, %v494_v17, 0.0 }
  0xde   :  { %v481_v21 = vrot.slane %v480_v19, 4  ;;  %v501_v22 = vadd.f32 %v500_v20, %v499_v18  ;;  %v443_v23 = vpop.f32.mrf.mxu2 }
  0xdf   :  { %v471_v24 = vpop.f32.mrf.mxu3 }
  0xe0   :  { %v482_v25 = vadd.f32 %v481_v21, %v480_v19  ;;  %v502_v26 = vrot.slane %v501_v22, 4 }
  0xe2   :  { %v483_v27 = vrot.slane %v482_v25, 2  ;;  %v503_v28 = vadd.f32 %v502_v26, %v501_v22 }
  0xe4   :  { %v484_v29 = vadd.f32 %v483_v27, %v482_v25  ;;  %v504_v30 = vrot.slane %v503_v28, 2 }
  0xe6   :  { %v485_v31 = vrot.slane %v484_v29, 1  ;;  %v505_v32 = vadd.f32 %v504_v30, %v503_v28 }
  0xe8   :  { %v486_v33 = vadd.f32 %v485_v31, %v484_v29  ;;  %v506_v34 = vrot.slane %v505_v32, 1 }
  0xea   :  { %v487_v35 = vmul.f32 0.02, %v486_v33  ;;  %v507_v36 = vadd.f32 %v506_v34, %v505_v32 }
  0xec   :  { %v508_v37 = vmul.f32 0.02, %v507_v36  ;;  %v510_v38 = vmul.f32 %v487_v35, %v487_v35 }
  0xee   :  { %v511_v39 = vsub.f32 %v508_v37, %v510_v38 }
  0xf0   :  { %v512_v40 = vadd.f32 1e-05, %v511_v39 }
  0xf2   :  { %823 = vrsqrt.f32 %v512_v40  ;;  %vm519_vm2 = vweird.f32 %v512_v40 }
  0xf8   :  { %v824_v41 = vpop.eup %823 }
  0xf9   :  { %v514_v42 = vmul.f32 %v824_v41, %v512_v40  ;;  %vm520_vm1 = vweird.f32 %v824_v41 }
  0xfa   :  { %vm521_vm3 = vmor %vm519_vm2, %vm520_vm1 }
  0xfb   :  { %v515_v43 = vmul.f32 %v824_v41, %v514_v42 }
  0xfd   :  { %v516_v45 = vmul.f32 0.5, %v515_v43 }
  0xff   :  { %v517_v48 = vsub.f32 1.5, %v516_v45 }
 0x101   :  { %v518_v50 = vmul.f32 %v824_v41, %v517_v48 }
 0x103   :  { %v522_v51 = vsel %vm521_vm3, %v824_v41, %v518_v50 }
 0x104   :  { %v523_v52 = vmul.f32 %v522_v51, %v509_v49 }
 0x106   :  { %v525_v54 = vmul.f32 %v523_v52, %v487_v35  ;;  %v528_v56 = vperm.slane %v523_v52, 0 }
 0x108   :  { %v526_v57 = vsub.f32 %v524_v53, %v525_v54  ;;  %v530_v58 = vmul.f32 %v528_v56, %v1026_v46  ;;  %v531_v59 = vmul.f32 %v528_v56, %v1024_v44  ;;  %v532_v61 = vmul.f32 %v528_v56, %v1028_v47 }
 0x109   :  { %v533_v62 = vmul.f32 %v528_v56, %v1032_v55  ;;  %v534_v0 = vmul.f32 %v528_v56, %v1040_v60  ;;  %v535_v2 = vmul.f32 %v528_v56, %v1045_v1  ;;  %v536_v3 = vmul.f32 %v528_v56, %v470_v13 }
 0x10a   :  { %v538_v63 = vperm.slane %v526_v57, 0 }
 0x10c   :  { %v540_v4 = vadd.f32 %v538_v63, %v530_v58  ;;  %v541_v5 = vadd.f32 %v538_v63, %v531_v59  ;;  %v542_v6 = vadd.f32 %v538_v63, %v532_v61  ;;  %v543_v7 = vadd.f32 %v538_v63, %v533_v62 }
 0x10d   :  { %v544_v8 = vadd.f32 %v538_v63, %v534_v0  ;;  %v545_v9 = vadd.f32 %v538_v63, %v535_v2  ;;  %v546_v10 = vadd.f32 %v538_v63, %v536_v3 }
 0x10e   :  { %vm547_vm4 = vcmp.ge.f32.partialorder %v540_v4, 0.0  ;;  %vm548_vm5 = vcmp.ge.f32.partialorder %v541_v5, 0.0  ;;  %vm549_vm6 = vcmp.ge.f32.partialorder %v542_v6, 0.0  ;;  %vm550_vm7 = vcmp.ge.f32.partialorder %v543_v7, 0.0 }
 0x10f   :  { %vm551_vm8 = vcmp.ge.f32.partialorder %v544_v8, 0.0  ;;  %vm552_vm9 = vcmp.ge.f32.partialorder %v545_v9, 0.0  ;;  %vm553_vm10 = vcmp.ge.f32.partialorder %v546_v10, 0.0  ;;  %v554_v44 = vmul.f32 0.2, %v540_v4 }
 0x110   :  { %v555_v46 = vmul.f32 0.2, %v541_v5  ;;  %v556_v47 = vmul.f32 0.2, %v542_v6  ;;  %v557_v55 = vmul.f32 0.2, %v543_v7 }
 0x111   :  { %v558_v60 = vmul.f32 0.2, %v544_v8  ;;  %v559_v1 = vmul.f32 0.2, %v545_v9  ;;  %v560_v11 = vmul.f32 0.2, %v546_v10  ;;  %v561_v12 = vsel %vm547_vm4, %v540_v4, %v554_v44 }
 0x112   :  { %v562_v13 = vsel %vm548_vm5, %v541_v5, %v555_v46  ;;  %v563_v14 = vsel %vm549_vm6, %v542_v6, %v556_v47  ;;  %v564_v15 = vsel %vm550_vm7, %v543_v7, %v557_v55 }
 0x113   :  { %v565_v16 = vsel %vm551_vm8, %v544_v8, %v558_v60  ;;  %v566_v17 = vsel %vm552_vm9, %v545_v9, %v559_v1  ;;  %v567_v18 = vsel %vm553_vm10, %v546_v10, %v560_v11  ;;  %v809_v19 = vpack.c.bf16 %v562_v13, %v561_v12 }
 0x114   :  { %v574_v20 = vpack.c.bf16 %v567_v18, %v567_v18  ;;  %v814_v21 = vpack.c.bf16 %v564_v15, %v563_v14  ;;  %v819_v22 = vpack.c.bf16 %v566_v17, %v565_v16 }
 0x115   :  { %810 = vst [vmem:[%s1082_s4] sm:$0xff] %v809_v19  }
 0x116   :  { %821 = vst [vmem:[%s1082_s4 + $0x8] sm:$0xff] %v814_v21  }
 0x117   :  { %822 = vst [vmem:[%s1082_s4 + $0x10] sm:$0xff] %v819_v22  }
 0x118   :  { %581 = vst [vmem:[%s1082_s4 + $0x18] sm:$0x1] %v574_v20 }

// kernel: vae_forward.8
= control target key start
LH: loop header
LB: loop body
LE: loop exit
PB: predicated region body
PF: predicated region fallthrough
CT: control target
= control target key end

     0   :  { %vm512_vm0 = vcmask 523264   ;;  %vm760_vm1 = vcmask 1041408   ;;  %s1342_s27 = smov 64   ;;  %s1343_s28 = smov 32   ;;  %s1822_s1 = inlined_call_operand.vmem [shape: bf16[576,128], index: 1, kind: input, shape index: {}]   ;;  %s1823_s0 = inlined_call_operand.vmem [shape: bf16[98,576], index: 0, kind: input, shape index: {}]   ;;  %s1824_s2 = inlined_call_operand.vmem [shape: f32[1,128], index: 2, kind: input, shape index: {}]   ;;  %s1825_s3 = inlined_call_operand.vmem [shape: f32[1,128], index: 3, kind: input, shape index: {}]   ;;  %s1826_s4 = inlined_call_operand.vmem [shape: bf16[98,128], index: 4, kind: output, shape index: {}]  }
   0x1   :  { %v1248_v0 = vld [vmem:[%s1822_s1 + $0x38] sm:$0xff]  ;;  %v1247_v1 = vld [vmem:[%s1822_s1 + $0x30] sm:$0xff]  ;;  %v1246_v2 = vld [vmem:[%s1822_s1 + $0x28] sm:$0xff] }
   0x2   :  { %1312 = vmatpush.bf16.msra.mxu1 %v1248_v0  ;;  %1313 = vmatpush.bf16.msra.mxu2 %v1248_v0  ;;  %v1245_v3 = vld [vmem:[%s1822_s1 + $0x20] sm:$0xff]  ;;  %v1244_v4 = vld [vmem:[%s1822_s1 + $0x18] sm:$0xff]  ;;  %v1243_v5 = vld [vmem:[%s1822_s1 + $0x10] sm:$0xff] }
   0x3   :  { %1314 = vmatpush.bf16.msra.mxu3 %v1248_v0  ;;  %534 = vmatpush.bf16.msra.mxu0 %v1248_v0  ;;  %v1242_v6 = vld [vmem:[%s1822_s1 + $0x8] sm:$0xff]  ;;  %v1393_v7 = vld [vmem:[%s1823_s0 + $0xf0] sm:$0x11]  ;;  %v1241_v8 = vld [vmem:[%s1822_s1] sm:$0xff] }
   0x4   :  { %v982_v9 = vld [vmem:[%s1823_s0 + $0x50] sm:$0xf]  ;;  %v1223_v10 = vld [vmem:[%s1823_s0 + $0x60] sm:$0xf0]  ;;  %v1022_v11 = vld [vmem:[%s1823_s0 + $0xa0] sm:$0xf]  ;;  %v228_v15 = vunpack.c.l.b16 %v1393_v7 }
   0x5   :  { %v1233_v12 = vld [vmem:[%s1823_s0 + $0xb0] sm:$0xf0]  ;;  %v942_v13 = vld [vmem:[%s1823_s0] sm:$0xf]  ;;  %v1272_v16 = vld [vmem:[%s1822_s1 + $0xf8] sm:$0xff]  ;;  %v983_v18 = vor.u32 %v1223_v10, %v982_v9 }
   0x6   :  { %1315 = vmatpush.bf16.msra.mxu1 %v1247_v1  ;;  %1316 = vmatpush.bf16.msra.mxu2 %v1247_v1  ;;  %v1213_v14 = vld [vmem:[%s1823_s0 + $0x10] sm:$0xf0]  ;;  %v1264_v17 = vld [vmem:[%s1822_s1 + $0xb8] sm:$0xff]  ;;  %v1023_v19 = vor.u32 %v1233_v12, %v1022_v11  ;;  %v263_v22 = vpack.c.b16 %v228_v15, %v228_v15  ;;  %v1270_v28 = vld [vmem:[%s1822_s1 + $0xe8] sm:$0xff] }
   0x7   :  { %1317 = vmatpush.bf16.msra.mxu3 %v1247_v1  ;;  %535 = vmatpush.bf16.msra.mxu0 %v1247_v1  ;;  %v1256_v20 = vld [vmem:[%s1822_s1 + $0x78] sm:$0xff]  ;;  %v943_v21 = vor.u32 %v1213_v14, %v942_v13  ;;  %v1271_v24 = vld [vmem:[%s1822_s1 + $0xf0] sm:$0xff]  ;;  %v1262_v29 = vld [vmem:[%s1822_s1 + $0xa8] sm:$0xff] }
   0x8   :  { %v1276_v23 = vld [vmem:[%s1822_s1 + $0x118] sm:$0xff]  ;;  %v1263_v25 = vld [vmem:[%s1822_s1 + $0xb0] sm:$0xff]  ;;  %v1254_v30 = vld [vmem:[%s1822_s1 + $0x68] sm:$0xff] }
   0x9   :  { %v1255_v26 = vld [vmem:[%s1822_s1 + $0x70] sm:$0xff]  ;;  %v1274_v31 = vld [vmem:[%s1822_s1 + $0x108] sm:$0xff]  ;;  %v1269_v32 = vld [vmem:[%s1822_s1 + $0xe0] sm:$0xff] }
   0xa   :  { %1318 = vmatpush.bf16.msra.mxu1 %v1246_v2  ;;  %1319 = vmatpush.bf16.msra.mxu2 %v1246_v2  ;;  %v1275_v27 = vld [vmem:[%s1822_s1 + $0x110] sm:$0xff]  ;;  %v1261_v33 = vld [vmem:[%s1822_s1 + $0xa0] sm:$0xff]  ;;  %v1002_v35 = vld [vmem:[%s1823_s0 + $0x78] sm:$0xf] }
   0xb   :  { %1320 = vmatpush.bf16.msra.mxu3 %v1246_v2  ;;  %536 = vmatpush.bf16.msra.mxu0 %v1246_v2  ;;  %v1253_v34 = vld [vmem:[%s1822_s1 + $0x60] sm:$0xff]  ;;  %v1228_v36 = vld [vmem:[%s1823_s0 + $0x88] sm:$0xf0]  ;;  %v1042_v37 = vld [vmem:[%s1823_s0 + $0xc8] sm:$0xf] }
   0xc   :  { %v1238_v38 = vld [vmem:[%s1823_s0 + $0xd8] sm:$0xf0]  ;;  %v962_v39 = vld [vmem:[%s1823_s0 + $0x28] sm:$0xf]  ;;  %v1273_v41 = vld [vmem:[%s1822_s1 + $0x100] sm:$0xff]  ;;  %v1003_v44 = vor.u32 %v1228_v36, %v1002_v35 }
   0xd   :  { %v1218_v40 = vld [vmem:[%s1823_s0 + $0x38] sm:$0xf0]  ;;  %v1043_v45 = vor.u32 %v1238_v38, %v1042_v37  ;;  %v1267_v48 = vld [vmem:[%s1822_s1 + $0xd0] sm:$0xff]  ;;  %v1266_v51 = vld [vmem:[%s1822_s1 + $0xc8] sm:$0xff] }
   0xe   :  { %1321 = vmatpush.bf16.msra.mxu1 %v1245_v3  ;;  %1322 = vmatpush.bf16.msra.mxu2 %v1245_v3  ;;  %v1268_v42 = vld [vmem:[%s1822_s1 + $0xd8] sm:$0xff]  ;;  %v963_v47 = vor.u32 %v1218_v40, %v962_v39  ;;  %v1259_v49 = vld [vmem:[%s1822_s1 + $0x90] sm:$0xff]  ;;  %v1258_v52 = vld [vmem:[%s1822_s1 + $0x88] sm:$0xff] }
   0xf   :  { %1323 = vmatpush.bf16.msra.mxu3 %v1245_v3  ;;  %537 = vmatpush.bf16.msra.mxu0 %v1245_v3  ;;  %v1260_v43 = vld [vmem:[%s1822_s1 + $0x98] sm:$0xff]  ;;  %v1251_v50 = vld [vmem:[%s1822_s1 + $0x50] sm:$0xff]  ;;  %v1250_v53 = vld [vmem:[%s1822_s1 + $0x48] sm:$0xff] }
  0x10   :  { %v1252_v46 = vld [vmem:[%s1822_s1 + $0x58] sm:$0xff]  ;;  %v1265_v54 = vld [vmem:[%s1822_s1 + $0xc0] sm:$0xff]  ;;  %v1212_v56 = vld [vmem:[%s1823_s0 + $0xc] sm:$0xf] }
  0x11   :  { %v1257_v55 = vld [vmem:[%s1822_s1 + $0x80] sm:$0xff]  ;;  %v944_v60 = vld [vmem:[%s1823_s0 + $0x14] sm:$0xf0]  ;;  %v950_v61 = vld [vmem:[%s1823_s0 + $0x8] sm:$0xf] }
  0x12   :  { %1324 = vmatpush.bf16.msra.mxu1 %v1244_v4  ;;  %1325 = vmatpush.bf16.msra.mxu2 %v1244_v4  ;;  %v952_v57 = vld [vmem:[%s1823_s0 + $0x1c] sm:$0xf0]  ;;  %v1211_v59 = vld [vmem:[%s1823_s0 + $0x4] sm:$0xf]  ;;  %v1214_v62 = vld [vmem:[%s1823_s0 + $0x18] sm:$0xf0] }
  0x13   :  { %1326 = vmatpush.bf16.msra.mxu3 %v1244_v4  ;;  %538 = vmatpush.bf16.msra.mxu0 %v1244_v4  ;;  %v1249_v58 = vld [vmem:[%s1822_s1 + $0x40] sm:$0xff]  ;;  %v955_v63 = vor.u32 %v1212_v56, %v952_v57  ;;  %v958_v0 = vld [vmem:[%s1823_s0 + $0x10] sm:$0xf]  ;;  %v947_v2 = vor.u32 %v1211_v59, %v944_v60  ;;  %v951_v3 = vor.u32 %v1214_v62, %v950_v61  ;;  %v978_v13 = vld [vmem:[%s1823_s0 + $0x38] sm:$0xf] }
  0x14   :  { %v1215_v1 = vld [vmem:[%s1823_s0 + $0x20] sm:$0xf0]  ;;  %v964_v9 = vld [vmem:[%s1823_s0 + $0x3c] sm:$0xf0]  ;;  %v970_v10 = vld [vmem:[%s1823_s0 + $0x30] sm:$0xf] }
  0x15   :  { %v959_v4 = vor.u32 %v1215_v1, %v958_v0  ;;  %v1219_v11 = vld [vmem:[%s1823_s0 + $0x40] sm:$0xf0]  ;;  %v1220_v14 = vld [vmem:[%s1823_s0 + $0x48] sm:$0xf0]  ;;  %v1229_v35 = vld [vmem:[%s1823_s0 + $0x90] sm:$0xf0] }
  0x16   :  { %1327 = vmatpush.bf16.msra.mxu1 %v1243_v5  ;;  %1328 = vmatpush.bf16.msra.mxu2 %v1243_v5  ;;  %v1018_v37 = vld [vmem:[%s1823_s0 + $0x88] sm:$0xf]  ;;  %v1230_v38 = vld [vmem:[%s1823_s0 + $0x98] sm:$0xf0]  ;;  %v1236_v56 = vld [vmem:[%s1823_s0 + $0xcc] sm:$0xf] }
  0x17   :  { %1329 = vmatpush.bf16.msra.mxu3 %v1243_v5  ;;  %539 = vmatpush.bf16.msra.mxu0 %v1243_v5  ;;  %v1217_v5 = vld [vmem:[%s1823_s0 + $0x34] sm:$0xf]  ;;  %v1044_v57 = vld [vmem:[%s1823_s0 + $0xdc] sm:$0xf0]  ;;  %v1239_v59 = vld [vmem:[%s1823_s0 + $0xe0] sm:$0xf0] }
  0x18   :  { %v1058_v61 = vld [vmem:[%s1823_s0 + $0xd8] sm:$0xf]  ;;  %v1240_v62 = vld [vmem:[%s1823_s0 + $0xe8] sm:$0xf0] }
  0x19   :  { %v1059_v1 = vor.u32 %v1240_v62, %v1058_v61 }
  0x1a   :  { %1330 = vmatpush.bf16.msra.mxu1 %v1242_v6  ;;  %1331 = vmatpush.bf16.msra.mxu2 %v1242_v6 }
  0x1b   :  { %1332 = vmatpush.bf16.msra.mxu3 %v1242_v6  ;;  %540 = vmatpush.bf16.msra.mxu0 %v1242_v6  ;;  %v972_v6 = vld [vmem:[%s1823_s0 + $0x44] sm:$0xf0] }
  0x1c   :  { %v975_v12 = vor.u32 %v1217_v5, %v972_v6  ;;  %v229_v5 = vunpack.c.h.b16 %v1393_v7 }
  0x1e   :  { %1333 = vmatpush.bf16.msra.mxu1 %v1241_v8  ;;  %1334 = vmatpush.bf16.msra.mxu2 %v1241_v8 }
  0x1f   :  { %1335 = vmatpush.bf16.msra.mxu3 %v1241_v8  ;;  %541 = vmatpush.bf16.msra.mxu0 %v1241_v8  ;;  %v1216_v8 = vld [vmem:[%s1823_s0 + $0x2c] sm:$0xf] }
  0x20   :  { %v967_v15 = vor.u32 %v1216_v8, %v964_v9 }
  0x21   :  { %552 = vmatmul.bf16.vlgmr.msra.gmra.mxu1 %v983_v18  ;;  %562 = vmatmul.bf16.vlgmr.msra.gmra.mxu2 %v1023_v19  ;;  %v1222_v18 = vld [vmem:[%s1823_s0 + $0x5c] sm:$0xf]  ;;  %v992_v19 = vld [vmem:[%s1823_s0 + $0x6c] sm:$0xf0] }
  0x22   :  { %620 = vmatpush.bf16.msrb.mxu2 %v1264_v17  ;;  %577 = vmatpush.bf16.msrb.mxu1 %v1256_v20  ;;  %v979_v17 = vor.u32 %v1220_v14, %v978_v13  ;;  %v1221_v20 = vld [vmem:[%s1823_s0 + $0x54] sm:$0xf] }
  0x23   :  { %663 = vmatpush.bf16.msrb.mxu3 %v1272_v16  ;;  %542 = vmatmul.bf16.vlgmr.msra.gmra.mxu0 %v943_v21  ;;  %v971_v16 = vor.u32 %v1219_v11, %v970_v10  ;;  %v984_v21 = vld [vmem:[%s1823_s0 + $0x64] sm:$0xf0]  ;;  %v264_v10 = vpack.c.b16 %v229_v5, %v229_v5 }
  0x24   :  { %572 = vmatmul.bf16.vlgmr.msra.gmra.mxu3 %v263_v22  ;;  %710 = vmatpush.bf16.msrb.mxu0 %v1276_v23  ;;  %v990_v22 = vld [vmem:[%s1823_s0 + $0x58] sm:$0xf]  ;;  %v1224_v23 = vld [vmem:[%s1823_s0 + $0x68] sm:$0xf0] }
  0x26   :  { %621 = vmatpush.bf16.msrb.mxu2 %v1263_v25  ;;  %578 = vmatpush.bf16.msrb.mxu1 %v1255_v26  ;;  %v998_v25 = vld [vmem:[%s1823_s0 + $0x60] sm:$0xf]  ;;  %v1225_v26 = vld [vmem:[%s1823_s0 + $0x70] sm:$0xf0] }
  0x27   :  { %664 = vmatpush.bf16.msrb.mxu3 %v1271_v24  ;;  %v995_v24 = vor.u32 %v1222_v18, %v992_v19 }
  0x28   :  { %711 = vmatpush.bf16.msrb.mxu0 %v1275_v27  ;;  %v987_v27 = vor.u32 %v1221_v20, %v984_v21 }
  0x2a   :  { %622 = vmatpush.bf16.msrb.mxu2 %v1262_v29  ;;  %579 = vmatpush.bf16.msrb.mxu1 %v1254_v30  ;;  %v999_v29 = vor.u32 %v1225_v26, %v998_v25  ;;  %v1227_v30 = vld [vmem:[%s1823_s0 + $0x84] sm:$0xf] }
  0x2b   :  { %665 = vmatpush.bf16.msrb.mxu3 %v1270_v28  ;;  %v991_v28 = vor.u32 %v1224_v23, %v990_v22 }
  0x2c   :  { %712 = vmatpush.bf16.msrb.mxu0 %v1274_v31  ;;  %v1012_v31 = vld [vmem:[%s1823_s0 + $0x94] sm:$0xf0] }
  0x2d   :  { %v1015_v36 = vor.u32 %v1227_v30, %v1012_v31 }
  0x2e   :  { %623 = vmatpush.bf16.msrb.mxu2 %v1261_v33  ;;  %580 = vmatpush.bf16.msrb.mxu1 %v1253_v34  ;;  %v1004_v33 = vld [vmem:[%s1823_s0 + $0x8c] sm:$0xf0]  ;;  %v1010_v34 = vld [vmem:[%s1823_s0 + $0x80] sm:$0xf] }
  0x2f   :  { %666 = vmatpush.bf16.msrb.mxu3 %v1269_v32  ;;  %v1226_v32 = vld [vmem:[%s1823_s0 + $0x7c] sm:$0xf]  ;;  %v1011_v40 = vor.u32 %v1229_v35, %v1010_v34 }
  0x30   :  { %713 = vmatpush.bf16.msrb.mxu0 %v1273_v41  ;;  %v1007_v39 = vor.u32 %v1226_v32, %v1004_v33  ;;  %v1019_v41 = vor.u32 %v1230_v38, %v1018_v37 }
  0x31   :  { %557 = vmatmul.bf16.gmra.mxu1 %v1003_v44  ;;  %567 = vmatmul.bf16.gmra.mxu2 %v1043_v45  ;;  %v1231_v44 = vld [vmem:[%s1823_s0 + $0xa4] sm:$0xf]  ;;  %v1024_v45 = vld [vmem:[%s1823_s0 + $0xb4] sm:$0xf0] }
  0x32   :  { %624 = vmatpush.bf16.msrb.mxu2 %v1260_v43  ;;  %581 = vmatpush.bf16.msrb.mxu1 %v1252_v46  ;;  %v1032_v43 = vld [vmem:[%s1823_s0 + $0xbc] sm:$0xf0]  ;;  %v1030_v46 = vld [vmem:[%s1823_s0 + $0xa8] sm:$0xf] }
  0x33   :  { %667 = vmatpush.bf16.msrb.mxu3 %v1268_v42  ;;  %547 = vmatmul.bf16.gmra.mxu0 %v963_v47  ;;  %v1232_v42 = vld [vmem:[%s1823_s0 + $0xac] sm:$0xf]  ;;  %v1234_v47 = vld [vmem:[%s1823_s0 + $0xb8] sm:$0xf0] }
  0x36   :  { %625 = vmatpush.bf16.msrb.mxu2 %v1259_v49  ;;  %582 = vmatpush.bf16.msrb.mxu1 %v1251_v50  ;;  %v1038_v49 = vld [vmem:[%s1823_s0 + $0xb0] sm:$0xf]  ;;  %v1235_v50 = vld [vmem:[%s1823_s0 + $0xc0] sm:$0xf0] }
  0x37   :  { %668 = vmatpush.bf16.msrb.mxu3 %v1267_v48  ;;  %v1035_v48 = vor.u32 %v1232_v42, %v1032_v43 }
  0x3a   :  { %626 = vmatpush.bf16.msrb.mxu2 %v1258_v52  ;;  %583 = vmatpush.bf16.msrb.mxu1 %v1250_v53  ;;  %v1031_v52 = vor.u32 %v1234_v47, %v1030_v46  ;;  %v1039_v53 = vor.u32 %v1235_v50, %v1038_v49 }
  0x3b   :  { %669 = vmatpush.bf16.msrb.mxu3 %v1266_v51  ;;  %v1027_v51 = vor.u32 %v1231_v44, %v1024_v45 }
  0x3e   :  { %627 = vmatpush.bf16.msrb.mxu2 %v1257_v55  ;;  %584 = vmatpush.bf16.msrb.mxu1 %v1249_v58  ;;  %v1052_v55 = vld [vmem:[%s1823_s0 + $0xe4] sm:$0xf0]  ;;  %v1050_v58 = vld [vmem:[%s1823_s0 + $0xd0] sm:$0xf] }
  0x3f   :  { %670 = vmatpush.bf16.msrb.mxu3 %v1265_v54  ;;  %v1237_v54 = vld [vmem:[%s1823_s0 + $0xd4] sm:$0xf]  ;;  %v1051_v0 = vor.u32 %v1239_v59, %v1050_v58 }
  0x40   :  { %v1055_v60 = vor.u32 %v1237_v54, %v1052_v55 }
  0x41   :  { %585 = vmatmul.bf16.vlgmr.msrb.gmra.mxu1 %v947_v2  ;;  %628 = vmatmul.bf16.vlgmr.msrb.gmra.mxu2 %v951_v3  ;;  %v55_v2 = vld [vmem:[%s1823_s0 + $0xf8] sm:$0x11] }
  0x42   :  { %671 = vmatmul.bf16.vlgmr.msrb.gmra.mxu3 %v955_v63  ;;  %v1047_v63 = vor.u32 %v1236_v56, %v1044_v57  ;;  %v231_v3 = vunpack.c.h.b16 %v55_v2  ;;  %v230_v6 = vunpack.c.l.b16 %v55_v2 }
  0x43   :  { %1204 = vmatmul.msk.bf16.vlgmr.msrb.gmra.mxu0 %vm512_vm0, %v959_v4  ;;  %v56_v4 = vld [vmem:[%s1823_s0 + $0x100] sm:$0x1]  ;;  %s1341_s0 = smov 96  }
  0x44   :  { %v232_v8 = vunpack.c.l.b16 %v56_v4  ;;  %v266_v9 = vpack.c.b16 %v231_v3, %v231_v3  ;;  %v265_v11 = vpack.c.b16 %v230_v6, %v230_v6 }
  0x46   :  { %v267_v13 = vpack.c.b16 %v232_v8, %v232_v8 }
  0x51   :  { %590 = vmatmul.bf16.gmra.mxu1 %v967_v15  ;;  %633 = vmatmul.bf16.gmra.mxu2 %v971_v16 }
  0x52   :  { %676 = vmatmul.bf16.gmra.mxu3 %v975_v12 }
  0x53   :  { %1205 = vmatmul.msk.bf16.gmra.mxu0 %vm512_vm0, %v979_v17 }
  0x61   :  { %595 = vmatmul.bf16.gmra.mxu1 %v987_v27  ;;  %638 = vmatmul.bf16.gmra.mxu2 %v991_v28 }
  0x62   :  { %681 = vmatmul.bf16.gmra.mxu3 %v995_v24 }
  0x63   :  { %1206 = vmatmul.msk.bf16.gmra.mxu0 %vm512_vm0, %v999_v29 }
  0x71   :  { %600 = vmatmul.bf16.gmra.mxu1 %v1007_v39  ;;  %643 = vmatmul.bf16.gmra.mxu2 %v1011_v40 }
  0x72   :  { %686 = vmatmul.bf16.gmra.mxu3 %v1015_v36 }
  0x73   :  { %1207 = vmatmul.msk.bf16.gmra.mxu0 %vm512_vm0, %v1019_v41 }
  0x81   :  { %605 = vmatmul.bf16.gmra.mxu1 %v1027_v51  ;;  %648 = vmatmul.bf16.gmra.mxu2 %v1031_v52 }
  0x82   :  { %691 = vmatmul.bf16.gmra.mxu3 %v1035_v48 }
  0x83   :  { %1208 = vmatmul.msk.bf16.gmra.mxu0 %vm512_vm0, %v1039_v53 }
  0x91   :  { %610 = vmatmul.bf16.gmra.mxu1 %v1047_v63  ;;  %653 = vmatmul.bf16.gmra.mxu2 %v1051_v0 }
  0x92   :  { %696 = vmatmul.bf16.gmra.mxu3 %v1055_v60 }
  0x93   :  { %1209 = vmatmul.msk.bf16.gmra.mxu0 %vm512_vm0, %v1059_v1 }
  0x9e   :  { %v1676_v12 = vpop.f32.mrf.mxu1 }
  0xa0   :  { %v543_v14 = vpop.f32.mrf.mxu0 }
  0xa1   :  { %615 = vmatmul.bf16.gmra.mxu1 %v264_v10  ;;  %658 = vmatmul.bf16.gmra.mxu2 %v265_v11 }
  0xa2   :  { %701 = vmatmul.bf16.gmra.mxu3 %v266_v9 }
  0xa3   :  { %1210 = vmatmul.msk.bf16.gmra.mxu0 %vm512_vm0, %v267_v13 }
  0xa4   :  { %v1679_v15 = vpop.f32.mrf.mxu2 }
  0xa6   :  { %v1681_v16 = vpop.f32.mrf.mxu1 }
  0xa7   :  { %v1683_v17 = vpop.f32.mrf.mxu3 }
  0xa8   :  { %v545_v7 = vpop.f32.mrf.mxu0 }
  0xac   :  { %v1685_v18 = vpop.f32.mrf.mxu2 }
  0xae   :  { %v1687_v19 = vpop.f32.mrf.mxu1 }
  0xaf   :  { %v575_v20 = vpop.f32.mrf.mxu3 }
  0xb0   :  { %v548_v21 = vpop.f32.mrf.mxu0 }
  0xb4   :  { %v1689_v22 = vpop.f32.mrf.mxu2 }
  0xb6   :  { %v1691_v23 = vpop.f32.mrf.mxu1 }
  0xb8   :  { %v550_v24 = vpop.f32.mrf.mxu0 }
  0xbc   :  { %v1693_v25 = vpop.f32.mrf.mxu2 }
  0xbe   :  { %v586_v26 = vpop.f32.mrf.mxu1 }
  0xbf   :  { %v587_v27 = vadd.f32 %v586_v26, %v543_v14 }
  0xc0   :  { %v715_v28 = vpop.f32.mrf.mxu0 }
  0xc4   :  { %v629_v30 = vpop.f32.mrf.mxu2 }
  0xc5   :  { %v672_v29 = vpop.f32.mrf.mxu3  ;;  %v630_v31 = vadd.f32 %v629_v30, %v587_v27 }
  0xc6   :  { %v588_v32 = vpop.f32.mrf.mxu1 }
  0xc7   :  { %v673_v33 = vadd.f32 %v672_v29, %v630_v31  ;;  %v589_v34 = vadd.f32 %v588_v32, %v545_v7 }
  0xc8   :  { %v717_v35 = vpop.f32.mrf.mxu0 }
  0xc9   :  { %v1695_v36 = vadd.f32 %v715_v28, %v673_v33 }
  0xcc   :  { %v631_v38 = vpop.f32.mrf.mxu2 }
  0xcd   :  { %v674_v37 = vpop.f32.mrf.mxu3  ;;  %v632_v39 = vadd.f32 %v631_v38, %v589_v34 }
  0xce   :  { %v591_v40 = vpop.f32.mrf.mxu1 }
  0xcf   :  { %v675_v41 = vadd.f32 %v674_v37, %v632_v39  ;;  %v592_v42 = vadd.f32 %v591_v40, %v548_v21 }
  0xd0   :  { %v720_v43 = vpop.f32.mrf.mxu0 }
  0xd1   :  { %v1697_v44 = vadd.f32 %v717_v35, %v675_v41 }
  0xd3   :  { %v770_v39 = vmul.f32 %v1697_v44, %v1697_v44 }
  0xd4   :  { %v634_v46 = vpop.f32.mrf.mxu2 }
  0xd5   :  { %v677_v45 = vpop.f32.mrf.mxu3  ;;  %v635_v47 = vadd.f32 %v634_v46, %v592_v42 }
  0xd6   :  { %v593_v48 = vpop.f32.mrf.mxu1 }
  0xd7   :  { %v678_v49 = vadd.f32 %v677_v45, %v635_v47  ;;  %v594_v53 = vadd.f32 %v593_v48, %v550_v24 }
  0xd8   :  { %v722_v50 = vpop.f32.mrf.mxu0 }
  0xd9   :  { %v1699_v51 = vadd.f32 %v720_v43, %v678_v49 }
  0xdb   :  { %v771_v43 = vmul.f32 %v1699_v51, %v1699_v51 }
  0xdc   :  { %v636_v54 = vpop.f32.mrf.mxu2 }
  0xdd   :  { %v679_v52 = vpop.f32.mrf.mxu3  ;;  %v637_v55 = vadd.f32 %v636_v54, %v594_v53 }
  0xde   :  { %v596_v56 = vpop.f32.mrf.mxu1 }
  0xdf   :  { %v680_v57 = vadd.f32 %v679_v52, %v637_v55  ;;  %v597_v26 = vadd.f32 %v596_v56, %v1676_v12 }
  0xe0   :  { %v725_v58 = vpop.f32.mrf.mxu0 }
  0xe1   :  { %v1701_v59 = vadd.f32 %v722_v50, %v680_v57 }
  0xe4   :  { %v639_v61 = vpop.f32.mrf.mxu2 }
  0xe5   :  { %v682_v60 = vpop.f32.mrf.mxu3  ;;  %v640_v28 = vadd.f32 %v639_v61, %v597_v26 }
  0xe6   :  { %v598_v62 = vpop.f32.mrf.mxu1 }
  0xe7   :  { %v599_v29 = vadd.f32 %v598_v62, %v1681_v16  ;;  %v683_v34 = vadd.f32 %v682_v60, %v640_v28  ;;  %v769_v16 = vmul.f32 %v1695_v36, %v1695_v36 }
  0xe8   :  { %v727_v63 = vpop.f32.mrf.mxu0 }
  0xe9   :  { %v782_v49 = vadd.f32 %v770_v39, %v769_v16 }
  0xeb   :  { %v783_v57 = vadd.f32 %v782_v49, %v771_v43 }
  0xec   :  { %v641_v1 = vpop.f32.mrf.mxu2 }
  0xed   :  { %v684_v0 = vpop.f32.mrf.mxu3  ;;  %v642_v31 = vadd.f32 %v641_v1, %v599_v29 }
  0xee   :  { %v601_v2 = vpop.f32.mrf.mxu1 }
  0xef   :  { %v602_v33 = vadd.f32 %v601_v2, %v1687_v19  ;;  %v685_v40 = vadd.f32 %v684_v0, %v642_v31  ;;  %v1714_v19 = vadd.f32 %v725_v58, %v683_v34 }
  0xf0   :  { %v730_v3 = vpop.f32.mrf.mxu0 }
  0xf1   :  { %v1721_v50 = vadd.f32 %v727_v63, %v685_v40  ;;  %v773_v58 = vmul.f32 %v1714_v19, %v1714_v19 }
  0xf3   :  { %v774_v1 = vmul.f32 %v1721_v50, %v1721_v50 }
  0xf4   :  { %v644_v5 = vpop.f32.mrf.mxu2 }
  0xf5   :  { %v687_v4 = vpop.f32.mrf.mxu3  ;;  %v645_v35 = vadd.f32 %v644_v5, %v602_v33 }
  0xf6   :  { %v603_v6 = vpop.f32.mrf.mxu1 }
  0xf7   :  { %v604_v37 = vadd.f32 %v603_v6, %v1691_v23  ;;  %v749_v23 = vadd.f32 %v1697_v44, %v1695_v36  ;;  %v688_v45 = vadd.f32 %v687_v4, %v645_v35 }
  0xf8   :  { %v732_v8 = vpop.f32.mrf.mxu0 }
  0xf9   :  { %v750_v53 = vadd.f32 %v749_v23, %v1699_v51  ;;  %v1728_v60 = vadd.f32 %v730_v3, %v688_v45 }
  0xfc   :  { %v646_v10 = vpop.f32.mrf.mxu2 }
  0xfd   :  { %v689_v9 = vpop.f32.mrf.mxu3  ;;  %v647_v41 = vadd.f32 %v646_v10, %v604_v37 }
  0xfe   :  { %v606_v11 = vpop.f32.mrf.mxu1 }
  0xff   :  { %v607_v12 = vadd.f32 %v606_v11, %v1679_v15  ;;  %v772_v15 = vmul.f32 %v1701_v59, %v1701_v59  ;;  %v690_v54 = vadd.f32 %v689_v9, %v647_v41  ;;  %v775_v11 = vmul.f32 %v1728_v60, %v1728_v60 }
 0x100   :  { %v735_v13 = vpop.f32.mrf.mxu0 }
 0x101   :  { %v784_v63 = vadd.f32 %v783_v57, %v772_v15 }
 0x103   :  { %v785_v9 = vadd.f32 %v784_v63, %v773_v58 }
 0x104   :  { %v649_v7 = vpop.f32.mrf.mxu2 }
 0x105   :  { %v692_v14 = vpop.f32.mrf.mxu3  ;;  %v650_v46 = vadd.f32 %v649_v7, %v607_v12  ;;  %v786_v26 = vadd.f32 %v785_v9, %v774_v1 }
 0x106   :  { %v608_v20 = vpop.f32.mrf.mxu1 }
 0x107   :  { %v609_v47 = vadd.f32 %v608_v20, %v1685_v18  ;;  %v751_v18 = vadd.f32 %v750_v53, %v1701_v59  ;;  %v693_v61 = vadd.f32 %v692_v14, %v650_v46  ;;  %v787_v29 = vadd.f32 %v786_v26, %v775_v11 }
 0x108   :  { %v737_v21 = vpop.f32.mrf.mxu0 }
 0x109   :  { %v752_v4 = vadd.f32 %v751_v18, %v1714_v19  ;;  %v1739_v14 = vadd.f32 %v735_v13, %v693_v61 }
 0x10b   :  { %v753_v3 = vadd.f32 %v752_v4, %v1721_v50  ;;  %v777_v31 = vmul.f32 %v1739_v14, %v1739_v14 }
 0x10c   :  { %v651_v27 = vpop.f32.mrf.mxu2 }
 0x10d   :  { %v694_v24 = vpop.f32.mrf.mxu3  ;;  %v652_v55 = vadd.f32 %v651_v27, %v609_v47 }
 0x10e   :  { %v611_v30 = vpop.f32.mrf.mxu1 }
 0x10f   :  { %v612_v56 = vadd.f32 %v611_v30, %v1689_v22  ;;  %v1734_v22 = vadd.f32 %v732_v8, %v690_v54  ;;  %v695_v5 = vadd.f32 %v694_v24, %v652_v55 }
 0x110   :  { %v740_v32 = vpop.f32.mrf.mxu0 }
 0x111   :  { %v776_v8 = vmul.f32 %v1734_v22, %v1734_v22  ;;  %v1744_v24 = vadd.f32 %v737_v21, %v695_v5 }
 0x113   :  { %v788_v35 = vadd.f32 %v787_v29, %v776_v8 }
 0x114   :  { %v654_v42 = vpop.f32.mrf.mxu2 }
 0x115   :  { %v697_v38 = vpop.f32.mrf.mxu3  ;;  %v655_v62 = vadd.f32 %v654_v42, %v612_v56  ;;  %v789_v41 = vadd.f32 %v788_v35, %v777_v31 }
 0x116   :  { %v613_v48 = vpop.f32.mrf.mxu1 }
 0x117   :  { %v614_v2 = vadd.f32 %v613_v48, %v1693_v25  ;;  %v698_v7 = vadd.f32 %v697_v38, %v655_v62  ;;  %v754_v25 = vadd.f32 %v753_v3, %v1728_v60  ;;  %v778_v38 = vmul.f32 %v1744_v24, %v1744_v24 }
 0x118   :  { %v742_v52 = vpop.f32.mrf.mxu0 }
 0x119   :  { %v755_v30 = vadd.f32 %v754_v25, %v1734_v22  ;;  %v1749_v13 = vadd.f32 %v740_v32, %v698_v7 }
 0x11b   :  { %v756_v37 = vadd.f32 %v755_v30, %v1739_v14  ;;  %v779_v32 = vmul.f32 %v1749_v13, %v1749_v13 }
 0x11c   :  { %v656_v6 = vpop.f32.mrf.mxu2 }
 0x11d   :  { %v699_v0 = vpop.f32.mrf.mxu3  ;;  %v657_v10 = vadd.f32 %v656_v6, %v614_v2  ;;  %v757_v12 = vadd.f32 %v756_v37, %v1744_v24 }
 0x11e   :  { %v616_v20 = vpop.f32.mrf.mxu1 }
 0x11f   :  { %v700_v28 = vadd.f32 %v699_v0, %v657_v10  ;;  %v617_v34 = vadd.f32 %v616_v20, %v1683_v17  ;;  %v790_v17 = vadd.f32 %v789_v41, %v778_v38  ;;  %v758_v23 = vadd.f32 %v757_v12, %v1749_v13 }
 0x120   :  { %v745_v27 = vpop.f32.mrf.mxu0 }
 0x121   :  { %v1755_v21 = vadd.f32 %v742_v52, %v700_v28  ;;  %v791_v47 = vadd.f32 %v790_v17, %v779_v32  ;;  %v820_v32 = vld [vmem:[%s1824_s2] sm:$0x1] }
 0x122   :  { %v836_v17 = vld [vmem:[%s1825_s3] sm:$0x1] }
 0x123   :  { %v780_v45 = vmul.f32 %v1755_v21, %v1755_v21  ;;  %v759_v48 = vadd.f32 %v758_v23, %v1755_v21 }
 0x124   :  { %v659_v39 = vpop.f32.mrf.mxu2 }
 0x125   :  { %v702_v33 = vpop.f32.mrf.mxu3  ;;  %v660_v40 = vadd.f32 %v659_v39, %v617_v34  ;;  %v792_v53 = vadd.f32 %v791_v47, %v780_v45 }
 0x126   :  { %v618_v42 = vpop.f32.mrf.mxu1 }
 0x127   :  { %v703_v16 = vadd.f32 %v702_v33, %v660_v40 }
 0x128   :  { %v747_v43 = vpop.f32.mrf.mxu0 }
 0x129   :  { %v1763_v46 = vadd.f32 %v745_v27, %v703_v16 }
 0x12b   :  { %v761_v15 = vsel %vm760_vm1, %v1763_v46, 0.0  ;;  %v781_v52 = vmul.f32 %v1763_v46, %v1763_v46 }
 0x12c   :  { %v762_v54 = vadd.f32 %v761_v15, %v759_v48  ;;  %v661_v55 = vpop.f32.mrf.mxu2 }
 0x12d   :  { %v704_v49 = vpop.f32.mrf.mxu3  ;;  %v793_v56 = vsel %vm760_vm1, %v781_v52, 0.0 }
 0x12e   :  { %v763_v57 = vrot.slane %v762_v54, 4  ;;  %v794_v58 = vadd.f32 %v793_v56, %v792_v53 }
 0x130   :  { %v764_v18 = vadd.f32 %v763_v57, %v762_v54  ;;  %v795_v61 = vrot.slane %v794_v58, 4 }
 0x132   :  { %v765_v62 = vrot.slane %v764_v18, 2  ;;  %v796_v0 = vadd.f32 %v795_v61, %v794_v58 }
 0x134   :  { %v766_v63 = vadd.f32 %v765_v62, %v764_v18  ;;  %v797_v1 = vrot.slane %v796_v0, 2 }
 0x136   :  { %v767_v2 = vrot.slane %v766_v63, 1  ;;  %v798_v5 = vadd.f32 %v797_v1, %v796_v0 }
 0x138   :  { %v768_v4 = vadd.f32 %v767_v2, %v766_v63  ;;  %v799_v6 = vrot.slane %v798_v5, 1 }
 0x13a   :  { %813 = vrot.lane.b32.xlu2 %v768_v4, %s1341_s0  ;;  %807 = vrot.lane.b32.xlu1 %v768_v4, %s1342_s27  ;;  %v800_v9 = vadd.f32 %v799_v6, %v798_v5 }
 0x13b   :  { %801 = vrot.lane.b32.xlu0 %v768_v4, %s1343_s28 }
 0x142   :  { %816 = vrot.lane.b32.xlu2 %v800_v9, %s1341_s0  ;;  %810 = vrot.lane.b32.xlu1 %v800_v9, %s1342_s27 }
 0x143   :  { %804 = vrot.lane.b32.xlu0 %v800_v9, %s1343_s28 }
 0x194   :  { %v814_v7 = vpop.permute.xlu2 %813 }
 0x19c   :  { %v817_v30 = vpop.permute.xlu2 %816 }
 0x1ac   :  { %v808_v10 = vpop.permute.xlu1 %807 }
 0x1ad   :  { %v802_v3 = vpop.permute.xlu0 %801 }
 0x1ae   :  { %v803_v11 = vadd.f32 %v802_v3, %v768_v4 }
 0x1b0   :  { %v809_v20 = vadd.f32 %v808_v10, %v803_v11 }
 0x1b2   :  { %v815_v26 = vadd.f32 %v814_v7, %v809_v20 }
 0x1b4   :  { %v811_v8 = vpop.permute.xlu1 %810  ;;  %v819_v28 = vmul.f32 0.0025510204, %v815_v26 }
 0x1b5   :  { %v805_v27 = vpop.permute.xlu0 %804 }
 0x1b6   :  { %v806_v25 = vadd.f32 %v805_v27, %v800_v9  ;;  %v822_v33 = vmul.f32 %v819_v28, %v819_v28 }
 0x1b8   :  { %v812_v29 = vadd.f32 %v811_v8, %v806_v25 }
 0x1ba   :  { %v818_v31 = vadd.f32 %v817_v30, %v812_v29 }
 0x1bc   :  { %v821_v34 = vmul.f32 0.0025510204, %v818_v31 }
 0x1be   :  { %v823_v35 = vsub.f32 %v821_v34, %v822_v33 }
 0x1c0   :  { %v824_v37 = vadd.f32 1e-05, %v823_v35 }
 0x1c2   :  { %1339 = vrsqrt.f32 %v824_v37  ;;  %vm831_vm3 = vweird.f32 %v824_v37 }
 0x1c8   :  { %v1340_v38 = vpop.eup %1339 }
 0x1c9   :  { %v826_v39 = vmul.f32 %v1340_v38, %v824_v37  ;;  %vm832_vm2 = vweird.f32 %v1340_v38 }
 0x1ca   :  { %vm833_vm4 = vmor %vm831_vm3, %vm832_vm2 }
 0x1cb   :  { %v827_v40 = vmul.f32 %v1340_v38, %v826_v39 }
 0x1cd   :  { %v828_v41 = vmul.f32 0.5, %v827_v40 }
 0x1cf   :  { %v829_v12 = vsub.f32 1.5, %v828_v41 }
 0x1d1   :  { %v830_v42 = vmul.f32 %v1340_v38, %v829_v12 }
 0x1d3   :  { %v834_v16 = vsel %vm833_vm4, %v1340_v38, %v830_v42 }
 0x1d4   :  { %v835_v43 = vmul.f32 %v834_v16, %v820_v32 }
 0x1d6   :  { %v837_v23 = vmul.f32 %v835_v43, %v819_v28  ;;  %v840_v45 = vperm.slane %v835_v43, 0 }
 0x1d8   :  { %v838_v47 = vsub.f32 %v836_v17, %v837_v23  ;;  %v842_v48 = vmul.f32 %v840_v45, %v1695_v36  ;;  %v843_v49 = vmul.f32 %v840_v45, %v1697_v44  ;;  %v844_v15 = vmul.f32 %v840_v45, %v1699_v51 }
 0x1d9   :  { %v845_v52 = vmul.f32 %v840_v45, %v1701_v59  ;;  %v846_v53 = vmul.f32 %v840_v45, %v1714_v19  ;;  %v847_v54 = vmul.f32 %v840_v45, %v1721_v50  ;;  %v848_v55 = vmul.f32 %v840_v45, %v1728_v60 }
 0x1da   :  { %v849_v56 = vmul.f32 %v840_v45, %v1734_v22  ;;  %v850_v57 = vmul.f32 %v840_v45, %v1739_v14  ;;  %v856_v58 = vperm.slane %v838_v47, 0  ;;  %v851_v18 = vmul.f32 %v840_v45, %v1744_v24 }
 0x1db   :  { %v852_v36 = vmul.f32 %v840_v45, %v1749_v13  ;;  %v853_v44 = vmul.f32 %v840_v45, %v1755_v21  ;;  %v854_v51 = vmul.f32 %v840_v45, %v1763_v46 }
 0x1dc   :  { %v858_v59 = vadd.f32 %v856_v58, %v842_v48  ;;  %v859_v61 = vadd.f32 %v856_v58, %v843_v49  ;;  %v860_v19 = vadd.f32 %v856_v58, %v844_v15  ;;  %v861_v62 = vadd.f32 %v856_v58, %v845_v52 }
 0x1dd   :  { %v862_v50 = vadd.f32 %v856_v58, %v846_v53  ;;  %v863_v0 = vadd.f32 %v856_v58, %v847_v54  ;;  %v864_v60 = vadd.f32 %v856_v58, %v848_v55  ;;  %v865_v63 = vadd.f32 %v856_v58, %v849_v56 }
 0x1de   :  { %v866_v22 = vadd.f32 %v856_v58, %v850_v57  ;;  %v867_v1 = vadd.f32 %v856_v58, %v851_v18  ;;  %v868_v14 = vadd.f32 %v856_v58, %v852_v36  ;;  %v869_v2 = vadd.f32 %v856_v58, %v853_v44 }
 0x1df   :  { %v870_v4 = vadd.f32 %v856_v58, %v854_v51  ;;  %vm871_vm5 = vcmp.ge.f32.partialorder %v858_v59, 0.0  ;;  %vm872_vm6 = vcmp.ge.f32.partialorder %v859_v61, 0.0  ;;  %vm873_vm7 = vcmp.ge.f32.partialorder %v860_v19, 0.0 }
 0x1e0   :  { %vm874_vm8 = vcmp.ge.f32.partialorder %v861_v62, 0.0  ;;  %vm875_vm9 = vcmp.ge.f32.partialorder %v862_v50, 0.0  ;;  %vm876_vm10 = vcmp.ge.f32.partialorder %v863_v0, 0.0  ;;  %vm877_vm11 = vcmp.ge.f32.partialorder %v864_v60, 0.0 }
 0x1e1   :  { %vm878_vm12 = vcmp.ge.f32.partialorder %v865_v63, 0.0  ;;  %vm879_vm13 = vcmp.ge.f32.partialorder %v866_v22, 0.0  ;;  %vm880_vm14 = vcmp.ge.f32.partialorder %v867_v1, 0.0  ;;  %vm881_vm15 = vcmp.ge.f32.partialorder %v868_v14, 0.0 }
 0x1e2   :  { %vm882_vm0 = vcmp.ge.f32.partialorder %v869_v2, 0.0  ;;  %vm883_vm1 = vcmp.ge.f32.partialorder %v870_v4, 0.0  ;;  %v884_v24 = vmul.f32 0.2, %v858_v59  ;;  %v885_v13 = vmul.f32 0.2, %v859_v61 }
 0x1e3   :  { %v886_v21 = vmul.f32 0.2, %v860_v19  ;;  %v887_v46 = vmul.f32 0.2, %v861_v62  ;;  %v888_v5 = vmul.f32 0.2, %v862_v50 }
 0x1e4   :  { %v889_v6 = vmul.f32 0.2, %v863_v0  ;;  %v890_v9 = vmul.f32 0.2, %v864_v60  ;;  %v891_v10 = vmul.f32 0.2, %v865_v63  ;;  %v897_v3 = vsel %vm871_vm5, %v858_v59, %v884_v24 }
 0x1e5   :  { %v892_v11 = vmul.f32 0.2, %v866_v22  ;;  %v893_v7 = vmul.f32 0.2, %v867_v1  ;;  %v894_v20 = vmul.f32 0.2, %v868_v14  ;;  %v898_v26 = vsel %vm872_vm6, %v859_v61, %v885_v13 }
 0x1e6   :  { %v895_v27 = vmul.f32 0.2, %v869_v2  ;;  %v896_v25 = vmul.f32 0.2, %v870_v4  ;;  %v899_v8 = vsel %vm873_vm7, %v860_v19, %v886_v21  ;;  %v900_v28 = vsel %vm874_vm8, %v861_v62, %v887_v46 }
 0x1e7   :  { %v901_v29 = vsel %vm875_vm9, %v862_v50, %v888_v5  ;;  %v902_v30 = vsel %vm876_vm10, %v863_v0, %v889_v6  ;;  %v903_v31 = vsel %vm877_vm11, %v864_v60, %v890_v9  ;;  %v904_v33 = vsel %vm878_vm12, %v865_v63, %v891_v10 }
 0x1e8   :  { %v905_v34 = vsel %vm879_vm13, %v866_v22, %v892_v11  ;;  %v906_v35 = vsel %vm880_vm14, %v867_v1, %v893_v7  ;;  %v907_v37 = vsel %vm881_vm15, %v868_v14, %v894_v20  ;;  %v908_v38 = vsel %vm882_vm0, %v869_v2, %v895_v27 }
 0x1e9   :  { %v1280_v39 = vpack.c.bf16 %v898_v26, %v897_v3  ;;  %v1285_v40 = vpack.c.bf16 %v900_v28, %v899_v8  ;;  %v1290_v41 = vpack.c.bf16 %v902_v30, %v901_v29  ;;  %v909_v12 = vsel %vm883_vm1, %v870_v4, %v896_v25 }
 0x1ea   :  { %v1295_v32 = vpack.c.bf16 %v904_v33, %v903_v31  ;;  %v1300_v42 = vpack.c.bf16 %v906_v35, %v905_v34  ;;  %v1305_v16 = vpack.c.bf16 %v908_v38, %v907_v37  ;;  %v922_v43 = vpack.c.bf16 %v909_v12, %v909_v12 }
 0x1eb   :  { %1281 = vst [vmem:[%s1826_s4] sm:$0xff] %v1280_v39  }
 0x1ec   :  { %1307 = vst [vmem:[%s1826_s4 + $0x8] sm:$0xff] %v1285_v40  }
 0x1ed   :  { %1308 = vst [vmem:[%s1826_s4 + $0x10] sm:$0xff] %v1290_v41  }
 0x1ee   :  { %1309 = vst [vmem:[%s1826_s4 + $0x18] sm:$0xff] %v1295_v32  }
 0x1ef   :  { %1310 = vst [vmem:[%s1826_s4 + $0x20] sm:$0xff] %v1300_v42  }
 0x1f0   :  { %1311 = vst [vmem:[%s1826_s4 + $0x28] sm:$0xff] %v1305_v16  }
 0x1f1   :  { %935 = vst [vmem:[%s1826_s4 + $0x30] sm:$0x1] %v922_v43 }

// kernel: vae_forward.7
= control target key start
LH: loop header
LB: loop body
LE: loop exit
PB: predicated region body
PF: predicated region fallthrough
CT: control target
= control target key end

     0   :  { %21 = vsyncpa [#allocation6], 0  ;;  %s11307_s0 = inlined_call_operand.vmem [shape: bf16[2,3200], index: 0, kind: input, shape index: {}]   ;;  %s11308_s1 = inlined_call_operand.vmem [shape: bf16[3200,128], index: 1, kind: input, shape index: {}]   ;;  %s11309_s2 = inlined_call_operand.vmem [shape: f32[1,128], index: 2, kind: input, shape index: {}]   ;;  %s11310_s3 = inlined_call_operand.vmem [shape: f32[1,128], index: 3, kind: input, shape index: {}]   ;;  %s11311_s4 = inlined_call_operand.vmem [shape: bf16[128,256], index: 4, kind: input, shape index: {}]   ;;  %s11312_s5 = inlined_call_operand.vmem [shape: f32[1,256], index: 5, kind: input, shape index: {}]   ;;  %s11313_s6 = inlined_call_operand.vmem [shape: f32[2,128], index: 6, kind: input, shape index: {}]   ;;  %s11314_s7 = inlined_call_operand.vmem [shape: bf16[128,1152], index: 7, kind: input, shape index: {}]   ;;  %s11315_s8 = inlined_call_operand.vmem [shape: f32[1,128], index: 8, kind: input, shape index: {}]   ;;  %s11316_s9 = inlined_call_operand.vmem [shape: f32[1,128], index: 9, kind: input, shape index: {}]   ;;  %s11317_s10 = inlined_call_operand.vmem [shape: bf16[128,3200], index: 10, kind: input, shape index: {}]   ;;  %s11318_s11 = inlined_call_operand.vmem [shape: f32[1,128], index: 11, kind: input, shape index: {}]   ;;  %s11319_s12 = inlined_call_operand.vmem [shape: f32[1,128], index: 12, kind: input, shape index: {}]   ;;  %s11320_s13 = inlined_call_operand.hbm [shape: f32[2,128], index: 13, kind: output, shape index: {0}]   ;;  %s11321_s14 = inlined_call_operand.hbm [shape: f32[2,128], index: 14, kind: output, shape index: {1}]   ;;  %s11322_s15 = inlined_call_operand.vmem [shape: bf16[98,128], index: 15, kind: output, shape index: {2}]  }
   0x1   :  { %v7878_v0 = vld [vmem:[%s11308_s1 + $0x38] sm:$0xff]  ;;  %v7877_v4 = vld [vmem:[%s11308_s1 + $0x30] sm:$0xff]  ;;  %v7876_v8 = vld [vmem:[%s11308_s1 + $0x28] sm:$0xff] }
   0x2   :  { %v7894_v1 = vld [vmem:[%s11308_s1 + $0xb8] sm:$0xff]  ;;  %1711 = vmatpush.bf16.msra.mxu0 %v7878_v0  ;;  %v7893_v5 = vld [vmem:[%s11308_s1 + $0xb0] sm:$0xff]  ;;  %v7892_v9 = vld [vmem:[%s11308_s1 + $0xa8] sm:$0xff] }
   0x3   :  { %v7886_v2 = vld [vmem:[%s11308_s1 + $0x78] sm:$0xff]  ;;  %1737 = vmatpush.bf16.msra.mxu2 %v7894_v1  ;;  %v7885_v6 = vld [vmem:[%s11308_s1 + $0x70] sm:$0xff]  ;;  %v7884_v10 = vld [vmem:[%s11308_s1 + $0x68] sm:$0xff] }
   0x4   :  { %v7902_v3 = vld [vmem:[%s11308_s1 + $0xf8] sm:$0xff]  ;;  %1724 = vmatpush.bf16.msra.mxu1 %v7886_v2  ;;  %v7901_v7 = vld [vmem:[%s11308_s1 + $0xf0] sm:$0xff]  ;;  %v7900_v11 = vld [vmem:[%s11308_s1 + $0xe8] sm:$0xff] }
   0x5   :  { %1750 = vmatpush.bf16.msra.mxu3 %v7902_v3  ;;  %v7875_v12 = vld [vmem:[%s11308_s1 + $0x20] sm:$0xff]  ;;  %v7874_v16 = vld [vmem:[%s11308_s1 + $0x18] sm:$0xff]  ;;  %v7873_v21 = vld [vmem:[%s11308_s1 + $0x10] sm:$0xff] }
   0x6   :  { %1712 = vmatpush.bf16.msra.mxu0 %v7877_v4  ;;  %v7891_v13 = vld [vmem:[%s11308_s1 + $0xa0] sm:$0xff]  ;;  %v7890_v17 = vld [vmem:[%s11308_s1 + $0x98] sm:$0xff]  ;;  %v7889_v22 = vld [vmem:[%s11308_s1 + $0x90] sm:$0xff] }
   0x7   :  { %1738 = vmatpush.bf16.msra.mxu2 %v7893_v5  ;;  %v7883_v14 = vld [vmem:[%s11308_s1 + $0x60] sm:$0xff]  ;;  %v7882_v18 = vld [vmem:[%s11308_s1 + $0x58] sm:$0xff] }
   0x8   :  { %1725 = vmatpush.bf16.msra.mxu1 %v7885_v6  ;;  %v7899_v15 = vld [vmem:[%s11308_s1 + $0xe0] sm:$0xff]  ;;  %v7898_v19 = vld [vmem:[%s11308_s1 + $0xd8] sm:$0xff] }
   0x9   :  { %1751 = vmatpush.bf16.msra.mxu3 %v7901_v7  ;;  %v49_v20 = vld [vmem:[%s11307_s0] sm:$0xff] }
   0xa   :  { %1713 = vmatpush.bf16.msra.mxu0 %v7876_v8  ;;  %454 = vst [vmem:[#allocation1] ss:$9 sm:$0xff] %v49_v20 }
   0xb   :  { %1739 = vmatpush.bf16.msra.mxu2 %v7892_v9 }
   0xc   :  { %1726 = vmatpush.bf16.msra.mxu1 %v7884_v10 }
   0xd   :  { %1752 = vmatpush.bf16.msra.mxu3 %v7900_v11 }
   0xe   :  { %1714 = vmatpush.bf16.msra.mxu0 %v7875_v12 }
   0xf   :  { %1740 = vmatpush.bf16.msra.mxu2 %v7891_v13 }
  0x10   :  { %1727 = vmatpush.bf16.msra.mxu1 %v7883_v14 }
  0x11   :  { %1753 = vmatpush.bf16.msra.mxu3 %v7899_v15 }
  0x12   :  { %1715 = vmatpush.bf16.msra.mxu0 %v7874_v16 }
  0x13   :  { %1741 = vmatpush.bf16.msra.mxu2 %v7890_v17 }
  0x14   :  { %22 = vsyncpa [#allocation8], 0  ;;  %1728 = vmatpush.bf16.msra.mxu1 %v7882_v18  ;;  %v7881_v23 = vld [vmem:[%s11308_s1 + $0x50] sm:$0xff]  ;;  %v7872_v25 = vld [vmem:[%s11308_s1 + $0x8] sm:$0xff]  ;;  %vm2036_vm0 = vcmask 1041408   ;;  %s5890_s16 = sshll.u32 %s11320_s13, 4  ;;  %s5891_s16 = int_to_ptr.hbm [resolvable:$true] %s5890_s16 }
  0x15   :  { %1754 = vmatpush.bf16.msra.mxu3 %v7898_v19  ;;  %v7897_v24 = vld [vmem:[%s11308_s1 + $0xd0] sm:$0xff]  ;;  %v7888_v26 = vld [vmem:[%s11308_s1 + $0x88] sm:$0xff]  ;;  %v7871_v29 = vld [vmem:[%s11308_s1] sm:$0xff] }
  0x16   :  { %1716 = vmatpush.bf16.msra.mxu0 %v7873_v21  ;;  %v7880_v27 = vld [vmem:[%s11308_s1 + $0x48] sm:$0xff]  ;;  %v7887_v30 = vld [vmem:[%s11308_s1 + $0x80] sm:$0xff]  ;;  %v7910_v31 = vld [vmem:[%s11308_s1 + $0x138] sm:$0xff] }
  0x17   :  { %1742 = vmatpush.bf16.msra.mxu2 %v7889_v22  ;;  %v7896_v28 = vld [vmem:[%s11308_s1 + $0xc8] sm:$0xff]  ;;  %v7926_v32 = vld [vmem:[%s11308_s1 + $0x1b8] sm:$0xff]  ;;  %v7879_v33 = vld [vmem:[%s11308_s1 + $0x40] sm:$0xff] }
  0x18   :  { %1729 = vmatpush.bf16.msra.mxu1 %v7881_v23  ;;  %v7895_v34 = vld [vmem:[%s11308_s1 + $0xc0] sm:$0xff]  ;;  %v7918_v35 = vld [vmem:[%s11308_s1 + $0x178] sm:$0xff]  ;;  %v7909_v37 = vld [vmem:[%s11308_s1 + $0x130] sm:$0xff] }
  0x19   :  { %1755 = vmatpush.bf16.msra.mxu3 %v7897_v24  ;;  %v7934_v36 = vld [vmem:[%s11308_s1 + $0x1f8] sm:$0xff]  ;;  %v7925_v38 = vld [vmem:[%s11308_s1 + $0x1b0] sm:$0xff]  ;;  %v455_v40 = vld [vmem:[#allocation1] sm:$0xff] }
  0x1a   :  { %1717 = vmatpush.bf16.msra.mxu0 %v7872_v25  ;;  %v457_v39 = vld [vmem:[#allocation1 + $0x12] sm:$0xff]  ;;  %v458_v43 = vld [vmem:[#allocation1 + $0x1b] sm:$0xff]  ;;  %v456_v44 = vld [vmem:[#allocation1 + $0x9] sm:$0xff] }
  0x1b   :  { %1743 = vmatpush.bf16.msra.mxu2 %v7888_v26  ;;  %v7917_v41 = vld [vmem:[%s11308_s1 + $0x170] sm:$0xff]  ;;  %v8675_v46 = vld [vmem:[#allocation1 + $0x24] sm:$0xff]  ;;  %v7906_v58 = vld [vmem:[%s11308_s1 + $0x118] sm:$0xff] }
  0x1c   :  { %1730 = vmatpush.bf16.msra.mxu1 %v7880_v27  ;;  %v7933_v42 = vld [vmem:[%s11308_s1 + $0x1f0] sm:$0xff]  ;;  %v8677_v47 = vld [vmem:[#allocation1 + $0x3f] sm:$0xff]  ;;  %v50_v48 = vld [vmem:[%s11307_s0 + $0x8] sm:$0xff] }
  0x1d   :  { %1756 = vmatpush.bf16.msra.mxu3 %v7896_v28  ;;  %v8673_v45 = vld [vmem:[#allocation1 + $0x36] sm:$0xff]  ;;  %v8682_v49 = vld [vmem:[#allocation1 + $0x2d] sm:$0xff]  ;;  %v7907_v54 = vld [vmem:[%s11308_s1 + $0x120] sm:$0xff] }
  0x1e   :  { %1718 = vmatpush.bf16.msra.mxu0 %v7871_v29  ;;  %v7908_v50 = vld [vmem:[%s11308_s1 + $0x128] sm:$0xff]  ;;  %464 = vst [vmem:[#allocation1] ss:$9 sm:$0xff] %v50_v48  ;;  %v7923_v55 = vld [vmem:[%s11308_s1 + $0x1a0] sm:$0xff]  ;;  %v7922_v59 = vld [vmem:[%s11308_s1 + $0x198] sm:$0xff] }
  0x1f   :  { %1744 = vmatpush.bf16.msra.mxu2 %v7887_v30  ;;  %v7924_v51 = vld [vmem:[%s11308_s1 + $0x1a8] sm:$0xff]  ;;  %v7915_v56 = vld [vmem:[%s11308_s1 + $0x160] sm:$0xff]  ;;  %v7914_v60 = vld [vmem:[%s11308_s1 + $0x158] sm:$0xff] }
  0x20   :  { %1731 = vmatpush.bf16.msra.mxu1 %v7879_v33  ;;  %v7916_v52 = vld [vmem:[%s11308_s1 + $0x168] sm:$0xff]  ;;  %v7931_v57 = vld [vmem:[%s11308_s1 + $0x1e0] sm:$0xff]  ;;  %v7930_v61 = vld [vmem:[%s11308_s1 + $0x1d8] sm:$0xff] }
  0x21   :  { %1757 = vmatpush.bf16.msra.mxu3 %v7895_v34  ;;  %1719 = vmatmul.bf16.vlgmr.msra.gmra.mxu0 %v455_v40  ;;  %v7932_v53 = vld [vmem:[%s11308_s1 + $0x1e8] sm:$0xff]  ;;  %v7905_v62 = vld [vmem:[%s11308_s1 + $0x110] sm:$0xff]  ;;  %v7903_v6 = vld [vmem:[%s11308_s1 + $0x100] sm:$0xff] }
  0x22   :  { %1763 = vmatpush.bf16.msrb.mxu0 %v7910_v31  ;;  %1745 = vmatmul.bf16.vlgmr.msra.gmra.mxu2 %v457_v39  ;;  %v7921_v63 = vld [vmem:[%s11308_s1 + $0x190] sm:$0xff]  ;;  %v7904_v2 = vld [vmem:[%s11308_s1 + $0x108] sm:$0xff]  ;;  %v7919_v7 = vld [vmem:[%s11308_s1 + $0x180] sm:$0xff] }
  0x23   :  { %1789 = vmatpush.bf16.msrb.mxu2 %v7926_v32  ;;  %1732 = vmatmul.bf16.vlgmr.msra.gmra.mxu1 %v456_v44  ;;  %v7913_v0 = vld [vmem:[%s11308_s1 + $0x150] sm:$0xff]  ;;  %v7920_v3 = vld [vmem:[%s11308_s1 + $0x188] sm:$0xff]  ;;  %v7942_v8 = vld [vmem:[%s11308_s1 + $0x238] sm:$0xff] }
  0x24   :  { %1776 = vmatpush.bf16.msrb.mxu1 %v7918_v35  ;;  %1758 = vmatmul.bf16.vlgmr.msra.gmra.mxu3 %v458_v43  ;;  %v7929_v1 = vld [vmem:[%s11308_s1 + $0x1d0] sm:$0xff]  ;;  %v7912_v4 = vld [vmem:[%s11308_s1 + $0x148] sm:$0xff]  ;;  %v7958_v9 = vld [vmem:[%s11308_s1 + $0x2b8] sm:$0xff] }
  0x25   :  { %1802 = vmatpush.bf16.msrb.mxu3 %v7934_v36  ;;  %v7928_v5 = vld [vmem:[%s11308_s1 + $0x1c8] sm:$0xff]  ;;  %v7911_v10 = vld [vmem:[%s11308_s1 + $0x140] sm:$0xff]  ;;  %v7950_v12 = vld [vmem:[%s11308_s1 + $0x278] sm:$0xff] }
  0x26   :  { %1764 = vmatpush.bf16.msrb.mxu0 %v7909_v37  ;;  %v7927_v11 = vld [vmem:[%s11308_s1 + $0x1c0] sm:$0xff]  ;;  %v7966_v13 = vld [vmem:[%s11308_s1 + $0x2f8] sm:$0xff]  ;;  %v7941_v14 = vld [vmem:[%s11308_s1 + $0x230] sm:$0xff] }
  0x27   :  { %1790 = vmatpush.bf16.msrb.mxu2 %v7925_v38  ;;  %v7957_v15 = vld [vmem:[%s11308_s1 + $0x2b0] sm:$0xff]  ;;  %v7940_v18 = vld [vmem:[%s11308_s1 + $0x228] sm:$0xff]  ;;  %v7939_v22 = vld [vmem:[%s11308_s1 + $0x220] sm:$0xff] }
  0x28   :  { %1777 = vmatpush.bf16.msrb.mxu1 %v7917_v41  ;;  %v7949_v16 = vld [vmem:[%s11308_s1 + $0x270] sm:$0xff]  ;;  %v7956_v19 = vld [vmem:[%s11308_s1 + $0x2a8] sm:$0xff]  ;;  %v7955_v23 = vld [vmem:[%s11308_s1 + $0x2a0] sm:$0xff] }
  0x29   :  { %1803 = vmatpush.bf16.msrb.mxu3 %v7933_v42  ;;  %v7965_v17 = vld [vmem:[%s11308_s1 + $0x2f0] sm:$0xff]  ;;  %v7948_v20 = vld [vmem:[%s11308_s1 + $0x268] sm:$0xff]  ;;  %v7947_v24 = vld [vmem:[%s11308_s1 + $0x260] sm:$0xff] }
  0x2a   :  { %1765 = vmatpush.bf16.msrb.mxu0 %v7908_v50  ;;  %v7964_v21 = vld [vmem:[%s11308_s1 + $0x2e8] sm:$0xff]  ;;  %v7963_v25 = vld [vmem:[%s11308_s1 + $0x2e0] sm:$0xff]  ;;  %v7938_v26 = vld [vmem:[%s11308_s1 + $0x218] sm:$0xff] }
  0x2b   :  { %1791 = vmatpush.bf16.msrb.mxu2 %v7924_v51  ;;  %v7954_v27 = vld [vmem:[%s11308_s1 + $0x298] sm:$0xff]  ;;  %v7937_v30 = vld [vmem:[%s11308_s1 + $0x210] sm:$0xff]  ;;  %v7936_v34 = vld [vmem:[%s11308_s1 + $0x208] sm:$0xff] }
  0x2c   :  { %1778 = vmatpush.bf16.msrb.mxu1 %v7916_v52  ;;  %v7946_v28 = vld [vmem:[%s11308_s1 + $0x258] sm:$0xff]  ;;  %v7953_v31 = vld [vmem:[%s11308_s1 + $0x290] sm:$0xff]  ;;  %v7952_v35 = vld [vmem:[%s11308_s1 + $0x288] sm:$0xff] }
  0x2d   :  { %1804 = vmatpush.bf16.msrb.mxu3 %v7932_v53  ;;  %v7962_v29 = vld [vmem:[%s11308_s1 + $0x2d8] sm:$0xff]  ;;  %v7945_v32 = vld [vmem:[%s11308_s1 + $0x250] sm:$0xff]  ;;  %v7944_v36 = vld [vmem:[%s11308_s1 + $0x248] sm:$0xff] }
  0x2e   :  { %1766 = vmatpush.bf16.msrb.mxu0 %v7907_v54  ;;  %v7961_v33 = vld [vmem:[%s11308_s1 + $0x2d0] sm:$0xff]  ;;  %v7960_v37 = vld [vmem:[%s11308_s1 + $0x2c8] sm:$0xff]  ;;  %v7935_v38 = vld [vmem:[%s11308_s1 + $0x200] sm:$0xff] }
  0x2f   :  { %1792 = vmatpush.bf16.msrb.mxu2 %v7923_v55  ;;  %v7951_v39 = vld [vmem:[%s11308_s1 + $0x280] sm:$0xff]  ;;  %v7974_v40 = vld [vmem:[%s11308_s1 + $0x338] sm:$0xff]  ;;  %v466_v48 = vld [vmem:[#allocation1 + $0x9] sm:$0xff] }
  0x30   :  { %1779 = vmatpush.bf16.msrb.mxu1 %v7915_v56  ;;  %v7990_v41 = vld [vmem:[%s11308_s1 + $0x3b8] sm:$0xff]  ;;  %v7943_v42 = vld [vmem:[%s11308_s1 + $0x240] sm:$0xff]  ;;  %v7973_v50 = vld [vmem:[%s11308_s1 + $0x330] sm:$0xff] }
  0x31   :  { %1805 = vmatpush.bf16.msrb.mxu3 %v7931_v57  ;;  %v7959_v43 = vld [vmem:[%s11308_s1 + $0x2c0] sm:$0xff]  ;;  %v7982_v44 = vld [vmem:[%s11308_s1 + $0x378] sm:$0xff]  ;;  %v7989_v51 = vld [vmem:[%s11308_s1 + $0x3b0] sm:$0xff] }
  0x32   :  { %1767 = vmatpush.bf16.msrb.mxu0 %v7906_v58  ;;  %v7981_v52 = vld [vmem:[%s11308_s1 + $0x370] sm:$0xff]  ;;  %v7972_v54 = vld [vmem:[%s11308_s1 + $0x328] sm:$0xff]  ;;  %v7971_v58 = vld [vmem:[%s11308_s1 + $0x320] sm:$0xff] }
  0x33   :  { %1793 = vmatpush.bf16.msrb.mxu2 %v7922_v59  ;;  %v7997_v53 = vld [vmem:[%s11308_s1 + $0x3f0] sm:$0xff]  ;;  %v7988_v55 = vld [vmem:[%s11308_s1 + $0x3a8] sm:$0xff]  ;;  %v7987_v59 = vld [vmem:[%s11308_s1 + $0x3a0] sm:$0xff] }
  0x34   :  { %1780 = vmatpush.bf16.msrb.mxu1 %v7914_v60  ;;  %v7980_v56 = vld [vmem:[%s11308_s1 + $0x368] sm:$0xff]  ;;  %v7979_v60 = vld [vmem:[%s11308_s1 + $0x360] sm:$0xff] }
  0x35   :  { %1806 = vmatpush.bf16.msrb.mxu3 %v7930_v61  ;;  %v7996_v57 = vld [vmem:[%s11308_s1 + $0x3e8] sm:$0xff]  ;;  %v7995_v61 = vld [vmem:[%s11308_s1 + $0x3e0] sm:$0xff] }
  0x36   :  { %1768 = vmatpush.bf16.msrb.mxu0 %v7905_v62  ;;  %v7970_v62 = vld [vmem:[%s11308_s1 + $0x318] sm:$0xff] }
  0x37   :  { %1794 = vmatpush.bf16.msrb.mxu2 %v7921_v63  ;;  %v7986_v63 = vld [vmem:[%s11308_s1 + $0x398] sm:$0xff] }
  0x38   :  { %1781 = vmatpush.bf16.msrb.mxu1 %v7913_v0  ;;  %v7978_v0 = vld [vmem:[%s11308_s1 + $0x358] sm:$0xff] }
  0x39   :  { %1807 = vmatpush.bf16.msrb.mxu3 %v7929_v1  ;;  %v7994_v1 = vld [vmem:[%s11308_s1 + $0x3d8] sm:$0xff] }
  0x3a   :  { %1769 = vmatpush.bf16.msrb.mxu0 %v7904_v2  ;;  %v7969_v2 = vld [vmem:[%s11308_s1 + $0x310] sm:$0xff] }
  0x3b   :  { %1795 = vmatpush.bf16.msrb.mxu2 %v7920_v3  ;;  %v7985_v3 = vld [vmem:[%s11308_s1 + $0x390] sm:$0xff] }
  0x3c   :  { %1782 = vmatpush.bf16.msrb.mxu1 %v7912_v4  ;;  %v7977_v4 = vld [vmem:[%s11308_s1 + $0x350] sm:$0xff] }
  0x3d   :  { %1808 = vmatpush.bf16.msrb.mxu3 %v7928_v5  ;;  %v7993_v5 = vld [vmem:[%s11308_s1 + $0x3d0] sm:$0xff] }
  0x3e   :  { %1770 = vmatpush.bf16.msrb.mxu0 %v7903_v6  ;;  %v7968_v6 = vld [vmem:[%s11308_s1 + $0x308] sm:$0xff] }
  0x3f   :  { %1796 = vmatpush.bf16.msrb.mxu2 %v7919_v7  ;;  %v7984_v7 = vld [vmem:[%s11308_s1 + $0x388] sm:$0xff] }
  0x40   :  { %1783 = vmatpush.bf16.msrb.mxu1 %v7911_v10  ;;  %v470_v10 = vld [vmem:[#allocation1 + $0x2d] sm:$0xff] }
  0x41   :  { %1809 = vmatpush.bf16.msrb.mxu3 %v7927_v11  ;;  %1771 = vmatmul.bf16.vlgmr.msrb.gmra.mxu0 %v8675_v46  ;;  %v467_v46 = vld [vmem:[#allocation1 + $0x12] sm:$0xff]  ;;  %v472_v11 = vld [vmem:[#allocation1 + $0x3f] sm:$0xff] }
  0x42   :  { %1815 = vmatpush.bf16.msra.mxu0 %v7942_v8  ;;  %1797 = vmatmul.bf16.vlgmr.msrb.gmra.mxu2 %v8673_v45  ;;  %v465_v45 = vld [vmem:[#allocation1] sm:$0xff] }
  0x43   :  { %1841 = vmatpush.bf16.msra.mxu2 %v7958_v9  ;;  %1784 = vmatmul.bf16.vlgmr.msrb.gmra.mxu1 %v8682_v49  ;;  %v468_v49 = vld [vmem:[#allocation1 + $0x1b] sm:$0xff]  ;;  %v469_v8 = vld [vmem:[#allocation1 + $0x24] sm:$0xff] }
  0x44   :  { %1828 = vmatpush.bf16.msra.mxu1 %v7950_v12  ;;  %1810 = vmatmul.bf16.vlgmr.msrb.gmra.mxu3 %v8677_v47  ;;  %v7998_v47 = vld [vmem:[%s11308_s1 + $0x3f8] sm:$0xff]  ;;  %v51_v12 = vld [vmem:[%s11307_s0 + $0x10] sm:$0xff] }
  0x45   :  { %1854 = vmatpush.bf16.msra.mxu3 %v7966_v13  ;;  %v471_v9 = vld [vmem:[#allocation1 + $0x36] sm:$0xff]  ;;  %v7976_v13 = vld [vmem:[%s11308_s1 + $0x348] sm:$0xff] }
  0x46   :  { %1816 = vmatpush.bf16.msra.mxu0 %v7941_v14  ;;  %474 = vst [vmem:[#allocation1] ss:$9 sm:$0xff] %v51_v12  ;;  %v7992_v14 = vld [vmem:[%s11308_s1 + $0x3c8] sm:$0xff]  ;;  %v8042_v12 = vld [vmem:[%s11308_s1 + $0x558] sm:$0xff] }
  0x47   :  { %1842 = vmatpush.bf16.msra.mxu2 %v7957_v15  ;;  %v7967_v15 = vld [vmem:[%s11308_s1 + $0x300] sm:$0xff] }
  0x48   :  { %1829 = vmatpush.bf16.msra.mxu1 %v7949_v16  ;;  %v7983_v16 = vld [vmem:[%s11308_s1 + $0x380] sm:$0xff] }
  0x49   :  { %1855 = vmatpush.bf16.msra.mxu3 %v7965_v17  ;;  %v8006_v17 = vld [vmem:[%s11308_s1 + $0x438] sm:$0xff] }
  0x4a   :  { %1817 = vmatpush.bf16.msra.mxu0 %v7940_v18  ;;  %v8022_v18 = vld [vmem:[%s11308_s1 + $0x4b8] sm:$0xff] }
  0x4b   :  { %1843 = vmatpush.bf16.msra.mxu2 %v7956_v19  ;;  %v7975_v19 = vld [vmem:[%s11308_s1 + $0x340] sm:$0xff] }
  0x4c   :  { %1830 = vmatpush.bf16.msra.mxu1 %v7948_v20  ;;  %v7991_v20 = vld [vmem:[%s11308_s1 + $0x3c0] sm:$0xff] }
  0x4d   :  { %1856 = vmatpush.bf16.msra.mxu3 %v7964_v21  ;;  %v8014_v21 = vld [vmem:[%s11308_s1 + $0x478] sm:$0xff] }
  0x4e   :  { %1818 = vmatpush.bf16.msra.mxu0 %v7939_v22  ;;  %v8030_v22 = vld [vmem:[%s11308_s1 + $0x4f8] sm:$0xff] }
  0x4f   :  { %1844 = vmatpush.bf16.msra.mxu2 %v7955_v23  ;;  %v8005_v23 = vld [vmem:[%s11308_s1 + $0x430] sm:$0xff] }
  0x50   :  { %1831 = vmatpush.bf16.msra.mxu1 %v7947_v24  ;;  %v8021_v24 = vld [vmem:[%s11308_s1 + $0x4b0] sm:$0xff] }
  0x51   :  { %1857 = vmatpush.bf16.msra.mxu3 %v7963_v25  ;;  %v8013_v25 = vld [vmem:[%s11308_s1 + $0x470] sm:$0xff] }
  0x52   :  { %1819 = vmatpush.bf16.msra.mxu0 %v7938_v26  ;;  %v8029_v26 = vld [vmem:[%s11308_s1 + $0x4f0] sm:$0xff] }
  0x53   :  { %1845 = vmatpush.bf16.msra.mxu2 %v7954_v27  ;;  %v8004_v27 = vld [vmem:[%s11308_s1 + $0x428] sm:$0xff] }
  0x54   :  { %1832 = vmatpush.bf16.msra.mxu1 %v7946_v28  ;;  %v8020_v28 = vld [vmem:[%s11308_s1 + $0x4a8] sm:$0xff] }
  0x55   :  { %1858 = vmatpush.bf16.msra.mxu3 %v7962_v29  ;;  %v8012_v29 = vld [vmem:[%s11308_s1 + $0x468] sm:$0xff] }
  0x56   :  { %1820 = vmatpush.bf16.msra.mxu0 %v7937_v30  ;;  %v8028_v30 = vld [vmem:[%s11308_s1 + $0x4e8] sm:$0xff] }
  0x57   :  { %1846 = vmatpush.bf16.msra.mxu2 %v7953_v31  ;;  %v8003_v31 = vld [vmem:[%s11308_s1 + $0x420] sm:$0xff] }
  0x58   :  { %1833 = vmatpush.bf16.msra.mxu1 %v7945_v32  ;;  %v8019_v32 = vld [vmem:[%s11308_s1 + $0x4a0] sm:$0xff] }
  0x59   :  { %1859 = vmatpush.bf16.msra.mxu3 %v7961_v33  ;;  %v8011_v33 = vld [vmem:[%s11308_s1 + $0x460] sm:$0xff] }
  0x5a   :  { %1821 = vmatpush.bf16.msra.mxu0 %v7936_v34  ;;  %v8027_v34 = vld [vmem:[%s11308_s1 + $0x4e0] sm:$0xff] }
  0x5b   :  { %1847 = vmatpush.bf16.msra.mxu2 %v7952_v35  ;;  %v8002_v35 = vld [vmem:[%s11308_s1 + $0x418] sm:$0xff] }
  0x5c   :  { %1834 = vmatpush.bf16.msra.mxu1 %v7944_v36  ;;  %v8018_v36 = vld [vmem:[%s11308_s1 + $0x498] sm:$0xff] }
  0x5d   :  { %1860 = vmatpush.bf16.msra.mxu3 %v7960_v37  ;;  %v8010_v37 = vld [vmem:[%s11308_s1 + $0x458] sm:$0xff] }
  0x5e   :  { %1822 = vmatpush.bf16.msra.mxu0 %v7935_v38  ;;  %v8026_v38 = vld [vmem:[%s11308_s1 + $0x4d8] sm:$0xff] }
  0x5f   :  { %1848 = vmatpush.bf16.msra.mxu2 %v7951_v39  ;;  %v8001_v39 = vld [vmem:[%s11308_s1 + $0x410] sm:$0xff] }
  0x60   :  { %1835 = vmatpush.bf16.msra.mxu1 %v7943_v42  ;;  %v8025_v42 = vld [vmem:[%s11308_s1 + $0x4d0] sm:$0xff] }
  0x61   :  { %1861 = vmatpush.bf16.msra.mxu3 %v7959_v43  ;;  %1823 = vmatmul.bf16.vlgmr.msra.gmra.mxu0 %v465_v45  ;;  %v8000_v43 = vld [vmem:[%s11308_s1 + $0x408] sm:$0xff] }
  0x62   :  { %1867 = vmatpush.bf16.msrb.mxu0 %v7974_v40  ;;  %1849 = vmatmul.bf16.vlgmr.msra.gmra.mxu2 %v467_v46  ;;  %v8017_v40 = vld [vmem:[%s11308_s1 + $0x490] sm:$0xff]  ;;  %v8008_v45 = vld [vmem:[%s11308_s1 + $0x448] sm:$0xff] }
  0x63   :  { %1893 = vmatpush.bf16.msrb.mxu2 %v7990_v41  ;;  %1836 = vmatmul.bf16.vlgmr.msra.gmra.mxu1 %v466_v48  ;;  %v8009_v41 = vld [vmem:[%s11308_s1 + $0x450] sm:$0xff]  ;;  %v8024_v46 = vld [vmem:[%s11308_s1 + $0x4c8] sm:$0xff]  ;;  %v8015_v48 = vld [vmem:[%s11308_s1 + $0x480] sm:$0xff] }
  0x64   :  { %1880 = vmatpush.bf16.msrb.mxu1 %v7982_v44  ;;  %1862 = vmatmul.bf16.vlgmr.msra.gmra.mxu3 %v468_v49  ;;  %v8016_v44 = vld [vmem:[%s11308_s1 + $0x488] sm:$0xff]  ;;  %v8038_v49 = vld [vmem:[%s11308_s1 + $0x538] sm:$0xff] }
  0x65   :  { %1906 = vmatpush.bf16.msrb.mxu3 %v7998_v47  ;;  %v7999_v47 = vld [vmem:[%s11308_s1 + $0x400] sm:$0xff] }
  0x66   :  { %1868 = vmatpush.bf16.msrb.mxu0 %v7973_v50  ;;  %v8054_v50 = vld [vmem:[%s11308_s1 + $0x5b8] sm:$0xff] }
  0x67   :  { %1894 = vmatpush.bf16.msrb.mxu2 %v7989_v51  ;;  %v8007_v51 = vld [vmem:[%s11308_s1 + $0x440] sm:$0xff] }
  0x68   :  { %1881 = vmatpush.bf16.msrb.mxu1 %v7981_v52  ;;  %v8023_v52 = vld [vmem:[%s11308_s1 + $0x4c0] sm:$0xff] }
  0x69   :  { %1907 = vmatpush.bf16.msrb.mxu3 %v7997_v53  ;;  %v8046_v53 = vld [vmem:[%s11308_s1 + $0x578] sm:$0xff] }
  0x6a   :  { %1869 = vmatpush.bf16.msrb.mxu0 %v7972_v54  ;;  %v475_v54 = vld [vmem:[#allocation1] sm:$0xff] }
  0x6b   :  { %1895 = vmatpush.bf16.msrb.mxu2 %v7988_v55  ;;  %v477_v55 = vld [vmem:[#allocation1 + $0x12] sm:$0xff] }
  0x6c   :  { %1882 = vmatpush.bf16.msrb.mxu1 %v7980_v56  ;;  %v8062_v56 = vld [vmem:[%s11308_s1 + $0x5f8] sm:$0xff] }
  0x6d   :  { %1908 = vmatpush.bf16.msrb.mxu3 %v7996_v57  ;;  %v476_v57 = vld [vmem:[#allocation1 + $0x9] sm:$0xff] }
  0x6e   :  { %1870 = vmatpush.bf16.msrb.mxu0 %v7971_v58  ;;  %v478_v58 = vld [vmem:[#allocation1 + $0x1b] sm:$0xff] }
  0x6f   :  { %1896 = vmatpush.bf16.msrb.mxu2 %v7987_v59  ;;  %v8037_v59 = vld [vmem:[%s11308_s1 + $0x530] sm:$0xff] }
  0x70   :  { %1883 = vmatpush.bf16.msrb.mxu1 %v7979_v60  ;;  %v8053_v60 = vld [vmem:[%s11308_s1 + $0x5b0] sm:$0xff] }
  0x71   :  { %1909 = vmatpush.bf16.msrb.mxu3 %v7995_v61  ;;  %v8045_v61 = vld [vmem:[%s11308_s1 + $0x570] sm:$0xff] }
  0x72   :  { %1871 = vmatpush.bf16.msrb.mxu0 %v7970_v62  ;;  %v8061_v62 = vld [vmem:[%s11308_s1 + $0x5f0] sm:$0xff] }
  0x73   :  { %1897 = vmatpush.bf16.msrb.mxu2 %v7986_v63  ;;  %v8036_v63 = vld [vmem:[%s11308_s1 + $0x528] sm:$0xff] }
  0x74   :  { %1884 = vmatpush.bf16.msrb.mxu1 %v7978_v0  ;;  %v8052_v0 = vld [vmem:[%s11308_s1 + $0x5a8] sm:$0xff] }
  0x75   :  { %1910 = vmatpush.bf16.msrb.mxu3 %v7994_v1  ;;  %v8044_v1 = vld [vmem:[%s11308_s1 + $0x568] sm:$0xff] }
  0x76   :  { %1872 = vmatpush.bf16.msrb.mxu0 %v7969_v2  ;;  %v8060_v2 = vld [vmem:[%s11308_s1 + $0x5e8] sm:$0xff] }
  0x77   :  { %1898 = vmatpush.bf16.msrb.mxu2 %v7985_v3  ;;  %v8035_v3 = vld [vmem:[%s11308_s1 + $0x520] sm:$0xff] }
  0x78   :  { %1885 = vmatpush.bf16.msrb.mxu1 %v7977_v4  ;;  %v8051_v4 = vld [vmem:[%s11308_s1 + $0x5a0] sm:$0xff] }
  0x79   :  { %1911 = vmatpush.bf16.msrb.mxu3 %v7993_v5 }
  0x7a   :  { %1873 = vmatpush.bf16.msrb.mxu0 %v7968_v6  ;;  %v8043_v6 = vld [vmem:[%s11308_s1 + $0x560] sm:$0xff] }
  0x7b   :  { %1899 = vmatpush.bf16.msrb.mxu2 %v7984_v7  ;;  %v8059_v7 = vld [vmem:[%s11308_s1 + $0x5e0] sm:$0xff] }
  0x7c   :  { %1886 = vmatpush.bf16.msrb.mxu1 %v7976_v13  ;;  %v8058_v13 = vld [vmem:[%s11308_s1 + $0x5d8] sm:$0xff] }
  0x7d   :  { %1912 = vmatpush.bf16.msrb.mxu3 %v7992_v14 }
  0x7e   :  { %1874 = vmatpush.bf16.msrb.mxu0 %v7967_v15  ;;  %v8033_v15 = vld [vmem:[%s11308_s1 + $0x510] sm:$0xff] }
  0x7f   :  { %1900 = vmatpush.bf16.msrb.mxu2 %v7983_v16  ;;  %v8049_v16 = vld [vmem:[%s11308_s1 + $0x590] sm:$0xff] }
  0x80   :  { %1887 = vmatpush.bf16.msrb.mxu1 %v7975_v19 }
  0x81   :  { %1913 = vmatpush.bf16.msrb.mxu3 %v7991_v20  ;;  %1875 = vmatmul.bf16.vlgmr.msrb.gmra.mxu0 %v469_v8  ;;  %v8041_v20 = vld [vmem:[%s11308_s1 + $0x550] sm:$0xff] }
  0x82   :  { %1919 = vmatpush.bf16.msra.mxu0 %v8006_v17  ;;  %1901 = vmatmul.bf16.vlgmr.msrb.gmra.mxu2 %v471_v9  ;;  %v8034_v9 = vld [vmem:[%s11308_s1 + $0x518] sm:$0xff] }
  0x83   :  { %1945 = vmatpush.bf16.msra.mxu2 %v8022_v18  ;;  %1888 = vmatmul.bf16.vlgmr.msrb.gmra.mxu1 %v470_v10  ;;  %v8050_v10 = vld [vmem:[%s11308_s1 + $0x598] sm:$0xff] }
  0x84   :  { %1932 = vmatpush.bf16.msra.mxu1 %v8014_v21  ;;  %1914 = vmatmul.bf16.vlgmr.msrb.gmra.mxu3 %v472_v11  ;;  %v8057_v21 = vld [vmem:[%s11308_s1 + $0x5d0] sm:$0xff] }
  0x85   :  { %1958 = vmatpush.bf16.msra.mxu3 %v8030_v22  ;;  %v8032_v22 = vld [vmem:[%s11308_s1 + $0x508] sm:$0xff] }
  0x86   :  { %1920 = vmatpush.bf16.msra.mxu0 %v8005_v23 }
  0x87   :  { %1946 = vmatpush.bf16.msra.mxu2 %v8021_v24  ;;  %v8048_v24 = vld [vmem:[%s11308_s1 + $0x588] sm:$0xff] }
  0x88   :  { %1933 = vmatpush.bf16.msra.mxu1 %v8013_v25  ;;  %v479_v25 = vld [vmem:[#allocation1 + $0x24] sm:$0xff] }
  0x89   :  { %1959 = vmatpush.bf16.msra.mxu3 %v8029_v26  ;;  %v481_v26 = vld [vmem:[#allocation1 + $0x36] sm:$0xff] }
  0x8a   :  { %1921 = vmatpush.bf16.msra.mxu0 %v8004_v27 }
  0x8b   :  { %1947 = vmatpush.bf16.msra.mxu2 %v8020_v28  ;;  %v480_v28 = vld [vmem:[#allocation1 + $0x2d] sm:$0xff] }
  0x8c   :  { %1934 = vmatpush.bf16.msra.mxu1 %v8012_v29  ;;  %v482_v29 = vld [vmem:[#allocation1 + $0x3f] sm:$0xff] }
  0x8d   :  { %1960 = vmatpush.bf16.msra.mxu3 %v8028_v30  ;;  %v52_v30 = vld [vmem:[%s11307_s0 + $0x18] sm:$0x1] }
  0x8e   :  { %1922 = vmatpush.bf16.msra.mxu0 %v8003_v31  ;;  %484 = vst [vmem:[#allocation1] ss:$9 sm:$0xff] %v52_v30  ;;  %v8040_v31 = vld [vmem:[%s11308_s1 + $0x548] sm:$0xff] }
  0x8f   :  { %1948 = vmatpush.bf16.msra.mxu2 %v8019_v32  ;;  %v8056_v32 = vld [vmem:[%s11308_s1 + $0x5c8] sm:$0xff] }
  0x90   :  { %1935 = vmatpush.bf16.msra.mxu1 %v8011_v33 }
  0x91   :  { %1961 = vmatpush.bf16.msra.mxu3 %v8027_v34  ;;  %v8031_v34 = vld [vmem:[%s11308_s1 + $0x500] sm:$0xff] }
  0x92   :  { %1923 = vmatpush.bf16.msra.mxu0 %v8002_v35  ;;  %v8047_v35 = vld [vmem:[%s11308_s1 + $0x580] sm:$0xff] }
  0x93   :  { %1949 = vmatpush.bf16.msra.mxu2 %v8018_v36  ;;  %v8070_v36 = vld [vmem:[%s11308_s1 + $0x638] sm:$0xff] }
  0x94   :  { %1936 = vmatpush.bf16.msra.mxu1 %v8010_v37 }
  0x95   :  { %1962 = vmatpush.bf16.msra.mxu3 %v8026_v38  ;;  %v8039_v38 = vld [vmem:[%s11308_s1 + $0x540] sm:$0xff] }
  0x96   :  { %1924 = vmatpush.bf16.msra.mxu0 %v8001_v39  ;;  %v8055_v39 = vld [vmem:[%s11308_s1 + $0x5c0] sm:$0xff] }
  0x97   :  { %1950 = vmatpush.bf16.msra.mxu2 %v8017_v40  ;;  %v8069_v40 = vld [vmem:[%s11308_s1 + $0x630] sm:$0xff] }
  0x98   :  { %1937 = vmatpush.bf16.msra.mxu1 %v8009_v41  ;;  %v8068_v41 = vld [vmem:[%s11308_s1 + $0x628] sm:$0xff] }
  0x99   :  { %1963 = vmatpush.bf16.msra.mxu3 %v8025_v42  ;;  %v8067_v42 = vld [vmem:[%s11308_s1 + $0x620] sm:$0xff] }
  0x9a   :  { %1925 = vmatpush.bf16.msra.mxu0 %v8000_v43 }
  0x9b   :  { %1951 = vmatpush.bf16.msra.mxu2 %v8016_v44 }
  0x9c   :  { %1938 = vmatpush.bf16.msra.mxu1 %v8008_v45 }
  0x9d   :  { %1964 = vmatpush.bf16.msra.mxu3 %v8024_v46 }
  0x9e   :  { %1926 = vmatpush.bf16.msra.mxu0 %v7999_v47  ;;  %v1720_v5 = vpop.f32.mrf.mxu0  ;;  %v8066_v47 = vld [vmem:[%s11308_s1 + $0x618] sm:$0xff] }
  0x9f   :  { %1952 = vmatpush.bf16.msra.mxu2 %v8015_v48 }
  0xa0   :  { %1939 = vmatpush.bf16.msra.mxu1 %v8007_v51  ;;  %v1733_v8 = vpop.f32.mrf.mxu1 }
  0xa1   :  { %1965 = vmatpush.bf16.msra.mxu3 %v8023_v52  ;;  %1927 = vmatmul.bf16.vlgmr.msra.gmra.mxu0 %v475_v54  ;;  %v1734_v11 = vadd.f32 %v1733_v8, %v1720_v5 }
  0xa2   :  { %1971 = vmatpush.bf16.msrb.mxu0 %v8038_v49  ;;  %1953 = vmatmul.bf16.vlgmr.msra.gmra.mxu2 %v477_v55  ;;  %v8064_v55 = vld [vmem:[%s11308_s1 + $0x608] sm:$0xff] }
  0xa3   :  { %1997 = vmatpush.bf16.msrb.mxu2 %v8054_v50  ;;  %1940 = vmatmul.bf16.vlgmr.msra.gmra.mxu1 %v476_v57  ;;  %v8065_v50 = vld [vmem:[%s11308_s1 + $0x610] sm:$0xff]  ;;  %v8063_v57 = vld [vmem:[%s11308_s1 + $0x600] sm:$0xff] }
  0xa4   :  { %1984 = vmatpush.bf16.msrb.mxu1 %v8046_v53  ;;  %1966 = vmatmul.bf16.vlgmr.msra.gmra.mxu3 %v478_v58 }
  0xa5   :  { %2010 = vmatpush.bf16.msrb.mxu3 %v8062_v56  ;;  %v1746_v14 = vpop.f32.mrf.mxu2 }
  0xa6   :  { %1972 = vmatpush.bf16.msrb.mxu0 %v8037_v59  ;;  %v1747_v17 = vadd.f32 %v1746_v14, %v1734_v11  ;;  %v1722_v19 = vpop.f32.mrf.mxu0  ;;  %v485_v59 = vld [vmem:[#allocation1] sm:$0xff] }
  0xa7   :  { %1998 = vmatpush.bf16.msrb.mxu2 %v8053_v60  ;;  %v1759_v18 = vpop.f32.mrf.mxu3 }
  0xa8   :  { %1985 = vmatpush.bf16.msrb.mxu1 %v8045_v61  ;;  %v1760_v23 = vadd.f32 %v1759_v18, %v1747_v17  ;;  %v1735_v27 = vpop.f32.mrf.mxu1 }
  0xa9   :  { %2011 = vmatpush.bf16.msrb.mxu3 %v8061_v62 }
  0xaa   :  { %1973 = vmatpush.bf16.msrb.mxu0 %v8036_v63 }
  0xab   :  { %1999 = vmatpush.bf16.msrb.mxu2 %v8052_v0 }
  0xac   :  { %1986 = vmatpush.bf16.msrb.mxu1 %v8044_v1 }
  0xad   :  { %2012 = vmatpush.bf16.msrb.mxu3 %v8060_v2  ;;  %v1748_v33 = vpop.f32.mrf.mxu2 }
  0xae   :  { %1974 = vmatpush.bf16.msrb.mxu0 %v8035_v3 }
  0xaf   :  { %2000 = vmatpush.bf16.msrb.mxu2 %v8051_v4  ;;  %v1761_v37 = vpop.f32.mrf.mxu3 }
  0xb0   :  { %1987 = vmatpush.bf16.msrb.mxu1 %v8043_v6 }
  0xb1   :  { %2013 = vmatpush.bf16.msrb.mxu3 %v8059_v7 }
  0xb2   :  { %1975 = vmatpush.bf16.msrb.mxu0 %v8034_v9 }
  0xb3   :  { %2001 = vmatpush.bf16.msrb.mxu2 %v8050_v10 }
  0xb4   :  { %1988 = vmatpush.bf16.msrb.mxu1 %v8042_v12 }
  0xb5   :  { %2014 = vmatpush.bf16.msrb.mxu3 %v8058_v13 }
  0xb6   :  { %1976 = vmatpush.bf16.msrb.mxu0 %v8033_v15 }
  0xb7   :  { %2002 = vmatpush.bf16.msrb.mxu2 %v8049_v16 }
  0xb8   :  { %1989 = vmatpush.bf16.msrb.mxu1 %v8041_v20 }
  0xb9   :  { %2015 = vmatpush.bf16.msrb.mxu3 %v8057_v21 }
  0xba   :  { %1977 = vmatpush.bf16.msrb.mxu0 %v8032_v22 }
  0xbb   :  { %2003 = vmatpush.bf16.msrb.mxu2 %v8048_v24 }
  0xbc   :  { %1990 = vmatpush.bf16.msrb.mxu1 %v8040_v31 }
  0xbd   :  { %2016 = vmatpush.bf16.msrb.mxu3 %v8056_v32 }
  0xbe   :  { %1978 = vmatpush.bf16.msrb.mxu0 %v8031_v34  ;;  %v1772_v43 = vpop.f32.mrf.mxu0 }
  0xbf   :  { %2004 = vmatpush.bf16.msrb.mxu2 %v8047_v35  ;;  %v1773_v44 = vadd.f32 %v1772_v43, %v1760_v23  ;;  %v8085_v43 = vld [vmem:[%s11311_s4 + $0x74] sm:$0xf] }
  0xc0   :  { %1991 = vmatpush.bf16.msrb.mxu1 %v8039_v38  ;;  %v1785_v45 = vpop.f32.mrf.mxu1 }
  0xc1   :  { %2017 = vmatpush.bf16.msrb.mxu3 %v8055_v39  ;;  %1979 = vmatmul.bf16.vlgmr.msrb.gmra.mxu0 %v479_v25  ;;  %v1786_v46 = vadd.f32 %v1785_v45, %v1773_v44  ;;  %v6779_v45 = vld [vmem:[%s11311_s4 + $0x78] sm:$0xf0] }
  0xc2   :  { %2023 = vmatpush.bf16.msra.mxu0 %v8070_v36  ;;  %2005 = vmatmul.bf16.vlgmr.msrb.gmra.mxu2 %v481_v26 }
  0xc3   :  { %1992 = vmatmul.bf16.vlgmr.msrb.gmra.mxu1 %v480_v28 }
  0xc4   :  { %2018 = vmatmul.bf16.vlgmr.msrb.gmra.mxu3 %v482_v29 }
  0xc5   :  { %v1798_v48 = vpop.f32.mrf.mxu2 }
  0xc6   :  { %2024 = vmatpush.bf16.msra.mxu0 %v8069_v40  ;;  %v1799_v49 = vadd.f32 %v1798_v48, %v1786_v46  ;;  %v1774_v52 = vpop.f32.mrf.mxu0 }
  0xc7   :  { %v1811_v51 = vpop.f32.mrf.mxu3 }
  0xc8   :  { %v1812_v53 = vadd.f32 %v1811_v51, %v1799_v49  ;;  %v1787_v54 = vpop.f32.mrf.mxu1  ;;  %v6769_v49 = vld [vmem:[%s11311_s4 + $0x60] sm:$0xf]  ;;  %v8083_v51 = vld [vmem:[%s11311_s4 + $0x64] sm:$0xf] }
  0xca   :  { %2025 = vmatpush.bf16.msra.mxu0 %v8068_v41  ;;  %v6777_v41 = vld [vmem:[%s11311_s4 + $0x70] sm:$0xf] }
  0xcd   :  { %v1800_v56 = vpop.f32.mrf.mxu2 }
  0xce   :  { %2026 = vmatpush.bf16.msra.mxu0 %v8067_v42  ;;  %v8086_v42 = vld [vmem:[%s11311_s4 + $0x74] sm:$0xf0]  ;;  %v6761_v56 = vld [vmem:[%s11311_s4 + $0x50] sm:$0xf] }
  0xcf   :  { %v1813_v58 = vpop.f32.mrf.mxu3  ;;  %v6778_v44 = vor.u32 %v8086_v42, %v6777_v41 }
  0xd0   :  { %v8081_v58 = vld [vmem:[%s11311_s4 + $0x54] sm:$0xf] }
  0xd1   :  { %2186 = vmatpush.bf16.msra.mxu1 %v6778_v44  ;;  %v8072_v44 = vld [vmem:[%s11311_s4 + $0x4] sm:$0xf0] }
  0xd2   :  { %2027 = vmatpush.bf16.msra.mxu0 %v8066_v47  ;;  %v6782_v47 = vor.u32 %v8085_v43, %v6779_v45  ;;  %v6721_v43 = vld [vmem:[%s11311_s4] sm:$0xf]  ;;  %v8071_v45 = vld [vmem:[%s11311_s4 + $0x4] sm:$0xf] }
  0xd4   :  { %2199 = vmatpush.bf16.msra.mxu2 %v6782_v47  ;;  %v6722_v47 = vor.u32 %v8072_v44, %v6721_v43  ;;  %v6967_v43 = vld [vmem:[%s11314_s7 + $0x18c] sm:$0xf0] }
  0xd5   :  { %v6973_v44 = vld [vmem:[%s11314_s7 + $0x170] sm:$0xf] }
  0xd6   :  { %2028 = vmatpush.bf16.msra.mxu0 %v8065_v50  ;;  %v8084_v50 = vld [vmem:[%s11311_s4 + $0x64] sm:$0xf0] }
  0xd7   :  { %v6770_v52 = vor.u32 %v8084_v50, %v6769_v49 }
  0xd9   :  { %2187 = vmatpush.bf16.msra.mxu1 %v6770_v52  ;;  %v8154_v52 = vld [vmem:[%s11314_s7 + $0x218] sm:$0xf0] }
  0xda   :  { %2029 = vmatpush.bf16.msra.mxu0 %v8064_v55 }
  0xde   :  { %2030 = vmatpush.bf16.msra.mxu0 %v8063_v57  ;;  %v1824_v60 = vpop.f32.mrf.mxu0  ;;  %v8082_v57 = vld [vmem:[%s11311_s4 + $0x54] sm:$0xf0] }
  0xdf   :  { %v1825_v61 = vadd.f32 %v1824_v60, %v1812_v53  ;;  %v6771_v53 = vld [vmem:[%s11311_s4 + $0x68] sm:$0xf0]  ;;  %v6762_v60 = vor.u32 %v8082_v57, %v6761_v56 }
  0xe0   :  { %v1837_v62 = vpop.f32.mrf.mxu1  ;;  %v6774_v54 = vor.u32 %v8083_v51, %v6771_v53  ;;  %v7037_v51 = vld [vmem:[%s11314_s7 + $0x1f8] sm:$0xf]  ;;  %v7001_v53 = vld [vmem:[%s11314_s7 + $0x1b0] sm:$0xf] }
  0xe1   :  { %2031 = vmatmul.bf16.vlgmr.msra.gmra.mxu0 %v485_v59  ;;  %v1838_v63 = vadd.f32 %v1837_v62, %v1825_v61  ;;  %v6763_v61 = vld [vmem:[%s11311_s4 + $0x58] sm:$0xf0]  ;;  %2188 = vmatpush.bf16.msra.mxu1 %v6762_v60 }
  0xe2   :  { %2200 = vmatpush.bf16.msra.mxu2 %v6774_v54  ;;  %v7038_v54 = vor.u32 %v8154_v52, %v7037_v51  ;;  %v6821_v51 = vld [vmem:[%s11314_s7 + $0x48] sm:$0xf]  ;;  %v8100_v52 = vld [vmem:[%s11314_s7 + $0x68] sm:$0xf0] }
  0xe4   :  { %2683 = vmatpush.bf16.msra.mxu3 %v7038_v54  ;;  %v8123_v54 = vld [vmem:[%s11314_s7 + $0x124] sm:$0xf] }
  0xe5   :  { %v1850_v0 = vpop.f32.mrf.mxu2 }
  0xe6   :  { %v1851_v1 = vadd.f32 %v1850_v0, %v1838_v63  ;;  %v1826_v3 = vpop.f32.mrf.mxu0  ;;  %v6766_v63 = vor.u32 %v8081_v58, %v6763_v61 }
  0xe7   :  { %v1863_v2 = vpop.f32.mrf.mxu3  ;;  %v8080_v3 = vld [vmem:[%s11311_s4 + $0x44] sm:$0xf0] }
  0xe8   :  { %v1864_v4 = vadd.f32 %v1863_v2, %v1851_v1  ;;  %v1839_v5 = vpop.f32.mrf.mxu1  ;;  %2201 = vmatpush.bf16.msra.mxu2 %v6766_v63  ;;  %v6753_v2 = vld [vmem:[%s11311_s4 + $0x40] sm:$0xf] }
  0xe9   :  { %v6754_v5 = vor.u32 %v8080_v3, %v6753_v2  ;;  %v2054_v63 = vld [vmem:[%s11309_s2] sm:$0x1] }
  0xea   :  { %v2069_v3 = vld [vmem:[%s11310_s3] sm:$0x1] }
  0xeb   :  { %2189 = vmatpush.bf16.msra.mxu1 %v6754_v5 }
  0xed   :  { %v1852_v6 = vpop.f32.mrf.mxu2 }
  0xee   :  { %v8079_v6 = vld [vmem:[%s11311_s4 + $0x44] sm:$0xf] }
  0xef   :  { %v1865_v7 = vpop.f32.mrf.mxu3 }
  0xf0   :  { %v6755_v7 = vld [vmem:[%s11311_s4 + $0x48] sm:$0xf0] }
  0xfe   :  { %v1876_v8 = vpop.f32.mrf.mxu0 }
  0xff   :  { %v1877_v9 = vadd.f32 %v1876_v8, %v1864_v4 }
 0x100   :  { %v1889_v10 = vpop.f32.mrf.mxu1 }
 0x101   :  { %v1890_v11 = vadd.f32 %v1889_v10, %v1877_v9  ;;  %v6758_v9 = vor.u32 %v8079_v6, %v6755_v7 }
 0x103   :  { %2202 = vmatpush.bf16.msra.mxu2 %v6758_v9 }
 0x105   :  { %v1902_v12 = vpop.f32.mrf.mxu2 }
 0x106   :  { %v1903_v13 = vadd.f32 %v1902_v12, %v1890_v11  ;;  %v1878_v15 = vpop.f32.mrf.mxu0  ;;  %v6745_v12 = vld [vmem:[%s11311_s4 + $0x30] sm:$0xf] }
 0x107   :  { %v1915_v14 = vpop.f32.mrf.mxu3 }
 0x108   :  { %v1916_v16 = vadd.f32 %v1915_v14, %v1903_v13  ;;  %v1891_v17 = vpop.f32.mrf.mxu1  ;;  %v8078_v13 = vld [vmem:[%s11311_s4 + $0x34] sm:$0xf0]  ;;  %v8077_v14 = vld [vmem:[%s11311_s4 + $0x34] sm:$0xf] }
 0x10d   :  { %v1904_v18 = vpop.f32.mrf.mxu2 }
 0x10e   :  { %v6746_v18 = vor.u32 %v8078_v13, %v6745_v12  ;;  %v6965_v13 = vld [vmem:[%s11314_s7 + $0x168] sm:$0xf] }
 0x10f   :  { %v1917_v19 = vpop.f32.mrf.mxu3 }
 0x110   :  { %v6747_v19 = vld [vmem:[%s11311_s4 + $0x38] sm:$0xf0]  ;;  %2190 = vmatpush.bf16.msra.mxu1 %v6746_v18 }
 0x111   :  { %v8150_v18 = vld [vmem:[%s11314_s7 + $0x1fc] sm:$0xf] }
 0x11e   :  { %v1928_v20 = vpop.f32.mrf.mxu0 }
 0x11f   :  { %v1929_v31 = vadd.f32 %v1928_v20, %v1916_v16  ;;  %v6750_v20 = vor.u32 %v8077_v14, %v6747_v19  ;;  %v8136_v14 = vld [vmem:[%s11314_s7 + $0x188] sm:$0xf0]  ;;  %v7039_v19 = vld [vmem:[%s11314_s7 + $0x21c] sm:$0xf0] }
 0x120   :  { %v1941_v21 = vpop.f32.mrf.mxu1 }
 0x121   :  { %v1942_v35 = vadd.f32 %v1941_v21, %v1929_v31  ;;  %2203 = vmatpush.bf16.msra.mxu2 %v6750_v20  ;;  %v7042_v20 = vor.u32 %v8150_v18, %v7039_v19  ;;  %v8110_v18 = vld [vmem:[%s11314_s7 + $0xb8] sm:$0xf0] }
 0x122   :  { %v8106_v19 = vld [vmem:[%s11314_s7 + $0x9c] sm:$0xf] }
 0x123   :  { %2696 = vmatpush.bf16.msrb.mxu0 %v7042_v20  ;;  %v6867_v20 = vld [vmem:[%s11314_s7 + $0xbc] sm:$0xf0] }
 0x125   :  { %v1954_v22 = vpop.f32.mrf.mxu2 }
 0x126   :  { %v1930_v24 = vpop.f32.mrf.mxu0  ;;  %v1955_v36 = vadd.f32 %v1954_v22, %v1942_v35  ;;  %v8073_v35 = vld [vmem:[%s11311_s4 + $0x14] sm:$0xf] }
 0x127   :  { %v1967_v23 = vpop.f32.mrf.mxu3  ;;  %v8076_v24 = vld [vmem:[%s11311_s4 + $0x24] sm:$0xf0] }
 0x128   :  { %v1943_v25 = vpop.f32.mrf.mxu1  ;;  %v1968_v39 = vadd.f32 %v1967_v23, %v1955_v36  ;;  %v6737_v23 = vld [vmem:[%s11311_s4 + $0x20] sm:$0xf] }
 0x129   :  { %v8075_v25 = vld [vmem:[%s11311_s4 + $0x24] sm:$0xf] }
 0x12d   :  { %v1956_v26 = vpop.f32.mrf.mxu2 }
 0x12f   :  { %v1969_v27 = vpop.f32.mrf.mxu3 }
 0x13e   :  { %v1980_v28 = vpop.f32.mrf.mxu0 }
 0x13f   :  { %v1981_v40 = vadd.f32 %v1980_v28, %v1968_v39  ;;  %v6738_v28 = vor.u32 %v8076_v24, %v6737_v23  ;;  %v6731_v39 = vld [vmem:[%s11311_s4 + $0x18] sm:$0xf0]  ;;  %v8151_v23 = vld [vmem:[%s11314_s7 + $0x204] sm:$0xf] }
 0x140   :  { %v1993_v29 = vpop.f32.mrf.mxu1 }
 0x141   :  { %v1994_v46 = vadd.f32 %v1993_v29, %v1981_v40  ;;  %v6739_v29 = vld [vmem:[%s11311_s4 + $0x28] sm:$0xf0]  ;;  %2191 = vmatpush.bf16.msra.mxu1 %v6738_v28  ;;  %v6734_v40 = vor.u32 %v8073_v35, %v6731_v39  ;;  %v8118_v28 = vld [vmem:[%s11314_s7 + $0xf8] sm:$0xf0]  ;;  %v6857_v39 = vld [vmem:[%s11314_s7 + $0x90] sm:$0xf] }
 0x142   :  { %v8142_v35 = vld [vmem:[%s11314_s7 + $0x1bc] sm:$0xf] }
 0x145   :  { %v2006_v30 = vpop.f32.mrf.mxu2 }
 0x146   :  { %v1982_v33 = vpop.f32.mrf.mxu0  ;;  %v2007_v48 = vadd.f32 %v2006_v30, %v1994_v46  ;;  %v6742_v30 = vor.u32 %v8075_v25, %v6739_v29  ;;  %v7047_v25 = vld [vmem:[%s11314_s7 + $0x224] sm:$0xf0] }
 0x147   :  { %v2019_v32 = vpop.f32.mrf.mxu3  ;;  %v6729_v33 = vld [vmem:[%s11311_s4 + $0x10] sm:$0xf] }
 0x148   :  { %v1995_v34 = vpop.f32.mrf.mxu1  ;;  %v2020_v55 = vadd.f32 %v2019_v32, %v2007_v48  ;;  %2204 = vmatpush.bf16.msra.mxu2 %v6742_v30  ;;  %v6723_v48 = vld [vmem:[%s11311_s4 + $0x8] sm:$0xf0]  ;;  %v8141_v30 = vld [vmem:[%s11314_s7 + $0x1b4] sm:$0xf] }
 0x149   :  { %v8074_v34 = vld [vmem:[%s11311_s4 + $0x14] sm:$0xf0]  ;;  %v6726_v49 = vor.u32 %v8071_v45, %v6723_v48 }
 0x14a   :  { %v6975_v48 = vld [vmem:[%s11314_s7 + $0x194] sm:$0xf0] }
 0x14c   :  { %2205 = vmatpush.bf16.msra.mxu2 %v6734_v40  ;;  %v8109_v40 = vld [vmem:[%s11314_s7 + $0xb0] sm:$0xf0] }
 0x14d   :  { %v2008_v37 = vpop.f32.mrf.mxu2 }
 0x14f   :  { %v2021_v38 = vpop.f32.mrf.mxu3 }
 0x150   :  { %v6730_v38 = vor.u32 %v8074_v34, %v6729_v33  ;;  %2206 = vmatpush.bf16.msra.mxu2 %v6726_v49  ;;  %v8146_v34 = vld [vmem:[%s11314_s7 + $0x1d8] sm:$0xf0] }
 0x152   :  { %2192 = vmatpush.bf16.msra.mxu1 %v6730_v38 }
 0x156   :  { %2193 = vmatpush.bf16.msra.mxu1 %v6722_v47  ;;  %v8133_v47 = vld [vmem:[%s11314_s7 + $0x174] sm:$0xf] }
 0x15e   :  { %v2032_v59 = vpop.f32.mrf.mxu0 }
 0x15f   :  { %v9210_v62 = vadd.f32 %v2032_v59, %v2020_v55  ;;  %v8145_v55 = vld [vmem:[%s11314_s7 + $0x1d0] sm:$0xf0] }
 0x160   :  { %v7002_v56 = vor.u32 %v8145_v55, %v7001_v53  ;;  %v6822_v53 = vor.u32 %v8100_v52, %v6821_v51  ;;  %v6931_v55 = vld [vmem:[%s11314_s7 + $0x144] sm:$0xf0]  ;;  %v6945_v51 = vld [vmem:[%s11314_s7 + $0x130] sm:$0xf]  ;;  %v8129_v52 = vld [vmem:[%s11314_s7 + $0x150] sm:$0xf0] }
 0x161   :  { %v2037_v0 = vsel %vm2036_vm0, %v9210_v62, 0.0  ;;  %v2045_v1 = vmul.f32 %v9210_v62, %v9210_v62 }
 0x162   :  { %v2038_v4 = vrot.slane %v2037_v0, 4  ;;  %2684 = vmatpush.bf16.msra.mxu3 %v7002_v56  ;;  %v6937_v56 = vld [vmem:[%s11314_s7 + $0x128] sm:$0xf] }
 0x163   :  { %v2046_v8 = vsel %vm2036_vm0, %v2045_v1, 0.0 }
 0x164   :  { %v2039_v10 = vadd.f32 %v2038_v4, %v2037_v0  ;;  %v2047_v11 = vrot.slane %v2046_v8, 4 }
 0x166   :  { %v2040_v15 = vrot.slane %v2039_v10, 2  ;;  %v2048_v16 = vadd.f32 %v2047_v11, %v2046_v8  ;;  %v2034_v17 = vpop.f32.mrf.mxu0 }
 0x168   :  { %v2041_v21 = vadd.f32 %v2040_v15, %v2039_v10  ;;  %v2049_v22 = vrot.slane %v2048_v16, 2  ;;  %v6966_v15 = vor.u32 %v8136_v14, %v6965_v13  ;;  %v8156_v13 = vld [vmem:[%s11314_s7 + $0x228] sm:$0xf0] }
 0x16a   :  { %v2042_v26 = vrot.slane %v2041_v21, 1  ;;  %v2050_v27 = vadd.f32 %v2049_v22, %v2048_v16  ;;  %2685 = vmatpush.bf16.msra.mxu3 %v6966_v15  ;;  %v8127_v16 = vld [vmem:[%s11314_s7 + $0x140] sm:$0xf0]  ;;  %v8105_v15 = vld [vmem:[%s11314_s7 + $0x94] sm:$0xf] }
 0x16b   :  { %v8155_v22 = vld [vmem:[%s11314_s7 + $0x220] sm:$0xf0] }
 0x16c   :  { %v2043_v31 = vadd.f32 %v2042_v26, %v2041_v21  ;;  %v2051_v32 = vrot.slane %v2050_v27, 1  ;;  %v7045_v21 = vld [vmem:[%s11314_s7 + $0x200] sm:$0xf]  ;;  %v7050_v26 = vor.u32 %v8151_v23, %v7047_v25 }
 0x16d   :  { %v7046_v24 = vor.u32 %v8155_v22, %v7045_v21  ;;  %v6870_v22 = vor.u32 %v8106_v19, %v6867_v20  ;;  %v7017_v23 = vld [vmem:[%s11314_s7 + $0x1c0] sm:$0xf] }
 0x16e   :  { %v2044_v36 = vmul.f32 0.5, %v2043_v31  ;;  %v2052_v37 = vadd.f32 %v2051_v32, %v2050_v27  ;;  %v6893_v27 = vld [vmem:[%s11314_s7 + $0xd8] sm:$0xf]  ;;  %2722 = vmatpush.bf16.msrb.mxu2 %v7050_v26  ;;  %v9455_v25 = vld [vmem:[%s11312_s5] sm:$0x3]  ;;  %s5901_s5 = sshll.u32 %s11321_s14, 4  ;;  %s5902_s5 = int_to_ptr.hbm [resolvable:$true] %s5901_s5 }
 0x16f   :  { %2709 = vmatpush.bf16.msrb.mxu1 %v7046_v24  ;;  %v6894_v29 = vor.u32 %v8118_v28, %v6893_v27  ;;  %v7003_v31 = vld [vmem:[%s11314_s7 + $0x1d4] sm:$0xf0]  ;;  %v8147_v24 = vld [vmem:[%s11314_s7 + $0x1e0] sm:$0xf0]  ;;  %v8096_v27 = vld [vmem:[%s11314_s7 + $0x4c] sm:$0xf] }
 0x170   :  { %v2053_v41 = vmul.f32 0.5, %v2052_v37  ;;  %v2055_v42 = vmul.f32 %v2044_v36, %v2044_v36  ;;  %v7009_v32 = vld [vmem:[%s11314_s7 + $0x1b8] sm:$0xf]  ;;  %v7006_v33 = vor.u32 %v8141_v30, %v7003_v31  ;;  %v7018_v26 = vor.u32 %v8147_v24, %v7017_v23  ;;  %v6823_v28 = vld [vmem:[%s11314_s7 + $0x6c] sm:$0xf0] }
 0x171   :  { %v7010_v37 = vor.u32 %v8146_v34, %v7009_v32  ;;  %v6826_v30 = vor.u32 %v8096_v27, %v6823_v28  ;;  %v8101_v31 = vld [vmem:[%s11314_s7 + $0x70] sm:$0xf0]  ;;  %v2102_v34 = vperm.slane %v9455_v25, 0  ;;  %v6983_v19 = vld [vmem:[%s11314_s7 + $0x19c] sm:$0xf0] }
 0x172   :  { %v2056_v46 = vsub.f32 %v2053_v41, %v2055_v42  ;;  %2697 = vmatpush.bf16.msrb.mxu0 %v7006_v33  ;;  %v6858_v41 = vor.u32 %v8109_v40, %v6857_v39  ;;  %v8132_v42 = vld [vmem:[%s11314_s7 + $0x16c] sm:$0xf]  ;;  %v8097_v32 = vld [vmem:[%s11314_s7 + $0x54] sm:$0xf]  ;;  %v6831_v33 = vld [vmem:[%s11314_s7 + $0x74] sm:$0xf0] }
 0x173   :  { %2710 = vmatpush.bf16.msrb.mxu1 %v7010_v37  ;;  %v6970_v45 = vor.u32 %v8132_v42, %v6967_v43  ;;  %v6981_v37 = vld [vmem:[%s11314_s7 + $0x178] sm:$0xf]  ;;  %v8087_v40 = vld [vmem:[%s11314_s7 + $0x4] sm:$0xf]  ;;  %v6793_v42 = vld [vmem:[%s11314_s7 + $0x8] sm:$0xf] }
 0x174   :  { %v2057_v50 = vadd.f32 1e-05, %v2056_v46  ;;  %v8137_v46 = vld [vmem:[%s11314_s7 + $0x190] sm:$0xf0]  ;;  %v6989_v20 = vld [vmem:[%s11314_s7 + $0x180] sm:$0xf] }
 0x175   :  { %v6974_v49 = vor.u32 %v8137_v46, %v6973_v44  ;;  %v2103_v44 = vperm.slane %v9455_v25, 1  ;;  %v8092_v46 = vld [vmem:[%s11314_s7 + $0x28] sm:$0xf0]  ;;  %v8139_v23 = vld [vmem:[%s11314_s7 + $0x1a0] sm:$0xf0] }
 0x176   :  { %8404 = vrsqrt.f32 %v2057_v50  ;;  %vm2064_vm2 = vweird.f32 %v2057_v50  ;;  %2698 = vmatpush.bf16.msrb.mxu0 %v6970_v45  ;;  %v8135_v24 = vld [vmem:[%s11314_s7 + $0x184] sm:$0xf]  ;;  %v6990_v25 = vor.u32 %v8139_v23, %v6989_v20  ;;  %v8090_v23 = vld [vmem:[%s11314_s7 + $0x1c] sm:$0xf] }
 0x177   :  { %2711 = vmatpush.bf16.msrb.mxu1 %v6974_v49  ;;  %v6794_v49 = vor.u32 %v8092_v46, %v6793_v42  ;;  %v6801_v42 = vld [vmem:[%s11314_s7 + $0x10] sm:$0xf] }
 0x178   :  { %v6911_v46 = vld [vmem:[%s11314_s7 + $0x10c] sm:$0xf0] }
 0x17c   :  { %v8405_v57 = vpop.eup %8404 }
 0x17d   :  { %v2059_v58 = vmul.f32 %v8405_v57, %v2057_v50  ;;  %vm2065_vm1 = vweird.f32 %v8405_v57  ;;  %v6978_v50 = vor.u32 %v8133_v47, %v6975_v48  ;;  %v8088_v47 = vld [vmem:[%s11314_s7 + $0xc] sm:$0xf] }
 0x17e   :  { %vm2066_vm3 = vmor %vm2064_vm2, %vm2065_vm1 }
 0x17f   :  { %v2060_v59 = vmul.f32 %v8405_v57, %v2059_v58  ;;  %v8128_v58 = vld [vmem:[%s11314_s7 + $0x148] sm:$0xf0] }
 0x181   :  { %v2061_v60 = vmul.f32 0.5, %v2060_v59  ;;  %v8124_v59 = vld [vmem:[%s11314_s7 + $0x12c] sm:$0xf] }
 0x183   :  { %v2062_v61 = vsub.f32 1.5, %v2061_v60  ;;  %v6939_v60 = vld [vmem:[%s11314_s7 + $0x14c] sm:$0xf0] }
 0x185   :  { %v2063_v0 = vmul.f32 %v8405_v57, %v2062_v61  ;;  %v6938_v61 = vor.u32 %v8128_v58, %v6937_v56  ;;  %v7055_v56 = vld [vmem:[%s11314_s7 + $0x22c] sm:$0xf0] }
 0x187   :  { %v2067_v1 = vsel %vm2066_vm3, %v8405_v57, %v2063_v0  ;;  %v6934_v57 = vor.u32 %v8123_v54, %v6931_v55  ;;  %v6785_v0 = vld [vmem:[%s11314_s7] sm:$0xf]  ;;  %2712 = vmatpush.bf16.msrb.mxu1 %v6938_v61  ;;  %v6946_v54 = vor.u32 %v8129_v52, %v6945_v51  ;;  %v8152_v55 = vld [vmem:[%s11314_s7 + $0x20c] sm:$0xf]  ;;  %v8117_v51 = vld [vmem:[%s11314_s7 + $0xf4] sm:$0xf] }
 0x188   :  { %v2068_v2 = vmul.f32 %v2067_v1, %v2054_v63  ;;  %v6942_v63 = vor.u32 %v8124_v59, %v6939_v60  ;;  %v8091_v1 = vld [vmem:[%s11314_s7 + $0x20] sm:$0xf0]  ;;  %v7058_v58 = vor.u32 %v8152_v55, %v7055_v56  ;;  %v8157_v59 = vld [vmem:[%s11314_s7 + $0x230] sm:$0xf0]  ;;  %v6919_v52 = vld [vmem:[%s11314_s7 + $0x114] sm:$0xf0] }
 0x189   :  { %2699 = vmatpush.bf16.msrb.mxu0 %v6934_v57  ;;  %v7061_v57 = vld [vmem:[%s11314_s7 + $0x210] sm:$0xf]  ;;  %v8153_v60 = vld [vmem:[%s11314_s7 + $0x214] sm:$0xf]  ;;  %v6922_v55 = vor.u32 %v8117_v51, %v6919_v52 }
 0x18a   :  { %v2070_v4 = vmul.f32 %v2068_v2, %v2044_v36  ;;  %v2073_v5 = vperm.slane %v2068_v2, 0  ;;  %v7011_v36 = vld [vmem:[%s11314_s7 + $0x1dc] sm:$0xf0]  ;;  %v6786_v2 = vor.u32 %v8091_v1, %v6785_v0  ;;  %v7062_v61 = vor.u32 %v8157_v59, %v7061_v57  ;;  %v6909_v0 = vld [vmem:[%s11314_s7 + $0xe8] sm:$0xf] }
 0x18b   :  { %v7014_v38 = vor.u32 %v8142_v35, %v7011_v36  ;;  %v6834_v36 = vor.u32 %v8097_v32, %v6831_v33  ;;  %v8120_v1 = vld [vmem:[%s11314_s7 + $0x108] sm:$0xf0]  ;;  %v8125_v32 = vld [vmem:[%s11314_s7 + $0x134] sm:$0xf]  ;;  %v6947_v33 = vld [vmem:[%s11314_s7 + $0x154] sm:$0xf0] }
 0x18c   :  { %v2071_v6 = vsub.f32 %v2069_v3, %v2070_v4  ;;  %v2075_v7 = vmul.f32 %v2073_v5, %v9210_v62  ;;  %v6929_v62 = vld [vmem:[%s11314_s7 + $0x120] sm:$0xf]  ;;  %v8114_v3 = vld [vmem:[%s11314_s7 + $0xdc] sm:$0xf]  ;;  %v6875_v59 = vld [vmem:[%s11314_s7 + $0xc4] sm:$0xf0] }
 0x18d   :  { %v6930_v17 = vor.u32 %v8127_v16, %v6929_v62  ;;  %2723 = vmatpush.bf16.msrb.mxu2 %v7014_v38  ;;  %v6895_v4 = vld [vmem:[%s11314_s7 + $0xfc] sm:$0xf0]  ;;  %v6859_v62 = vld [vmem:[%s11314_s7 + $0xb4] sm:$0xf0]  ;;  %v8138_v38 = vld [vmem:[%s11314_s7 + $0x198] sm:$0xf0] }
 0x18e   :  { %v2077_v8 = vperm.slane %v2071_v6, 0  ;;  %v6901_v5 = vld [vmem:[%s11314_s7 + $0xe0] sm:$0xf]  ;;  %v6898_v6 = vor.u32 %v8114_v3, %v6895_v4  ;;  %v6865_v16 = vld [vmem:[%s11314_s7 + $0x98] sm:$0xf]  ;;  %v6982_v39 = vor.u32 %v8138_v38, %v6981_v37  ;;  %v6910_v3 = vor.u32 %v8120_v1, %v6909_v0 }
 0x18f   :  { %2686 = vmatpush.bf16.msra.mxu3 %v6930_v17  ;;  %v6862_v17 = vor.u32 %v8105_v15, %v6859_v62  ;;  %v6866_v21 = vor.u32 %v8110_v18, %v6865_v16  ;;  %v8143_v4 = vld [vmem:[%s11314_s7 + $0x1c4] sm:$0xf]  ;;  %v6873_v15 = vld [vmem:[%s11314_s7 + $0xa0] sm:$0xf]  ;;  %v8134_v18 = vld [vmem:[%s11314_s7 + $0x17c] sm:$0xf] }
 0x190   :  { %v2079_v9 = vadd.f32 %v2077_v8, %v2075_v7  ;;  %v8119_v7 = vld [vmem:[%s11314_s7 + $0x100] sm:$0xf0]  ;;  %2700 = vmatpush.bf16.msrb.mxu0 %v6898_v6  ;;  %v7025_v6 = vld [vmem:[%s11314_s7 + $0x1c8] sm:$0xf]  ;;  %v8126_v37 = vld [vmem:[%s11314_s7 + $0x13c] sm:$0xf] }
 0x191   :  { %2724 = vmatpush.bf16.msrb.mxu2 %v6978_v50  ;;  %v8115_v8 = vld [vmem:[%s11314_s7 + $0xe4] sm:$0xf]  ;;  %v6795_v50 = vld [vmem:[%s11314_s7 + $0x2c] sm:$0xf0]  ;;  %v6955_v38 = vld [vmem:[%s11314_s7 + $0x15c] sm:$0xf0] }
 0x192   :  { %v2081_v10 = vmul.f32 0.2, %v2079_v9  ;;  %vm2080_vm4 = vcmp.ge.f32.partialorder %v2079_v9, 0.0  ;;  %v8111_v62 = vld [vmem:[%s11314_s7 + $0xc0] sm:$0xf0] }
 0x193   :  { %2687 = vmatpush.bf16.msra.mxu3 %v6894_v29  ;;  %v6829_v29 = vld [vmem:[%s11314_s7 + $0x50] sm:$0xf]  ;;  %v8108_v0 = vld [vmem:[%s11314_s7 + $0xac] sm:$0xf]  ;;  %v8113_v51 = vld [vmem:[%s11314_s7 + $0xd0] sm:$0xf0] }
 0x194   :  { %v2082_v11 = vsel %vm2080_vm4, %v2079_v9, %v2081_v10  ;;  %v6903_v9 = vld [vmem:[%s11314_s7 + $0x104] sm:$0xf0]  ;;  %v6902_v10 = vor.u32 %v8119_v7, %v6901_v5  ;;  %2701 = vmatpush.bf16.msrb.mxu0 %v6862_v17  ;;  %v6830_v35 = vor.u32 %v8101_v31, %v6829_v29  ;;  %v6874_v17 = vor.u32 %v8111_v62, %v6873_v15  ;;  %v6837_v29 = vld [vmem:[%s11314_s7 + $0x58] sm:$0xf] }
 0x195   :  { %v2083_v12 = vpack.c.bf16 %v2082_v11, %v2082_v11  ;;  %2725 = vmatpush.bf16.msrb.mxu2 %v6942_v63  ;;  %v6906_v11 = vor.u32 %v8115_v8, %v6903_v9  ;;  %v7063_v63 = vld [vmem:[%s11314_s7 + $0x234] sm:$0xf0]  ;;  %v7019_v5 = vld [vmem:[%s11314_s7 + $0x1e4] sm:$0xf0]  ;;  %v8148_v9 = vld [vmem:[%s11314_s7 + $0x1e8] sm:$0xf0] }
 0x196   :  { %2713 = vmatpush.bf16.msrb.mxu1 %v6902_v10  ;;  %v7022_v8 = vor.u32 %v8143_v4, %v7019_v5  ;;  %v8144_v10 = vld [vmem:[%s11314_s7 + $0x1cc] sm:$0xf]  ;;  %v8098_v5 = vld [vmem:[%s11314_s7 + $0x5c] sm:$0xf] }
 0x197   :  { %2194 = vmatmul.bf16.vlgmr.msra.gmra.mxu1 %v2083_v12  ;;  %2207 = vmatmul.bf16.vlgmr.msra.gmra.mxu2 %v2083_v12  ;;  %v7053_v12 = vld [vmem:[%s11314_s7 + $0x208] sm:$0xf] }
 0x198   :  { %2688 = vmatpush.bf16.msra.mxu3 %v6858_v41  ;;  %v7054_v14 = vor.u32 %v8156_v13, %v7053_v12  ;;  %2702 = vmatpush.bf16.msrb.mxu0 %v6826_v30  ;;  %v6787_v41 = vld [vmem:[%s11314_s7 + $0x24] sm:$0xf0]  ;;  %v7026_v13 = vor.u32 %v8148_v9, %v7025_v6  ;;  %v8102_v30 = vld [vmem:[%s11314_s7 + $0x78] sm:$0xf0]  ;;  %v6839_v6 = vld [vmem:[%s11314_s7 + $0x7c] sm:$0xf0] }
 0x199   :  { %2726 = vmatpush.bf16.msrb.mxu2 %v6906_v11  ;;  %v6790_v45 = vor.u32 %v8087_v40, %v6787_v41  ;;  %v7027_v11 = vld [vmem:[%s11314_s7 + $0x1ec] sm:$0xf0]  ;;  %v6838_v31 = vor.u32 %v8102_v30, %v6837_v29  ;;  %v6958_v41 = vor.u32 %v8126_v37, %v6955_v38  ;;  %v8103_v9 = vld [vmem:[%s11314_s7 + $0x80] sm:$0xf0] }
 0x19a   :  { %2714 = vmatpush.bf16.msrb.mxu1 %v6866_v21  ;;  %v7033_v38 = vld [vmem:[%s11314_s7 + $0x1d0] sm:$0xf] }
 0x19c   :  { %2689 = vmatpush.bf16.msra.mxu3 %v6822_v53  ;;  %2703 = vmatpush.bf16.msrb.mxu0 %v6790_v45  ;;  %v6798_v53 = vor.u32 %v8088_v47, %v6795_v50  ;;  %v8116_v45 = vld [vmem:[%s11314_s7 + $0xec] sm:$0xf]  ;;  %v6917_v47 = vld [vmem:[%s11314_s7 + $0xf0] sm:$0xf]  ;;  %v8121_v50 = vld [vmem:[%s11314_s7 + $0x110] sm:$0xf0] }
 0x19d   :  { %2727 = vmatpush.bf16.msrb.mxu2 %v6870_v22  ;;  %v6986_v22 = vor.u32 %v8134_v18, %v6983_v19  ;;  %v6809_v18 = vld [vmem:[%s11314_s7 + $0x18] sm:$0xf] }
 0x19e   :  { %2715 = vmatpush.bf16.msrb.mxu1 %v6830_v35  ;;  %v6950_v35 = vor.u32 %v8125_v32, %v6947_v33 }
 0x1a0   :  { %2690 = vmatpush.bf16.msra.mxu3 %v6786_v2  ;;  %2748 = vmatpush.bf16.msra.mxu0 %v7058_v58  ;;  %v7066_v2 = vor.u32 %v8153_v60, %v7063_v63  ;;  %v8107_v58 = vld [vmem:[%s11314_s7 + $0xa4] sm:$0xf]  ;;  %v6881_v60 = vld [vmem:[%s11314_s7 + $0xa8] sm:$0xf] }
 0x1a1   :  { %2728 = vmatpush.bf16.msrb.mxu2 %v6834_v36  ;;  %v8130_v36 = vld [vmem:[%s11314_s7 + $0x158] sm:$0xf0]  ;;  %v6878_v63 = vor.u32 %v8107_v58, %v6875_v59 }
 0x1a2   :  { %2716 = vmatpush.bf16.msrb.mxu1 %v6794_v49  ;;  %v6914_v49 = vor.u32 %v8116_v45, %v6911_v46  ;;  %v6925_v46 = vld [vmem:[%s11314_s7 + $0xf8] sm:$0xf] }
 0x1a4   :  { %2735 = vmatpush.bf16.msrb.mxu3 %v7054_v14  ;;  %v7030_v14 = vor.u32 %v8144_v10, %v7027_v11  ;;  %2749 = vmatpush.bf16.msra.mxu0 %v7022_v8  ;;  %v6842_v8 = vor.u32 %v8098_v5, %v6839_v6  ;;  %v8099_v10 = vld [vmem:[%s11314_s7 + $0x64] sm:$0xf]  ;;  %v6847_v11 = vld [vmem:[%s11314_s7 + $0x84] sm:$0xf0] }
 0x1a5   :  { %2729 = vmatpush.bf16.msrb.mxu2 %v6798_v53  ;;  %v6850_v15 = vor.u32 %v8099_v10, %v6847_v11 }
 0x1a6   :  { %2761 = vmatpush.bf16.msra.mxu1 %v7062_v61  ;;  %v8112_v61 = vld [vmem:[%s11314_s7 + $0xc8] sm:$0xf0] }
 0x1a8   :  { %2736 = vmatpush.bf16.msrb.mxu3 %v7018_v26  ;;  %v6991_v26 = vld [vmem:[%s11314_s7 + $0x1a4] sm:$0xf0]  ;;  %2750 = vmatpush.bf16.msra.mxu0 %v6986_v22  ;;  %v8094_v22 = vld [vmem:[%s11314_s7 + $0x38] sm:$0xf0] }
 0x1a9   :  { %2774 = vmatpush.bf16.msra.mxu2 %v7066_v2  ;;  %v6994_v28 = vor.u32 %v8135_v24, %v6991_v26  ;;  %v6882_v2 = vor.u32 %v8112_v61, %v6881_v60  ;;  %v6810_v24 = vor.u32 %v8094_v22, %v6809_v18 }
 0x1aa   :  { %2762 = vmatpush.bf16.msra.mxu1 %v7026_v13 }
 0x1ac   :  { %2737 = vmatpush.bf16.msrb.mxu3 %v6982_v39  ;;  %2751 = vmatpush.bf16.msra.mxu0 %v6950_v35 }
 0x1ad   :  { %2775 = vmatpush.bf16.msra.mxu2 %v7030_v14 }
 0x1ae   :  { %2763 = vmatpush.bf16.msra.mxu1 %v6990_v25  ;;  %v6811_v25 = vld [vmem:[%s11314_s7 + $0x3c] sm:$0xf0] }
 0x1b0   :  { %2738 = vmatpush.bf16.msrb.mxu3 %v6946_v54  ;;  %v6918_v54 = vor.u32 %v8121_v50, %v6917_v47  ;;  %2752 = vmatpush.bf16.msra.mxu0 %v6914_v49  ;;  %v8122_v47 = vld [vmem:[%s11314_s7 + $0x118] sm:$0xf0]  ;;  %v6889_v50 = vld [vmem:[%s11314_s7 + $0xb0] sm:$0xf] }
 0x1b1   :  { %2776 = vmatpush.bf16.msra.mxu2 %v6994_v28  ;;  %v6926_v49 = vor.u32 %v8122_v47, %v6925_v46  ;;  %v6890_v52 = vor.u32 %v8113_v51, %v6889_v50 }
 0x1b4   :  { %2739 = vmatpush.bf16.msrb.mxu3 %v6910_v3  ;;  %v6883_v3 = vld [vmem:[%s11314_s7 + $0xcc] sm:$0xf0]  ;;  %2753 = vmatpush.bf16.msra.mxu0 %v6878_v63 }
 0x1b5   :  { %2777 = vmatpush.bf16.msra.mxu2 %v6958_v41  ;;  %v6886_v4 = vor.u32 %v8108_v0, %v6883_v3  ;;  %v8140_v41 = vld [vmem:[%s11314_s7 + $0x1a8] sm:$0xf0] }
 0x1b8   :  { %2740 = vmatpush.bf16.msrb.mxu3 %v6874_v17  ;;  %v6803_v17 = vld [vmem:[%s11314_s7 + $0x34] sm:$0xf0]  ;;  %2754 = vmatpush.bf16.msra.mxu0 %v6842_v8 }
 0x1b9   :  { %2778 = vmatpush.bf16.msra.mxu2 %v6922_v55 }
 0x1bc   :  { %2741 = vmatpush.bf16.msrb.mxu3 %v6838_v31  ;;  %v2226_v31 = vld [vmem:[%s11313_s6] sm:$0x3] }
 0x1bd   :  { %2779 = vmatpush.bf16.msra.mxu2 %v6886_v4 }
 0x1c1   :  { %2780 = vmatpush.bf16.msra.mxu2 %v6850_v15 }
 0x214   :  { %v2195_v43 = vpop.f32.mrf.mxu1 }
 0x215   :  { %v9498_v48 = vadd.f32 %v2195_v43, %v2102_v34  ;;  %v6953_v34 = vld [vmem:[%s11314_s7 + $0x138] sm:$0xf]  ;;  %v8093_v43 = vld [vmem:[%s11314_s7 + $0x30] sm:$0xf0] }
 0x216   :  { %v6954_v40 = vor.u32 %v8130_v36, %v6953_v34  ;;  %v7069_v34 = vld [vmem:[%s11314_s7 + $0x218] sm:$0xf] }
 0x217   :  { %2232 = vst [vmem:[#allocation5] sm:$0x3] %v9498_v48 }
 0x218   :  { %2764 = vmatpush.bf16.msra.mxu1 %v6954_v40 }
 0x21a   :  { %v2208_v7 = vpop.f32.mrf.mxu2 }
 0x21b   :  { %v9552_v12 = vadd.f32 %v2208_v7, %v2103_v44  ;;  %v6802_v44 = vor.u32 %v8093_v43, %v6801_v42  ;;  %v6845_v7 = vld [vmem:[%s11314_s7 + $0x60] sm:$0xf] }
 0x21c   :  { %v2197_v16 = vpop.f32.mrf.mxu1  ;;  %2765 = vmatpush.bf16.msra.mxu1 %v6918_v54  ;;  %v6846_v14 = vor.u32 %v8103_v9, %v6845_v7  ;;  %v6961_v43 = vld [vmem:[%s11314_s7 + $0x140] sm:$0xf]  ;;  %v8104_v54 = vld [vmem:[%s11314_s7 + $0x88] sm:$0xf0] }
 0x21d   :  { %v2213_v21 = vmin.f32 %v9552_v12, 20.0  ;;  %2742 = vmatpush.bf16.msrb.mxu3 %v6802_v44  ;;  %v8089_v16 = vld [vmem:[%s11314_s7 + $0x14] sm:$0xf]  ;;  %vm2212_vm6 = vcmp.gt.f32.partialorder %v9552_v12, 20.0  ;;  %v8131_v44 = vld [vmem:[%s11314_s7 + $0x160] sm:$0xf0] }
 0x21e   :  { %v6962_v45 = vor.u32 %v8131_v44, %v6961_v43 }
 0x21f   :  { %v2214_v27 = vmul.f32 1.442695, %v2213_v21  ;;  %v6806_v21 = vor.u32 %v8089_v16, %v6803_v17 }
 0x220   :  { %2766 = vmatpush.bf16.msra.mxu1 %v6882_v2 }
 0x221   :  { %8406 = vpow2.f32 %v2214_v27  ;;  %v6814_v27 = vor.u32 %v8090_v23, %v6811_v25  ;;  %2755 = vmatpush.bf16.msra.mxu0 %v6806_v21 }
 0x222   :  { %v2210_v39 = vpop.f32.mrf.mxu2 }
 0x223   :  { %2781 = vmatpush.bf16.msra.mxu2 %v6814_v27  ;;  %v8149_v39 = vld [vmem:[%s11314_s7 + $0x1f0] sm:$0xf0] }
 0x224   :  { %2767 = vmatpush.bf16.msra.mxu1 %v6846_v14  ;;  %v7034_v40 = vor.u32 %v8149_v39, %v7033_v38 }
 0x227   :  { %v8407_v53 = vpop.eup %8406 }
 0x228   :  { %v2216_v56 = vadd.f32 1.0, %v8407_v53  ;;  %v2219_v57 = vmul.f32 -0.5, %v8407_v53  ;;  %v2222_v13 = vand.u32 2147483647, %v8407_v53  ;;  %2768 = vmatpush.bf16.msra.mxu1 %v6810_v24 }
 0x22a   :  { %8408 = vlog2.f32 %v2216_v56  ;;  %v2220_v1 = vadd.f32 1.0, %v2219_v57  ;;  %vm2223_vm5 = vcmp.lt.f32.partialorder %v2222_v13, 0.0004427343  ;;  %v6817_v56 = vld [vmem:[%s11314_s7 + $0x20] sm:$0xf] }
 0x22b   :  { %v8095_v57 = vld [vmem:[%s11314_s7 + $0x40] sm:$0xf0] }
 0x22c   :  { %v2221_v20 = vmul.f32 %v8407_v53, %v2220_v1  ;;  %v6853_v53 = vld [vmem:[%s11314_s7 + $0x68] sm:$0xf]  ;;  %v6818_v58 = vor.u32 %v8095_v57, %v6817_v56 }
 0x22d   :  { %v6854_v55 = vor.u32 %v8104_v54, %v6853_v53 }
 0x230   :  { %v8409_v62 = vpop.eup %8408 }
 0x231   :  { %v2218_v19 = vmul.f32 0.6931472, %v8409_v62 }
 0x233   :  { %v2224_v26 = vsel %vm2223_vm5, %v2221_v20, %v2218_v19 }
 0x234   :  { %v2225_v28 = vsel %vm2212_vm6, %v9552_v12, %v2224_v26  ;;  %v8158_v12 = vld [vmem:[%s11314_s7 + $0x238] sm:$0xf0] }
 0x235   :  { %v2227_v29 = vmul.f32 0.5, %v2225_v28  ;;  %2233 = vst [vmem:[#allocation7] sm:$0x3] %v2225_v28  ;;  %v7070_v37 = vor.u32 %v8158_v12, %v7069_v34 }
 0x237   :  { %v2228_v30 = vmul.f32 1.442695, %v2227_v29 }
 0x239   :  { %8410 = vpow2.f32 %v2228_v30 }
 0x23f   :  { %v8411_v32 = vpop.eup %8410 }
 0x240   :  { %v2230_v33 = vmul.f32 %v8411_v32, %v2226_v31 }
 0x242   :  { %v2231_v35 = vadd.f32 %v2230_v33, %v9498_v48  ;;  %v6997_v48 = vld [vmem:[%s11314_s7 + $0x188] sm:$0xf] }
 0x243   :  { %v6998_v42 = vor.u32 %v8140_v41, %v6997_v48 }
 0x244   :  { %v2234_v36 = vpack.c.bf16 %v2231_v35, %v2231_v35 }
 0x246   :  { %2691 = vmatmul.bf16.vlgmr.msra.gmra.mxu3 %v2234_v36  ;;  %2704 = vmatmul.bf16.vlgmr.msrb.gmra.mxu0 %v2234_v36 }
 0x247   :  { %2717 = vmatmul.bf16.vlgmr.msrb.gmra.mxu1 %v2234_v36  ;;  %2730 = vmatmul.bf16.vlgmr.msrb.gmra.mxu2 %v2234_v36 }
 0x248   :  { %2787 = vmatpush.bf16.msra.mxu3 %v7070_v37 }
 0x24c   :  { %2788 = vmatpush.bf16.msra.mxu3 %v7034_v40 }
 0x250   :  { %2789 = vmatpush.bf16.msra.mxu3 %v6998_v42 }
 0x254   :  { %2790 = vmatpush.bf16.msra.mxu3 %v6962_v45 }
 0x256   :  { %2743 = vmatmul.bf16.vlgmr.msrb.gmra.mxu3 %v2234_v36  ;;  %2756 = vmatmul.bf16.vlgmr.msra.gmra.mxu0 %v2234_v36 }
 0x257   :  { %2769 = vmatmul.bf16.vlgmr.msra.gmra.mxu1 %v2234_v36  ;;  %2782 = vmatmul.bf16.vlgmr.msra.gmra.mxu2 %v2234_v36 }
 0x258   :  { %2791 = vmatpush.bf16.msra.mxu3 %v6926_v49 }
 0x25c   :  { %2792 = vmatpush.bf16.msra.mxu3 %v6890_v52 }
 0x260   :  { %2793 = vmatpush.bf16.msra.mxu3 %v6854_v55 }
 0x264   :  { %2794 = vmatpush.bf16.msra.mxu3 %v6818_v58 }
 0x267   :  { %2795 = vmatmul.bf16.vlgmr.msra.gmra.mxu3 %v2234_v36 }
 0x2c3   :  { %v9735_v59 = vpop.f32.mrf.mxu0 }
 0x2c4   :  { %v2807_v60 = vsel %vm2036_vm0, %v9735_v59, 0.0  ;;  %v2864_v61 = vmul.f32 %v9735_v59, %v9735_v59  ;;  %v9741_v63 = vpop.f32.mrf.mxu1 }
 0x2c5   :  { %v2814_v0 = vsel %vm2036_vm0, %v9741_v63, 0.0  ;;  %v2865_v1 = vmul.f32 %v9741_v63, %v9741_v63  ;;  %v2808_v2 = vrot.slane %v2807_v60, 4 }
 0x2c6   :  { %v2879_v3 = vsel %vm2036_vm0, %v2864_v61, 0.0  ;;  %v2815_v4 = vrot.slane %v2814_v0, 4 }
 0x2c7   :  { %v2886_v5 = vsel %vm2036_vm0, %v2865_v1, 0.0  ;;  %v2880_v6 = vrot.slane %v2879_v3, 4  ;;  %v2809_v8 = vadd.f32 %v2808_v2, %v2807_v60 }
 0x2c8   :  { %v2816_v13 = vadd.f32 %v2815_v4, %v2814_v0  ;;  %v2887_v14 = vrot.slane %v2886_v5, 4 }
 0x2c9   :  { %v9749_v7 = vpop.f32.mrf.mxu3  ;;  %v2881_v18 = vadd.f32 %v2880_v6, %v2879_v3  ;;  %v2810_v21 = vrot.slane %v2809_v8, 2 }
 0x2ca   :  { %v2800_v9 = vsel %vm2036_vm0, %v9749_v7, 0.0  ;;  %v2863_v10 = vmul.f32 %v9749_v7, %v9749_v7  ;;  %v9755_v11 = vpop.f32.mrf.mxu2  ;;  %v2817_v23 = vrot.slane %v2816_v13, 2  ;;  %v2888_v24 = vadd.f32 %v2887_v14, %v2886_v5 }
 0x2cb   :  { %v2801_v15 = vrot.slane %v2800_v9, 4  ;;  %v2707_v62 = vpop.f32.mrf.mxu0  ;;  %v2866_v22 = vmul.f32 %v9755_v11, %v9755_v11  ;;  %v2821_v26 = vsel %vm2036_vm0, %v9755_v11, 0.0  ;;  %v2882_v29 = vrot.slane %v2881_v18, 2 }
 0x2cc   :  { %v2872_v16 = vsel %vm2036_vm0, %v2863_v10, 0.0  ;;  %v2720_v17 = vpop.f32.mrf.mxu1  ;;  %v2822_v32 = vrot.slane %v2821_v26, 4  ;;  %v2811_v34 = vadd.f32 %v2810_v21, %v2809_v8  ;;  %v2818_v12 = vadd.f32 %v2817_v23, %v2816_v13 }
 0x2cd   :  { %v2802_v19 = vadd.f32 %v2801_v15, %v2800_v9  ;;  %v2873_v20 = vrot.slane %v2872_v16, 4  ;;  %v2893_v28 = vsel %vm2036_vm0, %v2866_v22, 0.0  ;;  %v2889_v35 = vrot.slane %v2888_v24, 2 }
 0x2ce   :  { %v2894_v36 = vrot.slane %v2893_v28, 4  ;;  %v2883_v48 = vadd.f32 %v2882_v29, %v2881_v18  ;;  %v2823_v43 = vadd.f32 %v2822_v32, %v2821_v26  ;;  %v2812_v46 = vrot.slane %v2811_v34, 1 }
 0x2cf   :  { %v2874_v25 = vadd.f32 %v2873_v20, %v2872_v16  ;;  %v2803_v27 = vrot.slane %v2802_v19, 2  ;;  %v2819_v47 = vrot.slane %v2818_v12, 1  ;;  %v2890_v49 = vadd.f32 %v2889_v35, %v2888_v24 }
 0x2d0   :  { %v2895_v50 = vadd.f32 %v2894_v36, %v2893_v28  ;;  %v2884_v53 = vrot.slane %v2883_v48, 1  ;;  %v2824_v58 = vrot.slane %v2823_v43, 2  ;;  %v2813_v1 = vadd.f32 %v2812_v46, %v2811_v34 }
 0x2d1   :  { %v2694_v30 = vpop.f32.mrf.mxu3  ;;  %v2875_v31 = vrot.slane %v2874_v25, 2  ;;  %v2804_v38 = vadd.f32 %v2803_v27, %v2802_v19  ;;  %v2820_v2 = vadd.f32 %v2819_v47, %v2818_v12  ;;  %v2891_v3 = vrot.slane %v2890_v49, 1 }
 0x2d2   :  { %v2733_v33 = vpop.f32.mrf.mxu2  ;;  %v2896_v4 = vrot.slane %v2895_v50, 2  ;;  %v2885_v17 = vadd.f32 %v2884_v53, %v2883_v48  ;;  %v2825_v19 = vadd.f32 %v2824_v58, %v2823_v43 }
 0x2d3   :  { %v9763_v37 = vpop.f32.mrf.mxu0  ;;  %v2876_v42 = vadd.f32 %v2875_v31, %v2874_v25  ;;  %v2805_v51 = vrot.slane %v2804_v38, 1  ;;  %v2892_v34 = vadd.f32 %v2891_v3, %v2890_v49 }
 0x2d4   :  { %v2868_v39 = vmul.f32 %v9763_v37, %v9763_v37  ;;  %v9767_v40 = vpop.f32.mrf.mxu1  ;;  %v2835_v41 = vsel %vm2036_vm0, %v9763_v37, 0.0  ;;  %v2897_v21 = vadd.f32 %v2896_v4, %v2895_v50  ;;  %v2826_v35 = vrot.slane %v2825_v19, 1 }
 0x2d5   :  { %v2869_v45 = vmul.f32 %v9767_v40, %v9767_v40  ;;  %v2836_v52 = vrot.slane %v2835_v41, 4  ;;  %v2842_v55 = vsel %vm2036_vm0, %v9767_v40, 0.0  ;;  %v2877_v57 = vrot.slane %v2876_v42, 1 }
 0x2d6   :  { %v2907_v44 = vsel %vm2036_vm0, %v2868_v39, 0.0  ;;  %v2806_v6 = vadd.f32 %v2805_v51, %v2804_v38  ;;  %v2843_v9 = vrot.slane %v2842_v55, 4  ;;  %v2898_v39 = vrot.slane %v2897_v21, 1 }
 0x2d7   :  { %v2908_v54 = vrot.slane %v2907_v44, 4  ;;  %v2914_v60 = vsel %vm2036_vm0, %v2869_v45, 0.0  ;;  %v2837_v8 = vadd.f32 %v2836_v52, %v2835_v41  ;;  %v2878_v18 = vadd.f32 %v2877_v57, %v2876_v42 }
 0x2d8   :  { %v2915_v15 = vrot.slane %v2914_v60, 4  ;;  %v2935_v25 = vadd.f32 %v2813_v1, %v2806_v6  ;;  %v2844_v27 = vadd.f32 %v2843_v9, %v2842_v55  ;;  %v2827_v53 = vadd.f32 %v2826_v35, %v2825_v19 }
 0x2d9   :  { %v9776_v56 = vpop.f32.mrf.mxu3  ;;  %v2909_v14 = vadd.f32 %v2908_v54, %v2907_v44  ;;  %v2838_v26 = vrot.slane %v2837_v8, 2  ;;  %v2936_v12 = vadd.f32 %v2885_v17, %v2878_v18  ;;  %v2899_v49 = vadd.f32 %v2898_v39, %v2897_v21 }
 0x2da   :  { %v2828_v61 = vsel %vm2036_vm0, %v9776_v56, 0.0  ;;  %v9781_v0 = vpop.f32.mrf.mxu2  ;;  %v2867_v62 = vmul.f32 %v9776_v56, %v9776_v56  ;;  %v2916_v30 = vadd.f32 %v2915_v15, %v2914_v60  ;;  %v2937_v43 = vadd.f32 %v2935_v25, %v2820_v2 }
 0x2db   :  { %v2759_v5 = vpop.f32.mrf.mxu0  ;;  %v2829_v10 = vrot.slane %v2828_v61, 4  ;;  %v2849_v16 = vsel %vm2036_vm0, %v9781_v0, 0.0  ;;  %v2870_v24 = vmul.f32 %v9781_v0, %v9781_v0  ;;  %v2910_v29 = vrot.slane %v2909_v14, 2 }
 0x2dc   :  { %v2772_v13 = vpop.f32.mrf.mxu1  ;;  %v2900_v22 = vsel %vm2036_vm0, %v2867_v62, 0.0  ;;  %v2850_v23 = vrot.slane %v2849_v16, 4  ;;  %v2839_v44 = vadd.f32 %v2838_v26, %v2837_v8  ;;  %v2845_v45 = vrot.slane %v2844_v27, 2 }
 0x2dd   :  { %v2830_v20 = vadd.f32 %v2829_v10, %v2828_v61  ;;  %v2901_v31 = vrot.slane %v2900_v22, 4  ;;  %v2921_v32 = vsel %vm2036_vm0, %v2870_v24, 0.0  ;;  %v2911_v47 = vadd.f32 %v2910_v29, %v2909_v14 }
 0x2de   :  { %v2851_v41 = vadd.f32 %v2850_v23, %v2849_v16  ;;  %v2922_v42 = vrot.slane %v2921_v32, 4  ;;  %v2917_v50 = vrot.slane %v2916_v30, 2  ;;  %v2938_v54 = vadd.f32 %v2936_v12, %v2892_v34  ;;  %v8346_v34 = vld [vmem:[%s11317_s10 + $0x5d8] sm:$0xf0] }
 0x2df   :  { %v2831_v28 = vrot.slane %v2830_v20, 2  ;;  %v2902_v48 = vadd.f32 %v2901_v31, %v2900_v22  ;;  %v2939_v60 = vadd.f32 %v2937_v43, %v2827_v53  ;;  %v2840_v61 = vrot.slane %v2839_v44, 1  ;;  %v8334_v12 = vld [vmem:[%s11317_s10 + $0x57c] sm:$0xf] }
 0x2e0   :  { %v2923_v52 = vadd.f32 %v2922_v42, %v2921_v32  ;;  %v2852_v58 = vrot.slane %v2851_v41, 2  ;;  %v2846_v1 = vadd.f32 %v2845_v45, %v2844_v27  ;;  %v2912_v4 = vrot.slane %v2911_v47, 1  ;;  %v7781_v42 = vld [vmem:[%s11317_s10 + $0x580] sm:$0xf] }
 0x2e1   :  { %v2746_v33 = vpop.f32.mrf.mxu3  ;;  %v2832_v36 = vadd.f32 %v2831_v28, %v2830_v20  ;;  %v2903_v51 = vrot.slane %v2902_v48, 2  ;;  %v2918_v5 = vadd.f32 %v2917_v50, %v2916_v30  ;;  %v2940_v6 = vadd.f32 %v2938_v54, %v2899_v49  ;;  %v7783_v50 = vld [vmem:[%s11317_s10 + $0x5e4] sm:$0xf0]  ;;  %v7673_v49 = vld [vmem:[%s11317_s10 + $0x4b0] sm:$0xf] }
 0x2e2   :  { %v2785_v38 = vpop.f32.mrf.mxu2  ;;  %v2924_v3 = vrot.slane %v2923_v52, 2  ;;  %v2853_v13 = vadd.f32 %v2852_v58, %v2851_v41  ;;  %v2841_v62 = vadd.f32 %v2840_v61, %v2839_v44  ;;  %v2847_v16 = vrot.slane %v2846_v1, 1  ;;  %v7773_v33 = vld [vmem:[%s11317_s10 + $0x578] sm:$0xf]  ;;  %v7775_v41 = vld [vmem:[%s11317_s10 + $0x5dc] sm:$0xf0] }
 0x2e3   :  { %v2833_v46 = vrot.slane %v2832_v36, 1  ;;  %v2904_v57 = vadd.f32 %v2903_v51, %v2902_v48  ;;  %v2913_v19 = vadd.f32 %v2912_v4, %v2911_v47  ;;  %v2919_v20 = vrot.slane %v2918_v5, 1  ;;  %v8335_v47 = vld [vmem:[%s11317_s10 + $0x584] sm:$0xf]  ;;  %v8309_v58 = vld [vmem:[%s11317_s10 + $0x4b4] sm:$0xf] }
 0x2e4   :  { %v2925_v17 = vadd.f32 %v2924_v3, %v2923_v52  ;;  %v2854_v27 = vrot.slane %v2853_v13, 1  ;;  %v2848_v28 = vadd.f32 %v2847_v16, %v2846_v1  ;;  %v7774_v48 = vor.u32 %v8346_v34, %v7773_v33  ;;  %v7675_v4 = vld [vmem:[%s11317_s10 + $0x514] sm:$0xf0]  ;;  %v7473_v33 = vld [vmem:[%s11317_s10 + $0x320] sm:$0xf] }
 0x2e5   :  { %v2834_v55 = vadd.f32 %v2833_v46, %v2832_v36  ;;  %v2905_v2 = vrot.slane %v2904_v57, 1  ;;  %v2920_v32 = vadd.f32 %v2919_v20, %v2918_v5  ;;  %v7778_v45 = vor.u32 %v8334_v12, %v7775_v41  ;;  %v8347_v46 = vld [vmem:[%s11317_s10 + $0x5e0] sm:$0xf0]  ;;  %v7681_v5 = vld [vmem:[%s11317_s10 + $0x4b8] sm:$0xf] }
 0x2e6   :  { %v2926_v29 = vrot.slane %v2925_v17, 1  ;;  %v2855_v43 = vadd.f32 %v2854_v27, %v2853_v13  ;;  %4252 = vmatpush.bf16.msrb.mxu0 %v7774_v48  ;;  %v7782_v53 = vor.u32 %v8347_v46, %v7781_v42  ;;  %v7786_v54 = vor.u32 %v8335_v47, %v7783_v50  ;;  %v7683_v13 = vld [vmem:[%s11317_s10 + $0x51c] sm:$0xf0]  ;;  %v8285_v27 = vld [vmem:[%s11317_s10 + $0x3f4] sm:$0xf] }
 0x2e7   :  { %v2941_v8 = vadd.f32 %v2939_v60, %v2834_v55  ;;  %v2906_v10 = vadd.f32 %v2905_v2, %v2904_v57  ;;  %4270 = vmatpush.bf16.msrb.mxu1 %v7778_v45  ;;  %v8321_v57 = vld [vmem:[%s11317_s10 + $0x510] sm:$0xf0]  ;;  %v8271_v34 = vld [vmem:[%s11317_s10 + $0x380] sm:$0xf0]  ;;  %v8272_v48 = vld [vmem:[%s11317_s10 + $0x388] sm:$0xf0] }
 0x2e8   :  { %v2927_v55 = vadd.f32 %v2926_v29, %v2925_v17  ;;  %4288 = vmatpush.bf16.msrb.mxu2 %v7782_v53  ;;  %4306 = vmatpush.bf16.msrb.mxu3 %v7786_v54  ;;  %v7674_v3 = vor.u32 %v8321_v57, %v7673_v49  ;;  %v7573_v17 = vld [vmem:[%s11317_s10 + $0x3e8] sm:$0xf]  ;;  %v8259_v12 = vld [vmem:[%s11317_s10 + $0x324] sm:$0xf]  ;;  %v7373_v47 = vld [vmem:[%s11317_s10 + $0x258] sm:$0xf] }
 0x2e9   :  { %v2942_v21 = vadd.f32 %v2940_v6, %v2906_v10  ;;  %v2943_v23 = vadd.f32 %v2941_v8, %v2841_v62  ;;  %v7678_v6 = vor.u32 %v8309_v58, %v7675_v4  ;;  %v8322_v8 = vld [vmem:[%s11317_s10 + $0x518] sm:$0xf0]  ;;  %v7375_v53 = vld [vmem:[%s11317_s10 + $0x2bc] sm:$0xf0]  ;;  %v8235_v58 = vld [vmem:[%s11317_s10 + $0x264] sm:$0xf] }
 0x2ea   :  { %v9791_v9 = vpop.f32.mrf.mxu3  ;;  %v8310_v10 = vld [vmem:[%s11317_s10 + $0x4bc] sm:$0xf]  ;;  %4253 = vmatpush.bf16.msrb.mxu0 %v7674_v3  ;;  %v7682_v62 = vor.u32 %v8322_v8, %v7681_v5  ;;  %v7381_v54 = vld [vmem:[%s11317_s10 + $0x260] sm:$0xf]  ;;  %v8221_v3 = vld [vmem:[%s11317_s10 + $0x1f0] sm:$0xf0] }
 0x2eb   :  { %v2856_v14 = vsel %vm2036_vm0, %v9791_v9, 0.0  ;;  %v2871_v15 = vmul.f32 %v9791_v9, %v9791_v9  ;;  %v2944_v26 = vadd.f32 %v2942_v21, %v2913_v19  ;;  %v2945_v35 = vadd.f32 %v2943_v23, %v2848_v28  ;;  %4271 = vmatpush.bf16.msrb.mxu1 %v7678_v6  ;;  %v8284_v19 = vld [vmem:[%s11317_s10 + $0x3ec] sm:$0xf]  ;;  %v7575_v23 = vld [vmem:[%s11317_s10 + $0x44c] sm:$0xf0] }
 0x2ec   :  { %v2857_v18 = vrot.slane %v2856_v14, 4  ;;  %v7686_v16 = vor.u32 %v8310_v10, %v7683_v13  ;;  %4289 = vmatpush.bf16.msrb.mxu2 %v7682_v62  ;;  %v7583_v28 = vld [vmem:[%s11317_s10 + $0x454] sm:$0xf0]  ;;  %v8246_v50 = vld [vmem:[%s11317_s10 + $0x2b8] sm:$0xf0] }
 0x2ed   :  { %v2928_v22 = vsel %vm2036_vm0, %v2871_v15, 0.0  ;;  %v2946_v44 = vadd.f32 %v2944_v26, %v2920_v32  ;;  %v2947_v60 = vadd.f32 %v2945_v35, %v2855_v43  ;;  %v8297_v26 = vld [vmem:[%s11317_s10 + $0x450] sm:$0xf0]  ;;  %v7586_v32 = vor.u32 %v8285_v27, %v7583_v28  ;;  %v8260_v43 = vld [vmem:[%s11317_s10 + $0x32c] sm:$0xf] }
 0x2ee   :  { %v2858_v24 = vadd.f32 %v2857_v18, %v2856_v14  ;;  %v2929_v25 = vrot.slane %v2928_v22, 4  ;;  %v8296_v18 = vld [vmem:[%s11317_s10 + $0x448] sm:$0xf0]  ;;  %4307 = vmatpush.bf16.msrb.mxu3 %v7686_v16  ;;  %v8209_v4 = vld [vmem:[%s11317_s10 + $0x194] sm:$0xf] }
 0x2ef   :  { %v2948_v2 = vadd.f32 %v2946_v44, %v2927_v55  ;;  %v7483_v44 = vld [vmem:[%s11317_s10 + $0x38c] sm:$0xf0]  ;;  %v8247_v55 = vld [vmem:[%s11317_s10 + $0x2c0] sm:$0xf0]  ;;  %v7281_v6 = vld [vmem:[%s11317_s10 + $0x198] sm:$0xf] }
 0x2f0   :  { %v2859_v30 = vrot.slane %v2858_v24, 2  ;;  %v2930_v31 = vadd.f32 %v2929_v25, %v2928_v22  ;;  %v7574_v22 = vor.u32 %v8296_v18, %v7573_v17  ;;  %v7578_v25 = vor.u32 %v8284_v19, %v7575_v23  ;;  %v8222_v8 = vld [vmem:[%s11317_s10 + $0x1f8] sm:$0xf0]  ;;  %v7173_v18 = vld [vmem:[%s11317_s10 + $0xc8] sm:$0xf] }
 0x2f1   :  { %v7486_v46 = vor.u32 %v8260_v43, %v7483_v44  ;;  %v7382_v57 = vor.u32 %v8247_v55, %v7381_v54  ;;  %v7282_v13 = vor.u32 %v8222_v8, %v7281_v6  ;;  %v8196_v19 = vld [vmem:[%s11317_s10 + $0x128] sm:$0xf0]  ;;  %v7175_v23 = vld [vmem:[%s11317_s10 + $0x12c] sm:$0xf0]  ;;  %v8197_v27 = vld [vmem:[%s11317_s10 + $0x130] sm:$0xf0] }
 0x2f2   :  { %v2860_v36 = vadd.f32 %v2859_v30, %v2858_v24  ;;  %v2931_v38 = vrot.slane %v2930_v31, 2  ;;  %v2798_v39 = vpop.f32.mrf.mxu3  ;;  %v7581_v24 = vld [vmem:[%s11317_s10 + $0x3f0] sm:$0xf]  ;;  %4254 = vmatpush.bf16.msrb.mxu0 %v7574_v22  ;;  %4272 = vmatpush.bf16.msrb.mxu1 %v7578_v25  ;;  %v7174_v22 = vor.u32 %v8196_v19, %v7173_v18  ;;  %v8185_v28 = vld [vmem:[%s11317_s10 + $0xd4] sm:$0xf] }
 0x2f3   :  { %4308 = vmatpush.bf16.msrb.mxu3 %v7586_v32  ;;  %v7481_v39 = vld [vmem:[%s11317_s10 + $0x328] sm:$0xf]  ;;  %v2952_v43 = vld [vmem:[%s11315_s8] sm:$0x1]  ;;  %v7791_v55 = vld [vmem:[%s11317_s10 + $0x5ec] sm:$0xf0] }
 0x2f4   :  { %v2861_v51 = vrot.slane %v2860_v36, 1  ;;  %v2932_v52 = vadd.f32 %v2931_v38, %v2930_v31  ;;  %v7582_v31 = vor.u32 %v8297_v26, %v7581_v24  ;;  %v7475_v38 = vld [vmem:[%s11317_s10 + $0x384] sm:$0xf0]  ;;  %v7482_v42 = vor.u32 %v8272_v48, %v7481_v39  ;;  %v7181_v24 = vld [vmem:[%s11317_s10 + $0xd0] sm:$0xf]  ;;  %s8469_s8 = smov [#allocation7]  }
 0x2f5   :  { %v7478_v41 = vor.u32 %v8259_v12, %v7475_v38  ;;  %v7081_v38 = vld [vmem:[%s11317_s10 + $0x8] sm:$0xf]  ;;  %v8323_v8 = vld [vmem:[%s11317_s10 + $0x520] sm:$0xf0]  ;;  %s11159_s17 = sshll.u32 %s8469_s8, 4  ;;  %s5900_s17 = int_to_ptr.vmem [resolvable:$true] %s11159_s17 }
 0x2f6   :  { %v2862_v61 = vadd.f32 %v2861_v51, %v2860_v36  ;;  %v2933_v1 = vrot.slane %v2932_v52, 1  ;;  %4290 = vmatpush.bf16.msrb.mxu2 %v7582_v31  ;;  %v7474_v36 = vor.u32 %v8271_v34, %v7473_v33  ;;  %v8234_v51 = vld [vmem:[%s11317_s10 + $0x25c] sm:$0xf]  ;;  %v7073_v33 = vld [vmem:[%s11317_s10] sm:$0xf] }
 0x2f7   :  { %4273 = vmatpush.bf16.msrb.mxu1 %v7478_v41  ;;  %4309 = vmatpush.bf16.msrb.mxu3 %v7486_v46  ;;  %v7378_v49 = vor.u32 %v8234_v51, %v7375_v53  ;;  %v8171_v34 = vld [vmem:[%s11317_s10 + $0x60] sm:$0xf0]  ;;  %v8172_v41 = vld [vmem:[%s11317_s10 + $0x68] sm:$0xf0]  ;;  %v7083_v46 = vld [vmem:[%s11317_s10 + $0x6c] sm:$0xf0] }
 0x2f8   :  { %v2934_v14 = vadd.f32 %v2933_v1, %v2932_v52  ;;  %v2949_v15 = vadd.f32 %v2947_v60, %v2862_v61  ;;  %4255 = vmatpush.bf16.msrb.mxu0 %v7474_v36  ;;  %v7374_v52 = vor.u32 %v8246_v50, %v7373_v47  ;;  %v7383_v60 = vld [vmem:[%s11317_s10 + $0x2c4] sm:$0xf0]  ;;  %v7273_v1 = vld [vmem:[%s11317_s10 + $0x190] sm:$0xf]  ;;  %v7074_v12 = vor.u32 %v8171_v34, %v7073_v33  ;;  %v8336_v53 = vld [vmem:[%s11317_s10 + $0x58c] sm:$0xf] }
 0x2f9   :  { %v7386_v61 = vor.u32 %v8235_v58, %v7383_v60  ;;  %v7274_v5 = vor.u32 %v8221_v3, %v7273_v1  ;;  %v7075_v36 = vld [vmem:[%s11317_s10 + $0x64] sm:$0xf0]  ;;  %v2968_v60 = vld [vmem:[%s11316_s9] sm:$0x1]  ;;  %v8337_v3 = vld [vmem:[%s11317_s10 + $0x594] sm:$0xf] }
 0x2fa   :  { %v2950_v20 = vadd.f32 %v2948_v2, %v2934_v14  ;;  %v9855_v21 = vmul.f32 0.055555556, %v2949_v15  ;;  %4291 = vmatpush.bf16.msrb.mxu2 %v7482_v42  ;;  %v7275_v2 = vld [vmem:[%s11317_s10 + $0x1f4] sm:$0xf0]  ;;  %v8210_v14 = vld [vmem:[%s11317_s10 + $0x19c] sm:$0xf] }
 0x2fb   :  { %4274 = vmatpush.bf16.msrb.mxu1 %v7378_v49  ;;  %4310 = vmatpush.bf16.msrb.mxu3 %v7386_v61  ;;  %v7278_v10 = vor.u32 %v8209_v4, %v7275_v2  ;;  %v7283_v15 = vld [vmem:[%s11317_s10 + $0x1fc] sm:$0xf0]  ;;  %v8160_v42 = vld [vmem:[%s11317_s10 + $0xc] sm:$0xf]  ;;  %v7789_v51 = vld [vmem:[%s11317_s10 + $0x588] sm:$0xf]  ;;  %v7794_v61 = vor.u32 %v8336_v53, %v7791_v55 }
 0x2fc   :  { %v2953_v29 = vmul.f32 0.055555556, %v2950_v20  ;;  %v2954_v30 = vmul.f32 %v9855_v21, %v9855_v21  ;;  %4256 = vmatpush.bf16.msrb.mxu0 %v7374_v52  ;;  %v7286_v16 = vor.u32 %v8210_v14, %v7283_v15  ;;  %v8184_v20 = vld [vmem:[%s11317_s10 + $0xcc] sm:$0xf]  ;;  %v7086_v50 = vor.u32 %v8160_v42, %v7083_v46  ;;  %v7797_v49 = vld [vmem:[%s11317_s10 + $0x590] sm:$0xf] }
 0x2fd   :  { %v7178_v26 = vor.u32 %v8184_v20, %v7175_v23  ;;  %v8348_v52 = vld [vmem:[%s11317_s10 + $0x5e8] sm:$0xf0]  ;;  %v7799_v4 = vld [vmem:[%s11317_s10 + $0x5f4] sm:$0xf0]  ;;  %v8287_v33 = vld [vmem:[%s11317_s10 + $0x404] sm:$0xf] }
 0x2fe   :  { %v2955_v35 = vsub.f32 %v2953_v29, %v2954_v30  ;;  %4292 = vmatpush.bf16.msrb.mxu2 %v7382_v57  ;;  %v7183_v29 = vld [vmem:[%s11317_s10 + $0x134] sm:$0xf0]  ;;  %v7182_v30 = vor.u32 %v8197_v27, %v7181_v24  ;;  %v7790_v54 = vor.u32 %v8348_v52, %v7789_v51  ;;  %v8349_v57 = vld [vmem:[%s11317_s10 + $0x5f0] sm:$0xf0]  ;;  %v7802_v6 = vor.u32 %v8337_v3, %v7799_v4  ;;  %v7499_v3 = vld [vmem:[%s11317_s10 + $0x39c] sm:$0xf0] }
 0x2ff   :  { %4275 = vmatpush.bf16.msrb.mxu1 %v7278_v10  ;;  %4311 = vmatpush.bf16.msrb.mxu3 %v7286_v16  ;;  %v7186_v31 = vor.u32 %v8185_v28, %v7183_v29  ;;  %v7798_v1 = vor.u32 %v8349_v57, %v7797_v49  ;;  %v8311_v10 = vld [vmem:[%s11317_s10 + $0x4c4] sm:$0xf]  ;;  %v8324_v16 = vld [vmem:[%s11317_s10 + $0x528] sm:$0xf0]  ;;  %v7589_v23 = vld [vmem:[%s11317_s10 + $0x3f8] sm:$0xf] }
 0x300   :  { %v9898_v45 = vadd.f32 1e-05, %v2955_v35  ;;  %4257 = vmatpush.bf16.msrb.mxu0 %v7274_v5  ;;  %v8159_v35 = vld [vmem:[%s11317_s10 + $0x4] sm:$0xf]  ;;  %v7689_v5 = vld [vmem:[%s11317_s10 + $0x4c0] sm:$0xf] }
 0x301   :  { %v7078_v48 = vor.u32 %v8159_v35, %v7075_v36  ;;  %v7690_v14 = vor.u32 %v8323_v8, %v7689_v5  ;;  %v7489_v35 = vld [vmem:[%s11317_s10 + $0x330] sm:$0xf]  ;;  %v8273_v36 = vld [vmem:[%s11317_s10 + $0x390] sm:$0xf0]  ;;  %v7491_v53 = vld [vmem:[%s11317_s10 + $0x394] sm:$0xf0] }
 0x302   :  { %8412 = vrsqrt.f32 %v9898_v45  ;;  %4293 = vmatpush.bf16.msrb.mxu2 %v7282_v13  ;;  %vm2963_vm8 = vweird.f32 %v9898_v45  ;;  %v7691_v13 = vld [vmem:[%s11317_s10 + $0x524] sm:$0xf0]  ;;  %v8261_v52 = vld [vmem:[%s11317_s10 + $0x334] sm:$0xf]  ;;  %v7497_v49 = vld [vmem:[%s11317_s10 + $0x338] sm:$0xf] }
 0x303   :  { %4276 = vmatpush.bf16.msrb.mxu1 %v7178_v26  ;;  %4312 = vmatpush.bf16.msrb.mxu3 %v7186_v31  ;;  %v7694_v15 = vor.u32 %v8311_v10, %v7691_v13  ;;  %v7591_v26 = vld [vmem:[%s11317_s10 + $0x45c] sm:$0xf0]  ;;  %v8274_v57 = vld [vmem:[%s11317_s10 + $0x398] sm:$0xf0]  ;;  %5904 = dma.vmem_to_hbm [thread:$0]  %s5900_s17, 32, %s5902_s5, [#allocation8]  }
 0x304   :  { %4258 = vmatpush.bf16.msrb.mxu0 %v7174_v22  ;;  %v7699_v22 = vld [vmem:[%s11317_s10 + $0x52c] sm:$0xf0]  ;;  %v7597_v31 = vld [vmem:[%s11317_s10 + $0x400] sm:$0xf] }
 0x306   :  { %4294 = vmatpush.bf16.msrb.mxu2 %v7182_v30 }
 0x307   :  { %4277 = vmatpush.bf16.msrb.mxu1 %v7078_v48  ;;  %4313 = vmatpush.bf16.msrb.mxu3 %v7086_v50 }
 0x308   :  { %v8413_v62 = vpop.eup %8412  ;;  %4259 = vmatpush.bf16.msrb.mxu0 %v7074_v12  ;;  %v7599_v12 = vld [vmem:[%s11317_s10 + $0x464] sm:$0xf0] }
 0x309   :  { %v2958_v17 = vmul.f32 %v8413_v62, %v9898_v45  ;;  %vm2964_vm7 = vweird.f32 %v8413_v62  ;;  %v7082_v45 = vor.u32 %v8172_v41, %v7081_v38  ;;  %v7602_v48 = vor.u32 %v8287_v33, %v7599_v12  ;;  %v7297_v12 = vld [vmem:[%s11317_s10 + $0x1a8] sm:$0xf] }
 0x30a   :  { %vm10000_vm9 = vmor %vm2963_vm8, %vm2964_vm7  ;;  %v7490_v41 = vor.u32 %v8273_v36, %v7489_v35  ;;  %v8224_v35 = vld [vmem:[%s11317_s10 + $0x208] sm:$0xf0] }
 0x30b   :  { %v2959_v25 = vmul.f32 %v8413_v62, %v2958_v17  ;;  %4295 = vmatpush.bf16.msrb.mxu2 %v7082_v45  ;;  %4342 = vmatpush.bf16.msra.mxu1 %v7794_v61  ;;  %v8312_v17 = vld [vmem:[%s11317_s10 + $0x4cc] sm:$0xf] }
 0x30c   :  { %4324 = vmatpush.bf16.msra.mxu0 %v7790_v54  ;;  %4378 = vmatpush.bf16.msra.mxu3 %v7802_v6  ;;  %v7702_v24 = vor.u32 %v8312_v17, %v7699_v22  ;;  %v7498_v17 = vor.u32 %v8274_v57, %v7497_v49  ;;  %v7091_v49 = vld [vmem:[%s11317_s10 + $0x74] sm:$0xf0] }
 0x30d   :  { %v2960_v32 = vmul.f32 0.5, %v2959_v25  ;;  %v8298_v25 = vld [vmem:[%s11317_s10 + $0x458] sm:$0xf0]  ;;  %v7097_v57 = vld [vmem:[%s11317_s10 + $0x18] sm:$0xf] }
 0x30f   :  { %v2961_v39 = vsub.f32 1.5, %v2960_v32  ;;  %4360 = vmatpush.bf16.msra.mxu2 %v7798_v1  ;;  %v8299_v32 = vld [vmem:[%s11317_s10 + $0x460] sm:$0xf0]  ;;  %4343 = vmatpush.bf16.msra.mxu1 %v7694_v15  ;;  %v7494_v15 = vor.u32 %v8261_v52, %v7491_v53  ;;  %v8161_v52 = vld [vmem:[%s11317_s10 + $0x14] sm:$0xf] }
 0x310   :  { %4325 = vmatpush.bf16.msra.mxu0 %v7690_v14  ;;  %4379 = vmatpush.bf16.msra.mxu3 %v7702_v24 }
 0x311   :  { %v2962_v47 = vmul.f32 %v8413_v62, %v2961_v39  ;;  %v7598_v39 = vor.u32 %v8299_v32, %v7597_v31  ;;  %v7399_v31 = vld [vmem:[%s11317_s10 + $0x2d4] sm:$0xf0]  ;;  %v7289_v32 = vld [vmem:[%s11317_s10 + $0x1a0] sm:$0xf] }
 0x313   :  { %v2966_v58 = vsel %vm10000_vm9, %v8413_v62, %v2962_v47  ;;  %v7697_v62 = vld [vmem:[%s11317_s10 + $0x4c8] sm:$0xf] }
 0x314   :  { %v2967_v2 = vmul.f32 %v2966_v58, %v2952_v43  ;;  %v7698_v20 = vor.u32 %v8324_v16, %v7697_v62  ;;  %4380 = vmatpush.bf16.msra.mxu3 %v7602_v48  ;;  %v8262_v58 = vld [vmem:[%s11317_s10 + $0x33c] sm:$0xf]  ;;  %v7389_v62 = vld [vmem:[%s11317_s10 + $0x268] sm:$0xf] }
 0x315   :  { %v8198_v48 = vld [vmem:[%s11317_s10 + $0x138] sm:$0xf0] }
 0x316   :  { %v2969_v18 = vmul.f32 %v2967_v2, %v9855_v21  ;;  %v2972_v19 = vperm.slane %v2967_v2, 0  ;;  %v8286_v21 = vld [vmem:[%s11317_s10 + $0x3fc] sm:$0xf]  ;;  %4361 = vmatpush.bf16.msra.mxu2 %v7698_v20  ;;  %v8236_v20 = vld [vmem:[%s11317_s10 + $0x26c] sm:$0xf] }
 0x317   :  { %v7594_v38 = vor.u32 %v8286_v21, %v7591_v26  ;;  %v7397_v21 = vld [vmem:[%s11317_s10 + $0x270] sm:$0xf] }
 0x318   :  { %v2970_v27 = vsub.f32 %v2968_v60, %v2969_v18  ;;  %v2974_v28 = vmul.f32 %v2972_v19, %v9749_v7  ;;  %v2983_v29 = vmul.f32 %v2972_v19, %v9735_v59  ;;  %v2989_v30 = vmul.f32 %v2972_v19, %v9741_v63 }
 0x319   :  { %v2995_v34 = vmul.f32 %v2972_v19, %v9755_v11  ;;  %v3001_v7 = vmul.f32 %v2972_v19, %v9776_v56  ;;  %v3007_v59 = vmul.f32 %v2972_v19, %v9763_v37  ;;  %v3013_v63 = vmul.f32 %v2972_v19, %v9767_v40  ;;  %4344 = vmatpush.bf16.msra.mxu1 %v7594_v38 }
 0x31a   :  { %v2976_v11 = vperm.slane %v2970_v27, 0  ;;  %v3019_v56 = vmul.f32 %v2972_v19, %v9781_v0  ;;  %v3025_v37 = vmul.f32 %v2972_v19, %v9791_v9  ;;  %v7590_v40 = vor.u32 %v8298_v25, %v7589_v23  ;;  %4362 = vmatpush.bf16.msra.mxu2 %v7598_v39  ;;  %v8248_v19 = vld [vmem:[%s11317_s10 + $0x2c8] sm:$0xf0]  ;;  %v7391_v25 = vld [vmem:[%s11317_s10 + $0x2cc] sm:$0xf0] }
 0x31b   :  { %v7502_v18 = vor.u32 %v8262_v58, %v7499_v3  ;;  %v7390_v24 = vor.u32 %v8248_v19, %v7389_v62  ;;  %v7394_v27 = vor.u32 %v8236_v20, %v7391_v25  ;;  %v7189_v39 = vld [vmem:[%s11317_s10 + $0xd8] sm:$0xf]  ;;  %v7099_v3 = vld [vmem:[%s11317_s10 + $0x7c] sm:$0xf0] }
 0x31c   :  { %v2978_v42 = vadd.f32 %v2976_v11, %v2974_v28  ;;  %v2984_v43 = vadd.f32 %v2983_v29, %v2976_v11  ;;  %v2990_v44 = vadd.f32 %v2989_v30, %v2976_v11  ;;  %v2996_v45 = vadd.f32 %v2995_v34, %v2976_v11  ;;  %4326 = vmatpush.bf16.msra.mxu0 %v7590_v40  ;;  %v8249_v28 = vld [vmem:[%s11317_s10 + $0x2d0] sm:$0xf0]  ;;  %v8223_v34 = vld [vmem:[%s11317_s10 + $0x200] sm:$0xf0]  ;;  %v7299_v40 = vld [vmem:[%s11317_s10 + $0x20c] sm:$0xf0] }
 0x31d   :  { %v3002_v46 = vadd.f32 %v3001_v7, %v2976_v11  ;;  %v3008_v47 = vadd.f32 %v3007_v59, %v2976_v11  ;;  %v3014_v50 = vadd.f32 %v3013_v63, %v2976_v11  ;;  %v3020_v51 = vadd.f32 %v3019_v56, %v2976_v11  ;;  %4345 = vmatpush.bf16.msra.mxu1 %v7494_v15  ;;  %v8237_v29 = vld [vmem:[%s11317_s10 + $0x274] sm:$0xf]  ;;  %v8211_v7 = vld [vmem:[%s11317_s10 + $0x1a4] sm:$0xf]  ;;  %v7291_v63 = vld [vmem:[%s11317_s10 + $0x204] sm:$0xf0] }
 0x31e   :  { %vm2979_vm10 = vcmp.ge.f32.partialorder %v2978_v42, 0.0  ;;  %v2980_v0 = vmul.f32 0.2, %v2978_v42  ;;  %vm2985_vm11 = vcmp.ge.f32.partialorder %v2984_v43, 0.0  ;;  %v2986_v9 = vmul.f32 0.2, %v2984_v43  ;;  %4363 = vmatpush.bf16.msra.mxu2 %v7498_v17  ;;  %4381 = vmatpush.bf16.msra.mxu3 %v7502_v18 }
 0x31f   :  { %vm2991_vm12 = vcmp.ge.f32.partialorder %v2990_v44, 0.0  ;;  %v2992_v54 = vmul.f32 0.2, %v2990_v44  ;;  %vm2997_vm13 = vcmp.ge.f32.partialorder %v2996_v45, 0.0  ;;  %v2998_v55 = vmul.f32 0.2, %v2996_v45 }
 0x320   :  { %v2981_v60 = vsel %vm2979_vm10, %v2978_v42, %v2980_v0  ;;  %v2987_v61 = vsel %vm2985_vm11, %v2984_v43, %v2986_v9  ;;  %vm3003_vm14 = vcmp.ge.f32.partialorder %v3002_v46, 0.0  ;;  %v3004_v1 = vmul.f32 0.2, %v3002_v46  ;;  %4327 = vmatpush.bf16.msra.mxu0 %v7490_v41  ;;  %v8186_v41 = vld [vmem:[%s11317_s10 + $0xdc] sm:$0xf] }
 0x321   :  { %2982 = vst [vmem:[#allocation2] sm:$0x3] %v2981_v60  ;;  %v2993_v4 = vsel %vm2991_vm12, %v2990_v44, %v2992_v54  ;;  %v2999_v5 = vsel %vm2997_vm13, %v2996_v45, %v2998_v55  ;;  %vm3009_vm15 = vcmp.ge.f32.partialorder %v3008_v47, 0.0  ;;  %v3010_v2 = vmul.f32 0.2, %v3008_v47  ;;  %4346 = vmatpush.bf16.msra.mxu1 %v7394_v27 }
 0x322   :  { %2988 = vst [vmem:[#allocation2 + $0x2] sm:$0x3] %v2987_v61  ;;  %v3005_v6 = vsel %vm3003_vm14, %v3002_v46, %v3004_v1  ;;  %vm3015_vm1 = vcmp.ge.f32.partialorder %v3014_v50, 0.0  ;;  %v3016_v8 = vmul.f32 0.2, %v3014_v50  ;;  %vm3021_vm2 = vcmp.ge.f32.partialorder %v3020_v51, 0.0 }
 0x323   :  { %2994 = vst [vmem:[#allocation2 + $0x4] sm:$0x3] %v2993_v4  ;;  %v3011_v10 = vsel %vm3009_vm15, %v3008_v47, %v3010_v2  ;;  %v3022_v13 = vmul.f32 0.2, %v3020_v51  ;;  %v3026_v14 = vadd.f32 %v3025_v37, %v2976_v11  ;;  %v7398_v30 = vor.u32 %v8249_v28, %v7397_v21  ;;  %v8212_v37 = vld [vmem:[%s11317_s10 + $0x1ac] sm:$0xf] }
 0x324   :  { %3000 = vst [vmem:[#allocation2 + $0x6] sm:$0x3] %v2999_v5  ;;  %v3017_v16 = vsel %vm3015_vm1, %v3014_v50, %v3016_v8  ;;  %4328 = vmatpush.bf16.msra.mxu0 %v7390_v24  ;;  %v7402_v33 = vor.u32 %v8237_v29, %v7399_v31  ;;  %v7290_v59 = vor.u32 %v8223_v34, %v7289_v32  ;;  %v7191_v43 = vld [vmem:[%s11317_s10 + $0x13c] sm:$0xf0]  ;;  %v8199_v45 = vld [vmem:[%s11317_s10 + $0x140] sm:$0xf0] }
 0x325   :  { %3006 = vst [vmem:[#allocation2 + $0x8] sm:$0x3] %v3005_v6  ;;  %v3023_v22 = vsel %vm3021_vm2, %v3020_v51, %v3022_v13  ;;  %vm3027_vm3 = vcmp.ge.f32.partialorder %v3026_v14, 0.0  ;;  %v3028_v23 = vmul.f32 0.2, %v3026_v14  ;;  %4364 = vmatpush.bf16.msra.mxu2 %v7398_v30  ;;  %v7294_v11 = vor.u32 %v8211_v7, %v7291_v63 }
 0x326   :  { %3012 = vst [vmem:[#allocation2 + $0xa] sm:$0x3] %v3011_v10  ;;  %4382 = vmatpush.bf16.msra.mxu3 %v7402_v33  ;;  %v7298_v56 = vor.u32 %v8224_v35, %v7297_v12  ;;  %v7302_v38 = vor.u32 %v8212_v37, %v7299_v40  ;;  %v7190_v42 = vor.u32 %v8198_v48, %v7189_v39  ;;  %v7197_v44 = vld [vmem:[%s11317_s10 + $0xe0] sm:$0xf]  ;;  %v8187_v47 = vld [vmem:[%s11317_s10 + $0xe4] sm:$0xf] }
 0x327   :  { %3018 = vst [vmem:[#allocation2 + $0xc] sm:$0x3] %v3017_v16  ;;  %v3029_v26 = vsel %vm3027_vm3, %v3026_v14, %v3028_v23  ;;  %4347 = vmatpush.bf16.msra.mxu1 %v7294_v11  ;;  %v7194_v46 = vor.u32 %v8186_v41, %v7191_v43  ;;  %v7199_v50 = vld [vmem:[%s11317_s10 + $0x144] sm:$0xf0]  ;;  %v7089_v51 = vld [vmem:[%s11317_s10 + $0x10] sm:$0xf]  ;;  %v7198_v54 = vor.u32 %v8199_v45, %v7197_v44 }
 0x328   :  { %3024 = vst [vmem:[#allocation2 + $0xe] sm:$0x3] %v3023_v22  ;;  %4329 = vmatpush.bf16.msra.mxu0 %v7290_v59  ;;  %v8173_v9 = vld [vmem:[%s11317_s10 + $0x70] sm:$0xf0]  ;;  %v7202_v55 = vor.u32 %v8187_v47, %v7199_v50  ;;  %v7094_v60 = vor.u32 %v8161_v52, %v7091_v49  ;;  %v8174_v61 = vld [vmem:[%s11317_s10 + $0x78] sm:$0xf0] }
 0x329   :  { %3030 = vst [vmem:[#allocation2 + $0x10] sm:$0x3] %v3029_v26  ;;  %4365 = vmatpush.bf16.msra.mxu2 %v7298_v56  ;;  %v7090_v58 = vor.u32 %v8173_v9, %v7089_v51  ;;  %v8162_v1 = vld [vmem:[%s11317_s10 + $0x1c] sm:$0xf]  ;;  %v7805_v4 = vld [vmem:[%s11317_s10 + $0x598] sm:$0xf]  ;;  %v7098_v14 = vor.u32 %v8174_v61, %v7097_v57 }
 0x32a   :  { %4383 = vmatpush.bf16.msra.mxu3 %v7302_v38  ;;  %v8350_v5 = vld [vmem:[%s11317_s10 + $0x5f8] sm:$0xf0]  ;;  %v7807_v8 = vld [vmem:[%s11317_s10 + $0x5fc] sm:$0xf0]  ;;  %v8351_v13 = vld [vmem:[%s11317_s10 + $0x600] sm:$0xf0]  ;;  %v7102_v15 = vor.u32 %v8162_v1, %v7099_v3 }
 0x32b   :  { %v3031_v36 = vld [vmem:[#allocation2] sm:$0xff]  ;;  %4348 = vmatpush.bf16.msra.mxu1 %v7194_v46  ;;  %v8338_v2 = vld [vmem:[%s11317_s10 + $0x59c] sm:$0xf]  ;;  %v7806_v6 = vor.u32 %v8350_v5, %v7805_v4  ;;  %v7813_v10 = vld [vmem:[%s11317_s10 + $0x5a0] sm:$0xf] }
 0x32c   :  { %4330 = vmatpush.bf16.msra.mxu0 %v7190_v42  ;;  %v7810_v62 = vor.u32 %v8338_v2, %v7807_v8  ;;  %v8339_v16 = vld [vmem:[%s11317_s10 + $0x5a4] sm:$0xf]  ;;  %v7815_v17 = vld [vmem:[%s11317_s10 + $0x604] sm:$0xf0]  ;;  %v7705_v18 = vld [vmem:[%s11317_s10 + $0x4d0] sm:$0xf]  ;;  %v7814_v19 = vor.u32 %v8351_v13, %v7813_v10 }
 0x32d   :  { %4366 = vmatpush.bf16.msra.mxu2 %v7198_v54  ;;  %v7818_v20 = vor.u32 %v8339_v16, %v7815_v17  ;;  %v8325_v22 = vld [vmem:[%s11317_s10 + $0x530] sm:$0xf0]  ;;  %v7707_v24 = vld [vmem:[%s11317_s10 + $0x534] sm:$0xf0]  ;;  %v8326_v27 = vld [vmem:[%s11317_s10 + $0x538] sm:$0xf0] }
 0x32e   :  { %4384 = vmatpush.bf16.msra.mxu3 %v7202_v55  ;;  %v8313_v23 = vld [vmem:[%s11317_s10 + $0x4d4] sm:$0xf]  ;;  %v7706_v25 = vor.u32 %v8325_v22, %v7705_v18  ;;  %v7713_v26 = vld [vmem:[%s11317_s10 + $0x4d8] sm:$0xf]  ;;  %v8314_v28 = vld [vmem:[%s11317_s10 + $0x4dc] sm:$0xf] }
 0x32f   :  { %v3032_v0 = vld [vmem:[#allocation2 + $0x8] sm:$0xff]  ;;  %4349 = vmatpush.bf16.msra.mxu1 %v7094_v60  ;;  %v7710_v21 = vor.u32 %v8313_v23, %v7707_v24  ;;  %v7715_v29 = vld [vmem:[%s11317_s10 + $0x53c] sm:$0xf0]  ;;  %v7605_v30 = vld [vmem:[%s11317_s10 + $0x408] sm:$0xf]  ;;  %v7714_v34 = vor.u32 %v8326_v27, %v7713_v26 }
 0x330   :  { %v10199_v53 = vpack.c.bf16 %v3032_v0, %v3031_v36  ;;  %4331 = vmatpush.bf16.msra.mxu0 %v7090_v58  ;;  %v8300_v31 = vld [vmem:[%s11317_s10 + $0x468] sm:$0xf0]  ;;  %v7607_v33 = vld [vmem:[%s11317_s10 + $0x46c] sm:$0xf0]  ;;  %v7718_v7 = vor.u32 %v8314_v28, %v7715_v29  ;;  %v8301_v35 = vld [vmem:[%s11317_s10 + $0x470] sm:$0xf0] }
 0x331   :  { %4367 = vmatpush.bf16.msra.mxu2 %v7098_v14  ;;  %v8288_v32 = vld [vmem:[%s11317_s10 + $0x40c] sm:$0xf]  ;;  %v7613_v59 = vld [vmem:[%s11317_s10 + $0x410] sm:$0xf]  ;;  %v7606_v63 = vor.u32 %v8300_v31, %v7605_v30  ;;  %v8289_v36 = vld [vmem:[%s11317_s10 + $0x414] sm:$0xf] }
 0x332   :  { %4260 = vmatmul.bf16.vlgmr.msrb.gmra.mxu0 %v10199_v53  ;;  %4278 = vmatmul.bf16.vlgmr.msrb.gmra.mxu1 %v10199_v53  ;;  %v7610_v12 = vor.u32 %v8288_v32, %v7607_v33  ;;  %v7615_v11 = vld [vmem:[%s11317_s10 + $0x474] sm:$0xf0]  ;;  %v7505_v37 = vld [vmem:[%s11317_s10 + $0x340] sm:$0xf]  ;;  %v8275_v40 = vld [vmem:[%s11317_s10 + $0x3a0] sm:$0xf0]  ;;  %v7614_v38 = vor.u32 %v8301_v35, %v7613_v59 }
 0x333   :  { %4296 = vmatmul.bf16.vlgmr.msrb.gmra.mxu2 %v10199_v53  ;;  %4314 = vmatmul.bf16.vlgmr.msrb.gmra.mxu3 %v10199_v53  ;;  %v3033_v56 = vld [vmem:[#allocation2 + $0x10] sm:$0x3]  ;;  %v7618_v39 = vor.u32 %v8289_v36, %v7615_v11  ;;  %v8263_v48 = vld [vmem:[%s11317_s10 + $0x344] sm:$0xf]  ;;  %v7507_v41 = vld [vmem:[%s11317_s10 + $0x3a4] sm:$0xf0]  ;;  %v7506_v47 = vor.u32 %v8275_v40, %v7505_v37 }
 0x334   :  { %4396 = vmatpush.bf16.msrb.mxu0 %v7806_v6  ;;  %4414 = vmatpush.bf16.msrb.mxu1 %v7810_v62  ;;  %v7513_v42 = vld [vmem:[%s11317_s10 + $0x348] sm:$0xf]  ;;  %v8276_v43 = vld [vmem:[%s11317_s10 + $0x3a8] sm:$0xf0]  ;;  %v7515_v45 = vld [vmem:[%s11317_s10 + $0x3ac] sm:$0xf0]  ;;  %v10316_v46 = vpack.c.bf16 %v3033_v56, %v3033_v56  ;;  %v7510_v50 = vor.u32 %v8263_v48, %v7507_v41 }
 0x335   :  { %4385 = vmatpush.bf16.msra.mxu3 %v7102_v15  ;;  %4432 = vmatpush.bf16.msrb.mxu2 %v7814_v19  ;;  %v8264_v44 = vld [vmem:[%s11317_s10 + $0x34c] sm:$0xf]  ;;  %v7514_v51 = vor.u32 %v8276_v43, %v7513_v42  ;;  %v7405_v9 = vld [vmem:[%s11317_s10 + $0x278] sm:$0xf]  ;;  %v8250_v52 = vld [vmem:[%s11317_s10 + $0x2d8] sm:$0xf0] }
 0x336   :  { %v7518_v0 = vor.u32 %v8264_v44, %v7515_v45  ;;  %v8238_v54 = vld [vmem:[%s11317_s10 + $0x27c] sm:$0xf]  ;;  %v7407_v55 = vld [vmem:[%s11317_s10 + $0x2dc] sm:$0xf0]  ;;  %v8251_v57 = vld [vmem:[%s11317_s10 + $0x2e0] sm:$0xf0]  ;;  %v7406_v61 = vor.u32 %v8250_v52, %v7405_v9 }
 0x337   :  { %v7413_v49 = vld [vmem:[%s11317_s10 + $0x280] sm:$0xf]  ;;  %v8239_v58 = vld [vmem:[%s11317_s10 + $0x284] sm:$0xf]  ;;  %v7415_v60 = vld [vmem:[%s11317_s10 + $0x2e4] sm:$0xf0]  ;;  %v7410_v1 = vor.u32 %v8238_v54, %v7407_v55 }
 0x338   :  { %4397 = vmatpush.bf16.msrb.mxu0 %v7706_v25  ;;  %4415 = vmatpush.bf16.msrb.mxu1 %v7710_v21  ;;  %v7305_v3 = vld [vmem:[%s11317_s10 + $0x1b0] sm:$0xf]  ;;  %v8225_v4 = vld [vmem:[%s11317_s10 + $0x210] sm:$0xf0]  ;;  %v7414_v5 = vor.u32 %v8251_v57, %v7413_v49  ;;  %v7418_v2 = vor.u32 %v8239_v58, %v7415_v60  ;;  %v7307_v8 = vld [vmem:[%s11317_s10 + $0x214] sm:$0xf0] }
 0x339   :  { %4450 = vmatpush.bf16.msrb.mxu3 %v7818_v20  ;;  %4433 = vmatpush.bf16.msrb.mxu2 %v7714_v34  ;;  %v8213_v6 = vld [vmem:[%s11317_s10 + $0x1b4] sm:$0xf]  ;;  %v7313_v10 = vld [vmem:[%s11317_s10 + $0x1b8] sm:$0xf]  ;;  %v8226_v13 = vld [vmem:[%s11317_s10 + $0x218] sm:$0xf0]  ;;  %v7306_v62 = vor.u32 %v8225_v4, %v7305_v3 }
 0x33a   :  { %v8214_v14 = vld [vmem:[%s11317_s10 + $0x1bc] sm:$0xf]  ;;  %v7315_v15 = vld [vmem:[%s11317_s10 + $0x21c] sm:$0xf0]  ;;  %v7310_v16 = vor.u32 %v8213_v6, %v7307_v8  ;;  %v7205_v17 = vld [vmem:[%s11317_s10 + $0xe8] sm:$0xf]  ;;  %v7314_v19 = vor.u32 %v8226_v13, %v7313_v10 }
 0x33b   :  { %v8200_v18 = vld [vmem:[%s11317_s10 + $0x148] sm:$0xf0]  ;;  %v7318_v20 = vor.u32 %v8214_v14, %v7315_v15  ;;  %v7207_v23 = vld [vmem:[%s11317_s10 + $0x14c] sm:$0xf0]  ;;  %v8201_v25 = vld [vmem:[%s11317_s10 + $0x150] sm:$0xf0] }
 0x33c   :  { %4398 = vmatpush.bf16.msrb.mxu0 %v7606_v63  ;;  %4416 = vmatpush.bf16.msrb.mxu1 %v7610_v12  ;;  %v8188_v22 = vld [vmem:[%s11317_s10 + $0xec] sm:$0xf]  ;;  %v7213_v24 = vld [vmem:[%s11317_s10 + $0xf0] sm:$0xf]  ;;  %v8189_v21 = vld [vmem:[%s11317_s10 + $0xf4] sm:$0xf]  ;;  %v7206_v27 = vor.u32 %v8200_v18, %v7205_v17 }
 0x33d   :  { %4451 = vmatpush.bf16.msrb.mxu3 %v7718_v7  ;;  %4434 = vmatpush.bf16.msrb.mxu2 %v7614_v38  ;;  %v7215_v26 = vld [vmem:[%s11317_s10 + $0x154] sm:$0xf0]  ;;  %v7210_v28 = vor.u32 %v8188_v22, %v7207_v23  ;;  %v7105_v29 = vld [vmem:[%s11317_s10 + $0x20] sm:$0xf]  ;;  %v8175_v30 = vld [vmem:[%s11317_s10 + $0x80] sm:$0xf0]  ;;  %v7214_v31 = vor.u32 %v8201_v25, %v7213_v24 }
 0x33e   :  { %v7218_v32 = vor.u32 %v8189_v21, %v7215_v26  ;;  %v8163_v33 = vld [vmem:[%s11317_s10 + $0x24] sm:$0xf]  ;;  %v7107_v34 = vld [vmem:[%s11317_s10 + $0x84] sm:$0xf0]  ;;  %v8176_v59 = vld [vmem:[%s11317_s10 + $0x88] sm:$0xf0]  ;;  %v7106_v35 = vor.u32 %v8175_v30, %v7105_v29 }
 0x33f   :  { %v7113_v7 = vld [vmem:[%s11317_s10 + $0x28] sm:$0xf]  ;;  %v8164_v63 = vld [vmem:[%s11317_s10 + $0x2c] sm:$0xf]  ;;  %v7115_v12 = vld [vmem:[%s11317_s10 + $0x8c] sm:$0xf0]  ;;  %v7110_v36 = vor.u32 %v8163_v33, %v7107_v34 }
 0x340   :  { %4399 = vmatpush.bf16.msrb.mxu0 %v7506_v47  ;;  %4417 = vmatpush.bf16.msrb.mxu1 %v7510_v50  ;;  %v7114_v11 = vor.u32 %v8176_v59, %v7113_v7  ;;  %v7118_v56 = vor.u32 %v8164_v63, %v7115_v12  ;;  %v7821_v37 = vld [vmem:[%s11317_s10 + $0x5a8] sm:$0xf]  ;;  %v8352_v40 = vld [vmem:[%s11317_s10 + $0x608] sm:$0xf0]  ;;  %v7823_v48 = vld [vmem:[%s11317_s10 + $0x60c] sm:$0xf0] }
 0x341   :  { %4452 = vmatpush.bf16.msrb.mxu3 %v7618_v39  ;;  %4435 = vmatpush.bf16.msrb.mxu2 %v7514_v51  ;;  %v8340_v38 = vld [vmem:[%s11317_s10 + $0x5ac] sm:$0xf]  ;;  %v7822_v39 = vor.u32 %v8352_v40, %v7821_v37  ;;  %v7829_v41 = vld [vmem:[%s11317_s10 + $0x5b0] sm:$0xf]  ;;  %v8353_v42 = vld [vmem:[%s11317_s10 + $0x610] sm:$0xf0] }
 0x342   :  { %4265 = vmatmul.bf16.gmra.mxu0 %v10316_v46  ;;  %4283 = vmatmul.bf16.gmra.mxu1 %v10316_v46  ;;  %v7826_v43 = vor.u32 %v8340_v38, %v7823_v48  ;;  %v7830_v44 = vor.u32 %v8353_v42, %v7829_v41  ;;  %v8341_v45 = vld [vmem:[%s11317_s10 + $0x5b4] sm:$0xf]  ;;  %v7831_v47 = vld [vmem:[%s11317_s10 + $0x614] sm:$0xf0]  ;;  %v7721_v50 = vld [vmem:[%s11317_s10 + $0x4e0] sm:$0xf] }
 0x343   :  { %4301 = vmatmul.bf16.gmra.mxu2 %v10316_v46  ;;  %4319 = vmatmul.bf16.gmra.mxu3 %v10316_v46  ;;  %v7834_v51 = vor.u32 %v8341_v45, %v7831_v47  ;;  %v8315_v9 = vld [vmem:[%s11317_s10 + $0x4e4] sm:$0xf]  ;;  %v7723_v52 = vld [vmem:[%s11317_s10 + $0x544] sm:$0xf0]  ;;  %v8328_v55 = vld [vmem:[%s11317_s10 + $0x548] sm:$0xf0] }
 0x344   :  { %4400 = vmatpush.bf16.msrb.mxu0 %v7406_v61  ;;  %4418 = vmatpush.bf16.msrb.mxu1 %v7410_v1  ;;  %v7729_v54 = vld [vmem:[%s11317_s10 + $0x4e8] sm:$0xf]  ;;  %v8316_v49 = vld [vmem:[%s11317_s10 + $0x4ec] sm:$0xf]  ;;  %v7726_v58 = vor.u32 %v8315_v9, %v7723_v52  ;;  %v7731_v60 = vld [vmem:[%s11317_s10 + $0x54c] sm:$0xf0] }
 0x345   :  { %4453 = vmatpush.bf16.msrb.mxu3 %v7518_v0  ;;  %4436 = vmatpush.bf16.msrb.mxu2 %v7414_v5  ;;  %v8327_v0 = vld [vmem:[%s11317_s10 + $0x540] sm:$0xf0]  ;;  %v7621_v61 = vld [vmem:[%s11317_s10 + $0x418] sm:$0xf]  ;;  %v8302_v1 = vld [vmem:[%s11317_s10 + $0x478] sm:$0xf0]  ;;  %v7730_v3 = vor.u32 %v8328_v55, %v7729_v54  ;;  %v7734_v4 = vor.u32 %v8316_v49, %v7731_v60 }
 0x346   :  { %v7722_v57 = vor.u32 %v8327_v0, %v7721_v50  ;;  %v8290_v5 = vld [vmem:[%s11317_s10 + $0x41c] sm:$0xf]  ;;  %v7629_v6 = vld [vmem:[%s11317_s10 + $0x420] sm:$0xf]  ;;  %v8303_v8 = vld [vmem:[%s11317_s10 + $0x480] sm:$0xf0]  ;;  %v7622_v14 = vor.u32 %v8302_v1, %v7621_v61 }
 0x347   :  { %v8291_v10 = vld [vmem:[%s11317_s10 + $0x424] sm:$0xf]  ;;  %v7631_v13 = vld [vmem:[%s11317_s10 + $0x484] sm:$0xf0]  ;;  %v7521_v17 = vld [vmem:[%s11317_s10 + $0x350] sm:$0xf] }
 0x348   :  { %4401 = vmatpush.bf16.msrb.mxu0 %v7306_v62  ;;  %4419 = vmatpush.bf16.msrb.mxu1 %v7310_v16  ;;  %v7630_v62 = vor.u32 %v8303_v8, %v7629_v6  ;;  %v7634_v16 = vor.u32 %v8291_v10, %v7631_v13  ;;  %v8277_v18 = vld [vmem:[%s11317_s10 + $0x3b0] sm:$0xf0]  ;;  %v7529_v22 = vld [vmem:[%s11317_s10 + $0x358] sm:$0xf]  ;;  %v8278_v23 = vld [vmem:[%s11317_s10 + $0x3b8] sm:$0xf0] }
 0x349   :  { %4454 = vmatpush.bf16.msrb.mxu3 %v7418_v2  ;;  %4437 = vmatpush.bf16.msrb.mxu2 %v7314_v19  ;;  %v7623_v2 = vld [vmem:[%s11317_s10 + $0x47c] sm:$0xf0]  ;;  %v8265_v19 = vld [vmem:[%s11317_s10 + $0x354] sm:$0xf]  ;;  %v8266_v24 = vld [vmem:[%s11317_s10 + $0x35c] sm:$0xf]  ;;  %v7522_v21 = vor.u32 %v8277_v18, %v7521_v17 }
 0x34a   :  { %v7626_v15 = vor.u32 %v8290_v5, %v7623_v2  ;;  %v7531_v25 = vld [vmem:[%s11317_s10 + $0x3bc] sm:$0xf0]  ;;  %v7421_v29 = vld [vmem:[%s11317_s10 + $0x288] sm:$0xf]  ;;  %v8252_v30 = vld [vmem:[%s11317_s10 + $0x2e8] sm:$0xf0] }
 0x34b   :  { %v7429_v33 = vld [vmem:[%s11317_s10 + $0x290] sm:$0xf]  ;;  %v8253_v34 = vld [vmem:[%s11317_s10 + $0x2f0] sm:$0xf0]  ;;  %v7431_v59 = vld [vmem:[%s11317_s10 + $0x2f4] sm:$0xf0]  ;;  %v7422_v63 = vor.u32 %v8252_v30, %v7421_v29 }
 0x34c   :  { %4402 = vmatpush.bf16.msrb.mxu0 %v7206_v27  ;;  %4420 = vmatpush.bf16.msrb.mxu1 %v7210_v28  ;;  %v7530_v27 = vor.u32 %v8278_v23, %v7529_v22  ;;  %v7534_v28 = vor.u32 %v8266_v24, %v7531_v25  ;;  %v8241_v7 = vld [vmem:[%s11317_s10 + $0x294] sm:$0xf]  ;;  %v8215_v37 = vld [vmem:[%s11317_s10 + $0x1c4] sm:$0xf]  ;;  %v7323_v40 = vld [vmem:[%s11317_s10 + $0x224] sm:$0xf0] }
 0x34d   :  { %4455 = vmatpush.bf16.msrb.mxu3 %v7318_v20  ;;  %4438 = vmatpush.bf16.msrb.mxu2 %v7214_v31  ;;  %v7523_v20 = vld [vmem:[%s11317_s10 + $0x3b4] sm:$0xf0]  ;;  %v8240_v31 = vld [vmem:[%s11317_s10 + $0x28c] sm:$0xf]  ;;  %v7329_v38 = vld [vmem:[%s11317_s10 + $0x1c8] sm:$0xf] }
 0x34e   :  { %v7526_v26 = vor.u32 %v8265_v19, %v7523_v20  ;;  %v8216_v48 = vld [vmem:[%s11317_s10 + $0x1cc] sm:$0xf]  ;;  %v7331_v41 = vld [vmem:[%s11317_s10 + $0x22c] sm:$0xf0]  ;;  %v8202_v45 = vld [vmem:[%s11317_s10 + $0x158] sm:$0xf0] }
 0x34f   :  { %v7334_v50 = vor.u32 %v8216_v48, %v7331_v41  ;;  %v7223_v0 = vld [vmem:[%s11317_s10 + $0x15c] sm:$0xf0]  ;;  %v8203_v52 = vld [vmem:[%s11317_s10 + $0x160] sm:$0xf0]  ;;  %v7231_v55 = vld [vmem:[%s11317_s10 + $0x164] sm:$0xf0] }
 0x350   :  { %4403 = vmatpush.bf16.msrb.mxu0 %v7106_v35  ;;  %4421 = vmatpush.bf16.msrb.mxu1 %v7110_v36  ;;  %v7321_v35 = vld [vmem:[%s11317_s10 + $0x1c0] sm:$0xf]  ;;  %v8227_v36 = vld [vmem:[%s11317_s10 + $0x220] sm:$0xf0]  ;;  %v8177_v60 = vld [vmem:[%s11317_s10 + $0x90] sm:$0xf0] }
 0x351   :  { %4456 = vmatpush.bf16.msrb.mxu3 %v7218_v32  ;;  %4439 = vmatpush.bf16.msrb.mxu2 %v7114_v11  ;;  %v7423_v32 = vld [vmem:[%s11317_s10 + $0x2ec] sm:$0xf0]  ;;  %v7430_v11 = vor.u32 %v8253_v34, %v7429_v33  ;;  %v7322_v42 = vor.u32 %v8227_v36, %v7321_v35  ;;  %v7229_v9 = vld [vmem:[%s11317_s10 + $0x100] sm:$0xf]  ;;  %v8191_v54 = vld [vmem:[%s11317_s10 + $0x104] sm:$0xf] }
 0x352   :  { %4332 = vmatmul.bf16.vlgmr.msra.gmra.mxu0 %v10199_v53  ;;  %4350 = vmatmul.bf16.vlgmr.msra.gmra.mxu1 %v10199_v53  ;;  %v7426_v12 = vor.u32 %v8240_v31, %v7423_v32  ;;  %v7230_v61 = vor.u32 %v8203_v52, %v7229_v9  ;;  %v7234_v1 = vor.u32 %v8191_v54, %v7231_v55  ;;  %v7129_v5 = vld [vmem:[%s11317_s10 + $0x38] sm:$0xf]  ;;  %v8178_v2 = vld [vmem:[%s11317_s10 + $0x98] sm:$0xf0]  ;;  %v7131_v8 = vld [vmem:[%s11317_s10 + $0x9c] sm:$0xf0] }
 0x353   :  { %4368 = vmatmul.bf16.vlgmr.msra.gmra.mxu2 %v10199_v53  ;;  %4386 = vmatmul.bf16.vlgmr.msra.gmra.mxu3 %v10199_v53  ;;  %v8166_v6 = vld [vmem:[%s11317_s10 + $0x3c] sm:$0xf]  ;;  %v7839_v19 = vld [vmem:[%s11317_s10 + $0x61c] sm:$0xf0]  ;;  %v8355_v22 = vld [vmem:[%s11317_s10 + $0x620] sm:$0xf0] }
 0x354   :  { %4468 = vmatpush.bf16.msra.mxu0 %v7822_v39  ;;  %4486 = vmatpush.bf16.msra.mxu1 %v7826_v43  ;;  %v8228_v39 = vld [vmem:[%s11317_s10 + $0x228] sm:$0xf0]  ;;  %v7326_v43 = vor.u32 %v8215_v37, %v7323_v40  ;;  %v8342_v17 = vld [vmem:[%s11317_s10 + $0x5bc] sm:$0xf]  ;;  %v7845_v20 = vld [vmem:[%s11317_s10 + $0x5c0] sm:$0xf] }
 0x355   :  { %4457 = vmatpush.bf16.msrb.mxu3 %v7118_v56  ;;  %4504 = vmatpush.bf16.msra.mxu2 %v7830_v44  ;;  %v7434_v56 = vor.u32 %v8241_v7, %v7431_v59  ;;  %v7221_v44 = vld [vmem:[%s11317_s10 + $0xf8] sm:$0xf]  ;;  %v7330_v47 = vor.u32 %v8228_v39, %v7329_v38  ;;  %v7842_v23 = vor.u32 %v8342_v17, %v7839_v19  ;;  %v8343_v25 = vld [vmem:[%s11317_s10 + $0x5c4] sm:$0xf]  ;;  %v8317_v29 = vld [vmem:[%s11317_s10 + $0x4f4] sm:$0xf] }
 0x356   :  { %v7222_v49 = vor.u32 %v8202_v45, %v7221_v44  ;;  %v7846_v24 = vor.u32 %v8355_v22, %v7845_v20  ;;  %v7739_v30 = vld [vmem:[%s11317_s10 + $0x554] sm:$0xf0]  ;;  %v8330_v32 = vld [vmem:[%s11317_s10 + $0x558] sm:$0xf0]  ;;  %v7747_v59 = vld [vmem:[%s11317_s10 + $0x55c] sm:$0xf0] }
 0x357   :  { %v7745_v31 = vld [vmem:[%s11317_s10 + $0x4f8] sm:$0xf]  ;;  %v8318_v33 = vld [vmem:[%s11317_s10 + $0x4fc] sm:$0xf]  ;;  %v7742_v7 = vor.u32 %v8317_v29, %v7739_v30  ;;  %v7645_v37 = vld [vmem:[%s11317_s10 + $0x430] sm:$0xf] }
 0x358   :  { %4469 = vmatpush.bf16.msra.mxu0 %v7722_v57  ;;  %4487 = vmatpush.bf16.msra.mxu1 %v7726_v58  ;;  %v7121_v58 = vld [vmem:[%s11317_s10 + $0x30] sm:$0xf]  ;;  %v7746_v35 = vor.u32 %v8330_v32, %v7745_v31  ;;  %v7750_v36 = vor.u32 %v8318_v33, %v7747_v59  ;;  %v8305_v40 = vld [vmem:[%s11317_s10 + $0x490] sm:$0xf0]  ;;  %v7647_v39 = vld [vmem:[%s11317_s10 + $0x494] sm:$0xf0] }
 0x359   :  { %4522 = vmatpush.bf16.msra.mxu3 %v7834_v51  ;;  %4505 = vmatpush.bf16.msra.mxu2 %v7730_v3  ;;  %v8190_v51 = vld [vmem:[%s11317_s10 + $0xfc] sm:$0xf]  ;;  %v8165_v3 = vld [vmem:[%s11317_s10 + $0x34] sm:$0xf]  ;;  %v7122_v10 = vor.u32 %v8177_v60, %v7121_v58  ;;  %v7537_v44 = vld [vmem:[%s11317_s10 + $0x360] sm:$0xf] }
 0x35a   :  { %v7226_v57 = vor.u32 %v8190_v51, %v7223_v0  ;;  %v8293_v38 = vld [vmem:[%s11317_s10 + $0x434] sm:$0xf]  ;;  %v8279_v45 = vld [vmem:[%s11317_s10 + $0x3c0] sm:$0xf0]  ;;  %v7545_v51 = vld [vmem:[%s11317_s10 + $0x368] sm:$0xf] }
 0x35b   :  { %v8280_v0 = vld [vmem:[%s11317_s10 + $0x3c8] sm:$0xf0]  ;;  %v7547_v52 = vld [vmem:[%s11317_s10 + $0x3cc] sm:$0xf0]  ;;  %v7538_v54 = vor.u32 %v8279_v45, %v7537_v44  ;;  %v7437_v58 = vld [vmem:[%s11317_s10 + $0x298] sm:$0xf] }
 0x35c   :  { %4470 = vmatpush.bf16.msra.mxu0 %v7622_v14  ;;  %4488 = vmatpush.bf16.msra.mxu1 %v7626_v15  ;;  %v7130_v14 = vor.u32 %v8178_v2, %v7129_v5  ;;  %v7134_v15 = vor.u32 %v8166_v6, %v7131_v8  ;;  %v8268_v9 = vld [vmem:[%s11317_s10 + $0x36c] sm:$0xf]  ;;  %v8254_v60 = vld [vmem:[%s11317_s10 + $0x2f8] sm:$0xf0]  ;;  %v8243_v5 = vld [vmem:[%s11317_s10 + $0x2a4] sm:$0xf] }
 0x35d   :  { %4523 = vmatpush.bf16.msra.mxu3 %v7734_v4  ;;  %4506 = vmatpush.bf16.msra.mxu2 %v7630_v62  ;;  %v7123_v4 = vld [vmem:[%s11317_s10 + $0x94] sm:$0xf0]  ;;  %v7447_v2 = vld [vmem:[%s11317_s10 + $0x304] sm:$0xf0]  ;;  %v7438_v6 = vor.u32 %v8254_v60, %v7437_v58  ;;  %v8218_v19 = vld [vmem:[%s11317_s10 + $0x1dc] sm:$0xf] }
 0x35e   :  { %v7126_v13 = vor.u32 %v8165_v3, %v7123_v4  ;;  %v7837_v62 = vld [vmem:[%s11317_s10 + $0x5b8] sm:$0xf]  ;;  %v7445_v3 = vld [vmem:[%s11317_s10 + $0x2a0] sm:$0xf]  ;;  %v8255_v4 = vld [vmem:[%s11317_s10 + $0x300] sm:$0xf0] }
 0x35f   :  { %v7345_v17 = vld [vmem:[%s11317_s10 + $0x1d8] sm:$0xf]  ;;  %v7347_v20 = vld [vmem:[%s11317_s10 + $0x23c] sm:$0xf0]  ;;  %v7245_v29 = vld [vmem:[%s11317_s10 + $0x110] sm:$0xf] }
 0x360   :  { %4471 = vmatpush.bf16.msra.mxu0 %v7522_v21  ;;  %4489 = vmatpush.bf16.msra.mxu1 %v7526_v26  ;;  %v7847_v21 = vld [vmem:[%s11317_s10 + $0x624] sm:$0xf0]  ;;  %v7737_v26 = vld [vmem:[%s11317_s10 + $0x4f0] sm:$0xf]  ;;  %v8205_v30 = vld [vmem:[%s11317_s10 + $0x170] sm:$0xf0] }
 0x361   :  { %4524 = vmatpush.bf16.msra.mxu3 %v7634_v16  ;;  %4507 = vmatpush.bf16.msra.mxu2 %v7530_v27  ;;  %v8354_v16 = vld [vmem:[%s11317_s10 + $0x618] sm:$0xf0]  ;;  %v7850_v27 = vor.u32 %v8343_v25, %v7847_v21  ;;  %v8204_v25 = vld [vmem:[%s11317_s10 + $0x168] sm:$0xf0]  ;;  %v8193_v31 = vld [vmem:[%s11317_s10 + $0x114] sm:$0xf] }
 0x362   :  { %4337 = vmatmul.bf16.gmra.mxu0 %v10316_v46  ;;  %4355 = vmatmul.bf16.gmra.mxu1 %v10316_v46  ;;  %v7838_v18 = vor.u32 %v8354_v16, %v7837_v62  ;;  %v8217_v62 = vld [vmem:[%s11317_s10 + $0x1d4] sm:$0xf]  ;;  %v7339_v16 = vld [vmem:[%s11317_s10 + $0x234] sm:$0xf0]  ;;  %v8344_v44 = vld [vmem:[%s11317_s10 + $0x5cc] sm:$0xf] }
 0x363   :  { %4373 = vmatmul.bf16.gmra.mxu2 %v10316_v46  ;;  %4391 = vmatmul.bf16.gmra.mxu3 %v10316_v46  ;;  %v7247_v32 = vld [vmem:[%s11317_s10 + $0x174] sm:$0xf0]  ;;  %v8319_v60 = vld [vmem:[%s11317_s10 + $0x504] sm:$0xf] }
 0x364   :  { %4472 = vmatpush.bf16.msra.mxu0 %v7422_v63  ;;  %4490 = vmatpush.bf16.msra.mxu1 %v7426_v12  ;;  %v7637_v63 = vld [vmem:[%s11317_s10 + $0x428] sm:$0xf]  ;;  %v8304_v12 = vld [vmem:[%s11317_s10 + $0x488] sm:$0xf0]  ;;  %v7250_v59 = vor.u32 %v8193_v31, %v7247_v32  ;;  %v8270_v31 = vld [vmem:[%s11317_s10 + $0x37c] sm:$0xf] }
 0x365   :  { %4525 = vmatpush.bf16.msra.mxu3 %v7534_v28  ;;  %4508 = vmatpush.bf16.msra.mxu2 %v7430_v11  ;;  %v8329_v28 = vld [vmem:[%s11317_s10 + $0x550] sm:$0xf0]  ;;  %v8292_v11 = vld [vmem:[%s11317_s10 + $0x42c] sm:$0xf]  ;;  %v7638_v48 = vor.u32 %v8304_v12, %v7637_v63  ;;  %v7137_v63 = vld [vmem:[%s11317_s10 + $0x40] sm:$0xf] }
 0x366   :  { %v7738_v34 = vor.u32 %v8329_v28, %v7737_v26  ;;  %v7350_v26 = vor.u32 %v8218_v19, %v7347_v20  ;;  %v7239_v28 = vld [vmem:[%s11317_s10 + $0x16c] sm:$0xf0]  ;;  %v8179_v12 = vld [vmem:[%s11317_s10 + $0xa0] sm:$0xf0]  ;;  %v7563_v32 = vld [vmem:[%s11317_s10 + $0x3dc] sm:$0xf0] }
 0x367   :  { %v8295_v20 = vld [vmem:[%s11317_s10 + $0x444] sm:$0xf] }
 0x368   :  { %4473 = vmatpush.bf16.msra.mxu0 %v7322_v42  ;;  %4491 = vmatpush.bf16.msra.mxu1 %v7326_v43  ;;  %v7646_v42 = vor.u32 %v8305_v40, %v7645_v37  ;;  %v7650_v43 = vor.u32 %v8293_v38, %v7647_v39  ;;  %v8180_v40 = vld [vmem:[%s11317_s10 + $0xa8] sm:$0xf0]  ;;  %v7147_v39 = vld [vmem:[%s11317_s10 + $0xac] sm:$0xf0] }
 0x369   :  { %4526 = vmatpush.bf16.msra.mxu3 %v7434_v56  ;;  %4509 = vmatpush.bf16.msra.mxu2 %v7330_v47  ;;  %v7639_v56 = vld [vmem:[%s11317_s10 + $0x48c] sm:$0xf0]  ;;  %v8267_v47 = vld [vmem:[%s11317_s10 + $0x364] sm:$0xf]  ;;  %v8168_v38 = vld [vmem:[%s11317_s10 + $0x4c] sm:$0xf] }
 0x36a   :  { %v7642_v41 = vor.u32 %v8292_v11, %v7639_v56  ;;  %v7145_v11 = vld [vmem:[%s11317_s10 + $0x48] sm:$0xf]  ;;  %v7138_v56 = vor.u32 %v8179_v12, %v7137_v63  ;;  %v8244_v63 = vld [vmem:[%s11317_s10 + $0x2ac] sm:$0xf] }
 0x36c   :  { %4474 = vmatpush.bf16.msra.mxu0 %v7222_v49  ;;  %4492 = vmatpush.bf16.msra.mxu1 %v7226_v57  ;;  %v7546_v49 = vor.u32 %v8280_v0, %v7545_v51  ;;  %v7550_v57 = vor.u32 %v8268_v9, %v7547_v52  ;;  %v8357_v51 = vld [vmem:[%s11317_s10 + $0x630] sm:$0xf0] }
 0x36d   :  { %4527 = vmatpush.bf16.msra.mxu3 %v7334_v50  ;;  %4510 = vmatpush.bf16.msra.mxu2 %v7230_v61  ;;  %v7539_v50 = vld [vmem:[%s11317_s10 + $0x3c4] sm:$0xf0]  ;;  %v8242_v61 = vld [vmem:[%s11317_s10 + $0x29c] sm:$0xf]  ;;  %v8345_v52 = vld [vmem:[%s11317_s10 + $0x5d4] sm:$0xf] }
 0x36e   :  { %v7542_v55 = vor.u32 %v8267_v47, %v7539_v50  ;;  %v7855_v47 = vld [vmem:[%s11317_s10 + $0x62c] sm:$0xf0] }
 0x36f   :  { %v7861_v50 = vld [vmem:[%s11317_s10 + $0x5d0] sm:$0xf]  ;;  %v7858_v0 = vor.u32 %v8344_v44, %v7855_v47  ;;  %v7355_v47 = vld [vmem:[%s11317_s10 + $0x244] sm:$0xf0] }
 0x370   :  { %4475 = vmatpush.bf16.msra.mxu0 %v7122_v10  ;;  %4493 = vmatpush.bf16.msra.mxu1 %v7126_v13  ;;  %v7337_v10 = vld [vmem:[%s11317_s10 + $0x1d0] sm:$0xf]  ;;  %v8229_v13 = vld [vmem:[%s11317_s10 + $0x230] sm:$0xf0]  ;;  %v7862_v9 = vor.u32 %v8357_v51, %v7861_v50  ;;  %v7361_v50 = vld [vmem:[%s11317_s10 + $0x1e8] sm:$0xf] }
 0x371   :  { %4528 = vmatpush.bf16.msra.mxu3 %v7234_v1  ;;  %4511 = vmatpush.bf16.msra.mxu2 %v7130_v14  ;;  %v7439_v1 = vld [vmem:[%s11317_s10 + $0x2fc] sm:$0xf0]  ;;  %v7446_v14 = vor.u32 %v8255_v4, %v7445_v3  ;;  %v7338_v22 = vor.u32 %v8229_v13, %v7337_v10  ;;  %v8332_v4 = vld [vmem:[%s11317_s10 + $0x568] sm:$0xf0]  ;;  %v7653_v10 = vld [vmem:[%s11317_s10 + $0x438] sm:$0xf] }
 0x372   :  { %4404 = vmatmul.bf16.vlgmr.msrb.gmra.mxu0 %v10199_v53  ;;  %4422 = vmatmul.bf16.vlgmr.msrb.gmra.mxu1 %v10199_v53  ;;  %v7442_v8 = vor.u32 %v8242_v61, %v7439_v1  ;;  %v7755_v61 = vld [vmem:[%s11317_s10 + $0x564] sm:$0xf0]  ;;  %v8306_v13 = vld [vmem:[%s11317_s10 + $0x498] sm:$0xf0] }
 0x373   :  { %4440 = vmatmul.bf16.vlgmr.msrb.gmra.mxu2 %v10199_v53  ;;  %4458 = vmatmul.bf16.vlgmr.msrb.gmra.mxu3 %v10199_v53  ;;  %v7761_v1 = vld [vmem:[%s11317_s10 + $0x508] sm:$0xf]  ;;  %v7758_v3 = vor.u32 %v8319_v60, %v7755_v61 }
 0x374   :  { %4540 = vmatpush.bf16.msrb.mxu0 %v7838_v18  ;;  %4558 = vmatpush.bf16.msrb.mxu1 %v7842_v23  ;;  %v8230_v18 = vld [vmem:[%s11317_s10 + $0x238] sm:$0xf0]  ;;  %v7342_v23 = vor.u32 %v8217_v62, %v7339_v16  ;;  %v7655_v62 = vld [vmem:[%s11317_s10 + $0x49c] sm:$0xf0] }
 0x375   :  { %4529 = vmatpush.bf16.msra.mxu3 %v7134_v15  ;;  %4576 = vmatpush.bf16.msrb.mxu2 %v7846_v24  ;;  %v7450_v15 = vor.u32 %v8243_v5, %v7447_v2  ;;  %v7237_v24 = vld [vmem:[%s11317_s10 + $0x108] sm:$0xf]  ;;  %v7346_v21 = vor.u32 %v8230_v18, %v7345_v17  ;;  %v8320_v5 = vld [vmem:[%s11317_s10 + $0x50c] sm:$0xf]  ;;  %v7763_v2 = vld [vmem:[%s11317_s10 + $0x56c] sm:$0xf0] }
 0x376   :  { %v7238_v33 = vor.u32 %v8204_v25, %v7237_v24  ;;  %v7661_v16 = vld [vmem:[%s11317_s10 + $0x440] sm:$0xf]  ;;  %v8307_v17 = vld [vmem:[%s11317_s10 + $0x4a0] sm:$0xf0]  ;;  %v7553_v24 = vld [vmem:[%s11317_s10 + $0x370] sm:$0xf] }
 0x377   :  { %v7662_v19 = vor.u32 %v8307_v17, %v7661_v16  ;;  %v8281_v25 = vld [vmem:[%s11317_s10 + $0x3d0] sm:$0xf0] }
 0x378   :  { %4541 = vmatpush.bf16.msrb.mxu0 %v7738_v34  ;;  %4559 = vmatpush.bf16.msrb.mxu1 %v7742_v7  ;;  %v7246_v7 = vor.u32 %v8205_v30, %v7245_v29  ;;  %v8282_v30 = vld [vmem:[%s11317_s10 + $0x3d8] sm:$0xf0] }
 0x379   :  { %4594 = vmatpush.bf16.msrb.mxu3 %v7850_v27  ;;  %4577 = vmatpush.bf16.msrb.mxu2 %v7746_v35  ;;  %v8192_v27 = vld [vmem:[%s11317_s10 + $0x10c] sm:$0xf]  ;;  %v8167_v35 = vld [vmem:[%s11317_s10 + $0x44] sm:$0xf] }
 0x37a   :  { %v7242_v34 = vor.u32 %v8192_v27, %v7239_v28  ;;  %v7555_v27 = vld [vmem:[%s11317_s10 + $0x3d4] sm:$0xf0] }
 0x37b   :  { %v7561_v28 = vld [vmem:[%s11317_s10 + $0x378] sm:$0xf] }
 0x37c   :  { %4542 = vmatpush.bf16.msrb.mxu0 %v7638_v48  ;;  %4560 = vmatpush.bf16.msrb.mxu1 %v7642_v41  ;;  %v7146_v48 = vor.u32 %v8180_v40, %v7145_v11  ;;  %v7150_v41 = vor.u32 %v8168_v38, %v7147_v39  ;;  %v8257_v11 = vld [vmem:[%s11317_s10 + $0x310] sm:$0xf0] }
 0x37d   :  { %4595 = vmatpush.bf16.msrb.mxu3 %v7750_v36  ;;  %4578 = vmatpush.bf16.msrb.mxu2 %v7646_v42  ;;  %v7139_v36 = vld [vmem:[%s11317_s10 + $0xa4] sm:$0xf0]  ;;  %v8245_v39 = vld [vmem:[%s11317_s10 + $0x2b4] sm:$0xf] }
 0x37e   :  { %v7142_v37 = vor.u32 %v8167_v35, %v7139_v36  ;;  %v7853_v42 = vld [vmem:[%s11317_s10 + $0x5c8] sm:$0xf]  ;;  %v7455_v35 = vld [vmem:[%s11317_s10 + $0x30c] sm:$0xf0] }
 0x37f   :  { %v7461_v36 = vld [vmem:[%s11317_s10 + $0x2b0] sm:$0xf]  ;;  %v7458_v40 = vor.u32 %v8244_v63, %v7455_v35  ;;  %v7163_v63 = vld [vmem:[%s11317_s10 + $0xbc] sm:$0xf0] }
 0x380   :  { %4543 = vmatpush.bf16.msrb.mxu0 %v7538_v54  ;;  %4561 = vmatpush.bf16.msrb.mxu1 %v7542_v55  ;;  %v7863_v54 = vld [vmem:[%s11317_s10 + $0x634] sm:$0xf0]  ;;  %v7462_v38 = vor.u32 %v8257_v11, %v7461_v36 }
 0x381   :  { %4596 = vmatpush.bf16.msrb.mxu3 %v7650_v43  ;;  %4579 = vmatpush.bf16.msrb.mxu2 %v7546_v49  ;;  %v8356_v43 = vld [vmem:[%s11317_s10 + $0x628] sm:$0xf0]  ;;  %v7866_v55 = vor.u32 %v8345_v52, %v7863_v54  ;;  %v7753_v49 = vld [vmem:[%s11317_s10 + $0x500] sm:$0xf]  ;;  %v7363_v52 = vld [vmem:[%s11317_s10 + $0x24c] sm:$0xf0] }
 0x382   :  { %4409 = vmatmul.bf16.gmra.mxu0 %v10316_v46  ;;  %4427 = vmatmul.bf16.gmra.mxu1 %v10316_v46  ;;  %v7854_v45 = vor.u32 %v8356_v43, %v7853_v42  ;;  %v7353_v42 = vld [vmem:[%s11317_s10 + $0x1e0] sm:$0xf]  ;;  %v8231_v43 = vld [vmem:[%s11317_s10 + $0x240] sm:$0xf0] }
 0x383   :  { %4445 = vmatmul.bf16.gmra.mxu2 %v10316_v46  ;;  %4463 = vmatmul.bf16.gmra.mxu3 %v10316_v46  ;;  %v7354_v44 = vor.u32 %v8231_v43, %v7353_v42 }
 0x384   :  { %4544 = vmatpush.bf16.msrb.mxu0 %v7438_v6  ;;  %4562 = vmatpush.bf16.msrb.mxu1 %v7442_v8  ;;  %v7762_v6 = vor.u32 %v8332_v4, %v7761_v1  ;;  %v7766_v8 = vor.u32 %v8320_v5, %v7763_v2  ;;  %v7261_v4 = vld [vmem:[%s11317_s10 + $0x120] sm:$0xf]  ;;  %v8207_v5 = vld [vmem:[%s11317_s10 + $0x180] sm:$0xf0] }
 0x385   :  { %4597 = vmatpush.bf16.msrb.mxu3 %v7550_v57  ;;  %4580 = vmatpush.bf16.msrb.mxu2 %v7446_v14  ;;  %v8331_v57 = vld [vmem:[%s11317_s10 + $0x560] sm:$0xf0]  ;;  %v8294_v14 = vld [vmem:[%s11317_s10 + $0x43c] sm:$0xf] }
 0x386   :  { %v7754_v58 = vor.u32 %v8331_v57, %v7753_v49  ;;  %v7658_v18 = vor.u32 %v8294_v14, %v7655_v62  ;;  %v7253_v49 = vld [vmem:[%s11317_s10 + $0x118] sm:$0xf]  ;;  %v8206_v57 = vld [vmem:[%s11317_s10 + $0x178] sm:$0xf0]  ;;  %v7262_v14 = vor.u32 %v8207_v5, %v7261_v4 }
 0x387   :  { %v7254_v1 = vor.u32 %v8206_v57, %v7253_v49  ;;  %v7769_v49 = vld [vmem:[%s11317_s10 + $0x510] sm:$0xf]  ;;  %v8333_v57 = vld [vmem:[%s11317_s10 + $0x570] sm:$0xf0] }
 0x388   :  { %4545 = vmatpush.bf16.msrb.mxu0 %v7338_v22  ;;  %4563 = vmatpush.bf16.msrb.mxu1 %v7342_v23  ;;  %v7663_v22 = vld [vmem:[%s11317_s10 + $0x4a4] sm:$0xf0] }
 0x389   :  { %4598 = vmatpush.bf16.msrb.mxu3 %v7450_v15  ;;  %4581 = vmatpush.bf16.msrb.mxu2 %v7346_v21  ;;  %v7654_v15 = vor.u32 %v8306_v13, %v7653_v10  ;;  %v7666_v23 = vor.u32 %v8295_v20, %v7663_v22  ;;  %v7554_v21 = vor.u32 %v8281_v25, %v7553_v24  ;;  %v7263_v20 = vld [vmem:[%s11317_s10 + $0x184] sm:$0xf0]  ;;  %v7153_v22 = vld [vmem:[%s11317_s10 + $0x50] sm:$0xf]  ;;  %v8181_v24 = vld [vmem:[%s11317_s10 + $0xb0] sm:$0xf0] }
 0x38a   :  { %v8169_v25 = vld [vmem:[%s11317_s10 + $0x54] sm:$0xf] }
 0x38c   :  { %4546 = vmatpush.bf16.msrb.mxu0 %v7238_v33  ;;  %4564 = vmatpush.bf16.msrb.mxu1 %v7242_v34  ;;  %v7562_v33 = vor.u32 %v8282_v30, %v7561_v28  ;;  %v7566_v34 = vor.u32 %v8270_v31, %v7563_v32  ;;  %v7155_v28 = vld [vmem:[%s11317_s10 + $0xb4] sm:$0xf0]  ;;  %v8182_v30 = vld [vmem:[%s11317_s10 + $0xb8] sm:$0xf0] }
 0x38d   :  { %4599 = vmatpush.bf16.msrb.mxu3 %v7350_v26  ;;  %4582 = vmatpush.bf16.msrb.mxu2 %v7246_v7  ;;  %v8269_v26 = vld [vmem:[%s11317_s10 + $0x374] sm:$0xf]  ;;  %v7453_v7 = vld [vmem:[%s11317_s10 + $0x2a8] sm:$0xf] }
 0x38e   :  { %v7558_v29 = vor.u32 %v8269_v26, %v7555_v27  ;;  %v7154_v27 = vor.u32 %v8181_v24, %v7153_v22 }
 0x390   :  { %4547 = vmatpush.bf16.msrb.mxu0 %v7138_v56  ;;  %4565 = vmatpush.bf16.msrb.mxu1 %v7142_v37 }
 0x391   :  { %4600 = vmatpush.bf16.msrb.mxu3 %v7250_v59  ;;  %4583 = vmatpush.bf16.msrb.mxu2 %v7146_v48  ;;  %v8256_v59 = vld [vmem:[%s11317_s10 + $0x308] sm:$0xf0]  ;;  %v7463_v48 = vld [vmem:[%s11317_s10 + $0x314] sm:$0xf0] }
 0x392   :  { %4476 = vmatmul.bf16.vlgmr.msra.gmra.mxu0 %v10199_v53  ;;  %4494 = vmatmul.bf16.vlgmr.msra.gmra.mxu1 %v10199_v53  ;;  %v7454_v12 = vor.u32 %v8256_v59, %v7453_v7  ;;  %v8170_v59 = vld [vmem:[%s11317_s10 + $0x5c] sm:$0xf] }
 0x393   :  { %4512 = vmatmul.bf16.vlgmr.msra.gmra.mxu2 %v10199_v53  ;;  %4530 = vmatmul.bf16.vlgmr.msra.gmra.mxu3 %v10199_v53  ;;  %v7166_v11 = vor.u32 %v8170_v59, %v7163_v63 }
 0x394   :  { %4612 = vmatpush.bf16.msra.mxu0 %v7854_v45  ;;  %4630 = vmatpush.bf16.msra.mxu1 %v7858_v0  ;;  %v8219_v45 = vld [vmem:[%s11317_s10 + $0x1e4] sm:$0xf]  ;;  %v8232_v0 = vld [vmem:[%s11317_s10 + $0x248] sm:$0xf0] }
 0x395   :  { %4601 = vmatpush.bf16.msrb.mxu3 %v7150_v41  ;;  %4648 = vmatpush.bf16.msra.mxu2 %v7862_v9  ;;  %v7466_v41 = vor.u32 %v8245_v39, %v7463_v48  ;;  %v7358_v51 = vor.u32 %v8219_v45, %v7355_v47  ;;  %v8220_v9 = vld [vmem:[%s11317_s10 + $0x1ec] sm:$0xf]  ;;  %v7362_v54 = vor.u32 %v8232_v0, %v7361_v50  ;;  %v7869_v50 = vld [vmem:[%s11317_s10 + $0x5d8] sm:$0xf] }
 0x398   :  { %4613 = vmatpush.bf16.msra.mxu0 %v7754_v58  ;;  %4631 = vmatpush.bf16.msra.mxu1 %v7758_v3  ;;  %v8194_v58 = vld [vmem:[%s11317_s10 + $0x11c] sm:$0xf]  ;;  %v7255_v3 = vld [vmem:[%s11317_s10 + $0x17c] sm:$0xf0] }
 0x399   :  { %4666 = vmatpush.bf16.msra.mxu3 %v7866_v55  ;;  %4649 = vmatpush.bf16.msra.mxu2 %v7762_v6  ;;  %v7366_v55 = vor.u32 %v8220_v9, %v7363_v52  ;;  %v7258_v13 = vor.u32 %v8194_v58, %v7255_v3  ;;  %v8358_v9 = vld [vmem:[%s11317_s10 + $0x638] sm:$0xf0]  ;;  %v7770_v58 = vor.u32 %v8333_v57, %v7769_v49 }
 0x39c   :  { %4614 = vmatpush.bf16.msra.mxu0 %v7654_v15  ;;  %4632 = vmatpush.bf16.msra.mxu1 %v7658_v18  ;;  %v8195_v18 = vld [vmem:[%s11317_s10 + $0x124] sm:$0xf] }
 0x39d   :  { %4667 = vmatpush.bf16.msra.mxu3 %v7766_v8  ;;  %4650 = vmatpush.bf16.msra.mxu2 %v7662_v19 }
 0x3a0   :  { %4615 = vmatpush.bf16.msra.mxu0 %v7554_v21  ;;  %4633 = vmatpush.bf16.msra.mxu1 %v7558_v29  ;;  %v7161_v29 = vld [vmem:[%s11317_s10 + $0x58] sm:$0xf] }
 0x3a1   :  { %4668 = vmatpush.bf16.msra.mxu3 %v7666_v23  ;;  %4651 = vmatpush.bf16.msra.mxu2 %v7562_v33  ;;  %v7266_v23 = vor.u32 %v8195_v18, %v7263_v20  ;;  %v7162_v7 = vor.u32 %v8182_v30, %v7161_v29  ;;  %v8258_v30 = vld [vmem:[%s11317_s10 + $0x318] sm:$0xf0] }
 0x3a2   :  { %4481 = vmatmul.bf16.gmra.mxu0 %v10316_v46  ;;  %4499 = vmatmul.bf16.gmra.mxu1 %v10316_v46 }
 0x3a3   :  { %4517 = vmatmul.bf16.gmra.mxu2 %v10316_v46  ;;  %4535 = vmatmul.bf16.gmra.mxu3 %v10316_v46 }
 0x3a4   :  { %4616 = vmatpush.bf16.msra.mxu0 %v7454_v12  ;;  %4634 = vmatpush.bf16.msra.mxu1 %v7458_v40 }
 0x3a5   :  { %4669 = vmatpush.bf16.msra.mxu3 %v7566_v34  ;;  %4652 = vmatpush.bf16.msra.mxu2 %v7462_v38  ;;  %v7158_v34 = vor.u32 %v8169_v25, %v7155_v28 }
 0x3a8   :  { %4617 = vmatpush.bf16.msra.mxu0 %v7354_v44  ;;  %4635 = vmatpush.bf16.msra.mxu1 %v7358_v51 }
 0x3a9   :  { %4670 = vmatpush.bf16.msra.mxu3 %v7466_v41  ;;  %4653 = vmatpush.bf16.msra.mxu2 %v7362_v54 }
 0x3ac   :  { %4618 = vmatpush.bf16.msra.mxu0 %v7254_v1  ;;  %4636 = vmatpush.bf16.msra.mxu1 %v7258_v13 }
 0x3ad   :  { %4671 = vmatpush.bf16.msra.mxu3 %v7366_v55  ;;  %4654 = vmatpush.bf16.msra.mxu2 %v7262_v14  ;;  %v7870_v55 = vor.u32 %v8358_v9, %v7869_v50  ;;  %v7569_v14 = vld [vmem:[%s11317_s10 + $0x380] sm:$0xf] }
 0x3af   :  { %v4261_v56 = vpop.f32.mrf.mxu0  ;;  %v4279_v37 = vpop.f32.mrf.mxu1 }
 0x3b0   :  { %4702 = vst [vmem:[#allocation3 + $0xc8] sm:$0xff] %v4261_v56  ;;  %4619 = vmatpush.bf16.msra.mxu0 %v7154_v27  ;;  %4637 = vmatpush.bf16.msra.mxu1 %v7158_v34  ;;  %v7469_v27 = vld [vmem:[%s11317_s10 + $0x2b8] sm:$0xf]  ;;  %v7369_v34 = vld [vmem:[%s11317_s10 + $0x1f0] sm:$0xf] }
 0x3b1   :  { %4703 = vst [vmem:[#allocation3 + $0x8] sm:$0xff] %v4279_v37  ;;  %4672 = vmatpush.bf16.msra.mxu3 %v7266_v23  ;;  %4655 = vmatpush.bf16.msra.mxu2 %v7162_v7 }
 0x3b2   :  { %4548 = vmatmul.bf16.vlgmr.msrb.gmra.mxu0 %v10199_v53  ;;  %4566 = vmatmul.bf16.vlgmr.msrb.gmra.mxu1 %v10199_v53 }
 0x3b3   :  { %4584 = vmatmul.bf16.vlgmr.msrb.gmra.mxu2 %v10199_v53  ;;  %4602 = vmatmul.bf16.vlgmr.msrb.gmra.mxu3 %v10199_v53 }
 0x3b4   :  { %4684 = vmatpush.bf16.msrb.mxu0 %v7870_v55  ;;  %8394 = vmatpush.bf16.msrb.mxu1 %v7870_v55  ;;  %v8183_v55 = vld [vmem:[%s11317_s10 + $0xc0] sm:$0xf0] }
 0x3b5   :  { %4673 = vmatpush.bf16.msra.mxu3 %v7166_v11 }
 0x3b6   :  { %v4297_v60 = vpop.f32.mrf.mxu2  ;;  %v4315_v61 = vpop.f32.mrf.mxu3 }
 0x3b7   :  { %v4777_v2 = vld [vmem:[#allocation3 + $0xc8] sm:$0x3]  ;;  %v4782_v6 = vld [vmem:[#allocation3 + $0xc8] sm:$0xc]  ;;  %v4263_v8 = vpop.f32.mrf.mxu0  ;;  %v4281_v10 = vpop.f32.mrf.mxu1  ;;  %4704 = vst [vmem:[#allocation3 + $0x40] sm:$0xff] %v4297_v60 }
 0x3b8   :  { %4779 = vst [vmem:[#allocation4] sm:$0x3] %v4777_v2  ;;  %v4784_v15 = vrot.slane %v4782_v6, 2  ;;  %v4780_v62 = vld [vmem:[#allocation3 + $0x8] sm:$0x3]  ;;  %4685 = vmatpush.bf16.msrb.mxu0 %v7770_v58  ;;  %8395 = vmatpush.bf16.msrb.mxu1 %v7770_v58 }
 0x3b9   :  { %4705 = vst [vmem:[#allocation3 + $0x28] sm:$0xff] %v4315_v61  ;;  %v4790_v17 = vld [vmem:[#allocation3 + $0x8] sm:$0xc]  ;;  %v4795_v19 = vld [vmem:[#allocation3 + $0xc8] sm:$0x30] }
 0x3ba   :  { %v4786_v16 = vadd.f32 %v4784_v15, %v4780_v62  ;;  %4727 = vst [vmem:[#allocation3 + $0x1c0] sm:$0xff] %v4263_v8  ;;  %v4792_v31 = vrot.slane %v4790_v17, 2  ;;  %v4808_v12 = vld [vmem:[#allocation3 + $0x8] sm:$0x30]  ;;  %v4797_v56 = vrot.slane %v4795_v19, 4 }
 0x3bb   :  { %4728 = vst [vmem:[#allocation3 + $0x30] sm:$0xff] %v4281_v10  ;;  %v4810_v39 = vrot.slane %v4808_v12, 4  ;;  %v7669_v60 = vld [vmem:[%s11317_s10 + $0x448] sm:$0xf]  ;;  %v8308_v61 = vld [vmem:[%s11317_s10 + $0x4a8] sm:$0xf0] }
 0x3bc   :  { %4787 = vst [vmem:[#allocation4 + $0x2] sm:$0x3] %v4786_v16  ;;  %v4840_v4 = vld [vmem:[#allocation3 + $0xc8] sm:$0xc0]  ;;  %v7670_v2 = vor.u32 %v8308_v61, %v7669_v60  ;;  %v8283_v15 = vld [vmem:[%s11317_s10 + $0x3e0] sm:$0xf0] }
 0x3bd   :  { %v4842_v62 = vrot.slane %v4840_v4, 6 }
 0x3be   :  { %v4299_v21 = vpop.f32.mrf.mxu2  ;;  %v4317_v26 = vpop.f32.mrf.mxu3  ;;  %v4788_v35 = vld [vmem:[#allocation3 + $0x40] sm:$0x3]  ;;  %v4803_v36 = vld [vmem:[#allocation3 + $0x40] sm:$0xc]  ;;  %v4821_v5 = vld [vmem:[#allocation3 + $0x40] sm:$0x30]  ;;  %4686 = vmatpush.bf16.msrb.mxu0 %v7670_v2  ;;  %8396 = vmatpush.bf16.msrb.mxu1 %v7670_v2 }
 0x3bf   :  { %4729 = vst [vmem:[#allocation3 + $0x1a8] sm:$0xff] %v4299_v21  ;;  %v4266_v32 = vpop.f32.mrf.mxu0  ;;  %v4284_v33 = vpop.f32.mrf.mxu1  ;;  %v4794_v37 = vadd.f32 %v4792_v31, %v4788_v35  ;;  %v4805_v40 = vrot.slane %v4803_v36, 2  ;;  %v4823_v20 = vrot.slane %v4821_v5, 4  ;;  %v4853_v31 = vld [vmem:[#allocation3 + $0x8] sm:$0xc0] }
 0x3c0   :  { %v4801_v38 = vld [vmem:[#allocation3 + $0x28] sm:$0x3]  ;;  %4730 = vst [vmem:[#allocation3 + $0xa8] sm:$0xff] %v4317_v26  ;;  %v4816_v1 = vld [vmem:[#allocation3 + $0x28] sm:$0xc]  ;;  %v7570_v26 = vor.u32 %v8283_v15, %v7569_v14  ;;  %v4855_v36 = vrot.slane %v4853_v31, 6 }
 0x3c1   :  { %v4799_v48 = vadd.f32 %v4797_v56, %v4794_v37  ;;  %v4807_v41 = vadd.f32 %v4805_v40, %v4801_v38  ;;  %4752 = vst [vmem:[#allocation3 + $0x138] sm:$0x3] %v4266_v32  ;;  %v4829_v3 = vld [vmem:[#allocation3 + $0x28] sm:$0x30]  ;;  %v4818_v6 = vrot.slane %v4816_v1, 2 }
 0x3c2   :  { %4553 = vmatmul.bf16.gmra.mxu0 %v10316_v46  ;;  %4571 = vmatmul.bf16.gmra.mxu1 %v10316_v46  ;;  %4753 = vst [vmem:[#allocation3 + $0x38] sm:$0x3] %v4284_v33  ;;  %v4831_v8 = vrot.slane %v4829_v3, 2  ;;  %v7470_v33 = vor.u32 %v8258_v30, %v7469_v27  ;;  %v8233_v35 = vld [vmem:[%s11317_s10 + $0x250] sm:$0xf0] }
 0x3c3   :  { %4589 = vmatmul.bf16.gmra.mxu2 %v10316_v46  ;;  %4607 = vmatmul.bf16.gmra.mxu3 %v10316_v46  ;;  %4800 = vst [vmem:[#allocation4 + $0x4] sm:$0x3] %v4799_v48  ;;  %v4812_v42 = vadd.f32 %v4810_v39, %v4807_v41  ;;  %v4858_v40 = vld [vmem:[#allocation3 + $0x1c0] sm:$0x3]  ;;  %v7370_v48 = vor.u32 %v8233_v35, %v7369_v34  ;;  %v7269_v41 = vld [vmem:[%s11317_s10 + $0x128] sm:$0xf] }
 0x3c4   :  { %4687 = vmatpush.bf16.msrb.mxu0 %v7570_v26  ;;  %8397 = vmatpush.bf16.msrb.mxu1 %v7570_v26  ;;  %v4880_v61 = vld [vmem:[#allocation3 + $0x1c0] sm:$0xc]  ;;  %v4878_v4 = vld [vmem:[#allocation3 + $0x30] sm:$0x3]  ;;  %v4898_v15 = vld [vmem:[#allocation3 + $0x28] sm:$0xc0] }
 0x3c5   :  { %4813 = vst [vmem:[#allocation4 + $0x6] sm:$0x3] %v4812_v42  ;;  %v4882_v5 = vrot.slane %v4880_v61, 2 }
 0x3c6   :  { %v4302_v43 = vpop.f32.mrf.mxu2  ;;  %v4320_v44 = vpop.f32.mrf.mxu3 }
 0x3c7   :  { %v4268_v45 = vpop.f32.mrf.mxu0  ;;  %v4286_v47 = vpop.f32.mrf.mxu1  ;;  %4754 = vst [vmem:[#allocation3 + $0x240] sm:$0x3] %v4302_v43  ;;  %v8208_v43 = vld [vmem:[%s11317_s10 + $0x188] sm:$0xf0] }
 0x3c8   :  { %4755 = vst [vmem:[#allocation3 + $0x190] sm:$0x3] %v4320_v44  ;;  %4688 = vmatpush.bf16.msrb.mxu0 %v7470_v33  ;;  %8398 = vmatpush.bf16.msrb.mxu1 %v7470_v33  ;;  %v4873_v45 = vld [vmem:[#allocation3 + $0x40] sm:$0xc0] }
 0x3c9   :  { %v4875_v49 = vrot.slane %v4873_v45, 6 }
 0x3cc   :  { %4689 = vmatpush.bf16.msrb.mxu0 %v7370_v48  ;;  %8399 = vmatpush.bf16.msrb.mxu1 %v7370_v48 }
 0x3ce   :  { %v4304_v51 = vpop.f32.mrf.mxu2  ;;  %v4322_v0 = vpop.f32.mrf.mxu3 }
 0x3cf   :  { %v4333_v52 = vpop.f32.mrf.mxu0  ;;  %v4351_v54 = vpop.f32.mrf.mxu1  ;;  %v7270_v0 = vor.u32 %v8208_v43, %v7269_v41 }
 0x3d0   :  { %4706 = vst [vmem:[#allocation3 + $0xe8] sm:$0xff] %v4333_v52 }
 0x3d1   :  { %4707 = vst [vmem:[#allocation3 + $0xf0] sm:$0xff] %v4351_v54  ;;  %v7169_v54 = vld [vmem:[%s11317_s10 + $0x60] sm:$0xf]  ;;  %4690 = vmatpush.bf16.msrb.mxu0 %v7270_v0  ;;  %8400 = vmatpush.bf16.msrb.mxu1 %v7270_v0  ;;  %s8468_s10 = smov [#allocation5]  }
 0x3d2   :  { %4620 = vmatmul.bf16.vlgmr.msra.gmra.mxu0 %v10199_v53  ;;  %4638 = vmatmul.bf16.vlgmr.msra.gmra.mxu1 %v10199_v53  ;;  %v7170_v3 = vor.u32 %v8183_v55, %v7169_v54  ;;  %s11154_s29 = sshll.u32 %s8468_s10, 4  ;;  %s5889_s29 = int_to_ptr.vmem [resolvable:$true] %s11154_s29 }
 0x3d3   :  { %4656 = vmatmul.bf16.vlgmr.msra.gmra.mxu2 %v10199_v53  ;;  %4674 = vmatmul.bf16.vlgmr.msra.gmra.mxu3 %v10199_v53  ;;  %5893 = dma.vmem_to_hbm [thread:$0]  %s5889_s29, 32, %s5891_s16, [#allocation6]  }
 0x3d5   :  { %4691 = vmatpush.bf16.msrb.mxu0 %v7170_v3  ;;  %8401 = vmatpush.bf16.msrb.mxu1 %v7170_v3 }
 0x3d6   :  { %v4369_v10 = vpop.f32.mrf.mxu2  ;;  %v4387_v13 = vpop.f32.mrf.mxu3 }
 0x3d7   :  { %v4814_v16 = vld [vmem:[#allocation3 + $0xe8] sm:$0x3]  ;;  %v4827_v17 = vld [vmem:[#allocation3 + $0xe8] sm:$0xc]  ;;  %4708 = vst [vmem:[#allocation3 + $0x70] sm:$0xff] %v4369_v10  ;;  %v4335_v18 = vpop.f32.mrf.mxu0  ;;  %v4353_v19 = vpop.f32.mrf.mxu1 }
 0x3d8   :  { %v4820_v22 = vadd.f32 %v4818_v6, %v4814_v16  ;;  %v4833_v23 = vadd.f32 %v4831_v8, %v4827_v17  ;;  %v4835_v24 = vld [vmem:[#allocation3 + $0xe8] sm:$0x30]  ;;  %v4838_v25 = vld [vmem:[#allocation3 + $0xf0] sm:$0x3]  ;;  %v4848_v29 = vld [vmem:[#allocation3 + $0xf0] sm:$0xc] }
 0x3d9   :  { %4837 = vst [vmem:[#allocation4 + $0x8] sm:$0x30] %v4835_v24  ;;  %v4844_v21 = vadd.f32 %v4842_v62, %v4838_v25  ;;  %v4850_v32 = vrot.slane %v4848_v29, 2  ;;  %v4868_v42 = vld [vmem:[#allocation3 + $0xf0] sm:$0x30] }
 0x3da   :  { %v4825_v28 = vadd.f32 %v4823_v20, %v4820_v22  ;;  %4834 = vst [vmem:[#allocation4 + $0x8] sm:$0xc] %v4833_v23  ;;  %v4870_v50 = vrot.slane %v4868_v42, 4  ;;  %v11084_v62 = vld [vmem:[#allocation3 + $0x1c0] sm:$0x30]  ;;  %v4900_v22 = vrot.slane %v4898_v15, 6 }
 0x3db   :  { %4845 = vst [vmem:[#allocation4 + $0xe] sm:$0x3] %v4844_v21  ;;  %v4968_v23 = vrot.slane %v11084_v62, 4  ;;  %v4923_v26 = vld [vmem:[#allocation3 + $0xe8] sm:$0xc0] }
 0x3dc   :  { %4826 = vst [vmem:[#allocation4 + $0x8] sm:$0x3] %v4825_v28  ;;  %v4925_v48 = vrot.slane %v4923_v26, 6  ;;  %v4991_v62 = vld [vmem:[#allocation3 + $0x1c0] sm:$0xc0] }
 0x3dd   :  { %4709 = vst [vmem:[#allocation3 + $0x120] sm:$0xff] %v4387_v13 }
 0x3de   :  { %v4846_v7 = vld [vmem:[#allocation3 + $0x70] sm:$0x3]  ;;  %v4863_v59 = vld [vmem:[#allocation3 + $0x70] sm:$0xc]  ;;  %v4371_v63 = vpop.f32.mrf.mxu2  ;;  %v4389_v12 = vpop.f32.mrf.mxu3  ;;  %4731 = vst [vmem:[#allocation3 + $0x80] sm:$0xff] %v4335_v18 }
 0x3df   :  { %v4852_v11 = vadd.f32 %v4850_v32, %v4846_v7  ;;  %v4338_v56 = vpop.f32.mrf.mxu0  ;;  %v4356_v37 = vpop.f32.mrf.mxu1  ;;  %4732 = vst [vmem:[#allocation3 + $0x250] sm:$0xff] %v4353_v19  ;;  %v4865_v39 = vrot.slane %v4863_v59, 2  ;;  %v4893_v16 = vld [vmem:[#allocation3 + $0x70] sm:$0x30]  ;;  %v4979_v42 = vld [vmem:[#allocation3 + $0x70] sm:$0xc0] }
 0x3e0   :  { %4733 = vst [vmem:[#allocation3 + $0x1a0] sm:$0xff] %v4371_v63  ;;  %v4895_v27 = vrot.slane %v4893_v16, 4 }
 0x3e1   :  { %v4857_v38 = vadd.f32 %v4855_v36, %v4852_v11  ;;  %4734 = vst [vmem:[#allocation3 + $0x228] sm:$0xff] %v4389_v12  ;;  %v4905_v11 = vld [vmem:[#allocation3 + $0x30] sm:$0xc] }
 0x3e2   :  { %4625 = vmatmul.bf16.gmra.mxu0 %v10316_v46  ;;  %4643 = vmatmul.bf16.gmra.mxu1 %v10316_v46  ;;  %4756 = vst [vmem:[#allocation3 + $0x218] sm:$0x3] %v4338_v56 }
 0x3e3   :  { %v4859_v44 = vadd.f32 %v4858_v40, %v4857_v38  ;;  %4661 = vmatmul.bf16.gmra.mxu2 %v10316_v46  ;;  %4679 = vmatmul.bf16.gmra.mxu3 %v10316_v46  ;;  %4757 = vst [vmem:[#allocation3 + $0x200] sm:$0x3] %v4356_v37 }
 0x3e4   :  { %v4861_v47 = vld [vmem:[#allocation3 + $0x120] sm:$0x3]  ;;  %v4888_v17 = vld [vmem:[#allocation3 + $0x120] sm:$0xc]  ;;  %v4918_v18 = vld [vmem:[#allocation3 + $0x120] sm:$0x30] }
 0x3e5   :  { %4860 = vst [vmem:[#allocation4 + $0x10] sm:$0x3] %v4859_v44  ;;  %v4867_v51 = vadd.f32 %v4865_v39, %v4861_v47  ;;  %v4953_v24 = vld [vmem:[#allocation3 + $0x80] sm:$0xc]  ;;  %v4920_v28 = vrot.slane %v4918_v18, 4 }
 0x3e6   :  { %v4374_v9 = vpop.f32.mrf.mxu2  ;;  %v4392_v52 = vpop.f32.mrf.mxu3  ;;  %v4943_v29 = vld [vmem:[#allocation3 + $0x80] sm:$0x3]  ;;  %v4955_v33 = vrot.slane %v4953_v24, 6  ;;  %v4903_v39 = vld [vmem:[#allocation3 + $0x1a8] sm:$0x3]  ;;  %v4993_v24 = vrot.slane %v4991_v62, 6 }
 0x3e7   :  { %v4872_v57 = vadd.f32 %v4870_v50, %v4867_v51  ;;  %v4340_v58 = vpop.f32.mrf.mxu0  ;;  %v4358_v60 = vpop.f32.mrf.mxu1  ;;  %4758 = vst [vmem:[#allocation3 + $0x68] sm:$0x3] %v4374_v9  ;;  %v4945_v12 = vrot.slane %v4943_v29, 6  ;;  %v4930_v9 = vld [vmem:[#allocation3 + $0x1a8] sm:$0xc] }
 0x3e8   :  { %4759 = vst [vmem:[#allocation3 + $0x210] sm:$0x3] %v4392_v52  ;;  %v4948_v52 = vld [vmem:[#allocation3 + $0xa8] sm:$0xc]  ;;  %v4907_v58 = vrot.slane %v4905_v11, 2 }
 0x3e9   :  { %v4877_v1 = vadd.f32 %v4875_v49, %v4872_v57  ;;  %v4984_v16 = vld [vmem:[#allocation3 + $0x250] sm:$0x3]  ;;  %v11087_v29 = vld [vmem:[#allocation3 + $0x30] sm:$0xc0] }
 0x3eb   :  { %v4879_v2 = vadd.f32 %v4878_v4, %v4877_v1  ;;  %v4928_v4 = vld [vmem:[#allocation3 + $0xa8] sm:$0x3] }
 0x3ed   :  { %v4884_v6 = vadd.f32 %v4882_v5, %v4879_v2  ;;  %v4981_v5 = vrot.slane %v4979_v42, 6 }
 0x3ee   :  { %v4376_v8 = vpop.f32.mrf.mxu2  ;;  %v4394_v10 = vpop.f32.mrf.mxu3 }
 0x3ef   :  { %4885 = vst [vmem:[#allocation4 + $0x12] sm:$0x3] %v4884_v6  ;;  %v4405_v13 = vpop.f32.mrf.mxu0  ;;  %v4423_v14 = vpop.f32.mrf.mxu1  ;;  %v4986_v8 = vld [vmem:[#allocation3 + $0x30] sm:$0x30]  ;;  %v4932_v10 = vrot.slane %v4930_v9, 2 }
 0x3f0   :  { %4710 = vst [vmem:[#allocation3 + $0xd8] sm:$0xff] %v4405_v13  ;;  %v4988_v18 = vrot.slane %v4986_v8, 4  ;;  %v5051_v8 = vld [vmem:[#allocation3 + $0x228] sm:$0x3] }
 0x3f1   :  { %4711 = vst [vmem:[#allocation3 + $0x148] sm:$0xff] %v4423_v14 }
 0x3f2   :  { %4692 = vmatmul.bf16.vlgmr.msrb.gmra.mxu0 %v10199_v53  ;;  %4697 = vmatmul.bf16.vlgmr.msrb.gmra.mxu1 %v10316_v46  ;;  %v4961_v53 = vld [vmem:[#allocation3 + $0xf0] sm:$0xc0]  ;;  %v4890_v46 = vrot.slane %v4888_v17, 2 }
 0x3f3   :  { %v4963_v41 = vrot.slane %v4961_v53, 6 }
 0x3f6   :  { %v4441_v19 = vpop.f32.mrf.mxu2  ;;  %v4459_v20 = vpop.f32.mrf.mxu3 }
 0x3f7   :  { %4712 = vst [vmem:[#allocation3 + $0x158] sm:$0xff] %v4441_v19  ;;  %v4407_v25 = vpop.f32.mrf.mxu0  ;;  %v4425_v21 = vpop.f32.mrf.mxu1  ;;  %v4886_v30 = vld [vmem:[#allocation3 + $0xd8] sm:$0x3]  ;;  %v4913_v31 = vld [vmem:[#allocation3 + $0xd8] sm:$0xc] }
 0x3f8   :  { %4713 = vst [vmem:[#allocation3 + $0x108] sm:$0xff] %v4459_v20  ;;  %v4938_v32 = vld [vmem:[#allocation3 + $0xd8] sm:$0x30]  ;;  %v4892_v34 = vadd.f32 %v4890_v46, %v4886_v30  ;;  %v4915_v7 = vrot.slane %v4913_v31, 2  ;;  %v4911_v63 = vld [vmem:[#allocation3 + $0x148] sm:$0x3] }
 0x3f9   :  { %v4940_v59 = vrot.slane %v4938_v32, 2  ;;  %v4936_v35 = vld [vmem:[#allocation3 + $0x148] sm:$0xc]  ;;  %v4951_v36 = vld [vmem:[#allocation3 + $0x148] sm:$0x30]  ;;  %4735 = vst [vmem:[#allocation3 + $0xe0] sm:$0xff] %v4407_v25 }
 0x3fa   :  { %v4897_v56 = vadd.f32 %v4895_v27, %v4892_v34  ;;  %v4917_v37 = vadd.f32 %v4915_v7, %v4911_v63  ;;  %v4957_v38 = vadd.f32 %v4955_v33, %v4951_v36  ;;  %4736 = vst [vmem:[#allocation3 + $0x88] sm:$0xff] %v4425_v21  ;;  %v11089_v30 = vld [vmem:[#allocation3 + $0x1a8] sm:$0x30]  ;;  %v11091_v31 = vld [vmem:[#allocation3 + $0x1a8] sm:$0xc0]  ;;  %v5028_v33 = vrot.slane %v11087_v29, 6 }
 0x3fb   :  { %v4942_v40 = vadd.f32 %v4940_v59, %v4936_v35  ;;  %v5023_v34 = vrot.slane %v11089_v30, 4  ;;  %v5065_v59 = vrot.slane %v11091_v31, 6  ;;  %v11096_v63 = vld [vmem:[#allocation3 + $0xa8] sm:$0x30] }
 0x3fc   :  { %v4902_v43 = vadd.f32 %v4900_v22, %v4897_v56  ;;  %v4922_v44 = vadd.f32 %v4920_v28, %v4917_v37  ;;  %4958 = vst [vmem:[#allocation4 + $0x16] sm:$0x30] %v4957_v38 }
 0x3fd   :  { %v4947_v45 = vadd.f32 %v4945_v12, %v4942_v40  ;;  %v5009_v12 = vld [vmem:[#allocation3 + $0x120] sm:$0xc0] }
 0x3fe   :  { %v4959_v47 = vld [vmem:[#allocation3 + $0x158] sm:$0x3]  ;;  %v4974_v50 = vld [vmem:[#allocation3 + $0x158] sm:$0xc]  ;;  %v4443_v51 = vpop.f32.mrf.mxu2  ;;  %v4461_v0 = vpop.f32.mrf.mxu3  ;;  %v4904_v60 = vadd.f32 %v4903_v39, %v4902_v43  ;;  %v4927_v61 = vadd.f32 %v4925_v48, %v4922_v44  ;;  %v5004_v7 = vld [vmem:[#allocation3 + $0x158] sm:$0x30] }
 0x3ff   :  { %v4965_v54 = vadd.f32 %v4963_v41, %v4959_v47  ;;  %v4976_v55 = vrot.slane %v4974_v50, 2  ;;  %4737 = vst [vmem:[#allocation3 + $0x198] sm:$0xff] %v4443_v51  ;;  %v4410_v49 = vpop.f32.mrf.mxu0  ;;  %v4428_v57 = vpop.f32.mrf.mxu1  ;;  %v4949_v1 = vadd.f32 %v4948_v52, %v4947_v45  ;;  %v4972_v3 = vld [vmem:[#allocation3 + $0x108] sm:$0x3]  ;;  %v4999_v32 = vld [vmem:[#allocation3 + $0x108] sm:$0xc] }
 0x400   :  { %4738 = vst [vmem:[#allocation3 + $0x1d0] sm:$0xff] %v4461_v0  ;;  %v4909_v13 = vadd.f32 %v4907_v58, %v4904_v60  ;;  %v4929_v14 = vadd.f32 %v4928_v4, %v4927_v61  ;;  %v5001_v35 = vrot.slane %v4999_v32, 2  ;;  %v5041_v56 = vld [vmem:[#allocation3 + $0x108] sm:$0x30]  ;;  %v5016_v48 = vld [vmem:[#allocation3 + $0x250] sm:$0xc] }
 0x401   :  { %v4970_v2 = vadd.f32 %v4968_v23, %v4965_v54  ;;  %v4978_v6 = vadd.f32 %v4976_v55, %v4972_v3  ;;  %4950 = vst [vmem:[#allocation4 + $0x16] sm:$0xc] %v4949_v1  ;;  %v5053_v41 = vld [vmem:[#allocation3 + $0x1a0] sm:$0xc]  ;;  %v5006_v42 = vrot.slane %v5004_v7, 4  ;;  %v5011_v45 = vrot.slane %v5009_v12, 6 }
 0x402   :  { %4910 = vst [vmem:[#allocation4 + $0x14] sm:$0x3] %v4909_v13  ;;  %v4934_v17 = vadd.f32 %v4932_v10, %v4929_v14  ;;  %v5046_v47 = vld [vmem:[#allocation3 + $0xd8] sm:$0xc0]  ;;  %v5140_v51 = vld [vmem:[#allocation3 + $0x218] sm:$0x3] }
 0x403   :  { %4971 = vst [vmem:[#allocation4 + $0x1c] sm:$0x3] %v4970_v2  ;;  %v4983_v15 = vadd.f32 %v4981_v5, %v4978_v6  ;;  %v5148_v0 = vld [vmem:[#allocation3 + $0x158] sm:$0xc0]  ;;  %v5043_v9 = vrot.slane %v5041_v56, 4  ;;  %v5060_v55 = vrot.slane %v11096_v63, 4 }
 0x404   :  { %4935 = vst [vmem:[#allocation4 + $0x16] sm:$0x3] %v4934_v17  ;;  %v5048_v58 = vrot.slane %v5046_v47, 6  ;;  %v5018_v4 = vrot.slane %v5016_v48, 2  ;;  %v5153_v5 = vld [vmem:[#allocation3 + $0x250] sm:$0x30] }
 0x405   :  { %v4985_v19 = vadd.f32 %v4984_v16, %v4983_v15  ;;  %4760 = vst [vmem:[#allocation3 + $0xb8] sm:$0x3] %v4410_v49  ;;  %v5115_v49 = vld [vmem:[#allocation3 + $0x88] sm:$0x3]  ;;  %v5014_v2 = vld [vmem:[#allocation3 + $0x1a0] sm:$0x3] }
 0x406   :  { %v4446_v20 = vpop.f32.mrf.mxu2  ;;  %v4464_v22 = vpop.f32.mrf.mxu3  ;;  %4761 = vst [vmem:[#allocation3 + $0x78] sm:$0x3] %v4428_v57  ;;  %v5135_v57 = vld [vmem:[#allocation3 + $0x88] sm:$0xc]  ;;  %v5055_v6 = vrot.slane %v5053_v41, 2  ;;  %v5142_v10 = vrot.slane %v5140_v51, 4 }
 0x407   :  { %v4990_v25 = vadd.f32 %v4988_v18, %v4985_v19  ;;  %v4412_v23 = vpop.f32.mrf.mxu0  ;;  %v4430_v21 = vpop.f32.mrf.mxu1  ;;  %4762 = vst [vmem:[#allocation3 + $0x1b8] sm:$0x3] %v4446_v20  ;;  %v5083_v13 = vld [vmem:[#allocation3 + $0x148] sm:$0xc0]  ;;  %v5150_v14 = vrot.slane %v5148_v0, 6  ;;  %v5117_v19 = vrot.slane %v5115_v49, 6 }
 0x408   :  { %4763 = vst [vmem:[#allocation3 + $0xb0] sm:$0x3] %v4464_v22  ;;  %v5137_v20 = vrot.slane %v5135_v57, 6  ;;  %v5127_v41 = vld [vmem:[#allocation3 + $0x190] sm:$0x3] }
 0x409   :  { %v4995_v26 = vadd.f32 %v4993_v24, %v4990_v25 }
 0x40b   :  { %4996 = vst [vmem:[#allocation4 + $0x1e] sm:$0x3] %v4995_v26 }
 0x40e   :  { %v4448_v53 = vpop.f32.mrf.mxu2  ;;  %v4466_v27 = vpop.f32.mrf.mxu3 }
 0x40f   :  { %v4477_v46 = vpop.f32.mrf.mxu0  ;;  %v4495_v28 = vpop.f32.mrf.mxu1 }
 0x410   :  { %4714 = vst [vmem:[#allocation3 + $0x188] sm:$0xff] %v4477_v46 }
 0x411   :  { %4715 = vst [vmem:[#allocation3 + $0x98] sm:$0xff] %v4495_v28 }
 0x416   :  { %v4513_v36 = vpop.f32.mrf.mxu2  ;;  %v4531_v11 = vpop.f32.mrf.mxu3 }
 0x417   :  { %v4997_v37 = vld [vmem:[#allocation3 + $0x188] sm:$0x3]  ;;  %v5036_v40 = vld [vmem:[#allocation3 + $0x188] sm:$0xc]  ;;  %v4479_v38 = vpop.f32.mrf.mxu0  ;;  %v4497_v39 = vpop.f32.mrf.mxu1  ;;  %4716 = vst [vmem:[#allocation3 + $0x230] sm:$0xff] %v4513_v36  ;;  %v5155_v36 = vrot.slane %v5153_v5, 4 }
 0x418   :  { %v5003_v43 = vadd.f32 %v5001_v35, %v4997_v37  ;;  %v5038_v44 = vrot.slane %v5036_v40, 2  ;;  %v5034_v50 = vld [vmem:[#allocation3 + $0x98] sm:$0x3]  ;;  %4717 = vst [vmem:[#allocation3 + $0x58] sm:$0xff] %v4531_v11  ;;  %v5073_v1 = vld [vmem:[#allocation3 + $0x98] sm:$0xc] }
 0x419   :  { %4739 = vst [vmem:[#allocation3 + $0x1e0] sm:$0xff] %v4479_v38  ;;  %v5110_v3 = vld [vmem:[#allocation3 + $0x98] sm:$0x30]  ;;  %v5078_v62 = vld [vmem:[#allocation3 + $0x188] sm:$0x30]  ;;  %v5075_v22 = vrot.slane %v5073_v1, 2 }
 0x41a   :  { %v5008_v52 = vadd.f32 %v5006_v42, %v5003_v43  ;;  %v5040_v54 = vadd.f32 %v5038_v44, %v5034_v50  ;;  %4740 = vst [vmem:[#allocation3 + $0x20] sm:$0xff] %v4497_v39  ;;  %v5112_v24 = vrot.slane %v5110_v3, 2  ;;  %v5080_v28 = vrot.slane %v5078_v62, 4  ;;  %v5122_v35 = vld [vmem:[#allocation3 + $0x80] sm:$0xc0] }
 0x41b   :  { %v5085_v40 = vrot.slane %v5083_v13, 6  ;;  %v5090_v42 = vld [vmem:[#allocation3 + $0x228] sm:$0xc]  ;;  %v5120_v43 = vld [vmem:[#allocation3 + $0xe0] sm:$0xc]  ;;  %v5124_v51 = vrot.slane %v5122_v35, 4 }
 0x41c   :  { %v5013_v60 = vadd.f32 %v5011_v45, %v5008_v52  ;;  %v5045_v61 = vadd.f32 %v5043_v9, %v5040_v54  ;;  %v5031_v50 = vld [vmem:[#allocation3 + $0x138] sm:$0x3]  ;;  %v5088_v9 = vld [vmem:[#allocation3 + $0xe0] sm:$0x3]  ;;  %v5092_v29 = vrot.slane %v5090_v42, 2 }
 0x41d   :  { %v5100_v3 = vld [vmem:[#allocation3 + $0xa8] sm:$0xc0]  ;;  %v11121_v35 = vld [vmem:[#allocation3 + $0x98] sm:$0xc0]  ;;  %v5171_v42 = vld [vmem:[#allocation3 + $0x198] sm:$0x3] }
 0x41e   :  { %v5015_v15 = vadd.f32 %v5014_v2, %v5013_v60  ;;  %v5050_v16 = vadd.f32 %v5048_v58, %v5045_v61  ;;  %v4515_v17 = vpop.f32.mrf.mxu2  ;;  %v4533_v18 = vpop.f32.mrf.mxu3  ;;  %v5071_v53 = vld [vmem:[#allocation3 + $0x230] sm:$0x3]  ;;  %v5108_v27 = vld [vmem:[#allocation3 + $0x230] sm:$0xc]  ;;  %v5133_v46 = vld [vmem:[#allocation3 + $0x230] sm:$0x30] }
 0x41f   :  { %4741 = vst [vmem:[#allocation3 + $0x100] sm:$0xff] %v4515_v17  ;;  %v4482_v25 = vpop.f32.mrf.mxu0  ;;  %v4500_v23 = vpop.f32.mrf.mxu1  ;;  %v5077_v32 = vadd.f32 %v5075_v22, %v5071_v53  ;;  %v5114_v7 = vadd.f32 %v5112_v24, %v5108_v27  ;;  %v5139_v63 = vadd.f32 %v5137_v20, %v5133_v46  ;;  %v5146_v12 = vld [vmem:[#allocation3 + $0x58] sm:$0x3]  ;;  %v5129_v60 = vrot.slane %v5127_v41, 6  ;;  %v11105_v17 = vld [vmem:[#allocation3 + $0x250] sm:$0xc0] }
 0x420   :  { %v5020_v21 = vadd.f32 %v5018_v4, %v5015_v15  ;;  %v5052_v26 = vadd.f32 %v5051_v8, %v5050_v16  ;;  %v5152_v37 = vadd.f32 %v5150_v14, %v5146_v12  ;;  %4742 = vst [vmem:[#allocation3 + $0x48] sm:$0xff] %v4533_v18  ;;  %v5068_v58 = vld [vmem:[#allocation3 + $0x38] sm:$0x3]  ;;  %v5102_v8 = vrot.slane %v5100_v3, 6  ;;  %v11107_v18 = vld [vmem:[#allocation3 + $0x1a0] sm:$0x30] }
 0x421   :  { %v5082_v38 = vadd.f32 %v5080_v28, %v5077_v32  ;;  %v5119_v39 = vadd.f32 %v5117_v19, %v5114_v7  ;;  %v5144_v48 = vadd.f32 %v5142_v10, %v5139_v63  ;;  %4764 = vst [vmem:[#allocation3 + $0x150] sm:$0x3] %v4482_v25  ;;  %v5105_v10 = vld [vmem:[#allocation3 + $0x240] sm:$0x3]  ;;  %v11109_v19 = vld [vmem:[#allocation3 + $0x1a0] sm:$0xc0] }
 0x422   :  { %v5025_v11 = vadd.f32 %v5023_v34, %v5020_v21  ;;  %v5057_v56 = vadd.f32 %v5055_v6, %v5052_v26  ;;  %v5157_v47 = vadd.f32 %v5155_v36, %v5152_v37  ;;  %v5095_v34 = vld [vmem:[#allocation3 + $0x80] sm:$0x30]  ;;  %4765 = vst [vmem:[#allocation3 + $0x170] sm:$0x3] %v4500_v23  ;;  %v11111_v20 = vld [vmem:[#allocation3 + $0x228] sm:$0x30] }
 0x423   :  { %v5087_v0 = vadd.f32 %v5085_v40, %v5082_v38  ;;  %v5121_v30 = vadd.f32 %v5120_v43, %v5119_v39  ;;  %5145 = vst [vmem:[#allocation4 + $0x24] sm:$0x30] %v5144_v48  ;;  %v5097_v5 = vrot.slane %v5095_v34, 4  ;;  %v5166_v22 = vld [vmem:[#allocation3 + $0x108] sm:$0xc0]  ;;  %v5180_v25 = vrot.slane %v11105_v17, 6 }
 0x424   :  { %v5030_v44 = vadd.f32 %v5028_v33, %v5025_v11  ;;  %v5062_v45 = vadd.f32 %v5060_v55, %v5057_v56  ;;  %5158 = vst [vmem:[#allocation4 + $0x2a] sm:$0x3] %v5157_v47  ;;  %v5161_v24 = vld [vmem:[#allocation3 + $0x58] sm:$0xc]  ;;  %v5175_v23 = vrot.slane %v11107_v18, 4  ;;  %v5215_v21 = vrot.slane %v11109_v19, 6 }
 0x425   :  { %v5089_v33 = vadd.f32 %v5088_v9, %v5087_v0  ;;  %v5126_v55 = vadd.f32 %v5124_v51, %v5121_v30  ;;  %v5210_v26 = vrot.slane %v11111_v20, 4  ;;  %v5168_v46 = vrot.slane %v5166_v22, 6  ;;  %v11117_v28 = vld [vmem:[#allocation3 + $0x88] sm:$0xc0]  ;;  %v11119_v32 = vld [vmem:[#allocation3 + $0x78] sm:$0x3] }
 0x426   :  { %v5032_v52 = vadd.f32 %v5031_v50, %v5030_v44  ;;  %v5067_v54 = vadd.f32 %v5065_v59, %v5062_v45  ;;  %v4518_v49 = vpop.f32.mrf.mxu2  ;;  %v4536_v57 = vpop.f32.mrf.mxu3  ;;  %v5196_v12 = vld [vmem:[#allocation3 + $0x188] sm:$0xc0]  ;;  %v5163_v36 = vrot.slane %v5161_v24, 2  ;;  %v5191_v11 = vld [vmem:[#allocation3 + $0x58] sm:$0x30]  ;;  %v5311_v40 = vrot.slane %v11117_v28, 4 }
 0x427   :  { %v4484_v61 = vpop.f32.mrf.mxu0  ;;  %v4502_v1 = vpop.f32.mrf.mxu1  ;;  %v5094_v2 = vadd.f32 %v5092_v29, %v5089_v33  ;;  %v5131_v6 = vadd.f32 %v5129_v60, %v5126_v55  ;;  %4766 = vst [vmem:[#allocation3 + $0x110] sm:$0x3] %v4518_v49  ;;  %v5302_v38 = vld [vmem:[#allocation3 + $0x100] sm:$0x3]  ;;  %v5322_v39 = vld [vmem:[#allocation3 + $0x100] sm:$0xc] }
 0x428   :  { %5033 = vst [vmem:[#allocation4 + $0x20] sm:$0x3] %v5032_v52  ;;  %v5069_v4 = vadd.f32 %v5068_v58, %v5067_v54  ;;  %v5329_v43 = vrot.slane %v11119_v32, 4  ;;  %v5198_v47 = vrot.slane %v5196_v12, 6  ;;  %v5193_v50 = vrot.slane %v5191_v11, 4 }
 0x429   :  { %v5099_v31 = vadd.f32 %v5097_v5, %v5094_v2  ;;  %5132 = vst [vmem:[#allocation4 + $0x24] sm:$0xc] %v5131_v6  ;;  %v5203_v34 = vld [vmem:[#allocation3 + $0x198] sm:$0xc]  ;;  %v5235_v9 = vrot.slane %v11121_v35, 6  ;;  %v5304_v54 = vrot.slane %v5302_v38, 6 }
 0x42a   :  { %5070 = vst [vmem:[#allocation4 + $0x22] sm:$0x3] %v5069_v4  ;;  %v5270_v52 = vld [vmem:[#allocation3 + $0x230] sm:$0xc0]  ;;  %v5324_v49 = vrot.slane %v5322_v39, 6 }
 0x42b   :  { %v5104_v59 = vadd.f32 %v5102_v8, %v5099_v31  ;;  %4767 = vst [vmem:[#allocation3 + $0x208] sm:$0x3] %v4536_v57  ;;  %v5272_v32 = vrot.slane %v5270_v52, 6  ;;  %v5250_v12 = vld [vmem:[#allocation3 + $0x228] sm:$0xc0] }
 0x42c   :  { %v5314_v35 = vld [vmem:[#allocation3 + $0xb8] sm:$0x3]  ;;  %v5277_v39 = vld [vmem:[#allocation3 + $0x1e0] sm:$0xc]  ;;  %v5255_v28 = vld [vmem:[#allocation3 + $0x68] sm:$0x3] }
 0x42d   :  { %v5106_v15 = vadd.f32 %v5105_v10, %v5104_v59 }
 0x42e   :  { %v4520_v13 = vpop.f32.mrf.mxu2  ;;  %v4538_v14 = vpop.f32.mrf.mxu3 }
 0x42f   :  { %v4549_v62 = vpop.f32.mrf.mxu0  ;;  %v4567_v16 = vpop.f32.mrf.mxu1  ;;  %5107 = vst [vmem:[#allocation4 + $0x24] sm:$0x3] %v5106_v15 }
 0x430   :  { %4718 = vst [vmem:[#allocation3 + $0x10] sm:$0xff] %v4549_v62 }
 0x431   :  { %4719 = vst [vmem:[#allocation3 + $0x60] sm:$0xff] %v4567_v16  ;;  %v5201_v16 = vld [vmem:[#allocation3 + $0x1d0] sm:$0x3] }
 0x436   :  { %v4585_v53 = vpop.f32.mrf.mxu2  ;;  %v4603_v27 = vpop.f32.mrf.mxu3 }
 0x437   :  { %4720 = vst [vmem:[#allocation3 + $0x160] sm:$0xff] %v4585_v53  ;;  %v4551_v7 = vpop.f32.mrf.mxu0  ;;  %v4569_v63 = vpop.f32.mrf.mxu1  ;;  %v5159_v56 = vld [vmem:[#allocation3 + $0x10] sm:$0x3]  ;;  %v5186_v37 = vld [vmem:[#allocation3 + $0x10] sm:$0xc] }
 0x438   :  { %4721 = vst [vmem:[#allocation3 + $0x220] sm:$0xff] %v4603_v27  ;;  %v5165_v48 = vadd.f32 %v5163_v36, %v5159_v56  ;;  %v5188_v41 = vrot.slane %v5186_v37, 2  ;;  %v5184_v44 = vld [vmem:[#allocation3 + $0x60] sm:$0x3]  ;;  %v5223_v45 = vld [vmem:[#allocation3 + $0x60] sm:$0xc] }
 0x439   :  { %4743 = vst [vmem:[#allocation3 + $0x1b0] sm:$0xff] %v4551_v7  ;;  %v5228_v0 = vld [vmem:[#allocation3 + $0x10] sm:$0x30]  ;;  %v5225_v57 = vrot.slane %v5223_v45, 2  ;;  %v5265_v58 = vld [vmem:[#allocation3 + $0x60] sm:$0x30] }
 0x43a   :  { %v5170_v51 = vadd.f32 %v5168_v46, %v5165_v48  ;;  %v5190_v30 = vadd.f32 %v5188_v41, %v5184_v44  ;;  %4744 = vst [vmem:[#allocation3 + $0x238] sm:$0xff] %v4569_v63  ;;  %v5230_v4 = vrot.slane %v5228_v0, 4  ;;  %v5267_v14 = vrot.slane %v5265_v58, 4  ;;  %v5240_v46 = vld [vmem:[#allocation3 + $0x1d0] sm:$0xc] }
 0x43b   :  { %v5205_v27 = vrot.slane %v5203_v34, 2  ;;  %v5238_v36 = vld [vmem:[#allocation3 + $0x1e0] sm:$0x3]  ;;  %v5307_v48 = vld [vmem:[#allocation3 + $0x20] sm:$0xc]  ;;  %v5242_v44 = vrot.slane %v5240_v46, 2 }
 0x43c   :  { %v5172_v60 = vadd.f32 %v5171_v42, %v5170_v51  ;;  %v5195_v29 = vadd.f32 %v5193_v50, %v5190_v30  ;;  %v5282_v42 = vld [vmem:[#allocation3 + $0x88] sm:$0x30]  ;;  %v5275_v51 = vld [vmem:[#allocation3 + $0x20] sm:$0x3]  ;;  %v5252_v58 = vrot.slane %v5250_v12, 6 }
 0x43e   :  { %v5221_v33 = vld [vmem:[#allocation3 + $0x160] sm:$0x3]  ;;  %v5260_v55 = vld [vmem:[#allocation3 + $0x160] sm:$0xc]  ;;  %v5297_v61 = vld [vmem:[#allocation3 + $0x160] sm:$0x30]  ;;  %v4587_v1 = vpop.f32.mrf.mxu2  ;;  %v4605_v3 = vpop.f32.mrf.mxu3  ;;  %v5177_v10 = vadd.f32 %v5175_v23, %v5172_v60  ;;  %v5200_v13 = vadd.f32 %v5198_v47, %v5195_v29 }
 0x43f   :  { %v5227_v5 = vadd.f32 %v5225_v57, %v5221_v33  ;;  %v5262_v2 = vrot.slane %v5260_v55, 2  ;;  %v5299_v6 = vrot.slane %v5297_v61, 2  ;;  %v5258_v8 = vld [vmem:[#allocation3 + $0x220] sm:$0x3]  ;;  %v4554_v31 = vpop.f32.mrf.mxu0  ;;  %v4572_v59 = vpop.f32.mrf.mxu1  ;;  %v5295_v15 = vld [vmem:[#allocation3 + $0x220] sm:$0xc] }
 0x440   :  { %v5320_v62 = vld [vmem:[#allocation3 + $0x220] sm:$0x30]  ;;  %4745 = vst [vmem:[#allocation3 + $0xd0] sm:$0xff] %v4587_v1  ;;  %v5182_v7 = vadd.f32 %v5180_v25, %v5177_v10  ;;  %v5202_v63 = vadd.f32 %v5201_v16, %v5200_v13  ;;  %v5316_v25 = vrot.slane %v5314_v35, 6  ;;  %v5287_v60 = vld [vmem:[#allocation3 + $0xe0] sm:$0xc0] }
 0x441   :  { %v5232_v18 = vadd.f32 %v5230_v4, %v5227_v5  ;;  %v5264_v22 = vadd.f32 %v5262_v2, %v5258_v8  ;;  %v5301_v24 = vadd.f32 %v5299_v6, %v5295_v15  ;;  %v5326_v53 = vadd.f32 %v5324_v49, %v5320_v62  ;;  %4746 = vst [vmem:[#allocation3 + $0x178] sm:$0xff] %v4605_v3  ;;  %v5245_v23 = vld [vmem:[#allocation3 + $0xe0] sm:$0x30]  ;;  %v5218_v33 = vld [vmem:[#allocation3 + $0x200] sm:$0x3] }
 0x442   :  { %5183 = vst [vmem:[#allocation4 + $0x2c] sm:$0x3] %v5182_v7  ;;  %v5207_v41 = vadd.f32 %v5205_v27, %v5202_v63  ;;  %v5247_v17 = vrot.slane %v5245_v23, 4  ;;  %v5284_v55 = vrot.slane %v5282_v42, 4  ;;  %v5289_v3 = vrot.slane %v5287_v60, 6 }
 0x443   :  { %v5237_v11 = vadd.f32 %v5235_v9, %v5232_v18  ;;  %v5269_v56 = vadd.f32 %v5267_v14, %v5264_v22  ;;  %v5306_v37 = vadd.f32 %v5304_v54, %v5301_v24  ;;  %v5331_v38 = vadd.f32 %v5329_v43, %v5326_v53  ;;  %4768 = vst [vmem:[#allocation3 + $0xc0] sm:$0x3] %v4554_v31  ;;  %v5292_v6 = vld [vmem:[#allocation3 + $0x210] sm:$0x3]  ;;  %v5335_v13 = vld [vmem:[#allocation3 + $0x58] sm:$0xc0] }
 0x444   :  { %v5212_v0 = vadd.f32 %v5210_v26, %v5207_v41  ;;  %v5279_v43 = vrot.slane %v5277_v39, 2  ;;  %4769 = vst [vmem:[#allocation3 + $0x50] sm:$0x3] %v4572_v59  ;;  %v5340_v59 = vld [vmem:[#allocation3 + $0x198] sm:$0x30]  ;;  %v5337_v16 = vrot.slane %v5335_v13, 6 }
 0x445   :  { %v5239_v45 = vadd.f32 %v5238_v36, %v5237_v11  ;;  %v5274_v47 = vadd.f32 %v5272_v32, %v5269_v56  ;;  %v5308_v50 = vadd.f32 %v5307_v48, %v5306_v37  ;;  %5332 = vst [vmem:[#allocation4 + $0x32] sm:$0x30] %v5331_v38  ;;  %v5522_v14 = vld [vmem:[#allocation3 + $0x48] sm:$0x30]  ;;  %v5342_v15 = vrot.slane %v5340_v59, 4 }
 0x446   :  { %v4590_v30 = vpop.f32.mrf.mxu2  ;;  %v4608_v34 = vpop.f32.mrf.mxu3  ;;  %v5217_v29 = vadd.f32 %v5215_v21, %v5212_v0  ;;  %v5365_v62 = vld [vmem:[#allocation3 + $0x198] sm:$0xc0]  ;;  %v5524_v18 = vrot.slane %v5522_v14, 6  ;;  %v5353_v53 = vld [vmem:[#allocation3 + $0x10] sm:$0xc0] }
 0x447   :  { %v5244_v9 = vadd.f32 %v5242_v44, %v5239_v45  ;;  %v5276_v52 = vadd.f32 %v5275_v51, %v5274_v47  ;;  %v5313_v54 = vadd.f32 %v5311_v40, %v5308_v50  ;;  %v4556_v49 = vpop.f32.mrf.mxu0  ;;  %v4574_v57 = vpop.f32.mrf.mxu1  ;;  %4770 = vst [vmem:[#allocation3 + $0x18] sm:$0x3] %v4590_v30  ;;  %v5360_v63 = vld [vmem:[#allocation3 + $0x1d0] sm:$0x30]  ;;  %v11134_v56 = vld [vmem:[#allocation3 + $0x1d0] sm:$0xc0] }
 0x448   :  { %v5219_v1 = vadd.f32 %v5218_v33, %v5217_v29  ;;  %4771 = vst [vmem:[#allocation3] sm:$0x3] %v4608_v34  ;;  %v5355_v37 = vrot.slane %v5353_v53, 6  ;;  %v5367_v48 = vrot.slane %v5365_v62, 6  ;;  %v5362_v41 = vrot.slane %v5360_v63, 4 }
 0x449   :  { %v5249_v20 = vadd.f32 %v5247_v17, %v5244_v9  ;;  %v5281_v26 = vadd.f32 %v5279_v43, %v5276_v52  ;;  %v5318_v61 = vadd.f32 %v5316_v25, %v5313_v54  ;;  %v11136_v44 = vld [vmem:[#allocation3 + $0x1e0] sm:$0x30]  ;;  %v11138_v45 = vld [vmem:[#allocation3 + $0x1e0] sm:$0xc0]  ;;  %v5402_v50 = vrot.slane %v11134_v56, 6 }
 0x44a   :  { %5220 = vst [vmem:[#allocation4 + $0x2e] sm:$0x3] %v5219_v1  ;;  %v5358_v17 = vld [vmem:[#allocation3 + $0x48] sm:$0x3]  ;;  %v11141_v51 = vld [vmem:[#allocation3 + $0x48] sm:$0xc] }
 0x44b   :  { %v5254_v4 = vadd.f32 %v5252_v58, %v5249_v20  ;;  %v5286_v5 = vadd.f32 %v5284_v55, %v5281_v26  ;;  %5319 = vst [vmem:[#allocation4 + $0x32] sm:$0xc] %v5318_v61  ;;  %v5383_v0 = vld [vmem:[#allocation3 + $0x60] sm:$0xc0]  ;;  %v5397_v26 = vrot.slane %v11136_v44, 4  ;;  %v5439_v61 = vrot.slane %v11138_v45, 6 }
 0x44c   :  { %v5420_v60 = vld [vmem:[#allocation3 + $0x160] sm:$0xc0]  ;;  %v5392_v1 = vrot.slane %v11141_v51, 2 }
 0x44d   :  { %v5256_v40 = vadd.f32 %v5255_v28, %v5254_v4  ;;  %v5291_v2 = vadd.f32 %v5289_v3, %v5286_v5  ;;  %v5385_v3 = vrot.slane %v5383_v0, 6  ;;  %v5427_v5 = vld [vmem:[#allocation3 + $0x1b0] sm:$0xc] }
 0x44e   :  { %v4592_v19 = vpop.f32.mrf.mxu2  ;;  %v4610_v21 = vpop.f32.mrf.mxu3  ;;  %v5429_v62 = vrot.slane %v5427_v5, 2 }
 0x44f   :  { %5257 = vst [vmem:[#allocation4 + $0x30] sm:$0x3] %v5256_v40  ;;  %v5293_v8 = vadd.f32 %v5292_v6, %v5291_v2  ;;  %v4621_v31 = vpop.f32.mrf.mxu0  ;;  %v4639_v10 = vpop.f32.mrf.mxu1  ;;  %v5422_v19 = vrot.slane %v5420_v60, 6  ;;  %v5388_v21 = vld [vmem:[#allocation3 + $0x1b0] sm:$0x3] }
 0x450   :  { %4722 = vst [vmem:[#allocation3 + $0xa0] sm:$0xff] %v4621_v31  ;;  %v5405_v60 = vld [vmem:[#allocation3 + $0x1b8] sm:$0x3] }
 0x451   :  { %5294 = vst [vmem:[#allocation4 + $0x32] sm:$0x3] %v5293_v8  ;;  %v5535_v8 = vld [vmem:[#allocation3 + $0x1b0] sm:$0x30] }
 0x452   :  { %4723 = vst [vmem:[#allocation3 + $0x90] sm:$0xff] %v4639_v10 }
 0x456   :  { %v4657_v22 = vpop.f32.mrf.mxu2  ;;  %v4675_v24 = vpop.f32.mrf.mxu3 }
 0x457   :  { %v5333_v27 = vld [vmem:[#allocation3 + $0xa0] sm:$0x3]  ;;  %v5348_v46 = vld [vmem:[#allocation3 + $0xa0] sm:$0xc]  ;;  %v4623_v32 = vpop.f32.mrf.mxu0  ;;  %v4641_v7 = vpop.f32.mrf.mxu1  ;;  %v5520_v35 = vld [vmem:[#allocation3 + $0xa0] sm:$0xc0] }
 0x458   :  { %v5339_v12 = vadd.f32 %v5337_v16, %v5333_v27  ;;  %v5350_v23 = vrot.slane %v5348_v46, 2  ;;  %4724 = vst [vmem:[#allocation3 + $0xf8] sm:$0xff] %v4657_v22  ;;  %v5526_v36 = vadd.f32 %v5524_v18, %v5520_v35  ;;  %v5378_v25 = vld [vmem:[#allocation3 + $0xa0] sm:$0x30]  ;;  %v5425_v16 = vld [vmem:[#allocation3 + $0x238] sm:$0x3] }
 0x459   :  { %v5346_v11 = vld [vmem:[#allocation3 + $0x90] sm:$0x3]  ;;  %4725 = vst [vmem:[#allocation3 + $0x180] sm:$0xff] %v4675_v24  ;;  %v5373_v42 = vld [vmem:[#allocation3 + $0x90] sm:$0xc]  ;;  %v5380_v29 = vrot.slane %v5378_v25, 4 }
 0x45a   :  { %v5344_v38 = vadd.f32 %v5342_v15, %v5339_v12  ;;  %v5352_v39 = vadd.f32 %v5350_v23, %v5346_v11  ;;  %5527 = vst [vmem:[#allocation4 + $0x40] sm:$0xc0] %v5526_v36  ;;  %v5375_v34 = vrot.slane %v5373_v42, 2  ;;  %v5415_v52 = vld [vmem:[#allocation3 + $0x90] sm:$0x30]  ;;  %v5537_v35 = vrot.slane %v5535_v8, 6 }
 0x45b   :  { %4747 = vst [vmem:[#allocation3 + $0x1f0] sm:$0xff] %v4623_v32  ;;  %v5417_v40 = vrot.slane %v5415_v52, 4  ;;  %v5528_v31 = vld [vmem:[#allocation3 + $0x90] sm:$0xc0]  ;;  %v5432_v15 = vld [vmem:[#allocation3 + $0x20] sm:$0x30] }
 0x45c   :  { %5345 = vst [vmem:[#allocation4 + $0x38] sm:$0x3] %v5344_v38  ;;  %v5357_v47 = vadd.f32 %v5355_v37, %v5352_v39  ;;  %v11148_v18 = vld [vmem:[#allocation3 + $0x238] sm:$0x30]  ;;  %v5580_v25 = vld [vmem:[#allocation3 + $0xd0] sm:$0x30] }
 0x45d   :  { %4748 = vst [vmem:[#allocation3 + $0x130] sm:$0xff] %v4641_v7  ;;  %v5557_v52 = vrot.slane %v11148_v18, 6  ;;  %v5582_v5 = vrot.slane %v5580_v25, 6 }
 0x45e   :  { %v5359_v30 = vadd.f32 %v5358_v17, %v5357_v47  ;;  %v4659_v43 = vpop.f32.mrf.mxu2  ;;  %v4677_v9 = vpop.f32.mrf.mxu3 }
 0x45f   :  { %v5371_v54 = vld [vmem:[#allocation3 + $0xf8] sm:$0x3]  ;;  %v5410_v49 = vld [vmem:[#allocation3 + $0xf8] sm:$0xc]  ;;  %v4626_v57 = vpop.f32.mrf.mxu0  ;;  %v11143_v58 = vpop.f32.mrf.mxu1  ;;  %4749 = vst [vmem:[#allocation3 + $0x128] sm:$0xff] %v4659_v43 }
 0x460   :  { %v5364_v33 = vadd.f32 %v5362_v41, %v5359_v30  ;;  %v5377_v55 = vadd.f32 %v5375_v34, %v5371_v54  ;;  %v5412_v20 = vrot.slane %v5410_v49, 2  ;;  %v5408_v4 = vld [vmem:[#allocation3 + $0x180] sm:$0x3]  ;;  %4750 = vst [vmem:[#allocation3 + $0x1d8] sm:$0xff] %v4677_v9  ;;  %v5543_v46 = vld [vmem:[#allocation3 + $0xf8] sm:$0xc0] }
 0x461   :  { %4772 = vst [vmem:[#allocation3 + $0x168] sm:$0x3] %v4626_v57  ;;  %v5434_v9 = vrot.slane %v5432_v15, 4  ;;  %v5568_v57 = vld [vmem:[#allocation3 + $0x180] sm:$0xc0] }
 0x462   :  { %v5369_v28 = vadd.f32 %v5367_v48, %v5364_v33  ;;  %v5382_v2 = vadd.f32 %v5380_v29, %v5377_v55  ;;  %v5414_v6 = vadd.f32 %v5412_v20, %v5408_v4  ;;  %v5530_v13 = vld [vmem:[#allocation3 + $0x1f0] sm:$0x3]  ;;  %v5550_v14 = vld [vmem:[#allocation3 + $0x1f0] sm:$0xc]  ;;  %v5641_v24 = vld [vmem:[#allocation3 + $0x1f0] sm:$0x30] }
 0x463   :  { %v5532_v22 = vrot.slane %v5530_v13, 2  ;;  %v5646_v53 = vld [vmem:[#allocation3 + $0x1f0] sm:$0xc0]  ;;  %5643 = vst [vmem:[#allocation4 + $0x50] sm:$0x30] %v5641_v24  ;;  %v5552_v0 = vrot.slane %v5550_v14, 4 }
 0x464   :  { %5370 = vst [vmem:[#allocation4 + $0x3a] sm:$0x3] %v5369_v28  ;;  %v5387_v10 = vadd.f32 %v5385_v3, %v5382_v2  ;;  %v5419_v59 = vadd.f32 %v5417_v40, %v5414_v6  ;;  %v5648_v7 = vrot.slane %v5646_v53, 2  ;;  %v5545_v63 = vld [vmem:[#allocation3 + $0x130] sm:$0x3] }
 0x465   :  { %v5534_v36 = vadd.f32 %v5532_v22, %v5528_v31  ;;  %v5547_v11 = vrot.slane %v5545_v63, 2  ;;  %v5644_v37 = vld [vmem:[#allocation3 + $0x130] sm:$0x30]  ;;  %v5540_v48 = vld [vmem:[#allocation3 + $0x48] sm:$0xc0] }
 0x466   :  { %v5389_v27 = vadd.f32 %v5388_v21, %v5387_v10  ;;  %v5424_v32 = vadd.f32 %v5422_v19, %v5419_v59  ;;  %v11150_v12 = vpop.f32.mrf.mxu2  ;;  %v11152_v23 = vpop.f32.mrf.mxu3  ;;  %v5575_v44 = vld [vmem:[#allocation3 + $0x130] sm:$0xc]  ;;  %v5650_v47 = vadd.f32 %v5648_v7, %v5644_v37  ;;  %v5570_v17 = vld [vmem:[#allocation3 + $0x128] sm:$0x3]  ;;  %v5654_v34 = vld [vmem:[#allocation3 + $0x130] sm:$0xc0] }
 0x467   :  { %v4628_v38 = vpop.f32.mrf.mxu0  ;;  %v4646_v39 = vpop.f32.mrf.mxu1  ;;  %v5539_v51 = vadd.f32 %v5537_v35, %v5534_v36  ;;  %v5549_v30 = vadd.f32 %v5547_v11, %v5543_v46  ;;  %v5572_v43 = vrot.slane %v5570_v17, 2  ;;  %v5562_v29 = vld [vmem:[#allocation3 + $0x208] sm:$0x3]  ;;  %v5577_v20 = vrot.slane %v5575_v44, 4  ;;  %v5652_v3 = vld [vmem:[#allocation3 + $0x128] sm:$0x30] }
 0x468   :  { %v5394_v41 = vadd.f32 %v5392_v1, %v5389_v27  ;;  %v5426_v42 = vadd.f32 %v5425_v16, %v5424_v32  ;;  %5651 = vst [vmem:[#allocation4 + $0x52] sm:$0x30] %v5650_v47  ;;  %v5560_v4 = vld [vmem:[#allocation3 + $0x1b0] sm:$0xc0]  ;;  %v5587_v28 = vld [vmem:[#allocation3 + $0xc0] sm:$0x3] }
 0x469   :  { %v5541_v33 = vadd.f32 %v5540_v48, %v5539_v51  ;;  %v5554_v55 = vadd.f32 %v5552_v0, %v5549_v30  ;;  %v5574_v1 = vadd.f32 %v5572_v43, %v5568_v57  ;;  %v5656_v2 = vrot.slane %v5654_v34, 2  ;;  %v5659_v6 = vld [vmem:[#allocation3 + $0x168] sm:$0x3]  ;;  %v5442_v19 = vld [vmem:[#allocation3 + $0xb0] sm:$0x3] }
 0x46a   :  { %v5399_v54 = vadd.f32 %v5397_v26, %v5394_v41  ;;  %v5431_v49 = vadd.f32 %v5429_v62, %v5426_v42  ;;  %v5667_v31 = vld [vmem:[#allocation3 + $0x128] sm:$0xc0]  ;;  %v11169_v10 = vld [vmem:[#allocation3 + $0x100] sm:$0xc0]  ;;  %v5661_v15 = vrot.slane %v5659_v6, 4  ;;  %v5564_v16 = vrot.slane %v5562_v29, 2 }
 0x46b   :  { %5542 = vst [vmem:[#allocation4 + $0x42] sm:$0xc0] %v5541_v33  ;;  %v5559_v21 = vadd.f32 %v5557_v52, %v5554_v55  ;;  %v5579_v8 = vadd.f32 %v5577_v20, %v5574_v1  ;;  %v5658_v14 = vadd.f32 %v5656_v2, %v5652_v3  ;;  %v11174_v62 = vld [vmem:[#allocation3 + $0x110] sm:$0x3]  ;;  %v5585_v27 = vld [vmem:[#allocation3 + $0x238] sm:$0xc0] }
 0x46c   :  { %v5404_v26 = vadd.f32 %v5402_v50, %v5399_v54  ;;  %v5436_v40 = vadd.f32 %v5434_v9, %v5431_v49  ;;  %4773 = vst [vmem:[#allocation3 + $0x118] sm:$0x3] %v11143_v58  ;;  %v11177_v32 = vld [vmem:[#allocation3 + $0x220] sm:$0xc0]  ;;  %v5589_v58 = vrot.slane %v5587_v28, 2  ;;  %v5498_v35 = vrot.slane %v11169_v10, 4 }
 0x46d   :  { %v5561_v18 = vadd.f32 %v5560_v4, %v5559_v21  ;;  %v5584_v22 = vadd.f32 %v5582_v5, %v5579_v8  ;;  %4774 = vst [vmem:[#allocation3 + $0x248] sm:$0x3] %v11150_v12  ;;  %v5663_v46 = vadd.f32 %v5661_v15, %v5658_v14  ;;  %v5665_v12 = vld [vmem:[#allocation3 + $0x1d8] sm:$0x30]  ;;  %v5516_v11 = vrot.slane %v11174_v62, 4  ;;  %v11203_v10 = vld [vmem:[#allocation4 + $0x18] sm:$0xff] }
 0x46e   :  { %v5406_v59 = vadd.f32 %v5405_v60, %v5404_v26  ;;  %v5441_v13 = vadd.f32 %v5439_v61, %v5436_v40  ;;  %v4664_v56 = vpop.f32.mrf.mxu2  ;;  %v4682_v50 = vpop.f32.mrf.mxu3  ;;  %v5669_v61 = vrot.slane %v5667_v31, 2  ;;  %4775 = vst [vmem:[#allocation3 + $0x1e8] sm:$0x3] %v11152_v23  ;;  %v5459_v37 = vrot.slane %v11177_v32, 6  ;;  %v5489_v38 = vld [vmem:[#allocation3 + $0x178] sm:$0x3] }
 0x46f   :  { %v4693_v24 = vpop.f32.mrf.mxu0  ;;  %v4698_v53 = vpop.f32.mrf.mxu1  ;;  %v5566_v7 = vadd.f32 %v5564_v16, %v5561_v18  ;;  %v5586_v63 = vadd.f32 %v5585_v27, %v5584_v22  ;;  %5664 = vst [vmem:[#allocation4 + $0x54] sm:$0x30] %v5663_v46  ;;  %v5509_v48 = vld [vmem:[#allocation3 + $0x178] sm:$0xc]  ;;  %v11183_v41 = vld [vmem:[#allocation3 + $0x178] sm:$0x30] }
 0x470   :  { %5407 = vst [vmem:[#allocation4 + $0x3c] sm:$0x3] %v5406_v59  ;;  %v5443_v45 = vadd.f32 %v5442_v19, %v5441_v13  ;;  %v5671_v39 = vadd.f32 %v5669_v61, %v5665_v12  ;;  %v11185_v42 = vld [vmem:[#allocation3 + $0x178] sm:$0xc0]  ;;  %v5635_v44 = vld [vmem:[#allocation3] sm:$0x3] }
 0x471   :  { %5567 = vst [vmem:[#allocation4 + $0x44] sm:$0xc0] %v5566_v7  ;;  %v5591_v36 = vadd.f32 %v5589_v58, %v5586_v63  ;;  %v5452_v47 = vld [vmem:[#allocation3 + $0xf8] sm:$0x30]  ;;  %v5447_v25 = vld [vmem:[#allocation3 + $0x180] sm:$0xc] }
 0x472   :  { %5444 = vst [vmem:[#allocation4 + $0x3e] sm:$0x3] %v5443_v45  ;;  %v5484_v51 = vld [vmem:[#allocation3 + $0x180] sm:$0x30]  ;;  %v5491_v34 = vrot.slane %v5489_v38, 6  ;;  %v5511_v60 = vrot.slane %v5509_v48, 6 }
 0x473   :  { %5592 = vst [vmem:[#allocation4 + $0x46] sm:$0xc0] %v5591_v36  ;;  %v5672_v23 = vld [vmem:[#allocation3 + $0x118] sm:$0x3]  ;;  %v5600_v43 = vld [vmem:[#allocation3 + $0x128] sm:$0xc] }
 0x474   :  { %v5674_v17 = vrot.slane %v5672_v23, 4  ;;  %4726 = vst [vmem:[#allocation3 + $0x1f8] sm:$0xff] %v4693_v24  ;;  %v5595_v9 = vld [vmem:[#allocation3 + $0x1d8] sm:$0x3]  ;;  %v5620_v54 = vld [vmem:[#allocation3 + $0x1d8] sm:$0xc] }
 0x475   :  { %4776 = vst [vmem:[#allocation3 + $0x1c8] sm:$0x3] %v4698_v53  ;;  %v5680_v49 = vld [vmem:[#allocation3 + $0x1d8] sm:$0xc0]  ;;  %v5685_v57 = vld [vmem:[#allocation3 + $0x248] sm:$0x3] }
 0x476   :  { %v5676_v52 = vadd.f32 %v5674_v17, %v5671_v39  ;;  %v5607_v29 = vrot.slane %v11183_v41, 6  ;;  %v5627_v33 = vrot.slane %v11185_v42, 6  ;;  %v5637_v55 = vrot.slane %v5635_v44, 6  ;;  %v5693_v5 = vld [vmem:[#allocation3 + $0x1e8] sm:$0x3]  ;;  %v11189_v38 = vld [vmem:[#allocation4 + $0x8] sm:$0xff] }
 0x477   :  { %v4695_v0 = vpop.f32.mrf.mxu0  ;;  %v4700_v30 = vpop.f32.mrf.mxu1  ;;  %v5454_v20 = vrot.slane %v5452_v47, 4  ;;  %v5449_v1 = vrot.slane %v5447_v25, 2  ;;  %v5486_v3 = vrot.slane %v5484_v51, 2  ;;  %v5602_v4 = vrot.slane %v5600_v43, 4  ;;  %v5501_v6 = vld [vmem:[#allocation3 + $0x170] sm:$0x3] }
 0x478   :  { %4751 = vst [vmem:[#allocation3 + $0x140] sm:$0xff] %v4695_v0  ;;  %v5597_v28 = vrot.slane %v5595_v9, 2  ;;  %v5622_v26 = vrot.slane %v5620_v54, 2  ;;  %v5682_v40 = vrot.slane %v5680_v49, 2  ;;  %v5687_v2 = vrot.slane %v5685_v57, 4  ;;  %v11193_v25 = vld [vmem:[#allocation4] sm:$0xff] }
 0x479   :  { %5677 = vst [vmem:[#allocation4 + $0x56] sm:$0x30] %v5676_v52  ;;  %v5695_v31 = vrot.slane %v5693_v5, 2  ;;  %v5469_v61 = vld [vmem:[#allocation3 + $0x100] sm:$0x30]  ;;  %v5503_v39 = vrot.slane %v5501_v6, 6  ;;  %v5736_v54 = vmul.f32 %v11189_v38, %v11189_v38 }
 0x47a   :  { %v5464_v46 = vld [vmem:[#allocation3 + $0x238] sm:$0xc]  ;;  %v5494_v58 = vld [vmem:[#allocation3 + $0xd0] sm:$0xc]  ;;  %v5612_v48 = vld [vmem:[#allocation3 + $0x50] sm:$0x3] }
 0x47b   :  { %v5445_v19 = vld [vmem:[#allocation3 + $0x1f8] sm:$0x3]  ;;  %v5482_v21 = vld [vmem:[#allocation3 + $0x1f8] sm:$0xc]  ;;  %v5507_v8 = vld [vmem:[#allocation3 + $0x1f8] sm:$0x30] }
 0x47c   :  { %v5451_v59 = vadd.f32 %v5449_v1, %v5445_v19  ;;  %v5488_v13 = vadd.f32 %v5486_v3, %v5482_v21  ;;  %v5513_v14 = vadd.f32 %v5511_v60, %v5507_v8  ;;  %v5593_v15 = vld [vmem:[#allocation3 + $0x1f8] sm:$0xc0]  ;;  %v5699_v56 = vld [vmem:[#allocation3 + $0x1c8] sm:$0x3]  ;;  %v5462_v23 = vld [vmem:[#allocation3 + $0xd0] sm:$0x3] }
 0x47d   :  { %v5599_v50 = vadd.f32 %v5597_v28, %v5593_v15  ;;  %5701 = vst [vmem:[#allocation4 + $0x60] sm:$0x3] %v5699_v56  ;;  %v5630_v44 = vld [vmem:[#allocation3 + $0x18] sm:$0x3]  ;;  %v5466_v51 = vrot.slane %v5464_v46, 2  ;;  %v11197_v32 = vld [vmem:[#allocation4 + $0x10] sm:$0xff]  ;;  %v5738_v28 = vmul.f32 %v11203_v10, %v11203_v10 }
 0x47e   :  { %v5456_v18 = vadd.f32 %v5454_v20, %v5451_v59  ;;  %v5493_v22 = vadd.f32 %v5491_v34, %v5488_v13  ;;  %v5518_v24 = vadd.f32 %v5516_v11, %v5513_v14  ;;  %v5610_v0 = vld [vmem:[#allocation3 + $0xd0] sm:$0xc0]  ;;  %v5614_v9 = vrot.slane %v5612_v48, 2  ;;  %v11209_v3 = vld [vmem:[#allocation4 + $0x20] sm:$0xff] }
 0x47f   :  { %v5618_v62 = vld [vmem:[#allocation3 + $0x140] sm:$0x3]  ;;  %v5633_v16 = vld [vmem:[#allocation3 + $0x140] sm:$0xc]  ;;  %v5678_v27 = vld [vmem:[#allocation3 + $0x140] sm:$0x30]  ;;  %v5604_v7 = vadd.f32 %v5602_v4, %v5599_v50  ;;  %v5739_v19 = vmul.f32 %v11209_v3, %v11209_v3 }
 0x480   :  { %v5624_v53 = vadd.f32 %v5622_v26, %v5618_v62  ;;  %v5691_v45 = vld [vmem:[#allocation3 + $0x140] sm:$0xc0]  ;;  %v5639_v63 = vadd.f32 %v5637_v55, %v5633_v16  ;;  %v5684_v36 = vadd.f32 %v5682_v40, %v5678_v27  ;;  %v5461_v41 = vadd.f32 %v5459_v37, %v5456_v18  ;;  %5519 = vst [vmem:[#allocation4 + $0x40] sm:$0x30] %v5518_v24  ;;  %v5479_v40 = vld [vmem:[#allocation3 + $0x150] sm:$0x3] }
 0x481   :  { %v5697_v12 = vadd.f32 %v5695_v31, %v5691_v45  ;;  %v5495_v42 = vadd.f32 %v5494_v58, %v5493_v22  ;;  %v5609_v47 = vadd.f32 %v5607_v29, %v5604_v7  ;;  %v5474_v37 = vld [vmem:[#allocation3 + $0x20] sm:$0xc0]  ;;  %v5471_v49 = vrot.slane %v5469_v61, 4  ;;  %v11219_v31 = vld [vmem:[#allocation4 + $0x30] sm:$0xff]  ;;  %v11224_v15 = vld [vmem:[#allocation4 + $0x38] sm:$0xff] }
 0x482   :  { %v5629_v11 = vadd.f32 %v5627_v33, %v5624_v53  ;;  %5640 = vst [vmem:[#allocation4 + $0x50] sm:$0xc] %v5639_v63  ;;  %v5689_v17 = vadd.f32 %v5687_v2, %v5684_v36  ;;  %v5463_v30 = vadd.f32 %v5462_v23, %v5461_v41  ;;  %v5735_v29 = vmul.f32 %v11193_v25, %v11193_v25  ;;  %v11214_v2 = vld [vmem:[#allocation4 + $0x28] sm:$0xff] }
 0x483   :  { %v5500_v34 = vadd.f32 %v5498_v35, %v5495_v42  ;;  %5698 = vst [vmem:[#allocation4 + $0x58] sm:$0xc0] %v5697_v12  ;;  %v5611_v52 = vadd.f32 %v5610_v0, %v5609_v47  ;;  %v5715_v33 = vadd.f32 %v11189_v38, %v11193_v25  ;;  %v5737_v55 = vmul.f32 %v11197_v32, %v11197_v32 }
 0x484   :  { %v5631_v43 = vadd.f32 %v5630_v44, %v5629_v11  ;;  %5690 = vst [vmem:[#allocation4 + $0x58] sm:$0x30] %v5689_v17  ;;  %v5468_v57 = vadd.f32 %v5466_v51, %v5463_v30  ;;  %v5476_v20 = vrot.slane %v5474_v37, 6  ;;  %v5748_v4 = vadd.f32 %v5736_v54, %v5735_v29  ;;  %v11242_v36 = vld [vmem:[#allocation4 + $0x60] sm:$0x3] }
 0x485   :  { %v5505_v60 = vadd.f32 %v5503_v39, %v5500_v34  ;;  %v5616_v35 = vadd.f32 %v5614_v9, %v5611_v52  ;;  %v5716_v5 = vadd.f32 %v5715_v33, %v11197_v32  ;;  %v5740_v13 = vmul.f32 %v11214_v2, %v11214_v2 }
 0x486   :  { %5632 = vst [vmem:[#allocation4 + $0x50] sm:$0x3] %v5631_v43  ;;  %v5473_v1 = vadd.f32 %v5471_v49, %v5468_v57  ;;  %v5749_v6 = vadd.f32 %v5748_v4, %v5737_v55  ;;  %v5741_v50 = vmul.f32 %v11219_v31, %v11219_v31  ;;  %v5742_v22 = vmul.f32 %v11224_v15, %v11224_v15 }
 0x487   :  { %5506 = vst [vmem:[#allocation4 + $0x40] sm:$0xc] %v5505_v60  ;;  %v5717_v21 = vadd.f32 %v5716_v5, %v11203_v10  ;;  %v5747_v23 = vmul.f32 %v11242_v36, %v11242_v36  ;;  %v5726_v51 = vsel %vm2036_vm0, %v11242_v36, 0.0 }
 0x488   :  { %5617 = vst [vmem:[#allocation4 + $0x48] sm:$0xc0] %v5616_v35  ;;  %v5478_v26 = vadd.f32 %v5476_v20, %v5473_v1  ;;  %v5750_v14 = vadd.f32 %v5749_v6, %v5738_v28 }
 0x489   :  { %v5718_v59 = vadd.f32 %v5717_v21, %v11209_v3  ;;  %v5759_v34 = vsel %vm2036_vm0, %v5747_v23, 0.0 }
 0x48a   :  { %v5480_v8 = vadd.f32 %v5479_v40, %v5478_v26  ;;  %v5751_v62 = vadd.f32 %v5750_v14, %v5739_v19 }
 0x48b   :  { %v5719_v56 = vadd.f32 %v5718_v59, %v11214_v2  ;;  %v5713_v48 = vld [vmem:[#allocation4 + $0x58] sm:$0xff]  ;;  %v5768_v59 = vld [vmem:[%s11318_s11] sm:$0x1] }
 0x48c   :  { %5481 = vst [vmem:[#allocation4 + $0x40] sm:$0x3] %v5480_v8  ;;  %v5752_v18 = vadd.f32 %v5751_v62, %v5740_v13  ;;  %v5746_v47 = vmul.f32 %v5713_v48, %v5713_v48 }
 0x48d   :  { %v5720_v16 = vadd.f32 %v5719_v56, %v11219_v31  ;;  %v11240_v7 = vld [vmem:[#allocation4 + $0x50] sm:$0xff] }
 0x48e   :  { %v5753_v24 = vadd.f32 %v5752_v18, %v5741_v50  ;;  %v5745_v42 = vmul.f32 %v11240_v7, %v11240_v7  ;;  %v5783_v50 = vld [vmem:[%s11319_s12] sm:$0x1] }
 0x48f   :  { %v5721_v53 = vadd.f32 %v5720_v16, %v11224_v15  ;;  %v11235_v45 = vld [vmem:[#allocation4 + $0x48] sm:$0xff] }
 0x490   :  { %v5754_v58 = vadd.f32 %v5753_v24, %v5742_v22  ;;  %v5744_v39 = vmul.f32 %v11235_v45, %v11235_v45 }
 0x493   :  { %v11233_v27 = vld [vmem:[#allocation4 + $0x40] sm:$0xff] }
 0x494   :  { %v5722_v61 = vadd.f32 %v5721_v53, %v11233_v27  ;;  %v5743_v46 = vmul.f32 %v11233_v27, %v11233_v27 }
 0x496   :  { %v5755_v63 = vadd.f32 %v5754_v58, %v5743_v46  ;;  %v5723_v12 = vadd.f32 %v5722_v61, %v11235_v45 }
 0x498   :  { %v5724_v41 = vadd.f32 %v5723_v12, %v11240_v7  ;;  %v5756_v11 = vadd.f32 %v5755_v63, %v5744_v39 }
 0x49a   :  { %v5725_v44 = vadd.f32 %v5724_v41, %v5713_v48  ;;  %v5757_v17 = vadd.f32 %v5756_v11, %v5745_v42 }
 0x49c   :  { %v5727_v0 = vadd.f32 %v5726_v51, %v5725_v44  ;;  %v5758_v30 = vadd.f32 %v5757_v17, %v5746_v47 }
 0x49e   :  { %v5728_v43 = vrot.slane %v5727_v0, 4  ;;  %v5760_v37 = vadd.f32 %v5759_v34, %v5758_v30 }
 0x4a0   :  { %v5729_v9 = vadd.f32 %v5728_v43, %v5727_v0  ;;  %v5761_v52 = vrot.slane %v5760_v37, 4 }
 0x4a2   :  { %v5730_v54 = vrot.slane %v5729_v9, 2  ;;  %v5762_v49 = vadd.f32 %v5761_v52, %v5760_v37 }
 0x4a4   :  { %v5731_v57 = vadd.f32 %v5730_v54, %v5729_v9  ;;  %v5763_v60 = vrot.slane %v5762_v49, 2 }
 0x4a6   :  { %v5732_v29 = vrot.slane %v5731_v57, 1  ;;  %v5764_v35 = vadd.f32 %v5763_v60, %v5762_v49 }
 0x4a8   :  { %v5733_v33 = vadd.f32 %v5732_v29, %v5731_v57  ;;  %v5765_v55 = vrot.slane %v5764_v35, 1 }
 0x4aa   :  { %v5734_v20 = vmul.f32 0.010204081, %v5733_v33  ;;  %v5766_v1 = vadd.f32 %v5765_v55, %v5764_v35 }
 0x4ac   :  { %v5767_v4 = vmul.f32 0.010204081, %v5766_v1  ;;  %v5769_v5 = vmul.f32 %v5734_v20, %v5734_v20 }
 0x4ae   :  { %v5770_v28 = vsub.f32 %v5767_v4, %v5769_v5 }
 0x4b0   :  { %v5771_v26 = vadd.f32 1e-05, %v5770_v28 }
 0x4b2   :  { %8414 = vrsqrt.f32 %v5771_v26  ;;  %vm5778_vm4 = vweird.f32 %v5771_v26 }
 0x4b8   :  { %v8415_v40 = vpop.eup %8414 }
 0x4b9   :  { %v5773_v6 = vmul.f32 %v8415_v40, %v5771_v26  ;;  %vm5779_vm0 = vweird.f32 %v8415_v40 }
 0x4ba   :  { %vm5780_vm5 = vmor %vm5778_vm4, %vm5779_vm0 }
 0x4bb   :  { %v5774_v19 = vmul.f32 %v8415_v40, %v5773_v6 }
 0x4bd   :  { %v5775_v21 = vmul.f32 0.5, %v5774_v19 }
 0x4bf   :  { %v5776_v8 = vsub.f32 1.5, %v5775_v21 }
 0x4c1   :  { %v5777_v13 = vmul.f32 %v8415_v40, %v5776_v8 }
 0x4c3   :  { %v5781_v14 = vsel %vm5780_vm5, %v8415_v40, %v5777_v13 }
 0x4c4   :  { %v5782_v56 = vmul.f32 %v5781_v14, %v5768_v59 }
 0x4c6   :  { %v5784_v62 = vmul.f32 %v5782_v56, %v5734_v20  ;;  %v5787_v16 = vperm.slane %v5782_v56, 0 }
 0x4c8   :  { %v5785_v18 = vsub.f32 %v5783_v50, %v5784_v62  ;;  %v5789_v22 = vmul.f32 %v5787_v16, %v11193_v25  ;;  %v5790_v24 = vmul.f32 %v5787_v16, %v11189_v38  ;;  %v5791_v53 = vmul.f32 %v5787_v16, %v11197_v32 }
 0x4c9   :  { %v5792_v61 = vmul.f32 %v5787_v16, %v11203_v10  ;;  %v5793_v46 = vmul.f32 %v5787_v16, %v11209_v3  ;;  %v5794_v58 = vmul.f32 %v5787_v16, %v11214_v2  ;;  %v5795_v63 = vmul.f32 %v5787_v16, %v11219_v31 }
 0x4ca   :  { %v5796_v12 = vmul.f32 %v5787_v16, %v11224_v15  ;;  %v5797_v39 = vmul.f32 %v5787_v16, %v11233_v27  ;;  %v5803_v41 = vperm.slane %v5785_v18, 0  ;;  %v5798_v42 = vmul.f32 %v5787_v16, %v11235_v45 }
 0x4cb   :  { %v5799_v25 = vmul.f32 %v5787_v16, %v11240_v7  ;;  %v5800_v38 = vmul.f32 %v5787_v16, %v5713_v48  ;;  %v5801_v32 = vmul.f32 %v5787_v16, %v11242_v36 }
 0x4cc   :  { %v5805_v11 = vadd.f32 %v5803_v41, %v5789_v22  ;;  %v5806_v10 = vadd.f32 %v5803_v41, %v5790_v24  ;;  %v5807_v23 = vadd.f32 %v5803_v41, %v5791_v53  ;;  %v5808_v3 = vadd.f32 %v5803_v41, %v5792_v61 }
 0x4cd   :  { %v5809_v44 = vadd.f32 %v5803_v41, %v5793_v46  ;;  %v5810_v2 = vadd.f32 %v5803_v41, %v5794_v58  ;;  %v5811_v47 = vadd.f32 %v5803_v41, %v5795_v63  ;;  %v5812_v31 = vadd.f32 %v5803_v41, %v5796_v12 }
 0x4ce   :  { %v5813_v17 = vadd.f32 %v5803_v41, %v5797_v39  ;;  %v5814_v15 = vadd.f32 %v5803_v41, %v5798_v42  ;;  %v5815_v51 = vadd.f32 %v5803_v41, %v5799_v25  ;;  %v5816_v27 = vadd.f32 %v5803_v41, %v5800_v38 }
 0x4cf   :  { %v5817_v0 = vadd.f32 %v5803_v41, %v5801_v32  ;;  %vm5818_vm6 = vcmp.ge.f32.partialorder %v5805_v11, 0.0  ;;  %vm5819_vm7 = vcmp.ge.f32.partialorder %v5806_v10, 0.0  ;;  %vm5820_vm8 = vcmp.ge.f32.partialorder %v5807_v23, 0.0 }
 0x4d0   :  { %vm5821_vm9 = vcmp.ge.f32.partialorder %v5808_v3, 0.0  ;;  %vm5822_vm10 = vcmp.ge.f32.partialorder %v5809_v44, 0.0  ;;  %vm5823_vm11 = vcmp.ge.f32.partialorder %v5810_v2, 0.0  ;;  %vm5824_vm12 = vcmp.ge.f32.partialorder %v5811_v47, 0.0 }
 0x4d1   :  { %vm5825_vm13 = vcmp.ge.f32.partialorder %v5812_v31, 0.0  ;;  %vm5826_vm14 = vcmp.ge.f32.partialorder %v5813_v17, 0.0  ;;  %vm5827_vm15 = vcmp.ge.f32.partialorder %v5814_v15, 0.0  ;;  %vm5828_vm1 = vcmp.ge.f32.partialorder %v5815_v51, 0.0 }
 0x4d2   :  { %vm5829_vm2 = vcmp.ge.f32.partialorder %v5816_v27, 0.0  ;;  %vm5830_vm3 = vcmp.ge.f32.partialorder %v5817_v0, 0.0  ;;  %v5831_v45 = vmul.f32 0.2, %v5805_v11  ;;  %v5832_v7 = vmul.f32 0.2, %v5806_v10 }
 0x4d3   :  { %v5833_v36 = vmul.f32 0.2, %v5807_v23  ;;  %v5834_v48 = vmul.f32 0.2, %v5808_v3  ;;  %v5835_v30 = vmul.f32 0.2, %v5809_v44 }
 0x4d4   :  { %v5836_v34 = vmul.f32 0.2, %v5810_v2  ;;  %v5837_v43 = vmul.f32 0.2, %v5811_v47  ;;  %v5838_v37 = vmul.f32 0.2, %v5812_v31  ;;  %v5844_v9 = vsel %vm5818_vm6, %v5805_v11, %v5831_v45 }
 0x4d5   :  { %v5839_v52 = vmul.f32 0.2, %v5813_v17  ;;  %v5840_v54 = vmul.f32 0.2, %v5814_v15  ;;  %v5841_v49 = vmul.f32 0.2, %v5815_v51  ;;  %v5845_v57 = vsel %vm5819_vm7, %v5806_v10, %v5832_v7 }
 0x4d6   :  { %v5842_v60 = vmul.f32 0.2, %v5816_v27  ;;  %v5843_v29 = vmul.f32 0.2, %v5817_v0  ;;  %v5846_v35 = vsel %vm5820_vm8, %v5807_v23, %v5833_v36  ;;  %v5847_v33 = vsel %vm5821_vm9, %v5808_v3, %v5834_v48 }
 0x4d7   :  { %v5848_v55 = vsel %vm5822_vm10, %v5809_v44, %v5835_v30  ;;  %v5849_v20 = vsel %vm5823_vm11, %v5810_v2, %v5836_v34  ;;  %v5850_v1 = vsel %vm5824_vm12, %v5811_v47, %v5837_v43  ;;  %v5851_v4 = vsel %vm5825_vm13, %v5812_v31, %v5838_v37 }
 0x4d8   :  { %v5852_v5 = vsel %vm5826_vm14, %v5813_v17, %v5839_v52  ;;  %v5853_v28 = vsel %vm5827_vm15, %v5814_v15, %v5840_v54  ;;  %v5854_v26 = vsel %vm5828_vm1, %v5815_v51, %v5841_v49  ;;  %v5855_v40 = vsel %vm5829_vm2, %v5816_v27, %v5842_v60 }
 0x4d9   :  { %v8362_v6 = vpack.c.bf16 %v5845_v57, %v5844_v9  ;;  %v8367_v19 = vpack.c.bf16 %v5847_v33, %v5846_v35  ;;  %v8372_v21 = vpack.c.bf16 %v5849_v20, %v5848_v55  ;;  %v5856_v8 = vsel %vm5830_vm3, %v5817_v0, %v5843_v29 }
 0x4da   :  { %v8377_v59 = vpack.c.bf16 %v5851_v4, %v5850_v1  ;;  %v8382_v13 = vpack.c.bf16 %v5853_v28, %v5852_v5  ;;  %v8387_v14 = vpack.c.bf16 %v5855_v40, %v5854_v26  ;;  %v5869_v56 = vpack.c.bf16 %v5856_v8, %v5856_v8 }
 0x4db   :  { %8363 = vst [vmem:[%s11322_s15] sm:$0xff] %v8362_v6  }
 0x4dc   :  { %8389 = vst [vmem:[%s11322_s15 + $0x8] sm:$0xff] %v8367_v19  }
 0x4dd   :  { %8390 = vst [vmem:[%s11322_s15 + $0x10] sm:$0xff] %v8372_v21  }
 0x4de   :  { %8391 = vst [vmem:[%s11322_s15 + $0x18] sm:$0xff] %v8377_v59  }
 0x4df   :  { %8392 = vst [vmem:[%s11322_s15 + $0x20] sm:$0xff] %v8382_v13  }
 0x4e0   :  { %8393 = vst [vmem:[%s11322_s15 + $0x28] sm:$0xff] %v8387_v14  }
 0x4e1   :  { %5882 = vst [vmem:[%s11322_s15 + $0x30] sm:$0x1] %v5869_v56 }
 0x4e2   :  { %8464 = dma.done.wait [#allocation6], 32  }
 0x4e3   :  { %8465 = vsyncadd [#allocation6], 4294967264 }
 0x4e4   :  { %8466 = dma.done.wait [#allocation8], 32  }
 0x4e5   :  { %8467 = vsyncadd [#allocation8], 4294967264 }
 0x4e6   :  { %5917 = vsyncpa [#allocation6], 1 }
 0x4e7   :  { %5918 = vsyncpa [#allocation8], 1 }

// kernel: vae_forward.9
= control target key start
LH: loop header
LB: loop body
LE: loop exit
PB: predicated region body
PF: predicated region fallthrough
CT: control target
= control target key end

     0   :  { %vm631_vm0 = vcmask 261120   ;;  %s2469_s1 = inlined_call_operand.vmem [shape: bf16[288,128], index: 1, kind: input, shape index: {}]   ;;  %s2470_s0 = inlined_call_operand.vmem [shape: bf16[392,288], index: 0, kind: input, shape index: {}]   ;;  %s2471_s2 = inlined_call_operand.vmem [shape: f32[1,128], index: 2, kind: input, shape index: {}]   ;;  %s2472_s3 = inlined_call_operand.vmem [shape: f32[392,128], index: 3, kind: output, shape index: {}]  }
   0x1   :  { %v1623_v0 = vld [vmem:[%s2469_s1 + $0x38] sm:$0xff]  ;;  %v1682_v2 = vld [vmem:[%s2469_s1 + $0x88] sm:$0xff]  ;;  %v1622_v3 = vld [vmem:[%s2469_s1 + $0x30] sm:$0xff] }
   0x2   :  { %v1631_v1 = vld [vmem:[%s2469_s1 + $0x78] sm:$0xff]  ;;  %707 = vmatpush.bf16.msra.mxu0 %v1623_v0  ;;  %1634 = vmatpush.bf16.msra.mxu3 %v1623_v0  ;;  %v1630_v4 = vld [vmem:[%s2469_s1 + $0x70] sm:$0xff]  ;;  %v1694_v5 = vld [vmem:[%s2469_s1 + $0x80] sm:$0xff] }
   0x3   :  { %840 = vmatpush.bf16.msra.mxu1 %v1631_v1  ;;  %979 = vmatpush.bf16.msra.mxu2 %v1682_v2  ;;  %v1169_v6 = vld [vmem:[%s2470_s0 + $0x8] sm:$0xf]  ;;  %v1546_v7 = vld [vmem:[%s2470_s0 + $0x10] sm:$0xf0]  ;;  %v1620_v11 = vld [vmem:[%s2469_s1 + $0x20] sm:$0xff] }
   0x4   :  { %v1170_v8 = vor.u32 %v1546_v7, %v1169_v6  ;;  %v1621_v9 = vld [vmem:[%s2469_s1 + $0x28] sm:$0xff]  ;;  %v1628_v12 = vld [vmem:[%s2469_s1 + $0x60] sm:$0xff]  ;;  %v1619_v13 = vld [vmem:[%s2469_s1 + $0x18] sm:$0xff] }
   0x5   :  { %v1629_v10 = vld [vmem:[%s2469_s1 + $0x68] sm:$0xff]  ;;  %v1627_v14 = vld [vmem:[%s2469_s1 + $0x58] sm:$0xff]  ;;  %v1618_v15 = vld [vmem:[%s2469_s1 + $0x10] sm:$0xff] }
   0x6   :  { %708 = vmatpush.bf16.msra.mxu0 %v1622_v3  ;;  %1635 = vmatpush.bf16.msra.mxu3 %v1622_v3  ;;  %v1626_v16 = vld [vmem:[%s2469_s1 + $0x50] sm:$0xff]  ;;  %v1181_v17 = vld [vmem:[%s2470_s0 + $0x20] sm:$0xf]  ;;  %v1549_v18 = vld [vmem:[%s2470_s0 + $0x28] sm:$0xf0] }
   0x7   :  { %841 = vmatpush.bf16.msra.mxu1 %v1630_v4  ;;  %980 = vmatpush.bf16.msra.mxu2 %v1694_v5  ;;  %v1182_v19 = vor.u32 %v1549_v18, %v1181_v17  ;;  %v1617_v20 = vld [vmem:[%s2469_s1 + $0x8] sm:$0xff]  ;;  %v1616_v22 = vld [vmem:[%s2469_s1] sm:$0xff]  ;;  %v1602_v27 = vld [vmem:[%s2470_s0 + $0x1d0] sm:$0xf0] }
   0x8   :  { %v1625_v21 = vld [vmem:[%s2469_s1 + $0x48] sm:$0xff]  ;;  %v1624_v23 = vld [vmem:[%s2469_s1 + $0x40] sm:$0xff]  ;;  %v1163_v29 = vld [vmem:[%s2470_s0 + $0xc] sm:$0xf0] }
   0x9   :  { %v1161_v24 = vld [vmem:[%s2470_s0] sm:$0xf]  ;;  %v1545_v25 = vld [vmem:[%s2470_s0 + $0x8] sm:$0xf0]  ;;  %v1389_v26 = vld [vmem:[%s2470_s0 + $0x1c8] sm:$0xf] }
   0xa   :  { %1519 = vmatmul.msk.bf16.vlgmr.msra.gmra.mxu2 %vm631_vm0, %v1170_v8  ;;  %709 = vmatpush.bf16.msra.mxu0 %v1621_v9  ;;  %v1544_v28 = vld [vmem:[%s2470_s0 + $0x4] sm:$0xf]  ;;  %v1162_v30 = vor.u32 %v1545_v25, %v1161_v24  ;;  %v1390_v31 = vor.u32 %v1602_v27, %v1389_v26  ;;  %v1193_v33 = vld [vmem:[%s2470_s0 + $0x38] sm:$0xf]  ;;  %v1401_v38 = vld [vmem:[%s2470_s0 + $0x1e0] sm:$0xf] }
   0xb   :  { %1636 = vmatpush.bf16.msra.mxu3 %v1621_v9  ;;  %842 = vmatpush.bf16.msra.mxu1 %v1629_v10  ;;  %v1166_v32 = vor.u32 %v1544_v28, %v1163_v29  ;;  %v1552_v34 = vld [vmem:[%s2470_s0 + $0x40] sm:$0xf0]  ;;  %v1173_v36 = vld [vmem:[%s2470_s0 + $0x18] sm:$0xf]  ;;  %v1605_v39 = vld [vmem:[%s2470_s0 + $0x1e8] sm:$0xf0] }
   0xc   :  { %v1194_v35 = vor.u32 %v1552_v34, %v1193_v33  ;;  %v1548_v37 = vld [vmem:[%s2470_s0 + $0x20] sm:$0xf0]  ;;  %v1547_v40 = vld [vmem:[%s2470_s0 + $0x1c] sm:$0xf]  ;;  %v1175_v41 = vld [vmem:[%s2470_s0 + $0x24] sm:$0xf0]  ;;  %v1402_v43 = vor.u32 %v1605_v39, %v1401_v38 }
   0xd   :  { %v1174_v42 = vor.u32 %v1548_v37, %v1173_v36  ;;  %v1178_v44 = vor.u32 %v1547_v40, %v1175_v41  ;;  %v1205_v45 = vld [vmem:[%s2470_s0 + $0x50] sm:$0xf]  ;;  %v1555_v46 = vld [vmem:[%s2470_s0 + $0x58] sm:$0xf0]  ;;  %v1413_v50 = vld [vmem:[%s2470_s0 + $0x1f8] sm:$0xf] }
   0xe   :  { %710 = vmatpush.bf16.msra.mxu0 %v1620_v11  ;;  %v1206_v47 = vor.u32 %v1555_v46, %v1205_v45  ;;  %v1185_v48 = vld [vmem:[%s2470_s0 + $0x30] sm:$0xf]  ;;  %v1551_v49 = vld [vmem:[%s2470_s0 + $0x38] sm:$0xf0]  ;;  %v1608_v51 = vld [vmem:[%s2470_s0 + $0x200] sm:$0xf0] }
   0xf   :  { %1637 = vmatpush.bf16.msra.mxu3 %v1620_v11  ;;  %843 = vmatpush.bf16.msra.mxu1 %v1628_v12  ;;  %v1550_v52 = vld [vmem:[%s2470_s0 + $0x34] sm:$0xf]  ;;  %v1187_v53 = vld [vmem:[%s2470_s0 + $0x3c] sm:$0xf0]  ;;  %v1186_v54 = vor.u32 %v1551_v49, %v1185_v48  ;;  %v1414_v55 = vor.u32 %v1608_v51, %v1413_v50  ;;  %v1217_v57 = vld [vmem:[%s2470_s0 + $0x68] sm:$0xf] }
  0x10   :  { %v1190_v56 = vor.u32 %v1550_v52, %v1187_v53  ;;  %v1558_v58 = vld [vmem:[%s2470_s0 + $0x70] sm:$0xf0]  ;;  %v1197_v60 = vld [vmem:[%s2470_s0 + $0x48] sm:$0xf]  ;;  %v1425_v62 = vld [vmem:[%s2470_s0 + $0x210] sm:$0xf] }
  0x11   :  { %v1218_v59 = vor.u32 %v1558_v58, %v1217_v57  ;;  %v1554_v61 = vld [vmem:[%s2470_s0 + $0x50] sm:$0xf0]  ;;  %v1611_v63 = vld [vmem:[%s2470_s0 + $0x218] sm:$0xf0]  ;;  %v1553_v0 = vld [vmem:[%s2470_s0 + $0x4c] sm:$0xf] }
  0x12   :  { %711 = vmatpush.bf16.msra.mxu0 %v1619_v13  ;;  %v1426_v3 = vor.u32 %v1611_v63, %v1425_v62  ;;  %v1561_v6 = vld [vmem:[%s2470_s0 + $0x88] sm:$0xf0]  ;;  %v1209_v8 = vld [vmem:[%s2470_s0 + $0x60] sm:$0xf]  ;;  %v1614_v11 = vld [vmem:[%s2470_s0 + $0x230] sm:$0xf0] }
  0x13   :  { %1638 = vmatpush.bf16.msra.mxu3 %v1619_v13  ;;  %844 = vmatpush.bf16.msra.mxu1 %v1627_v14  ;;  %v1557_v9 = vld [vmem:[%s2470_s0 + $0x68] sm:$0xf0]  ;;  %v1211_v13 = vld [vmem:[%s2470_s0 + $0x6c] sm:$0xf0]  ;;  %v1241_v17 = vld [vmem:[%s2470_s0 + $0x98] sm:$0xf] }
  0x14   :  { %v1564_v18 = vld [vmem:[%s2470_s0 + $0xa0] sm:$0xf0]  ;;  %v1559_v24 = vld [vmem:[%s2470_s0 + $0x7c] sm:$0xf]  ;;  %v1223_v25 = vld [vmem:[%s2470_s0 + $0x84] sm:$0xf0] }
  0x15   :  { %v1226_v28 = vor.u32 %v1559_v24, %v1223_v25  ;;  %v1253_v29 = vld [vmem:[%s2470_s0 + $0xb0] sm:$0xf]  ;;  %v1563_v33 = vld [vmem:[%s2470_s0 + $0x98] sm:$0xf0]  ;;  %v1562_v34 = vld [vmem:[%s2470_s0 + $0x94] sm:$0xf] }
  0x16   :  { %712 = vmatpush.bf16.msra.mxu0 %v1618_v15  ;;  %v1601_v36 = vld [vmem:[%s2470_s0 + $0x1cc] sm:$0xf]  ;;  %v1391_v37 = vld [vmem:[%s2470_s0 + $0x1d4] sm:$0xf0]  ;;  %v1265_v41 = vld [vmem:[%s2470_s0 + $0xc8] sm:$0xf] }
  0x17   :  { %1639 = vmatpush.bf16.msra.mxu3 %v1618_v15  ;;  %845 = vmatpush.bf16.msra.mxu1 %v1626_v16  ;;  %v1394_v40 = vor.u32 %v1601_v36, %v1391_v37  ;;  %v1566_v45 = vld [vmem:[%s2470_s0 + $0xb0] sm:$0xf0]  ;;  %v1565_v46 = vld [vmem:[%s2470_s0 + $0xac] sm:$0xf]  ;;  %v1604_v48 = vld [vmem:[%s2470_s0 + $0x1e4] sm:$0xf] }
  0x18   :  { %v1403_v49 = vld [vmem:[%s2470_s0 + $0x1ec] sm:$0xf0]  ;;  %v1951_v58 = vld [vmem:[%s2471_s2] ss:$0 sm:$0xff]  ;;  %v1607_v63 = vld [vmem:[%s2470_s0 + $0x1fc] sm:$0xf] }
  0x19   :  { %v1406_v53 = vor.u32 %v1604_v48, %v1403_v49  ;;  %v1259_v62 = vld [vmem:[%s2470_s0 + $0xcc] sm:$0xf0]  ;;  %v1271_v24 = vld [vmem:[%s2470_s0 + $0xe4] sm:$0xf0]  ;;  %v1610_v25 = vld [vmem:[%s2470_s0 + $0x214] sm:$0xf] }
  0x1a   :  { %1520 = vmatmul.msk.bf16.gmra.mxu2 %vm631_vm0, %v1182_v19  ;;  %713 = vmatpush.bf16.msra.mxu0 %v1617_v20  ;;  %v1242_v19 = vor.u32 %v1564_v18, %v1241_v17  ;;  %v1301_v37 = vld [vmem:[%s2470_s0 + $0x110] sm:$0xf]  ;;  %v1574_v48 = vld [vmem:[%s2470_s0 + $0xf4] sm:$0xf] }
  0x1b   :  { %1640 = vmatpush.bf16.msra.mxu3 %v1617_v20  ;;  %846 = vmatpush.bf16.msra.mxu1 %v1625_v21  ;;  %v1876_v20 = vld [vmem:[%s2470_s0 + $0x240] sm:$0xff] }
  0x1e   :  { %714 = vmatpush.bf16.msra.mxu0 %v1616_v22 }
  0x1f   :  { %1641 = vmatpush.bf16.msra.mxu3 %v1616_v22  ;;  %847 = vmatpush.bf16.msra.mxu1 %v1624_v23  ;;  %v1560_v22 = vld [vmem:[%s2470_s0 + $0x80] sm:$0xf0] }
  0x21   :  { %715 = vmatmul.bf16.vlgmr.msra.gmra.mxu0 %v1162_v30  ;;  %v1567_v30 = vld [vmem:[%s2470_s0 + $0xb8] sm:$0xf0] }
  0x22   :  { %810 = vmatmul.bf16.vlgmr.msra.gmra.mxu3 %v1390_v31  ;;  %848 = vmatmul.bf16.vlgmr.msra.gmra.mxu1 %v1166_v32  ;;  %v1254_v31 = vor.u32 %v1567_v30, %v1253_v29  ;;  %v1233_v32 = vld [vmem:[%s2470_s0 + $0x90] sm:$0xf] }
  0x23   :  { %1642 = vmatpush.bf16.msrb.mxu3 %v1631_v1  ;;  %v1199_v1 = vld [vmem:[%s2470_s0 + $0x54] sm:$0xf0]  ;;  %v1234_v38 = vor.u32 %v1563_v33, %v1233_v32 }
  0x27   :  { %1643 = vmatpush.bf16.msrb.mxu3 %v1630_v4  ;;  %v1202_v4 = vor.u32 %v1553_v0, %v1199_v1  ;;  %v1415_v0 = vld [vmem:[%s2470_s0 + $0x204] sm:$0xf0] }
  0x2a   :  { %1521 = vmatmul.msk.bf16.gmra.mxu2 %vm631_vm0, %v1194_v35  ;;  %v1235_v35 = vld [vmem:[%s2470_s0 + $0x9c] sm:$0xf0] }
  0x2b   :  { %1644 = vmatpush.bf16.msrb.mxu3 %v1629_v10  ;;  %v1437_v10 = vld [vmem:[%s2470_s0 + $0x228] sm:$0xf]  ;;  %v1238_v39 = vor.u32 %v1562_v34, %v1235_v35 }
  0x2c   :  { %v1438_v15 = vor.u32 %v1614_v11, %v1437_v10  ;;  %v1289_v10 = vld [vmem:[%s2470_s0 + $0xf8] sm:$0xf]  ;;  %v1576_v11 = vld [vmem:[%s2470_s0 + $0x100] sm:$0xf0] }
  0x2f   :  { %1645 = vmatpush.bf16.msrb.mxu3 %v1628_v12  ;;  %v1556_v12 = vld [vmem:[%s2470_s0 + $0x64] sm:$0xf] }
  0x31   :  { %720 = vmatmul.bf16.gmra.mxu0 %v1174_v42  ;;  %v1570_v42 = vld [vmem:[%s2470_s0 + $0xd0] sm:$0xf0] }
  0x32   :  { %815 = vmatmul.bf16.gmra.mxu3 %v1402_v43  ;;  %853 = vmatmul.bf16.gmra.mxu1 %v1178_v44  ;;  %v1266_v43 = vor.u32 %v1570_v42, %v1265_v41  ;;  %v1245_v44 = vld [vmem:[%s2470_s0 + $0xa8] sm:$0xf] }
  0x33   :  { %1646 = vmatpush.bf16.msrb.mxu3 %v1627_v14  ;;  %v1210_v14 = vor.u32 %v1557_v9, %v1209_v8  ;;  %v1246_v51 = vor.u32 %v1566_v45, %v1245_v44 }
  0x37   :  { %1647 = vmatpush.bf16.msrb.mxu3 %v1626_v16  ;;  %v1214_v16 = vor.u32 %v1556_v12, %v1211_v13 }
  0x3a   :  { %1522 = vmatmul.msk.bf16.gmra.mxu2 %vm631_vm0, %v1206_v47  ;;  %v1247_v47 = vld [vmem:[%s2470_s0 + $0xb4] sm:$0xf0] }
  0x3b   :  { %1648 = vmatpush.bf16.msrb.mxu3 %v1625_v21  ;;  %v1221_v21 = vld [vmem:[%s2470_s0 + $0x78] sm:$0xf]  ;;  %v1250_v52 = vor.u32 %v1565_v46, %v1247_v47  ;;  %v1281_v46 = vld [vmem:[%s2470_s0 + $0xf0] sm:$0xf]  ;;  %v1575_v47 = vld [vmem:[%s2470_s0 + $0xf8] sm:$0xf0] }
  0x3c   :  { %v1222_v26 = vor.u32 %v1560_v22, %v1221_v21  ;;  %v1572_v21 = vld [vmem:[%s2470_s0 + $0xe0] sm:$0xf0]  ;;  %v1571_v22 = vld [vmem:[%s2470_s0 + $0xdc] sm:$0xf] }
  0x3f   :  { %1649 = vmatpush.bf16.msrb.mxu3 %v1624_v23  ;;  %v395_v23 = vunpack.c.l.b16 %v1876_v20 }
  0x41   :  { %725 = vmatmul.bf16.gmra.mxu0 %v1186_v54  ;;  %v470_v27 = vpack.c.b16 %v395_v23, %v395_v23  ;;  %v1277_v54 = vld [vmem:[%s2470_s0 + $0xe0] sm:$0xf] }
  0x42   :  { %820 = vmatmul.bf16.gmra.mxu3 %v1414_v55  ;;  %858 = vmatmul.bf16.gmra.mxu1 %v1190_v56  ;;  %v1573_v55 = vld [vmem:[%s2470_s0 + $0xe8] sm:$0xf0] }
  0x43   :  { %1650 = vmatpush.bf16.msra.mxu3 %v1682_v2  ;;  %v1198_v2 = vor.u32 %v1554_v61, %v1197_v60  ;;  %v1278_v57 = vor.u32 %v1573_v55, %v1277_v54  ;;  %v1569_v60 = vld [vmem:[%s2470_s0 + $0xc8] sm:$0xf0]  ;;  %v1568_v61 = vld [vmem:[%s2470_s0 + $0xc4] sm:$0xf]  ;;  %v1282_v55 = vor.u32 %v1575_v47, %v1281_v46 }
  0x47   :  { %1651 = vmatpush.bf16.msra.mxu3 %v1694_v5  ;;  %v1229_v5 = vld [vmem:[%s2470_s0 + $0x80] sm:$0xf] }
  0x48   :  { %v1230_v7 = vor.u32 %v1561_v6, %v1229_v5  ;;  %v1418_v5 = vor.u32 %v1607_v63, %v1415_v0  ;;  %v1313_v0 = vld [vmem:[%s2470_s0 + $0x128] sm:$0xf] }
  0x4a   :  { %1523 = vmatmul.msk.bf16.gmra.mxu2 %vm631_vm0, %v1218_v59  ;;  %v1257_v59 = vld [vmem:[%s2470_s0 + $0xc0] sm:$0xf] }
  0x51   :  { %730 = vmatmul.bf16.gmra.mxu0 %v1198_v2  ;;  %v1258_v2 = vor.u32 %v1569_v60, %v1257_v59 }
  0x52   :  { %825 = vmatmul.bf16.gmra.mxu3 %v1426_v3  ;;  %863 = vmatmul.bf16.gmra.mxu1 %v1202_v4  ;;  %v1262_v4 = vor.u32 %v1568_v61, %v1259_v62 }
  0x5a   :  { %1524 = vmatmul.msk.bf16.gmra.mxu2 %vm631_vm0, %v1230_v7 }
  0x61   :  { %735 = vmatmul.bf16.gmra.mxu0 %v1210_v14 }
  0x62   :  { %830 = vmatmul.bf16.gmra.mxu3 %v1438_v15  ;;  %868 = vmatmul.bf16.gmra.mxu1 %v1214_v16  ;;  %v1290_v15 = vor.u32 %v1576_v11, %v1289_v10  ;;  %v1578_v10 = vld [vmem:[%s2470_s0 + $0x110] sm:$0xf0]  ;;  %v396_v11 = vunpack.c.h.b16 %v1876_v20 }
  0x64   :  { %v471_v20 = vpack.c.b16 %v396_v11, %v396_v11 }
  0x6a   :  { %1525 = vmatmul.msk.bf16.gmra.mxu2 %vm631_vm0, %v1242_v19  ;;  %v1269_v19 = vld [vmem:[%s2470_s0 + $0xd8] sm:$0xf] }
  0x6b   :  { %v1270_v29 = vor.u32 %v1572_v21, %v1269_v19 }
  0x71   :  { %740 = vmatmul.bf16.gmra.mxu0 %v1222_v26  ;;  %v1427_v26 = vld [vmem:[%s2470_s0 + $0x21c] sm:$0xf0] }
  0x72   :  { %835 = vmatmul.bf16.gmra.mxu3 %v470_v27  ;;  %873 = vmatmul.bf16.gmra.mxu1 %v1226_v28  ;;  %v1430_v32 = vor.u32 %v1610_v25, %v1427_v26  ;;  %v1325_v26 = vld [vmem:[%s2470_s0 + $0x140] sm:$0xf] }
  0x7a   :  { %1526 = vmatmul.msk.bf16.gmra.mxu2 %vm631_vm0, %v1254_v31  ;;  %v1274_v31 = vor.u32 %v1571_v22, %v1271_v24 }
  0x81   :  { %745 = vmatmul.bf16.gmra.mxu0 %v1234_v38  ;;  %v1579_v38 = vld [vmem:[%s2470_s0 + $0x118] sm:$0xf0] }
  0x82   :  { %878 = vmatmul.bf16.gmra.mxu1 %v1238_v39  ;;  %943 = vmatmul.bf16.vlgmr.msrb.gmra.mxu3 %v1394_v40  ;;  %v1302_v42 = vor.u32 %v1579_v38, %v1301_v37  ;;  %v1581_v37 = vld [vmem:[%s2470_s0 + $0x128] sm:$0xf0]  ;;  %v1580_v38 = vld [vmem:[%s2470_s0 + $0x124] sm:$0xf] }
  0x8a   :  { %1527 = vmatmul.msk.bf16.gmra.mxu2 %vm631_vm0, %v1266_v43 }
  0x8d   :  { %v982_v50 = vpop.f32.mrf.mxu2 }
  0x91   :  { %750 = vmatmul.bf16.gmra.mxu0 %v1246_v51  ;;  %v1613_v51 = vld [vmem:[%s2470_s0 + $0x22c] sm:$0xf] }
  0x92   :  { %883 = vmatmul.bf16.gmra.mxu1 %v1250_v52  ;;  %948 = vmatmul.bf16.gmra.mxu3 %v1406_v53  ;;  %v1439_v52 = vld [vmem:[%s2470_s0 + $0x234] sm:$0xf0] }
  0x93   :  { %v1442_v59 = vor.u32 %v1613_v51, %v1439_v52 }
  0x95   :  { %v984_v56 = vpop.f32.mrf.mxu2 }
  0x9a   :  { %1528 = vmatmul.msk.bf16.gmra.mxu2 %vm631_vm0, %v1278_v57 }
  0x9d   :  { %v987_v1 = vpop.f32.mrf.mxu2 }
  0x9e   :  { %v716_v3 = vpop.f32.mrf.mxu0 }
  0x9f   :  { %v717_v6 = vadd.f32 %v1951_v58, %v716_v3  ;;  %v849_v7 = vpop.f32.mrf.mxu1 }
  0xa1   :  { %v850_v8 = vadd.f32 %v849_v7, %v717_v6  ;;  %755 = vmatmul.bf16.gmra.mxu0 %v1258_v2 }
  0xa2   :  { %888 = vmatmul.bf16.gmra.mxu1 %v1262_v4  ;;  %953 = vmatmul.bf16.gmra.mxu3 %v1418_v5 }
  0xa3   :  { %v983_v9 = vadd.f32 %v982_v50, %v850_v8  ;;  %v1283_v50 = vld [vmem:[%s2470_s0 + $0xfc] sm:$0xf0] }
  0xa4   :  { %v1286_v57 = vor.u32 %v1574_v48, %v1283_v50 }
  0xa5   :  { %1106 = vst [vmem:[%s2472_s3] sm:$0xff] %v983_v9  ;;  %v1982_v12 = vpop.f32.mrf.mxu3  ;;  %v989_v13 = vpop.f32.mrf.mxu2  ;;  %v1293_v9 = vld [vmem:[%s2470_s0 + $0x108] sm:$0xf] }
  0xa6   :  { %v718_v14 = vpop.f32.mrf.mxu0 }
  0xa7   :  { %v719_v16 = vadd.f32 %v1951_v58, %v718_v14  ;;  %v851_v17 = vpop.f32.mrf.mxu1  ;;  %v1577_v14 = vld [vmem:[%s2470_s0 + $0x10c] sm:$0xf] }
  0xa9   :  { %v852_v18 = vadd.f32 %v851_v17, %v719_v16 }
  0xaa   :  { %1529 = vmatmul.msk.bf16.gmra.mxu2 %vm631_vm0, %v1290_v15  ;;  %v1295_v15 = vld [vmem:[%s2470_s0 + $0x114] sm:$0xf0] }
  0xab   :  { %v985_v23 = vadd.f32 %v984_v56, %v852_v18  ;;  %v1294_v18 = vor.u32 %v1578_v10, %v1293_v9  ;;  %v1298_v21 = vor.u32 %v1577_v14, %v1295_v15 }
  0xad   :  { %1107 = vst [vmem:[%s2472_s3 + $0x8] sm:$0xff] %v985_v23  ;;  %v2007_v27 = vpop.f32.mrf.mxu3  ;;  %v992_v28 = vpop.f32.mrf.mxu2 }
  0xae   :  { %v721_v30 = vpop.f32.mrf.mxu0 }
  0xaf   :  { %v722_v33 = vadd.f32 %v1951_v58, %v721_v30  ;;  %v854_v34 = vpop.f32.mrf.mxu1 }
  0xb1   :  { %v855_v35 = vadd.f32 %v854_v34, %v722_v33  ;;  %760 = vmatmul.bf16.gmra.mxu0 %v1270_v29 }
  0xb2   :  { %893 = vmatmul.bf16.gmra.mxu1 %v1274_v31  ;;  %958 = vmatmul.bf16.gmra.mxu3 %v1430_v32 }
  0xb3   :  { %v988_v36 = vadd.f32 %v987_v1, %v855_v35  ;;  %v1582_v1 = vld [vmem:[%s2470_s0 + $0x130] sm:$0xf0] }
  0xb4   :  { %v1314_v5 = vor.u32 %v1582_v1, %v1313_v0  ;;  %v1317_v1 = vld [vmem:[%s2470_s0 + $0x138] sm:$0xf] }
  0xb5   :  { %1108 = vst [vmem:[%s2472_s3 + $0x10] sm:$0xff] %v988_v36  ;;  %v2019_v39 = vpop.f32.mrf.mxu3  ;;  %v994_v40 = vpop.f32.mrf.mxu2  ;;  %v1305_v36 = vld [vmem:[%s2470_s0 + $0x120] sm:$0xf] }
  0xb6   :  { %v723_v41 = vpop.f32.mrf.mxu0  ;;  %v1306_v46 = vor.u32 %v1581_v37, %v1305_v36  ;;  %v1331_v36 = vld [vmem:[%s2470_s0 + $0x15c] sm:$0xf0]  ;;  %v1433_v37 = vld [vmem:[%s2470_s0 + $0x218] sm:$0xf] }
  0xb7   :  { %v724_v43 = vadd.f32 %v1951_v58, %v723_v41  ;;  %v856_v44 = vpop.f32.mrf.mxu1  ;;  %v1307_v41 = vld [vmem:[%s2470_s0 + $0x12c] sm:$0xf0] }
  0xb8   :  { %v1310_v48 = vor.u32 %v1580_v38, %v1307_v41  ;;  %v1612_v38 = vld [vmem:[%s2470_s0 + $0x220] sm:$0xf0] }
  0xb9   :  { %v857_v45 = vadd.f32 %v856_v44, %v724_v43  ;;  %v1606_v43 = vld [vmem:[%s2470_s0 + $0x1f0] sm:$0xf0] }
  0xba   :  { %1530 = vmatmul.msk.bf16.gmra.mxu2 %vm631_vm0, %v1302_v42  ;;  %v1409_v42 = vld [vmem:[%s2470_s0 + $0x1e8] sm:$0xf] }
  0xbb   :  { %v990_v49 = vadd.f32 %v989_v13, %v857_v45 }
  0xbd   :  { %1109 = vst [vmem:[%s2472_s3 + $0x18] sm:$0xff] %v990_v49  ;;  %v2044_v53 = vpop.f32.mrf.mxu3  ;;  %v997_v54 = vpop.f32.mrf.mxu2  ;;  %v1410_v49 = vor.u32 %v1606_v43, %v1409_v42 }
  0xbe   :  { %v726_v56 = vpop.f32.mrf.mxu0 }
  0xbf   :  { %v727_v60 = vadd.f32 %v1951_v58, %v726_v56  ;;  %v859_v61 = vpop.f32.mrf.mxu1  ;;  %v1588_v56 = vld [vmem:[%s2470_s0 + $0x160] sm:$0xf0] }
  0xc1   :  { %v860_v62 = vadd.f32 %v859_v61, %v727_v60  ;;  %765 = vmatmul.bf16.gmra.mxu0 %v1282_v55  ;;  %v1337_v55 = vld [vmem:[%s2470_s0 + $0x158] sm:$0xf] }
  0xc2   :  { %898 = vmatmul.bf16.gmra.mxu1 %v1286_v57  ;;  %963 = vmatmul.bf16.gmra.mxu3 %v1442_v59  ;;  %v1338_v61 = vor.u32 %v1588_v56, %v1337_v55 }
  0xc3   :  { %v993_v63 = vadd.f32 %v992_v28, %v860_v62  ;;  %v1585_v28 = vld [vmem:[%s2470_s0 + $0x148] sm:$0xf0] }
  0xc4   :  { %v1326_v32 = vor.u32 %v1585_v28, %v1325_v26 }
  0xc5   :  { %1110 = vst [vmem:[%s2472_s3 + $0x20] sm:$0xff] %v993_v63  ;;  %v2056_v2 = vpop.f32.mrf.mxu3  ;;  %v999_v3 = vpop.f32.mrf.mxu2 }
  0xc6   :  { %v728_v4 = vpop.f32.mrf.mxu0 }
  0xc7   :  { %v729_v6 = vadd.f32 %v1951_v58, %v728_v4  ;;  %v861_v7 = vpop.f32.mrf.mxu1  ;;  %v1583_v4 = vld [vmem:[%s2470_s0 + $0x13c] sm:$0xf] }
  0xc9   :  { %v862_v8 = vadd.f32 %v861_v7, %v729_v6  ;;  %v1319_v6 = vld [vmem:[%s2470_s0 + $0x144] sm:$0xf0]  ;;  %v1421_v7 = vld [vmem:[%s2470_s0 + $0x200] sm:$0xf] }
  0xca   :  { %1531 = vmatmul.msk.bf16.gmra.mxu2 %vm631_vm0, %v1314_v5  ;;  %v1322_v14 = vor.u32 %v1583_v4, %v1319_v6  ;;  %v1445_v6 = vld [vmem:[%s2470_s0 + $0x230] sm:$0xf] }
  0xcb   :  { %v995_v13 = vadd.f32 %v994_v40, %v862_v8  ;;  %v1609_v8 = vld [vmem:[%s2470_s0 + $0x208] sm:$0xf0] }
  0xcc   :  { %v1422_v15 = vor.u32 %v1609_v8, %v1421_v7  ;;  %v1615_v7 = vld [vmem:[%s2470_s0 + $0x238] sm:$0xf0]  ;;  %v814_v8 = vadd.f32 %v1951_v58, %v2007_v27 }
  0xcd   :  { %1111 = vst [vmem:[%s2472_s3 + $0x28] sm:$0xff] %v995_v13  ;;  %v2076_v16 = vpop.f32.mrf.mxu3  ;;  %v1002_v17 = vpop.f32.mrf.mxu2 }
  0xce   :  { %v731_v19 = vpop.f32.mrf.mxu0 }
  0xcf   :  { %v732_v22 = vadd.f32 %v1951_v58, %v731_v19  ;;  %v864_v23 = vpop.f32.mrf.mxu1 }
  0xd1   :  { %v865_v24 = vadd.f32 %v864_v23, %v732_v22  ;;  %770 = vmatmul.bf16.gmra.mxu0 %v1294_v18  ;;  %v1591_v22 = vld [vmem:[%s2470_s0 + $0x178] sm:$0xf0] }
  0xd2   :  { %903 = vmatmul.bf16.gmra.mxu1 %v1298_v21  ;;  %968 = vmatmul.bf16.gmra.mxu3 %v471_v20  ;;  %v1349_v20 = vld [vmem:[%s2470_s0 + $0x170] sm:$0xf] }
  0xd3   :  { %v998_v25 = vadd.f32 %v997_v54, %v865_v24  ;;  %v1350_v26 = vor.u32 %v1591_v22, %v1349_v20  ;;  %v1373_v22 = vld [vmem:[%s2470_s0 + $0x1a0] sm:$0xf] }
  0xd5   :  { %1112 = vst [vmem:[%s2472_s3 + $0x30] sm:$0xff] %v998_v25  ;;  %v2088_v29 = vpop.f32.mrf.mxu3  ;;  %v1004_v30 = vpop.f32.mrf.mxu2 }
  0xd6   :  { %v733_v31 = vpop.f32.mrf.mxu0 }
  0xd7   :  { %v734_v33 = vadd.f32 %v1951_v58, %v733_v31  ;;  %v866_v34 = vpop.f32.mrf.mxu1 }
  0xd9   :  { %v867_v35 = vadd.f32 %v866_v34, %v734_v33  ;;  %v1587_v33 = vld [vmem:[%s2470_s0 + $0x158] sm:$0xf0]  ;;  %v1586_v34 = vld [vmem:[%s2470_s0 + $0x154] sm:$0xf] }
  0xda   :  { %1532 = vmatmul.msk.bf16.gmra.mxu2 %vm631_vm0, %v1326_v32  ;;  %v1329_v32 = vld [vmem:[%s2470_s0 + $0x150] sm:$0xf] }
  0xdb   :  { %v1000_v40 = vadd.f32 %v999_v3, %v867_v35  ;;  %v1584_v3 = vld [vmem:[%s2470_s0 + $0x140] sm:$0xf0]  ;;  %v1330_v42 = vor.u32 %v1587_v33, %v1329_v32 }
  0xdc   :  { %v1318_v11 = vor.u32 %v1584_v3, %v1317_v1  ;;  %v1590_v1 = vld [vmem:[%s2470_s0 + $0x170] sm:$0xf0]  ;;  %v1589_v3 = vld [vmem:[%s2470_s0 + $0x16c] sm:$0xf] }
  0xdd   :  { %1113 = vst [vmem:[%s2472_s3 + $0x38] sm:$0xff] %v1000_v40  ;;  %v2113_v44 = vpop.f32.mrf.mxu3  ;;  %v1007_v45 = vpop.f32.mrf.mxu2 }
  0xde   :  { %v736_v47 = vpop.f32.mrf.mxu0 }
  0xdf   :  { %v737_v50 = vadd.f32 %v1951_v58, %v736_v47  ;;  %v869_v51 = vpop.f32.mrf.mxu1 }
  0xe1   :  { %v870_v52 = vadd.f32 %v869_v51, %v737_v50  ;;  %775 = vmatmul.bf16.gmra.mxu0 %v1306_v46  ;;  %v1434_v46 = vor.u32 %v1612_v38, %v1433_v37  ;;  %v1361_v51 = vld [vmem:[%s2470_s0 + $0x188] sm:$0xf]  ;;  %v1593_v37 = vld [vmem:[%s2470_s0 + $0x188] sm:$0xf0] }
  0xe2   :  { %908 = vmatmul.bf16.gmra.mxu1 %v1310_v48  ;;  %1539 = vmatmul.msk.bf16.vlgmr.msra.gmra.mxu3 %vm631_vm0, %v1410_v49 }
  0xe3   :  { %v1003_v54 = vadd.f32 %v1002_v17, %v870_v52  ;;  %v1594_v52 = vld [vmem:[%s2470_s0 + $0x190] sm:$0xf0] }
  0xe5   :  { %1114 = vst [vmem:[%s2472_s3 + $0x40] sm:$0xff] %v1003_v54  ;;  %v2126_v57 = vpop.f32.mrf.mxu3  ;;  %v1009_v59 = vpop.f32.mrf.mxu2  ;;  %v812_v54 = vadd.f32 %v1951_v58, %v1982_v12  ;;  %v1341_v12 = vld [vmem:[%s2470_s0 + $0x168] sm:$0xf] }
  0xe6   :  { %v738_v60 = vpop.f32.mrf.mxu0 }
  0xe7   :  { %v739_v62 = vadd.f32 %v1951_v58, %v738_v60  ;;  %v871_v63 = vpop.f32.mrf.mxu1 }
  0xe9   :  { %v872_v0 = vadd.f32 %v871_v63, %v739_v62 }
  0xea   :  { %1533 = vmatmul.msk.bf16.gmra.mxu2 %vm631_vm0, %v1338_v61  ;;  %v1362_v61 = vor.u32 %v1594_v52, %v1361_v51 }
  0xeb   :  { %v1005_v5 = vadd.f32 %v1004_v30, %v872_v0 }
  0xed   :  { %1115 = vst [vmem:[%s2472_s3 + $0x48] sm:$0xff] %v1005_v5  ;;  %v2151_v9 = vpop.f32.mrf.mxu3  ;;  %v1012_v10 = vpop.f32.mrf.mxu2  ;;  %v1343_v5 = vld [vmem:[%s2470_s0 + $0x174] sm:$0xf0] }
  0xee   :  { %v741_v13 = vpop.f32.mrf.mxu0 }
  0xef   :  { %v742_v17 = vadd.f32 %v1951_v58, %v741_v13  ;;  %v874_v18 = vpop.f32.mrf.mxu1  ;;  %v1342_v13 = vor.u32 %v1590_v1, %v1341_v12 }
  0xf1   :  { %v875_v19 = vadd.f32 %v874_v18, %v742_v17  ;;  %780 = vmatmul.bf16.gmra.mxu0 %v1318_v11  ;;  %v1346_v17 = vor.u32 %v1589_v3, %v1343_v5  ;;  %v1446_v18 = vor.u32 %v1615_v7, %v1445_v6  ;;  %v1596_v6 = vld [vmem:[%s2470_s0 + $0x1a0] sm:$0xf0] }
  0xf2   :  { %913 = vmatmul.bf16.gmra.mxu1 %v1322_v14  ;;  %1540 = vmatmul.msk.bf16.gmra.mxu3 %vm631_vm0, %v1422_v15 }
  0xf3   :  { %v1008_v21 = vadd.f32 %v1007_v45, %v875_v19  ;;  %v1334_v45 = vor.u32 %v1586_v34, %v1331_v36 }
  0xf5   :  { %1116 = vst [vmem:[%s2472_s3 + $0x50] sm:$0xff] %v1008_v21  ;;  %v2164_v23 = vpop.f32.mrf.mxu3  ;;  %v1014_v24 = vpop.f32.mrf.mxu2 }
  0xf6   :  { %v743_v25 = vpop.f32.mrf.mxu0 }
  0xf7   :  { %v744_v28 = vadd.f32 %v1951_v58, %v743_v25  ;;  %v876_v30 = vpop.f32.mrf.mxu1  ;;  %v817_v25 = vadd.f32 %v1951_v58, %v2019_v39  ;;  %v1353_v39 = vld [vmem:[%s2470_s0 + $0x180] sm:$0xf] }
  0xf9   :  { %v877_v31 = vadd.f32 %v876_v30, %v744_v28 }
  0xfa   :  { %1534 = vmatmul.msk.bf16.gmra.mxu2 %vm631_vm0, %v1350_v26 }
  0xfb   :  { %v1010_v35 = vadd.f32 %v1009_v59, %v877_v31 }
  0xfd   :  { %1117 = vst [vmem:[%s2472_s3 + $0x58] sm:$0xff] %v1010_v35  ;;  %v838_v40 = vpop.f32.mrf.mxu3  ;;  %v1017_v41 = vpop.f32.mrf.mxu2  ;;  %v112_v35 = vld [vmem:[%s2470_s0 + $0x248] sm:$0xf] }
  0xfe   :  { %v746_v43 = vpop.f32.mrf.mxu0  ;;  %v397_v38 = vunpack.c.l.b16 %v112_v35 }
  0xff   :  { %v747_v47 = vadd.f32 %v1951_v58, %v746_v43  ;;  %v879_v48 = vpop.f32.mrf.mxu1  ;;  %v819_v43 = vadd.f32 %v1951_v58, %v2044_v53 }
 0x100   :  { %v472_v51 = vpack.c.b16 %v397_v38, %v397_v38 }
 0x101   :  { %v880_v49 = vadd.f32 %v879_v48, %v747_v47  ;;  %785 = vmatmul.bf16.gmra.mxu0 %v1330_v42  ;;  %v1355_v42 = vld [vmem:[%s2470_s0 + $0x18c] sm:$0xf0]  ;;  %v1354_v47 = vor.u32 %v1593_v37, %v1353_v39  ;;  %v1599_v37 = vld [vmem:[%s2470_s0 + $0x1b8] sm:$0xf0] }
 0x102   :  { %918 = vmatmul.bf16.gmra.mxu1 %v1334_v45  ;;  %1541 = vmatmul.msk.bf16.gmra.mxu3 %vm631_vm0, %v1434_v46 }
 0x103   :  { %v1013_v50 = vadd.f32 %v1012_v10, %v880_v49 }
 0x105   :  { %1118 = vst [vmem:[%s2472_s3 + $0x60] sm:$0xff] %v1013_v50  ;;  %v944_v55 = vpop.f32.mrf.mxu3  ;;  %v1019_v56 = vpop.f32.mrf.mxu2 }
 0x106   :  { %v2202_v59 = vadd.f32 %v944_v55, %v812_v54  ;;  %v748_v60 = vpop.f32.mrf.mxu0 }
 0x107   :  { %v749_v62 = vadd.f32 %v1951_v58, %v748_v60  ;;  %v881_v63 = vpop.f32.mrf.mxu1  ;;  %v1600_v60 = vld [vmem:[%s2470_s0 + $0x1c0] sm:$0xf0] }
 0x109   :  { %v882_v0 = vadd.f32 %v881_v63, %v749_v62 }
 0x10a   :  { %1535 = vmatmul.msk.bf16.gmra.mxu2 %vm631_vm0, %v1362_v61  ;;  %v822_v61 = vadd.f32 %v1951_v58, %v2056_v2  ;;  %v1365_v2 = vld [vmem:[%s2470_s0 + $0x198] sm:$0xf] }
 0x10b   :  { %v1015_v4 = vadd.f32 %v1014_v24, %v882_v0  ;;  %v1597_v24 = vld [vmem:[%s2470_s0 + $0x1a8] sm:$0xf0] }
 0x10c   :  { %v1374_v32 = vor.u32 %v1597_v24, %v1373_v22 }
 0x10d   :  { %1119 = vst [vmem:[%s2472_s3 + $0x68] sm:$0xff] %v1015_v4  ;;  %v946_v10 = vpop.f32.mrf.mxu3  ;;  %v1022_v11 = vpop.f32.mrf.mxu2 }
 0x10e   :  { %v2229_v14 = vadd.f32 %v946_v10, %v814_v8  ;;  %v751_v15 = vpop.f32.mrf.mxu0  ;;  %v1595_v8 = vld [vmem:[%s2470_s0 + $0x19c] sm:$0xf]  ;;  %v1367_v10 = vld [vmem:[%s2470_s0 + $0x1a4] sm:$0xf0] }
 0x10f   :  { %v752_v19 = vadd.f32 %v1951_v58, %v751_v15  ;;  %v884_v21 = vpop.f32.mrf.mxu1 }
 0x111   :  { %v885_v20 = vadd.f32 %v884_v21, %v752_v19  ;;  %790 = vmatmul.bf16.gmra.mxu0 %v1342_v13  ;;  %v1370_v21 = vor.u32 %v1595_v8, %v1367_v10 }
 0x112   :  { %923 = vmatmul.bf16.gmra.mxu1 %v1346_v17  ;;  %1542 = vmatmul.msk.bf16.gmra.mxu3 %vm631_vm0, %v1446_v18  ;;  %v1366_v17 = vor.u32 %v1596_v6, %v1365_v2 }
 0x113   :  { %v1018_v27 = vadd.f32 %v1017_v41, %v885_v20  ;;  %v1592_v41 = vld [vmem:[%s2470_s0 + $0x184] sm:$0xf] }
 0x114   :  { %v1358_v50 = vor.u32 %v1592_v41, %v1355_v42  ;;  %v1379_v41 = vld [vmem:[%s2470_s0 + $0x1bc] sm:$0xf0]  ;;  %v829_v42 = vadd.f32 %v1951_v58, %v2113_v44  ;;  %v832_v44 = vadd.f32 %v1951_v58, %v2126_v57 }
 0x115   :  { %1120 = vst [vmem:[%s2472_s3 + $0x70] sm:$0xff] %v1018_v27  ;;  %v949_v26 = vpop.f32.mrf.mxu3  ;;  %v1024_v28 = vpop.f32.mrf.mxu2 }
 0x116   :  { %v2244_v30 = vadd.f32 %v949_v26, %v817_v25  ;;  %v753_v31 = vpop.f32.mrf.mxu0  ;;  %v1603_v25 = vld [vmem:[%s2470_s0 + $0x1d8] sm:$0xf0]  ;;  %v827_v26 = vadd.f32 %v1951_v58, %v2088_v29  ;;  %v1377_v29 = vld [vmem:[%s2470_s0 + $0x1b0] sm:$0xf] }
 0x117   :  { %v754_v33 = vadd.f32 %v1951_v58, %v753_v31  ;;  %v886_v34 = vpop.f32.mrf.mxu1 }
 0x119   :  { %v887_v36 = vadd.f32 %v886_v34, %v754_v33 }
 0x11a   :  { %1536 = vmatmul.msk.bf16.gmra.mxu2 %vm631_vm0, %v1374_v32 }
 0x11b   :  { %v1020_v40 = vadd.f32 %v1019_v56, %v887_v36  ;;  %v1385_v56 = vld [vmem:[%s2470_s0 + $0x1b8] sm:$0xf] }
 0x11c   :  { %v1386_v1 = vor.u32 %v1600_v60, %v1385_v56 }
 0x11d   :  { %1121 = vst [vmem:[%s2472_s3 + $0x78] sm:$0xff] %v1020_v40  ;;  %v951_v45 = vpop.f32.mrf.mxu3  ;;  %v1027_v46 = vpop.f32.mrf.mxu2  ;;  %v1598_v40 = vld [vmem:[%s2470_s0 + $0x1b4] sm:$0xf] }
 0x11e   :  { %v2268_v48 = vadd.f32 %v951_v45, %v819_v43  ;;  %v756_v49 = vpop.f32.mrf.mxu0 }
 0x11f   :  { %v757_v52 = vadd.f32 %v1951_v58, %v756_v49  ;;  %v889_v54 = vpop.f32.mrf.mxu1 }
 0x121   :  { %v890_v55 = vadd.f32 %v889_v54, %v757_v52  ;;  %795 = vmatmul.bf16.gmra.mxu0 %v1354_v47 }
 0x122   :  { %928 = vmatmul.bf16.gmra.mxu1 %v1358_v50  ;;  %1543 = vmatmul.msk.bf16.gmra.mxu3 %vm631_vm0, %v472_v51  ;;  %v1382_v50 = vor.u32 %v1598_v40, %v1379_v41 }
 0x123   :  { %v1023_v53 = vadd.f32 %v1022_v11, %v890_v55  ;;  %v824_v11 = vadd.f32 %v1951_v58, %v2076_v16  ;;  %v1397_v16 = vld [vmem:[%s2470_s0 + $0x1d0] sm:$0xf] }
 0x124   :  { %v1398_v34 = vor.u32 %v1603_v25, %v1397_v16 }
 0x125   :  { %1122 = vst [vmem:[%s2472_s3 + $0x80] sm:$0xff] %v1023_v53  ;;  %v954_v62 = vpop.f32.mrf.mxu3  ;;  %v1029_v63 = vpop.f32.mrf.mxu2 }
 0x126   :  { %v2283_v0 = vadd.f32 %v954_v62, %v822_v61  ;;  %v758_v12 = vpop.f32.mrf.mxu0 }
 0x127   :  { %v759_v3 = vadd.f32 %v1951_v58, %v758_v12  ;;  %v891_v4 = vpop.f32.mrf.mxu1 }
 0x129   :  { %v892_v5 = vadd.f32 %v891_v4, %v759_v3  ;;  %v834_v3 = vadd.f32 %v1951_v58, %v2151_v9 }
 0x12a   :  { %1537 = vmatmul.msk.bf16.gmra.mxu2 %vm631_vm0, %v1386_v1 }
 0x12b   :  { %v1025_v7 = vadd.f32 %v1024_v28, %v892_v5 }
 0x12d   :  { %1123 = vst [vmem:[%s2472_s3 + $0x88] sm:$0xff] %v1025_v7  ;;  %v956_v13 = vpop.f32.mrf.mxu3  ;;  %v1032_v15 = vpop.f32.mrf.mxu2 }
 0x12e   :  { %v2304_v18 = vadd.f32 %v956_v13, %v824_v11  ;;  %v761_v19 = vpop.f32.mrf.mxu0  ;;  %v837_v11 = vadd.f32 %v1951_v58, %v2164_v23 }
 0x12f   :  { %v762_v20 = vadd.f32 %v1951_v58, %v761_v19  ;;  %v894_v27 = vpop.f32.mrf.mxu1 }
 0x131   :  { %v895_v22 = vadd.f32 %v894_v27, %v762_v20  ;;  %800 = vmatmul.bf16.gmra.mxu0 %v1366_v17 }
 0x132   :  { %933 = vmatmul.bf16.gmra.mxu1 %v1370_v21 }
 0x133   :  { %v1028_v24 = vadd.f32 %v1027_v46, %v895_v22  ;;  %v1378_v46 = vor.u32 %v1599_v37, %v1377_v29 }
 0x135   :  { %1124 = vst [vmem:[%s2472_s3 + $0x90] sm:$0xff] %v1028_v24  ;;  %v959_v28 = vpop.f32.mrf.mxu3  ;;  %v1034_v31 = vpop.f32.mrf.mxu2 }
 0x136   :  { %v2318_v32 = vadd.f32 %v959_v28, %v827_v26  ;;  %v763_v33 = vpop.f32.mrf.mxu0 }
 0x137   :  { %v764_v35 = vadd.f32 %v1951_v58, %v763_v33  ;;  %v896_v36 = vpop.f32.mrf.mxu1 }
 0x139   :  { %v897_v39 = vadd.f32 %v896_v36, %v764_v35 }
 0x13a   :  { %1538 = vmatmul.msk.bf16.gmra.mxu2 %vm631_vm0, %v1398_v34 }
 0x13b   :  { %v1030_v38 = vadd.f32 %v1029_v63, %v897_v39 }
 0x13d   :  { %1125 = vst [vmem:[%s2472_s3 + $0x98] sm:$0xff] %v1030_v38  ;;  %v961_v43 = vpop.f32.mrf.mxu3  ;;  %v1037_v45 = vpop.f32.mrf.mxu2 }
 0x13e   :  { %v2339_v47 = vadd.f32 %v961_v43, %v829_v42  ;;  %v766_v49 = vpop.f32.mrf.mxu0 }
 0x13f   :  { %v767_v51 = vadd.f32 %v1951_v58, %v766_v49  ;;  %v899_v52 = vpop.f32.mrf.mxu1 }
 0x141   :  { %v900_v54 = vadd.f32 %v899_v52, %v767_v51  ;;  %805 = vmatmul.bf16.gmra.mxu0 %v1378_v46 }
 0x142   :  { %938 = vmatmul.bf16.gmra.mxu1 %v1382_v50 }
 0x143   :  { %v1033_v55 = vadd.f32 %v1032_v15, %v900_v54 }
 0x145   :  { %1126 = vst [vmem:[%s2472_s3 + $0xa0] sm:$0xff] %v1033_v55  ;;  %v964_v53 = vpop.f32.mrf.mxu3  ;;  %v1039_v56 = vpop.f32.mrf.mxu2 }
 0x146   :  { %v2347_v60 = vadd.f32 %v964_v53, %v832_v44  ;;  %v768_v61 = vpop.f32.mrf.mxu0 }
 0x147   :  { %v769_v62 = vadd.f32 %v1951_v58, %v768_v61  ;;  %v901_v63 = vpop.f32.mrf.mxu1 }
 0x149   :  { %v902_v12 = vadd.f32 %v901_v63, %v769_v62 }
 0x14b   :  { %v1035_v1 = vadd.f32 %v1034_v31, %v902_v12 }
 0x14d   :  { %1127 = vst [vmem:[%s2472_s3 + $0xa8] sm:$0xff] %v1035_v1  ;;  %v966_v57 = vpop.f32.mrf.mxu3  ;;  %v1042_v4 = vpop.f32.mrf.mxu2 }
 0x14e   :  { %v2355_v5 = vadd.f32 %v966_v57, %v834_v3  ;;  %v771_v2 = vpop.f32.mrf.mxu0 }
 0x14f   :  { %v772_v6 = vadd.f32 %v1951_v58, %v771_v2  ;;  %v904_v7 = vpop.f32.mrf.mxu1 }
 0x151   :  { %v905_v8 = vadd.f32 %v904_v7, %v772_v6 }
 0x153   :  { %v1038_v10 = vadd.f32 %v1037_v45, %v905_v8 }
 0x155   :  { %1128 = vst [vmem:[%s2472_s3 + $0xb0] sm:$0xff] %v1038_v10  ;;  %v969_v9 = vpop.f32.mrf.mxu3  ;;  %v1044_v13 = vpop.f32.mrf.mxu2 }
 0x156   :  { %v2363_v15 = vadd.f32 %v969_v9, %v837_v11  ;;  %v773_v17 = vpop.f32.mrf.mxu0 }
 0x157   :  { %v774_v19 = vadd.f32 %v1951_v58, %v773_v17  ;;  %v906_v21 = vpop.f32.mrf.mxu1 }
 0x159   :  { %v907_v20 = vadd.f32 %v906_v21, %v774_v19 }
 0x15b   :  { %v1040_v27 = vadd.f32 %v1039_v56, %v907_v20 }
 0x15d   :  { %1129 = vst [vmem:[%s2472_s3 + $0xb8] sm:$0xff] %v1040_v27  ;;  %v971_v22 = vpop.f32.mrf.mxu3  ;;  %v1047_v23 = vpop.f32.mrf.mxu2 }
 0x15e   :  { %v776_v24 = vpop.f32.mrf.mxu0 }
 0x15f   :  { %v777_v16 = vadd.f32 %v1951_v58, %v776_v24  ;;  %v909_v25 = vpop.f32.mrf.mxu1 }
 0x161   :  { %v910_v26 = vadd.f32 %v909_v25, %v777_v16 }
 0x163   :  { %v1043_v28 = vadd.f32 %v1042_v4, %v910_v26 }
 0x165   :  { %1130 = vst [vmem:[%s2472_s3 + $0xc0] sm:$0xff] %v1043_v28  ;;  %v1049_v31 = vpop.f32.mrf.mxu2  ;;  %v1082_v33 = vpop.f32.mrf.mxu3 }
 0x166   :  { %v1083_v34 = vadd.f32 %v1082_v33, %v2244_v30  ;;  %v778_v35 = vpop.f32.mrf.mxu0 }
 0x167   :  { %v779_v36 = vadd.f32 %v1951_v58, %v778_v35  ;;  %v911_v39 = vpop.f32.mrf.mxu1 }
 0x168   :  { %1146 = vst [vmem:[%s2472_s3 + $0x140] sm:$0xff] %v1083_v34 }
 0x169   :  { %v912_v29 = vadd.f32 %v911_v39, %v779_v36 }
 0x16b   :  { %v1045_v37 = vadd.f32 %v1044_v13, %v912_v29 }
 0x16d   :  { %1131 = vst [vmem:[%s2472_s3 + $0xc8] sm:$0xff] %v1045_v37  ;;  %v1052_v38 = vpop.f32.mrf.mxu2  ;;  %v1084_v40 = vpop.f32.mrf.mxu3 }
 0x16e   :  { %v1085_v41 = vadd.f32 %v1084_v40, %v2268_v48  ;;  %v781_v42 = vpop.f32.mrf.mxu0 }
 0x16f   :  { %v782_v30 = vadd.f32 %v1951_v58, %v781_v42  ;;  %v914_v43 = vpop.f32.mrf.mxu1 }
 0x170   :  { %1147 = vst [vmem:[%s2472_s3 + $0x148] sm:$0xff] %v1085_v41 }
 0x171   :  { %v915_v45 = vadd.f32 %v914_v43, %v782_v30 }
 0x173   :  { %v1048_v46 = vadd.f32 %v1047_v23, %v915_v45 }
 0x175   :  { %1132 = vst [vmem:[%s2472_s3 + $0xd0] sm:$0xff] %v1048_v46  ;;  %v1054_v49 = vpop.f32.mrf.mxu2  ;;  %v1087_v50 = vpop.f32.mrf.mxu3 }
 0x176   :  { %v1088_v51 = vadd.f32 %v1087_v50, %v2283_v0  ;;  %v783_v52 = vpop.f32.mrf.mxu0 }
 0x177   :  { %v784_v48 = vadd.f32 %v1951_v58, %v783_v52  ;;  %v916_v54 = vpop.f32.mrf.mxu1 }
 0x178   :  { %1148 = vst [vmem:[%s2472_s3 + $0x150] sm:$0xff] %v1088_v51 }
 0x179   :  { %v917_v55 = vadd.f32 %v916_v54, %v784_v48 }
 0x17b   :  { %v1050_v44 = vadd.f32 %v1049_v31, %v917_v55 }
 0x17d   :  { %1133 = vst [vmem:[%s2472_s3 + $0xd8] sm:$0xff] %v1050_v44  ;;  %v1057_v53 = vpop.f32.mrf.mxu2  ;;  %v1089_v56 = vpop.f32.mrf.mxu3 }
 0x17e   :  { %v1090_v61 = vadd.f32 %v1089_v56, %v2304_v18  ;;  %v786_v62 = vpop.f32.mrf.mxu0 }
 0x17f   :  { %v787_v0 = vadd.f32 %v1951_v58, %v786_v62  ;;  %v919_v63 = vpop.f32.mrf.mxu1 }
 0x180   :  { %1149 = vst [vmem:[%s2472_s3 + $0x158] sm:$0xff] %v1090_v61 }
 0x181   :  { %v920_v12 = vadd.f32 %v919_v63, %v787_v0 }
 0x183   :  { %v1053_v1 = vadd.f32 %v1052_v38, %v920_v12 }
 0x185   :  { %1134 = vst [vmem:[%s2472_s3 + $0xe0] sm:$0xff] %v1053_v1  ;;  %v1059_v3 = vpop.f32.mrf.mxu2  ;;  %v1092_v57 = vpop.f32.mrf.mxu3 }
 0x186   :  { %v1093_v4 = vadd.f32 %v1092_v57, %v2318_v32  ;;  %v788_v2 = vpop.f32.mrf.mxu0 }
 0x187   :  { %v789_v18 = vadd.f32 %v1951_v58, %v788_v2  ;;  %v921_v6 = vpop.f32.mrf.mxu1 }
 0x188   :  { %1150 = vst [vmem:[%s2472_s3 + $0x160] sm:$0xff] %v1093_v4 }
 0x189   :  { %v922_v7 = vadd.f32 %v921_v6, %v789_v18 }
 0x18b   :  { %v1055_v8 = vadd.f32 %v1054_v49, %v922_v7 }
 0x18d   :  { %1135 = vst [vmem:[%s2472_s3 + $0xe8] sm:$0xff] %v1055_v8  ;;  %v1062_v10 = vpop.f32.mrf.mxu2  ;;  %v1094_v11 = vpop.f32.mrf.mxu3 }
 0x18e   :  { %v1095_v9 = vadd.f32 %v1094_v11, %v2339_v47  ;;  %v791_v13 = vpop.f32.mrf.mxu0 }
 0x18f   :  { %v792_v32 = vadd.f32 %v1951_v58, %v791_v13  ;;  %v924_v17 = vpop.f32.mrf.mxu1 }
 0x190   :  { %1151 = vst [vmem:[%s2472_s3 + $0x168] sm:$0xff] %v1095_v9 }
 0x191   :  { %v925_v19 = vadd.f32 %v924_v17, %v792_v32 }
 0x193   :  { %v1058_v21 = vadd.f32 %v1057_v53, %v925_v19 }
 0x195   :  { %1136 = vst [vmem:[%s2472_s3 + $0xf0] sm:$0xff] %v1058_v21  ;;  %v1064_v20 = vpop.f32.mrf.mxu2  ;;  %v1097_v27 = vpop.f32.mrf.mxu3 }
 0x196   :  { %v1098_v22 = vadd.f32 %v1097_v27, %v2347_v60  ;;  %v793_v23 = vpop.f32.mrf.mxu0 }
 0x197   :  { %v794_v47 = vadd.f32 %v1951_v58, %v793_v23  ;;  %v926_v24 = vpop.f32.mrf.mxu1 }
 0x198   :  { %1152 = vst [vmem:[%s2472_s3 + $0x170] sm:$0xff] %v1098_v22 }
 0x199   :  { %v927_v16 = vadd.f32 %v926_v24, %v794_v47 }
 0x19b   :  { %v1060_v25 = vadd.f32 %v1059_v3, %v927_v16 }
 0x19d   :  { %1137 = vst [vmem:[%s2472_s3 + $0xf8] sm:$0xff] %v1060_v25  ;;  %v1067_v26 = vpop.f32.mrf.mxu2  ;;  %v1099_v28 = vpop.f32.mrf.mxu3 }
 0x19e   :  { %v1100_v31 = vadd.f32 %v1099_v28, %v2355_v5  ;;  %v796_v33 = vpop.f32.mrf.mxu0 }
 0x19f   :  { %v797_v60 = vadd.f32 %v1951_v58, %v796_v33  ;;  %v929_v34 = vpop.f32.mrf.mxu1 }
 0x1a0   :  { %1153 = vst [vmem:[%s2472_s3 + $0x178] sm:$0xff] %v1100_v31 }
 0x1a1   :  { %v930_v35 = vadd.f32 %v929_v34, %v797_v60 }
 0x1a3   :  { %v1063_v36 = vadd.f32 %v1062_v10, %v930_v35 }
 0x1a5   :  { %1138 = vst [vmem:[%s2472_s3 + $0x100] sm:$0xff] %v1063_v36  ;;  %v1069_v39 = vpop.f32.mrf.mxu2  ;;  %v1102_v29 = vpop.f32.mrf.mxu3 }
 0x1a6   :  { %v1103_v37 = vadd.f32 %v1102_v29, %v2363_v15  ;;  %v798_v38 = vpop.f32.mrf.mxu0 }
 0x1a7   :  { %v799_v5 = vadd.f32 %v1951_v58, %v798_v38  ;;  %v931_v40 = vpop.f32.mrf.mxu1 }
 0x1a8   :  { %1154 = vst [vmem:[%s2472_s3 + $0x180] sm:$0xff] %v1103_v37 }
 0x1a9   :  { %v932_v41 = vadd.f32 %v931_v40, %v799_v5 }
 0x1ab   :  { %v1065_v42 = vadd.f32 %v1064_v20, %v932_v41 }
 0x1ad   :  { %1139 = vst [vmem:[%s2472_s3 + $0x108] sm:$0xff] %v1065_v42  ;;  %v1072_v30 = vpop.f32.mrf.mxu2  ;;  %v1104_v43 = vpop.f32.mrf.mxu3 }
 0x1ae   :  { %v801_v45 = vpop.f32.mrf.mxu0 }
 0x1af   :  { %v802_v46 = vadd.f32 %v1951_v58, %v801_v45  ;;  %v934_v15 = vpop.f32.mrf.mxu1 }
 0x1b1   :  { %v935_v49 = vadd.f32 %v934_v15, %v802_v46 }
 0x1b3   :  { %v1068_v50 = vadd.f32 %v1067_v26, %v935_v49 }
 0x1b5   :  { %1140 = vst [vmem:[%s2472_s3 + $0x110] sm:$0xff] %v1068_v50  ;;  %v1074_v51 = vpop.f32.mrf.mxu2 }
 0x1b6   :  { %v803_v52 = vpop.f32.mrf.mxu0 }
 0x1b7   :  { %v804_v48 = vadd.f32 %v1951_v58, %v803_v52  ;;  %v936_v54 = vpop.f32.mrf.mxu1 }
 0x1b9   :  { %v937_v55 = vadd.f32 %v936_v54, %v804_v48 }
 0x1bb   :  { %v1070_v44 = vadd.f32 %v1069_v39, %v937_v55 }
 0x1bd   :  { %1141 = vst [vmem:[%s2472_s3 + $0x118] sm:$0xff] %v1070_v44  ;;  %v1077_v53 = vpop.f32.mrf.mxu2 }
 0x1be   :  { %v1078_v56 = vadd.f32 %v1077_v53, %v2202_v59  ;;  %v806_v61 = vpop.f32.mrf.mxu0 }
 0x1bf   :  { %v807_v62 = vadd.f32 %v1951_v58, %v806_v61  ;;  %v939_v0 = vpop.f32.mrf.mxu1 }
 0x1c0   :  { %1144 = vst [vmem:[%s2472_s3 + $0x130] sm:$0xff] %v1078_v56 }
 0x1c1   :  { %v940_v63 = vadd.f32 %v939_v0, %v807_v62 }
 0x1c3   :  { %v1073_v12 = vadd.f32 %v1072_v30, %v940_v63 }
 0x1c5   :  { %1142 = vst [vmem:[%s2472_s3 + $0x120] sm:$0xff] %v1073_v12  ;;  %v1079_v1 = vpop.f32.mrf.mxu2 }
 0x1c6   :  { %v1080_v3 = vadd.f32 %v1079_v1, %v2229_v14  ;;  %v808_v57 = vpop.f32.mrf.mxu0 }
 0x1c7   :  { %v809_v59 = vadd.f32 %v1951_v58, %v808_v57  ;;  %v941_v4 = vpop.f32.mrf.mxu1 }
 0x1c8   :  { %1145 = vst [vmem:[%s2472_s3 + $0x138] sm:$0xff] %v1080_v3 }
 0x1c9   :  { %v942_v2 = vadd.f32 %v941_v4, %v809_v59 }
 0x1cb   :  { %v1075_v18 = vadd.f32 %v1074_v51, %v942_v2 }
 0x1cd   :  { %1143 = vst [vmem:[%s2472_s3 + $0x128] sm:$0xff] %v1075_v18 }

</bundles_post_ra>
